<compile_context>
chip_gen: v7x
topology: tpu7x:2x2x1
jax: 0.10.0
libtpu: 0.0.40
codegen_flags: <defaults>
</compile_context>

<pallas_src>
import jax
import jax.numpy as jnp
from jax.experimental import pallas as pl
from jax.experimental.pallas import tpu as pltpu

IN_FEATURES = 1024
OUT_FEATURES = 1024


def mlp_chain_kernel(x_ref, w1_ref, w2_ref, o_ref):
    # Weights arrive pre-transposed as (in_features, out_features), so each
    # matmul is a native (M,K)x(K,N) contraction: K on sublanes, N on lanes.
    dn = (((1,), (0,)), ((), ()))
    h = jax.lax.dot_general(
        x_ref[...].astype(jnp.bfloat16), w1_ref[...], dn,
        preferred_element_type=jnp.float32,
    )
    w2 = w2_ref[...]  # stays resident in VMEM, reused three times
    for _ in range(3):
        h = jax.lax.dot_general(
            h.astype(jnp.bfloat16), w2, dn,
            preferred_element_type=jnp.float32,
        )
    o_ref[...] = h.astype(o_ref.dtype)


def my_model_forward(x, w1, w2):
    """fc2(fc2(fc2(fc1(x)))).  w1/w2 in PyTorch (out_features, in_features) layout."""
    batch = x.shape[0]
    # One-time host-side prep (done by XLA outside the kernel): transpose to
    # (in, out) and cast to bf16 to halve HBM weight traffic.
    w1_t = w1.T.astype(jnp.bfloat16)
    w2_t = w2.T.astype(jnp.bfloat16)

    weight_bytes = 2 * IN_FEATURES * OUT_FEATURES * 2      # two bf16 weights
    act_bytes = 2 * batch * OUT_FEATURES * 4                # x + out in f32
    cost = pl.CostEstimate(
        flops=4 * 2 * batch * IN_FEATURES * OUT_FEATURES,   # 4 chained matmuls
        bytes_accessed=weight_bytes + act_bytes,
        transcendentals=0,
    )

    return pl.pallas_call(
        mlp_chain_kernel,
        out_shape=jax.ShapeDtypeStruct((batch, OUT_FEATURES), x.dtype),
        in_specs=[
            pl.BlockSpec((batch, IN_FEATURES), lambda: (0, 0)),
            pl.BlockSpec((IN_FEATURES, OUT_FEATURES), lambda: (0, 0)),
            pl.BlockSpec((IN_FEATURES, OUT_FEATURES), lambda: (0, 0)),
        ],
        out_specs=pl.BlockSpec((batch, OUT_FEATURES), lambda: (0, 0)),
        compiler_params=pltpu.CompilerParams(vmem_limit_bytes=32 << 20),
        cost_estimate=cost,
    )(x, w1_t, w2_t)


def reference_forward(x, w1, w2):
    # Exact f32 reference matching the PyTorch module.
    out = x @ w1.T
    out = out @ w2.T
    out = out @ w2.T
    out = out @ w2.T
    return out


if __name__ == "__main__":
    key = jax.random.PRNGKey(0)
    kx, k1, k2 = jax.random.split(key, 3)

    # data = torch.randn((1, 1024))
    x = jax.random.normal(kx, (1, IN_FEATURES), dtype=jnp.float32)

    # Deterministic init mimicking nn.Linear's U(-1/sqrt(fan_in), 1/sqrt(fan_in)).
    bound = 1.0 / (IN_FEATURES ** 0.5)
    w1 = jax.random.uniform(
        k1, (OUT_FEATURES, IN_FEATURES), jnp.float32, -bound, bound
    )
    w2 = jax.random.uniform(
        k2, (OUT_FEATURES, IN_FEATURES), jnp.float32, -bound, bound
    )

    out = my_model_forward(x, w1, w2)
    out = jax.block_until_ready(out)

    ref = reference_forward(x, w1, w2)
    # Looser tolerance: kernel streams bf16 weights / bf16 MXU inputs
    # (f32 accumulation) vs. the pure-f32 reference.
    if not jnp.allclose(out, ref, atol=2e-2, rtol=2e-2):
        raise AssertionError("Pallas kernel output does not match reference")

    print("KERNEL_OK")
</pallas_src>

<mosaic_0001>
module attributes {stable_mosaic.version = 11 : i64} {
  func.func @mlp_chain_kernel(%arg0: memref<1x1024xf32, #tpu.memory_space<vmem>>, %arg1: memref<1024x1024xbf16, #tpu.memory_space<vmem>>, %arg2: memref<1024x1024xbf16, #tpu.memory_space<vmem>>, %arg3: memref<1x1024xf32, #tpu.memory_space<vmem>>) attributes {dimension_semantics = [], scalar_prefetch = 0 : i64, scratch_operands = 0 : i64, tpu.core_type = #tpu.core_type<tc>} {
    %c0 = arith.constant 0 : index
    %c0_0 = arith.constant 0 : index
    %0 = vector.load %arg0[%c0, %c0_0] : memref<1x1024xf32, #tpu.memory_space<vmem>>, vector<1x1024xf32>
    %1 = arith.truncf %0 : vector<1x1024xf32> to vector<1x1024xbf16>
    %c0_1 = arith.constant 0 : index
    %c0_2 = arith.constant 0 : index
    %2 = vector.load %arg1[%c0_1, %c0_2] : memref<1024x1024xbf16, #tpu.memory_space<vmem>>, vector<1024x1024xbf16>
    %cst = arith.constant dense<0.000000e+00> : vector<1x1024xf32>
    %3 = tpu.matmul %1, %2, %cst {dimension_numbers = #tpu.dot_dimension_numbers<[1], [0], [0], [1], [0, 0, 1, 1], [], []>} : vector<1x1024xbf16>, vector<1024x1024xbf16>, vector<1x1024xf32> -> vector<1x1024xf32>
    %c0_3 = arith.constant 0 : index
    %c0_4 = arith.constant 0 : index
    %4 = vector.load %arg2[%c0_3, %c0_4] : memref<1024x1024xbf16, #tpu.memory_space<vmem>>, vector<1024x1024xbf16>
    %5 = arith.truncf %3 : vector<1x1024xf32> to vector<1x1024xbf16>
    %cst_5 = arith.constant dense<0.000000e+00> : vector<1x1024xf32>
    %6 = tpu.matmul %5, %4, %cst_5 {dimension_numbers = #tpu.dot_dimension_numbers<[1], [0], [0], [1], [0, 0, 1, 1], [], []>} : vector<1x1024xbf16>, vector<1024x1024xbf16>, vector<1x1024xf32> -> vector<1x1024xf32>
    %7 = arith.truncf %6 : vector<1x1024xf32> to vector<1x1024xbf16>
    %cst_6 = arith.constant dense<0.000000e+00> : vector<1x1024xf32>
    %8 = tpu.matmul %7, %4, %cst_6 {dimension_numbers = #tpu.dot_dimension_numbers<[1], [0], [0], [1], [0, 0, 1, 1], [], []>} : vector<1x1024xbf16>, vector<1024x1024xbf16>, vector<1x1024xf32> -> vector<1x1024xf32>
    %9 = arith.truncf %8 : vector<1x1024xf32> to vector<1x1024xbf16>
    %cst_7 = arith.constant dense<0.000000e+00> : vector<1x1024xf32>
    %10 = tpu.matmul %9, %4, %cst_7 {dimension_numbers = #tpu.dot_dimension_numbers<[1], [0], [0], [1], [0, 0, 1, 1], [], []>} : vector<1x1024xbf16>, vector<1024x1024xbf16>, vector<1x1024xf32> -> vector<1x1024xf32>
    %c0_8 = arith.constant 0 : index
    %c0_9 = arith.constant 0 : index
    %11 = vector.load %arg3[%c0_8, %c0_9] : memref<1x1024xf32, #tpu.memory_space<vmem>>, vector<1x1024xf32>
    tpu.vector_store %arg3[%c0_8, %c0_9], %10 {strides = array<i32>} : memref<1x1024xf32, #tpu.memory_space<vmem>>, vector<1x1024xf32>,
    return
  }
}

</mosaic_0001>

<bundles_post_ra>
// kernel: tpu_custom_call.1
= control target key start
LH: loop header
LB: loop body
LE: loop exit
PB: predicated region body
PF: predicated region fallthrough
CT: control target
= control target key end

     0   :  { %8 = vsyncpa [#allocation3], 0  ;;  %s13209_s0 = inlined_call_operand.hbm [shape: f32[1,1024], index: 0, kind: input, shape index: {}]   ;;  %s13210_s1 = inlined_call_operand.hbm [shape: bf16[1024,1024], index: 1, kind: input, shape index: {}]   ;;  %s13211_s2 = inlined_call_operand.hbm [shape: bf16[1024,1024], index: 2, kind: input, shape index: {}]   ;;  %s13212_s3 = inlined_call_operand.hbm [shape: f32[1,1024], index: 3, kind: output, shape index: {}]  }
   0x1   :  { %9 = vsyncpa [#allocation6], 0 }
   0x2   :  { %10 = vsyncpa [#allocation4], 0  ;;  %s10289_s12 = smov [#allocation5]   ;;  %s10195_s16 = scalar_lea.hbm %s13210_s1, 65536 }
   0x3   :  { %s26_s13 = sshll.u32 %s10289_s12, 4  ;;  %p10196_p0 = scmp.ne.s32.totalorder %s13210_s1, %s10195_s16  ;;  %s27_s13 = int_to_ptr.vmem [resolvable:$true] %s26_s13 }
   0x4   :  { %p10199_p1 = scmp.lt.u32.totalorder %s10195_s16, %s13210_s1 }
   0x6   :  { %p10201_p2 = pnand %p10199_p1, %p10196_p0 }
   0x8   :  { %10204 = shalt.err (!%p10201_p2)
}
   0x9   :  { %s10205_s21 = scalar_lea.vmem %s27_s13, 65536  ;;  %p10210_p4 = scmp.lt.s32.totalorder %s27_s13, %s27_s13 }
   0xa   :  { %p10206_p3 = scmp.ne.s32.totalorder %s27_s13, %s10205_s21  ;;  %p10211_p5 = scmp.lt.s32.totalorder %s10205_s21, %s10205_s21 }
   0xc   :  { %p10212_p6 = por %p10211_p5, %p10210_p4 }
   0xe   :  { %p10213_p7 = pnand %p10212_p6, %p10206_p3 }
  0x10   :  { %10216 = shalt.err (!%p10213_p7)
}
  0x11   :  { %s10290_s22 = smov 512   ;;  %s10291_s23 = smov 32  }
  0x12   :  { %32 = dma.hbm_to_vmem [thread:$0]  %s13210_s1, 65536, %s27_s13, [#allocation6], %s10290_s22, %s10290_s22, %s10291_s23  }
  0x13   :  { %s10292_s26 = smov [#allocation2]   ;;  %s10293_s28 = smov [#allocation7]  }
  0x14   :  { %s17_s27 = sshll.u32 %s10292_s26, 4  ;;  %s38_s29 = sshll.u32 %s10293_s28, 4  ;;  %s18_s27 = int_to_ptr.vmem [resolvable:$true] %s17_s27  ;;  %s39_s29 = int_to_ptr.vmem [resolvable:$true] %s38_s29 }
  0x15   :  { %s10217_s5 = scalar_lea.hbm %s13209_s0, 128 }
  0x16   :  { %p10218_p8 = scmp.ne.s32.totalorder %s13209_s0, %s10217_s5  ;;  %p10221_p9 = scmp.lt.u32.totalorder %s10217_s5, %s13209_s0 }
  0x18   :  { %p10223_p10 = pnand %p10221_p9, %p10218_p8 }
  0x1a   :  { %10226 = shalt.err (!%p10223_p10)
}
  0x1b   :  { %s10227_s1 = scalar_lea.vmem %s18_s27, 128  ;;  %p10232_p12 = scmp.lt.s32.totalorder %s18_s27, %s18_s27 }
  0x1c   :  { %p10228_p11 = scmp.ne.s32.totalorder %s18_s27, %s10227_s1  ;;  %p10233_p13 = scmp.lt.s32.totalorder %s10227_s1, %s10227_s1 }
  0x1e   :  { %p10234_p0 = por %p10233_p13, %p10232_p12 }
  0x20   :  { %p10235_p1 = pnand %p10234_p0, %p10228_p11 }
  0x22   :  { %10238 = shalt.err (!%p10235_p1)
}
  0x23   :  { %20 = dma.hbm_to_vmem [thread:$0]  %s13209_s0, 128, %s18_s27, [#allocation3]  }
  0x24   :  { %s10239_s14 = scalar_lea.hbm %s13211_s2, 65536 }
  0x25   :  { %p10240_p2 = scmp.ne.s32.totalorder %s13211_s2, %s10239_s14  ;;  %p10243_p3 = scmp.lt.u32.totalorder %s10239_s14, %s13211_s2 }
  0x27   :  { %p10245_p4 = pnand %p10243_p3, %p10240_p2 }
  0x29   :  { %10248 = shalt.err (!%p10245_p4)
}
  0x2a   :  { %s10249_s19 = scalar_lea.vmem %s39_s29, 65536  ;;  %p10254_p6 = scmp.lt.s32.totalorder %s39_s29, %s39_s29 }
  0x2b   :  { %p10250_p5 = scmp.ne.s32.totalorder %s39_s29, %s10249_s19  ;;  %p10255_p7 = scmp.lt.s32.totalorder %s10249_s19, %s10249_s19 }
  0x2d   :  { %p10256_p8 = por %p10255_p7, %p10254_p6 }
  0x2f   :  { %p10257_p9 = pnand %p10256_p8, %p10250_p5 }
  0x31   :  { %10260 = shalt.err (!%p10257_p9)
}
  0x32   :  { %44 = dma.hbm_to_vmem [thread:$0]  %s13211_s2, 65536, %s39_s29, [#allocation6], %s10290_s22, %s10290_s22, %s10291_s23  }
  0x33   :  { %10283 = dma.done.wait [#allocation3], 128  }
  0x34   :  { %10284 = vsyncadd [#allocation3], 4294967168 }
  0x35   :  { %10285 = dma.done.wait [#allocation6], 131072  }
  0x36   :  { %10286 = vsyncadd [#allocation6], 4294836224  ;;  %v104_v0 = vld [vmem:[#allocation5] sm:$0xff]  ;;  %v105_v2 = vld [vmem:[#allocation5 + $0x8] sm:$0xff]  ;;  %v56_v32 = vlaneseq  ;;  %s10295_s2 = smov [#allocation8]  }
  0x37   :  { %v108_v1 = vld [vmem:[#allocation5 + $0x20] sm:$0xff]  ;;  %v109_v4 = vld [vmem:[#allocation5 + $0x28] sm:$0xff]  ;;  %v10361_v56 = vld [vmem:[#allocation2] sm:$0xff]  ;;  %s8961_s21 = sshll.u32 %s10295_s2, 4  ;;  %s8962_s21 = int_to_ptr.vmem [resolvable:$true] %s8961_s21 }
  0x38   :  { %v8972_v3 = vcombine.high %v104_v0, %v108_v1  ;;  %v8971_v5 = vcombine.low %v104_v0, %v108_v1  ;;  %v112_v6 = vld [vmem:[#allocation5 + $0x40] sm:$0xff]  ;;  %v8974_v8 = vcombine.high %v105_v2, %v109_v4  ;;  %v8973_v9 = vcombine.low %v105_v2, %v109_v4  ;;  %v113_v11 = vld [vmem:[#allocation5 + $0x48] sm:$0xff]  ;;  %s10261_s22 = scalar_lea.vmem %s8962_s21, 128  ;;  %p10266_p11 = scmp.lt.s32.totalorder %s8962_s21, %s8962_s21 }
  0x39   :  { %v116_v7 = vld [vmem:[#allocation5 + $0x60] sm:$0xff]  ;;  %v117_v12 = vld [vmem:[#allocation5 + $0x68] sm:$0xff]  ;;  %v10358_v41 = vshrl.u32 %v56_v32, 7  ;;  %p10262_p10 = scmp.ne.s32.totalorder %s8962_s21, %s10261_s22  ;;  %p10267_p12 = scmp.lt.s32.totalorder %s10261_s22, %s10261_s22 }
  0x3a   :  { %v8980_v10 = vcombine.high %v112_v6, %v116_v7  ;;  %v120_v13 = vld [vmem:[#allocation5 + $0x80] sm:$0xff]  ;;  %3176 = vmatprep.subr.bf16.mxu0 %v8972_v3  ;;  %v8982_v14 = vcombine.high %v113_v11, %v117_v12  ;;  %v121_v16 = vld [vmem:[#allocation5 + $0x88] sm:$0xff]  ;;  %3340 = vmatprep.subr.bf16.mxu1 %v8974_v8  ;;  %v8979_v18 = vcombine.low %v112_v6, %v116_v7 }
  0x3b   :  { %v124_v15 = vld [vmem:[#allocation5 + $0xa0] sm:$0xff]  ;;  %v125_v17 = vld [vmem:[#allocation5 + $0xa8] sm:$0xff]  ;;  %3177 = vmatpush1.bf16.msra.mxu0 %v8971_v5  ;;  %3341 = vmatpush1.bf16.msra.mxu1 %v8973_v9  ;;  %v8981_v19 = vcombine.low %v113_v11, %v117_v12  ;;  %14144 = vst [vmem:[#allocation12_spill] sm:$0xff] %v10358_v41  ;;  %v62_v50 = vsub.s32 1, %v10358_v41  ;;  %p10268_p13 = por %p10267_p12, %p10266_p11 }
  0x3c   :  { %3178 = vmatprep.subr.bf16.mxu0 %v8980_v10  ;;  %v8988_v20 = vcombine.high %v120_v13, %v124_v15  ;;  %3342 = vmatprep.subr.bf16.mxu1 %v8982_v14  ;;  %v8990_v21 = vcombine.high %v121_v16, %v125_v17  ;;  %v128_v22 = vld [vmem:[#allocation5 + $0xc0] sm:$0xff]  ;;  %v129_v24 = vld [vmem:[#allocation5 + $0xc8] sm:$0xff]  ;;  %v8987_v26 = vcombine.low %v120_v13, %v124_v15 }
  0x3d   :  { %v132_v23 = vld [vmem:[#allocation5 + $0xe0] sm:$0xff]  ;;  %v133_v25 = vld [vmem:[#allocation5 + $0xe8] sm:$0xff]  ;;  %v8989_v27 = vcombine.low %v121_v16, %v125_v17  ;;  %v63_v60 = vrot.slane %v10361_v56, %v62_v50  ;;  %p10269_p0 = pnand %p10268_p13, %p10262_p10 }
  0x3e   :  { %v8996_v28 = vcombine.high %v128_v22, %v132_v23  ;;  %v8998_v29 = vcombine.high %v129_v24, %v133_v25  ;;  %v136_v30 = vld [vmem:[#allocation5 + $0x100] sm:$0xff]  ;;  %v137_v33 = vld [vmem:[#allocation5 + $0x108] sm:$0xff]  ;;  %v8995_v35 = vcombine.low %v128_v22, %v132_v23  ;;  %v8997_v36 = vcombine.low %v129_v24, %v133_v25 }
  0x3f   :  { %3179 = vmatpush1.bf16.msra.mxu0 %v8979_v18  ;;  %3343 = vmatpush1.bf16.msra.mxu1 %v8981_v19  ;;  %v140_v31 = vld [vmem:[#allocation5 + $0x120] sm:$0xff]  ;;  %v141_v34 = vld [vmem:[#allocation5 + $0x128] sm:$0xff]  ;;  %v10364_v0 = vpack.c.bf16 %v63_v60, %v63_v60 }
  0x40   :  { %3180 = vmatprep.subr.bf16.mxu0 %v8988_v20  ;;  %3344 = vmatprep.subr.bf16.mxu1 %v8990_v21  ;;  %v9004_v37 = vcombine.high %v136_v30, %v140_v31  ;;  %v9006_v38 = vcombine.high %v137_v33, %v141_v34  ;;  %v144_v39 = vld [vmem:[#allocation5 + $0x140] sm:$0xff]  ;;  %v145_v42 = vld [vmem:[#allocation5 + $0x148] sm:$0xff]  ;;  %v9003_v44 = vcombine.low %v136_v30, %v140_v31 }
  0x41   :  { %v148_v40 = vld [vmem:[#allocation5 + $0x160] sm:$0xff]  ;;  %v149_v43 = vld [vmem:[#allocation5 + $0x168] sm:$0xff]  ;;  %v9005_v45 = vcombine.low %v137_v33, %v141_v34  ;;  %3208 = vmatprep.mubr.bf16.mxu0 %v10364_v0  ;;  %3372 = vmatprep.mubr.bf16.mxu1 %v10364_v0 }
  0x42   :  { %v9012_v46 = vcombine.high %v144_v39, %v148_v40  ;;  %v9014_v47 = vcombine.high %v145_v42, %v149_v43  ;;  %v152_v48 = vld [vmem:[#allocation5 + $0x180] sm:$0xff]  ;;  %v153_v51 = vld [vmem:[#allocation5 + $0x188] sm:$0xff]  ;;  %v9011_v53 = vcombine.low %v144_v39, %v148_v40  ;;  %v9013_v54 = vcombine.low %v145_v42, %v149_v43 }
  0x43   :  { %3181 = vmatpush1.bf16.msra.mxu0 %v8987_v26  ;;  %3345 = vmatpush1.bf16.msra.mxu1 %v8989_v27  ;;  %v156_v49 = vld [vmem:[#allocation5 + $0x1a0] sm:$0xff]  ;;  %v157_v52 = vld [vmem:[#allocation5 + $0x1a8] sm:$0xff] }
  0x44   :  { %3182 = vmatprep.subr.bf16.mxu0 %v8996_v28  ;;  %3346 = vmatprep.subr.bf16.mxu1 %v8998_v29  ;;  %v9020_v55 = vcombine.high %v152_v48, %v156_v49  ;;  %v9022_v57 = vcombine.high %v153_v51, %v157_v52  ;;  %v160_v58 = vld [vmem:[#allocation5 + $0x1c0] sm:$0xff]  ;;  %v161_v61 = vld [vmem:[#allocation5 + $0x1c8] sm:$0xff]  ;;  %v9019_v63 = vcombine.low %v152_v48, %v156_v49 }
  0x45   :  { %v164_v59 = vld [vmem:[#allocation5 + $0x1e0] sm:$0xff]  ;;  %v165_v62 = vld [vmem:[#allocation5 + $0x1e8] sm:$0xff]  ;;  %v9021_v1 = vcombine.low %v153_v51, %v157_v52 }
  0x46   :  { %v9028_v2 = vcombine.high %v160_v58, %v164_v59  ;;  %v9030_v3 = vcombine.high %v161_v61, %v165_v62  ;;  %v168_v4 = vld [vmem:[#allocation5 + $0x200] sm:$0xff]  ;;  %v169_v6 = vld [vmem:[#allocation5 + $0x208] sm:$0xff]  ;;  %v9027_v8 = vcombine.low %v160_v58, %v164_v59  ;;  %v9029_v9 = vcombine.low %v161_v61, %v165_v62 }
  0x47   :  { %3183 = vmatpush1.bf16.msra.mxu0 %v8995_v35  ;;  %3347 = vmatpush1.bf16.msra.mxu1 %v8997_v36  ;;  %v172_v5 = vld [vmem:[#allocation5 + $0x220] sm:$0xff]  ;;  %v173_v7 = vld [vmem:[#allocation5 + $0x228] sm:$0xff] }
  0x48   :  { %3184 = vmatprep.subr.bf16.mxu0 %v9004_v37  ;;  %3348 = vmatprep.subr.bf16.mxu1 %v9006_v38  ;;  %v9036_v10 = vcombine.high %v168_v4, %v172_v5  ;;  %v9038_v11 = vcombine.high %v169_v6, %v173_v7  ;;  %v176_v12 = vld [vmem:[#allocation5 + $0x240] sm:$0xff]  ;;  %v177_v14 = vld [vmem:[#allocation5 + $0x248] sm:$0xff]  ;;  %v9035_v16 = vcombine.low %v168_v4, %v172_v5 }
  0x49   :  { %v180_v13 = vld [vmem:[#allocation5 + $0x260] sm:$0xff]  ;;  %v181_v15 = vld [vmem:[#allocation5 + $0x268] sm:$0xff]  ;;  %v9037_v17 = vcombine.low %v169_v6, %v173_v7 }
  0x4a   :  { %v9044_v18 = vcombine.high %v176_v12, %v180_v13  ;;  %v9046_v19 = vcombine.high %v177_v14, %v181_v15  ;;  %v184_v20 = vld [vmem:[#allocation5 + $0x280] sm:$0xff]  ;;  %v185_v22 = vld [vmem:[#allocation5 + $0x288] sm:$0xff]  ;;  %v9043_v24 = vcombine.low %v176_v12, %v180_v13  ;;  %v9045_v25 = vcombine.low %v177_v14, %v181_v15 }
  0x4b   :  { %3185 = vmatpush1.bf16.msra.mxu0 %v9003_v44  ;;  %3349 = vmatpush1.bf16.msra.mxu1 %v9005_v45  ;;  %v188_v21 = vld [vmem:[#allocation5 + $0x2a0] sm:$0xff]  ;;  %v189_v23 = vld [vmem:[#allocation5 + $0x2a8] sm:$0xff] }
  0x4c   :  { %3186 = vmatprep.subr.bf16.mxu0 %v9012_v46  ;;  %3350 = vmatprep.subr.bf16.mxu1 %v9014_v47  ;;  %v9052_v26 = vcombine.high %v184_v20, %v188_v21  ;;  %v9054_v27 = vcombine.high %v185_v22, %v189_v23  ;;  %v192_v28 = vld [vmem:[#allocation5 + $0x2c0] sm:$0xff]  ;;  %v193_v30 = vld [vmem:[#allocation5 + $0x2c8] sm:$0xff]  ;;  %v9051_v32 = vcombine.low %v184_v20, %v188_v21 }
  0x4d   :  { %v196_v29 = vld [vmem:[#allocation5 + $0x2e0] sm:$0xff]  ;;  %v197_v31 = vld [vmem:[#allocation5 + $0x2e8] sm:$0xff]  ;;  %v9053_v33 = vcombine.low %v185_v22, %v189_v23 }
  0x4e   :  { %v9060_v34 = vcombine.high %v192_v28, %v196_v29  ;;  %v9062_v35 = vcombine.high %v193_v30, %v197_v31  ;;  %v200_v36 = vld [vmem:[#allocation5 + $0x300] sm:$0xff]  ;;  %v201_v38 = vld [vmem:[#allocation5 + $0x308] sm:$0xff]  ;;  %v9059_v40 = vcombine.low %v192_v28, %v196_v29  ;;  %v9061_v42 = vcombine.low %v193_v30, %v197_v31 }
  0x4f   :  { %3187 = vmatpush1.bf16.msra.mxu0 %v9011_v53  ;;  %3351 = vmatpush1.bf16.msra.mxu1 %v9013_v54  ;;  %v204_v37 = vld [vmem:[#allocation5 + $0x320] sm:$0xff]  ;;  %v205_v39 = vld [vmem:[#allocation5 + $0x328] sm:$0xff] }
  0x50   :  { %3188 = vmatprep.subr.bf16.mxu0 %v9020_v55  ;;  %3352 = vmatprep.subr.bf16.mxu1 %v9022_v57  ;;  %v9068_v43 = vcombine.high %v200_v36, %v204_v37  ;;  %v9070_v44 = vcombine.high %v201_v38, %v205_v39  ;;  %v208_v45 = vld [vmem:[#allocation5 + $0x340] sm:$0xff]  ;;  %v209_v47 = vld [vmem:[#allocation5 + $0x348] sm:$0xff]  ;;  %v9067_v49 = vcombine.low %v200_v36, %v204_v37 }
  0x51   :  { %v212_v46 = vld [vmem:[#allocation5 + $0x360] sm:$0xff]  ;;  %v213_v48 = vld [vmem:[#allocation5 + $0x368] sm:$0xff]  ;;  %v9069_v50 = vcombine.low %v201_v38, %v205_v39 }
  0x52   :  { %v9076_v51 = vcombine.high %v208_v45, %v212_v46  ;;  %v9078_v52 = vcombine.high %v209_v47, %v213_v48  ;;  %v216_v53 = vld [vmem:[#allocation5 + $0x380] sm:$0xff]  ;;  %v217_v55 = vld [vmem:[#allocation5 + $0x388] sm:$0xff]  ;;  %v9075_v58 = vcombine.low %v208_v45, %v212_v46  ;;  %v9077_v59 = vcombine.low %v209_v47, %v213_v48 }
  0x53   :  { %3189 = vmatpush1.bf16.msra.mxu0 %v9019_v63  ;;  %3353 = vmatpush1.bf16.msra.mxu1 %v9021_v1  ;;  %v220_v54 = vld [vmem:[#allocation5 + $0x3a0] sm:$0xff]  ;;  %v221_v57 = vld [vmem:[#allocation5 + $0x3a8] sm:$0xff] }
  0x54   :  { %3190 = vmatprep.subr.bf16.mxu0 %v9028_v2  ;;  %3354 = vmatprep.subr.bf16.mxu1 %v9030_v3  ;;  %v9084_v60 = vcombine.high %v216_v53, %v220_v54  ;;  %v9086_v61 = vcombine.high %v217_v55, %v221_v57  ;;  %v224_v62 = vld [vmem:[#allocation5 + $0x3c0] sm:$0xff]  ;;  %v225_v1 = vld [vmem:[#allocation5 + $0x3c8] sm:$0xff]  ;;  %v58_v3 = vsub.s32 0, %v10358_v41  ;;  %v9083_v4 = vcombine.low %v216_v53, %v220_v54 }
  0x55   :  { %v228_v63 = vld [vmem:[#allocation5 + $0x3e0] sm:$0xff]  ;;  %v229_v2 = vld [vmem:[#allocation5 + $0x3e8] sm:$0xff]  ;;  %v9085_v5 = vcombine.low %v217_v55, %v221_v57 }
  0x56   :  { %v9092_v6 = vcombine.high %v224_v62, %v228_v63  ;;  %v9094_v7 = vcombine.high %v225_v1, %v229_v2  ;;  %v237_v12 = vld [vmem:[#allocation5 + $0x428] sm:$0xff]  ;;  %v59_v13 = vrot.slane %v10361_v56, %v58_v3  ;;  %v9091_v14 = vcombine.low %v224_v62, %v228_v63  ;;  %v248_v28 = vld [vmem:[#allocation5 + $0x480] sm:$0xff] }
  0x57   :  { %3191 = vmatpush1.bf16.msra.mxu0 %v9027_v8  ;;  %3355 = vmatpush1.bf16.msra.mxu1 %v9029_v9  ;;  %v232_v8 = vld [vmem:[#allocation5 + $0x400] sm:$0xff]  ;;  %v9093_v15 = vcombine.low %v225_v1, %v229_v2  ;;  %v241_v22 = vld [vmem:[#allocation5 + $0x448] sm:$0xff] }
  0x58   :  { %3192 = vmatprep.subr.bf16.mxu0 %v9036_v10  ;;  %3356 = vmatprep.subr.bf16.mxu1 %v9038_v11  ;;  %v236_v9 = vld [vmem:[#allocation5 + $0x420] sm:$0xff]  ;;  %v70_v10 = vsub.s32 3, %v10358_v41  ;;  %v233_v11 = vld [vmem:[#allocation5 + $0x408] sm:$0xff]  ;;  %v10372_v21 = vpack.c.bf16 %v59_v13, %v59_v13 }
  0x59   :  { %v245_v23 = vld [vmem:[#allocation5 + $0x468] sm:$0xff]  ;;  %v252_v29 = vld [vmem:[#allocation5 + $0x4a0] sm:$0xff] }
  0x5a   :  { %v71_v20 = vrot.slane %v10361_v56, %v70_v10  ;;  %v249_v31 = vld [vmem:[#allocation5 + $0x488] sm:$0xff]  ;;  %v256_v37 = vld [vmem:[#allocation5 + $0x4c0] sm:$0xff] }
  0x5b   :  { %3193 = vmatpush1.bf16.msra.mxu0 %v9035_v16  ;;  %3357 = vmatpush1.bf16.msra.mxu1 %v9037_v17  ;;  %v9100_v16 = vcombine.high %v232_v8, %v236_v9  ;;  %v9102_v17 = vcombine.high %v233_v11, %v237_v12  ;;  %v260_v38 = vld [vmem:[#allocation5 + $0x4e0] sm:$0xff]  ;;  %v257_v39 = vld [vmem:[#allocation5 + $0x4c8] sm:$0xff] }
  0x5c   :  { %3194 = vmatprep.subr.bf16.mxu0 %v9044_v18  ;;  %3358 = vmatprep.subr.bf16.mxu1 %v9046_v19  ;;  %v240_v18 = vld [vmem:[#allocation5 + $0x440] sm:$0xff]  ;;  %v10374_v30 = vpack.c.bf16 %v71_v20, %v71_v20  ;;  %v265_v48 = vld [vmem:[#allocation5 + $0x508] sm:$0xff] }
  0x5d   :  { %v244_v19 = vld [vmem:[#allocation5 + $0x460] sm:$0xff]  ;;  %v273_v57 = vld [vmem:[#allocation5 + $0x548] sm:$0xff] }
  0x5e   :  { %v264_v46 = vld [vmem:[#allocation5 + $0x500] sm:$0xff]  ;;  %v281_v2 = vld [vmem:[#allocation5 + $0x588] sm:$0xff] }
  0x5f   :  { %3195 = vmatpush1.bf16.msra.mxu0 %v9043_v24  ;;  %3359 = vmatpush1.bf16.msra.mxu1 %v9045_v25  ;;  %v9099_v24 = vcombine.low %v232_v8, %v236_v9  ;;  %v9101_v25 = vcombine.low %v233_v11, %v237_v12  ;;  %v268_v47 = vld [vmem:[#allocation5 + $0x520] sm:$0xff]  ;;  %v285_v3 = vld [vmem:[#allocation5 + $0x5a8] sm:$0xff] }
  0x60   :  { %3196 = vmatprep.subr.bf16.mxu0 %v9052_v26  ;;  %3360 = vmatprep.subr.bf16.mxu1 %v9054_v27  ;;  %v9108_v26 = vcombine.high %v240_v18, %v244_v19  ;;  %v9110_v27 = vcombine.high %v241_v22, %v245_v23  ;;  %v272_v54 = vld [vmem:[#allocation5 + $0x540] sm:$0xff]  ;;  %v289_v10 = vld [vmem:[#allocation5 + $0x5c8] sm:$0xff]  ;;  %v9149_v13 = vcombine.low %v281_v2, %v285_v3 }
  0x61   :  { %v276_v55 = vld [vmem:[#allocation5 + $0x560] sm:$0xff]  ;;  %v293_v11 = vld [vmem:[#allocation5 + $0x5e8] sm:$0xff] }
  0x62   :  { %v280_v63 = vld [vmem:[#allocation5 + $0x580] sm:$0xff] }
  0x63   :  { %3197 = vmatpush1.bf16.msra.mxu0 %v9051_v32  ;;  %3361 = vmatpush1.bf16.msra.mxu1 %v9053_v33  ;;  %v253_v32 = vld [vmem:[#allocation5 + $0x4a8] sm:$0xff]  ;;  %v9107_v33 = vcombine.low %v240_v18, %v244_v19  ;;  %v284_v1 = vld [vmem:[#allocation5 + $0x5a0] sm:$0xff] }
  0x64   :  { %3198 = vmatprep.subr.bf16.mxu0 %v9060_v34  ;;  %3362 = vmatprep.subr.bf16.mxu1 %v9062_v35  ;;  %v9109_v34 = vcombine.low %v241_v22, %v245_v23  ;;  %v9116_v35 = vcombine.high %v248_v28, %v252_v29  ;;  %v9118_v36 = vcombine.high %v249_v31, %v253_v32  ;;  %v288_v8 = vld [vmem:[#allocation5 + $0x5c0] sm:$0xff]  ;;  %v297_v18 = vld [vmem:[#allocation5 + $0x608] sm:$0xff] }
  0x65   :  { %v292_v9 = vld [vmem:[#allocation5 + $0x5e0] sm:$0xff]  ;;  %v9147_v12 = vcombine.low %v280_v63, %v284_v1  ;;  %v301_v19 = vld [vmem:[#allocation5 + $0x628] sm:$0xff]  ;;  %v9157_v22 = vcombine.low %v289_v10, %v293_v11 }
  0x66   :  { %v9155_v20 = vcombine.low %v288_v8, %v292_v9 }
  0x67   :  { %3199 = vmatpush1.bf16.msra.mxu0 %v9059_v40  ;;  %3363 = vmatpush1.bf16.msra.mxu1 %v9061_v42  ;;  %v261_v40 = vld [vmem:[#allocation5 + $0x4e8] sm:$0xff]  ;;  %v9115_v42 = vcombine.low %v248_v28, %v252_v29 }
  0x68   :  { %3200 = vmatprep.subr.bf16.mxu0 %v9068_v43  ;;  %3364 = vmatprep.subr.bf16.mxu1 %v9070_v44  ;;  %v9117_v43 = vcombine.low %v249_v31, %v253_v32  ;;  %v9124_v44 = vcombine.high %v256_v37, %v260_v38  ;;  %v9126_v45 = vcombine.high %v257_v39, %v261_v40  ;;  %v309_v28 = vld [vmem:[#allocation5 + $0x668] sm:$0xff] }
  0x69   :  { %v9165_v31 = vcombine.low %v297_v18, %v301_v19 }
  0x6b   :  { %3201 = vmatpush1.bf16.msra.mxu0 %v9067_v49  ;;  %3365 = vmatpush1.bf16.msra.mxu1 %v9069_v50  ;;  %v269_v49 = vld [vmem:[#allocation5 + $0x528] sm:$0xff]  ;;  %v9123_v50 = vcombine.low %v256_v37, %v260_v38 }
  0x6c   :  { %3202 = vmatprep.subr.bf16.mxu0 %v9076_v51  ;;  %3366 = vmatprep.subr.bf16.mxu1 %v9078_v52  ;;  %v9125_v51 = vcombine.low %v257_v39, %v261_v40  ;;  %v9132_v52 = vcombine.high %v264_v46, %v268_v47  ;;  %v9134_v53 = vcombine.high %v265_v48, %v269_v49  ;;  %v317_v37 = vld [vmem:[#allocation5 + $0x6a8] sm:$0xff] }
  0x6f   :  { %3203 = vmatpush1.bf16.msra.mxu0 %v9075_v58  ;;  %3367 = vmatpush1.bf16.msra.mxu1 %v9077_v59  ;;  %v277_v58 = vld [vmem:[#allocation5 + $0x568] sm:$0xff]  ;;  %v9131_v59 = vcombine.low %v264_v46, %v268_v47 }
  0x70   :  { %3204 = vmatprep.subr.bf16.mxu0 %v9084_v60  ;;  %3368 = vmatprep.subr.bf16.mxu1 %v9086_v61  ;;  %v9133_v60 = vcombine.low %v265_v48, %v269_v49  ;;  %v9140_v61 = vcombine.high %v272_v54, %v276_v55  ;;  %v9142_v62 = vcombine.high %v273_v57, %v277_v58  ;;  %v325_v46 = vld [vmem:[#allocation5 + $0x6e8] sm:$0xff] }
  0x73   :  { %3205 = vmatpush1.bf16.msra.mxu0 %v9083_v4  ;;  %3369 = vmatpush1.bf16.msra.mxu1 %v9085_v5  ;;  %v9139_v4 = vcombine.low %v272_v54, %v276_v55  ;;  %v9141_v5 = vcombine.low %v273_v57, %v277_v58  ;;  %v333_v54 = vld [vmem:[#allocation5 + $0x728] sm:$0xff] }
  0x74   :  { %3206 = vmatprep.subr.bf16.mxu0 %v9092_v6  ;;  %3370 = vmatprep.subr.bf16.mxu1 %v9094_v7  ;;  %v9148_v6 = vcombine.high %v280_v63, %v284_v1  ;;  %v9150_v7 = vcombine.high %v281_v2, %v285_v3  ;;  %v341_v63 = vld [vmem:[#allocation5 + $0x768] sm:$0xff] }
  0x77   :  { %3207 = vmatpush1.bf16.msra.mxu0 %v9091_v14  ;;  %3371 = vmatpush1.bf16.msra.mxu1 %v9093_v15  ;;  %v9156_v14 = vcombine.high %v288_v8, %v292_v9  ;;  %v9158_v15 = vcombine.high %v289_v10, %v293_v11  ;;  %v349_v8 = vld [vmem:[#allocation5 + $0x7a8] sm:$0xff] }
  0x78   :  { %3217 = vmatprep.subr.bf16.mxu0 %v9100_v16  ;;  %3381 = vmatprep.subr.bf16.mxu1 %v9102_v17  ;;  %v296_v16 = vld [vmem:[#allocation5 + $0x600] sm:$0xff] }
  0x79   :  { %v300_v17 = vld [vmem:[#allocation5 + $0x620] sm:$0xff] }
  0x7a   :  { %3209 = vmatmul.mubr.bf16.vlgmr.msra.gmra.mrb[0].mxu0 %v10372_v21  ;;  %3373 = vmatmul.mubr.bf16.vlgmr.msra.gmra.mrb[0].mxu1 %v10372_v21  ;;  %v9164_v23 = vcombine.high %v296_v16, %v300_v17  ;;  %v9163_v29 = vcombine.low %v296_v16, %v300_v17  ;;  %v357_v16 = vld [vmem:[#allocation5 + $0x7e8] sm:$0xff]  ;;  %v66_v17 = vsub.s32 2, %v10358_v41 }
  0x7b   :  { %3218 = vmatpush1.bf16.msra.mxu0 %v9099_v24  ;;  %3382 = vmatpush1.bf16.msra.mxu1 %v9101_v25  ;;  %v9166_v24 = vcombine.high %v297_v18, %v301_v19  ;;  %v304_v25 = vld [vmem:[#allocation5 + $0x640] sm:$0xff] }
  0x7c   :  { %3219 = vmatprep.subr.bf16.mxu0 %v9108_v26  ;;  %3383 = vmatprep.subr.bf16.mxu1 %v9110_v27  ;;  %v308_v26 = vld [vmem:[#allocation5 + $0x660] sm:$0xff]  ;;  %v305_v27 = vld [vmem:[#allocation5 + $0x648] sm:$0xff] }
  0x7d   :  { %3249 = vmatprep.mubr.bf16.mxu0 %v10374_v30  ;;  %3413 = vmatprep.mubr.bf16.mxu1 %v10374_v30  ;;  %v9172_v32 = vcombine.high %v304_v25, %v308_v26  ;;  %v9171_v38 = vcombine.low %v304_v25, %v308_v26  ;;  %v9173_v39 = vcombine.low %v305_v27, %v309_v28  ;;  %v78_v25 = vsub.s32 5, %v10358_v41  ;;  %v361_v26 = vld [vmem:[#allocation5 + $0x808] sm:$0xff] }
  0x7f   :  { %3220 = vmatpush1.bf16.msra.mxu0 %v9107_v33  ;;  %3384 = vmatpush1.bf16.msra.mxu1 %v9109_v34  ;;  %v9174_v33 = vcombine.high %v305_v27, %v309_v28  ;;  %v312_v34 = vld [vmem:[#allocation5 + $0x680] sm:$0xff]  ;;  %v365_v27 = vld [vmem:[#allocation5 + $0x828] sm:$0xff]  ;;  %v67_v28 = vrot.slane %v10361_v56, %v66_v17 }
  0x80   :  { %3221 = vmatprep.subr.bf16.mxu0 %v9116_v35  ;;  %3385 = vmatprep.subr.bf16.mxu1 %v9118_v36  ;;  %v316_v35 = vld [vmem:[#allocation5 + $0x6a0] sm:$0xff]  ;;  %v313_v36 = vld [vmem:[#allocation5 + $0x688] sm:$0xff] }
  0x81   :  { %v9180_v40 = vcombine.high %v312_v34, %v316_v35  ;;  %v9179_v47 = vcombine.low %v312_v34, %v316_v35  ;;  %v9181_v48 = vcombine.low %v313_v36, %v317_v37  ;;  %v368_v34 = vld [vmem:[#allocation5 + $0x840] sm:$0xff]  ;;  %v409_v17 = vld [vmem:[#allocation5 + $0x988] sm:$0xff] }
  0x82   :  { %v372_v35 = vld [vmem:[#allocation5 + $0x860] sm:$0xff] }
  0x83   :  { %3222 = vmatpush1.bf16.msra.mxu0 %v9115_v42  ;;  %3386 = vmatpush1.bf16.msra.mxu1 %v9117_v43  ;;  %v9182_v42 = vcombine.high %v313_v36, %v317_v37  ;;  %v320_v43 = vld [vmem:[#allocation5 + $0x6c0] sm:$0xff]  ;;  %v79_v36 = vrot.slane %v10361_v56, %v78_v25  ;;  %v10384_v37 = vpack.c.bf16 %v67_v28, %v67_v28  ;;  %v381_v56 = vld [vmem:[#allocation5 + $0x8a8] sm:$0xff] }
  0x84   :  { %3223 = vmatprep.subr.bf16.mxu0 %v9124_v44  ;;  %3387 = vmatprep.subr.bf16.mxu1 %v9126_v45  ;;  %v324_v44 = vld [vmem:[#allocation5 + $0x6e0] sm:$0xff]  ;;  %v321_v45 = vld [vmem:[#allocation5 + $0x6c8] sm:$0xff] }
  0x85   :  { %v9188_v49 = vcombine.high %v320_v43, %v324_v44  ;;  %v9187_v55 = vcombine.low %v320_v43, %v324_v44  ;;  %v9189_v57 = vcombine.low %v321_v45, %v325_v46  ;;  %v9236_v43 = vcombine.high %v368_v34, %v372_v35  ;;  %v420_v25 = vld [vmem:[#allocation5 + $0x9e0] sm:$0xff] }
  0x87   :  { %3224 = vmatpush1.bf16.msra.mxu0 %v9123_v50  ;;  %3388 = vmatpush1.bf16.msra.mxu1 %v9125_v51  ;;  %v9190_v50 = vcombine.high %v321_v45, %v325_v46  ;;  %v328_v51 = vld [vmem:[#allocation5 + $0x700] sm:$0xff] }
  0x88   :  { %3225 = vmatprep.subr.bf16.mxu0 %v9132_v52  ;;  %3389 = vmatprep.subr.bf16.mxu1 %v9134_v53  ;;  %v332_v52 = vld [vmem:[#allocation5 + $0x720] sm:$0xff]  ;;  %v329_v53 = vld [vmem:[#allocation5 + $0x708] sm:$0xff] }
  0x89   :  { %v9196_v58 = vcombine.high %v328_v51, %v332_v52  ;;  %v9195_v1 = vcombine.low %v328_v51, %v332_v52  ;;  %v9197_v2 = vcombine.low %v329_v53, %v333_v54  ;;  %v376_v45 = vld [vmem:[#allocation5 + $0x880] sm:$0xff] }
  0x8a   :  { %v380_v46 = vld [vmem:[#allocation5 + $0x8a0] sm:$0xff] }
  0x8b   :  { %3226 = vmatpush1.bf16.msra.mxu0 %v9131_v59  ;;  %3390 = vmatpush1.bf16.msra.mxu1 %v9133_v60  ;;  %v9198_v59 = vcombine.high %v329_v53, %v333_v54  ;;  %v336_v60 = vld [vmem:[#allocation5 + $0x740] sm:$0xff]  ;;  %v9244_v51 = vcombine.high %v376_v45, %v380_v46 }
  0x8c   :  { %3227 = vmatprep.subr.bf16.mxu0 %v9140_v61  ;;  %3391 = vmatprep.subr.bf16.mxu1 %v9142_v62  ;;  %v340_v61 = vld [vmem:[#allocation5 + $0x760] sm:$0xff]  ;;  %v337_v62 = vld [vmem:[#allocation5 + $0x748] sm:$0xff] }
  0x8d   :  { %v9204_v3 = vcombine.high %v336_v60, %v340_v61  ;;  %v9203_v9 = vcombine.low %v336_v60, %v340_v61  ;;  %v9205_v10 = vcombine.low %v337_v62, %v341_v63  ;;  %v384_v53 = vld [vmem:[#allocation5 + $0x8c0] sm:$0xff] }
  0x8e   :  { %v388_v54 = vld [vmem:[#allocation5 + $0x8e0] sm:$0xff] }
  0x8f   :  { %3228 = vmatpush1.bf16.msra.mxu0 %v9139_v4  ;;  %3392 = vmatpush1.bf16.msra.mxu1 %v9141_v5  ;;  %v9206_v4 = vcombine.high %v337_v62, %v341_v63  ;;  %v344_v5 = vld [vmem:[#allocation5 + $0x780] sm:$0xff]  ;;  %v9252_v60 = vcombine.high %v384_v53, %v388_v54 }
  0x90   :  { %3229 = vmatprep.subr.bf16.mxu0 %v9148_v6  ;;  %3393 = vmatprep.subr.bf16.mxu1 %v9150_v7  ;;  %v348_v6 = vld [vmem:[#allocation5 + $0x7a0] sm:$0xff]  ;;  %v345_v7 = vld [vmem:[#allocation5 + $0x788] sm:$0xff] }
  0x91   :  { %v9212_v11 = vcombine.high %v344_v5, %v348_v6  ;;  %v9211_v18 = vcombine.low %v344_v5, %v348_v6  ;;  %v9213_v19 = vcombine.low %v345_v7, %v349_v8  ;;  %v392_v62 = vld [vmem:[#allocation5 + $0x900] sm:$0xff] }
  0x92   :  { %v396_v63 = vld [vmem:[#allocation5 + $0x920] sm:$0xff] }
  0x93   :  { %3230 = vmatpush1.bf16.msra.mxu0 %v9147_v12  ;;  %3394 = vmatpush1.bf16.msra.mxu1 %v9149_v13  ;;  %v9214_v12 = vcombine.high %v345_v7, %v349_v8  ;;  %v352_v13 = vld [vmem:[#allocation5 + $0x7c0] sm:$0xff]  ;;  %v9260_v5 = vcombine.high %v392_v62, %v396_v63 }
  0x94   :  { %3231 = vmatprep.subr.bf16.mxu0 %v9156_v14  ;;  %3395 = vmatprep.subr.bf16.mxu1 %v9158_v15  ;;  %v356_v14 = vld [vmem:[#allocation5 + $0x7e0] sm:$0xff]  ;;  %v353_v15 = vld [vmem:[#allocation5 + $0x7c8] sm:$0xff] }
  0x95   :  { %v400_v7 = vld [vmem:[#allocation5 + $0x940] sm:$0xff] }
  0x96   :  { %v404_v8 = vld [vmem:[#allocation5 + $0x960] sm:$0xff] }
  0x97   :  { %3232 = vmatpush1.bf16.msra.mxu0 %v9155_v20  ;;  %3396 = vmatpush1.bf16.msra.mxu1 %v9157_v22  ;;  %v9220_v20 = vcombine.high %v352_v13, %v356_v14  ;;  %v9222_v22 = vcombine.high %v353_v15, %v357_v16 }
  0x98   :  { %3233 = vmatprep.subr.bf16.mxu0 %v9164_v23  ;;  %3397 = vmatprep.subr.bf16.mxu1 %v9166_v24  ;;  %v360_v23 = vld [vmem:[#allocation5 + $0x800] sm:$0xff] }
  0x99   :  { %v364_v24 = vld [vmem:[#allocation5 + $0x820] sm:$0xff] }
  0x9b   :  { %3234 = vmatpush1.bf16.msra.mxu0 %v9163_v29  ;;  %3398 = vmatpush1.bf16.msra.mxu1 %v9165_v31  ;;  %v9219_v29 = vcombine.low %v352_v13, %v356_v14  ;;  %v9221_v31 = vcombine.low %v353_v15, %v357_v16  ;;  %v9268_v13 = vcombine.high %v400_v7, %v404_v8  ;;  %v408_v15 = vld [vmem:[#allocation5 + $0x980] sm:$0xff] }
  0x9c   :  { %3235 = vmatprep.subr.bf16.mxu0 %v9172_v32  ;;  %3399 = vmatprep.subr.bf16.mxu1 %v9174_v33  ;;  %v9228_v32 = vcombine.high %v360_v23, %v364_v24  ;;  %v9230_v33 = vcombine.high %v361_v26, %v365_v27  ;;  %v412_v16 = vld [vmem:[#allocation5 + $0x9a0] sm:$0xff] }
  0x9d   :  { %v9275_v28 = vcombine.low %v408_v15, %v412_v16 }
  0x9f   :  { %3236 = vmatpush1.bf16.msra.mxu0 %v9171_v38  ;;  %3400 = vmatpush1.bf16.msra.mxu1 %v9173_v39  ;;  %v369_v38 = vld [vmem:[#allocation5 + $0x848] sm:$0xff] }
  0xa0   :  { %3237 = vmatprep.subr.bf16.mxu0 %v9180_v40  ;;  %3401 = vmatprep.subr.bf16.mxu1 %v9182_v42  ;;  %v373_v39 = vld [vmem:[#allocation5 + $0x868] sm:$0xff]  ;;  %v9227_v40 = vcombine.low %v360_v23, %v364_v24  ;;  %v9229_v42 = vcombine.low %v361_v26, %v365_v27  ;;  %v416_v24 = vld [vmem:[#allocation5 + $0x9c0] sm:$0xff] }
  0xa1   :  { %v9238_v44 = vcombine.high %v369_v38, %v373_v39  ;;  %v417_v26 = vld [vmem:[#allocation5 + $0x9c8] sm:$0xff] }
  0xa2   :  { %v421_v27 = vld [vmem:[#allocation5 + $0x9e8] sm:$0xff] }
  0xa3   :  { %3238 = vmatpush1.bf16.msra.mxu0 %v9179_v47  ;;  %3402 = vmatpush1.bf16.msra.mxu1 %v9181_v48  ;;  %v10386_v47 = vpack.c.bf16 %v79_v36, %v79_v36  ;;  %v377_v48 = vld [vmem:[#allocation5 + $0x888] sm:$0xff] }
  0xa4   :  { %3239 = vmatprep.subr.bf16.mxu0 %v9188_v49  ;;  %3403 = vmatprep.subr.bf16.mxu1 %v9190_v50  ;;  %v9235_v49 = vcombine.low %v368_v34, %v372_v35  ;;  %v9237_v50 = vcombine.low %v369_v38, %v373_v39  ;;  %v9246_v52 = vcombine.high %v377_v48, %v381_v56  ;;  %v428_v34 = vld [vmem:[#allocation5 + $0xa20] sm:$0xff]  ;;  %v425_v35 = vld [vmem:[#allocation5 + $0xa08] sm:$0xff] }
  0xa5   :  { %v429_v36 = vld [vmem:[#allocation5 + $0xa28] sm:$0xff]  ;;  %v9283_v38 = vcombine.low %v416_v24, %v420_v25  ;;  %v9285_v39 = vcombine.low %v417_v26, %v421_v27 }
  0xa7   :  { %3240 = vmatpush1.bf16.msra.mxu0 %v9187_v55  ;;  %3404 = vmatpush1.bf16.msra.mxu1 %v9189_v57  ;;  %v385_v55 = vld [vmem:[#allocation5 + $0x8c8] sm:$0xff] }
  0xa8   :  { %3241 = vmatprep.subr.bf16.mxu0 %v9196_v58  ;;  %3405 = vmatprep.subr.bf16.mxu1 %v9198_v59  ;;  %v389_v57 = vld [vmem:[#allocation5 + $0x8e8] sm:$0xff]  ;;  %v9243_v58 = vcombine.low %v376_v45, %v380_v46  ;;  %v9245_v59 = vcombine.low %v377_v48, %v381_v56  ;;  %v9293_v56 = vcombine.low %v425_v35, %v429_v36 }
  0xa9   :  { %v9254_v61 = vcombine.high %v385_v55, %v389_v57  ;;  %v433_v45 = vld [vmem:[#allocation5 + $0xa48] sm:$0xff] }
  0xaa   :  { %v437_v46 = vld [vmem:[#allocation5 + $0xa68] sm:$0xff] }
  0xab   :  { %3242 = vmatpush1.bf16.msra.mxu0 %v9195_v1  ;;  %3406 = vmatpush1.bf16.msra.mxu1 %v9197_v2  ;;  %v393_v1 = vld [vmem:[#allocation5 + $0x908] sm:$0xff] }
  0xac   :  { %3243 = vmatprep.subr.bf16.mxu0 %v9204_v3  ;;  %3407 = vmatprep.subr.bf16.mxu1 %v9206_v4  ;;  %v397_v2 = vld [vmem:[#allocation5 + $0x928] sm:$0xff]  ;;  %v9251_v3 = vcombine.low %v384_v53, %v388_v54  ;;  %v9253_v4 = vcombine.low %v385_v55, %v389_v57  ;;  %v9301_v57 = vcombine.low %v433_v45, %v437_v46 }
  0xad   :  { %v9262_v6 = vcombine.high %v393_v1, %v397_v2  ;;  %v441_v53 = vld [vmem:[#allocation5 + $0xa88] sm:$0xff] }
  0xae   :  { %v445_v54 = vld [vmem:[#allocation5 + $0xaa8] sm:$0xff] }
  0xaf   :  { %3244 = vmatpush1.bf16.msra.mxu0 %v9203_v9  ;;  %3408 = vmatpush1.bf16.msra.mxu1 %v9205_v10  ;;  %v401_v9 = vld [vmem:[#allocation5 + $0x948] sm:$0xff] }
  0xb0   :  { %3245 = vmatprep.subr.bf16.mxu0 %v9212_v11  ;;  %3409 = vmatprep.subr.bf16.mxu1 %v9214_v12  ;;  %v405_v10 = vld [vmem:[#allocation5 + $0x968] sm:$0xff]  ;;  %v9259_v11 = vcombine.low %v392_v62, %v396_v63  ;;  %v9261_v12 = vcombine.low %v393_v1, %v397_v2  ;;  %v9309_v2 = vcombine.low %v441_v53, %v445_v54 }
  0xb1   :  { %v9270_v14 = vcombine.high %v401_v9, %v405_v10  ;;  %v449_v62 = vld [vmem:[#allocation5 + $0xac8] sm:$0xff] }
  0xb2   :  { %v453_v63 = vld [vmem:[#allocation5 + $0xae8] sm:$0xff] }
  0xb3   :  { %3246 = vmatpush1.bf16.msra.mxu0 %v9211_v18  ;;  %3410 = vmatpush1.bf16.msra.mxu1 %v9213_v19  ;;  %v413_v18 = vld [vmem:[#allocation5 + $0x9a8] sm:$0xff]  ;;  %v9267_v19 = vcombine.low %v400_v7, %v404_v8 }
  0xb4   :  { %3247 = vmatprep.subr.bf16.mxu0 %v9220_v20  ;;  %3411 = vmatprep.subr.bf16.mxu1 %v9222_v22  ;;  %v9269_v20 = vcombine.low %v401_v9, %v405_v10  ;;  %v9276_v22 = vcombine.high %v408_v15, %v412_v16  ;;  %v9278_v23 = vcombine.high %v409_v17, %v413_v18  ;;  %v457_v7 = vld [vmem:[#allocation5 + $0xb08] sm:$0xff] }
  0xb5   :  { %v461_v8 = vld [vmem:[#allocation5 + $0xb28] sm:$0xff]  ;;  %v9317_v10 = vcombine.low %v449_v62, %v453_v63 }
  0xb6   :  { %v465_v15 = vld [vmem:[#allocation5 + $0xb48] sm:$0xff] }
  0xb7   :  { %3248 = vmatpush1.bf16.msra.mxu0 %v9219_v29  ;;  %3412 = vmatpush1.bf16.msra.mxu1 %v9221_v31  ;;  %v9277_v29 = vcombine.low %v409_v17, %v413_v18  ;;  %v9284_v31 = vcombine.high %v416_v24, %v420_v25  ;;  %v469_v16 = vld [vmem:[#allocation5 + $0xb68] sm:$0xff]  ;;  %v9325_v18 = vcombine.low %v457_v7, %v461_v8 }
  0xb8   :  { %3258 = vmatprep.subr.bf16.mxu0 %v9228_v32  ;;  %3422 = vmatprep.subr.bf16.mxu1 %v9230_v33  ;;  %v9286_v32 = vcombine.high %v417_v26, %v421_v27  ;;  %v424_v33 = vld [vmem:[#allocation5 + $0xa00] sm:$0xff]  ;;  %v473_v24 = vld [vmem:[#allocation5 + $0xb88] sm:$0xff]  ;;  %v9333_v27 = vcombine.low %v465_v15, %v469_v16 }
  0xb9   :  { %v9291_v48 = vcombine.low %v424_v33, %v428_v34  ;;  %v477_v25 = vld [vmem:[#allocation5 + $0xba8] sm:$0xff] }
  0xba   :  { %3250 = vmatmul.mubr.bf16.vlgmr.msra.gmra.mrb[0].mxu0 %v10384_v37  ;;  %3414 = vmatmul.mubr.bf16.vlgmr.msra.gmra.mrb[0].mxu1 %v10384_v37 }
  0xbb   :  { %3259 = vmatpush1.bf16.msra.mxu0 %v9227_v40  ;;  %3423 = vmatpush1.bf16.msra.mxu1 %v9229_v42  ;;  %v9292_v40 = vcombine.high %v424_v33, %v428_v34  ;;  %v9294_v42 = vcombine.high %v425_v35, %v429_v36  ;;  %v481_v33 = vld [vmem:[#allocation5 + $0xbc8] sm:$0xff]  ;;  %v74_v35 = vsub.s32 4, %v10358_v41 }
  0xbc   :  { %3260 = vmatprep.subr.bf16.mxu0 %v9236_v43  ;;  %3424 = vmatprep.subr.bf16.mxu1 %v9238_v44  ;;  %v432_v43 = vld [vmem:[#allocation5 + $0xa40] sm:$0xff]  ;;  %v485_v34 = vld [vmem:[#allocation5 + $0xbe8] sm:$0xff] }
  0xbd   :  { %3290 = vmatprep.mubr.bf16.mxu0 %v10386_v47  ;;  %3454 = vmatprep.mubr.bf16.mxu1 %v10386_v47  ;;  %v436_v44 = vld [vmem:[#allocation5 + $0xa60] sm:$0xff] }
  0xbe   :  { %v9299_v55 = vcombine.low %v432_v43, %v436_v44 }
  0xbf   :  { %3261 = vmatpush1.bf16.msra.mxu0 %v9235_v49  ;;  %3425 = vmatpush1.bf16.msra.mxu1 %v9237_v50  ;;  %v9300_v49 = vcombine.high %v432_v43, %v436_v44  ;;  %v9302_v50 = vcombine.high %v433_v45, %v437_v46  ;;  %v492_v43 = vld [vmem:[#allocation5 + $0xc20] sm:$0xff]  ;;  %v86_v44 = vsub.s32 7, %v10358_v41  ;;  %v489_v45 = vld [vmem:[#allocation5 + $0xc08] sm:$0xff] }
  0xc0   :  { %3262 = vmatprep.subr.bf16.mxu0 %v9244_v51  ;;  %3426 = vmatprep.subr.bf16.mxu1 %v9246_v52  ;;  %v440_v51 = vld [vmem:[#allocation5 + $0xa80] sm:$0xff]  ;;  %v493_v46 = vld [vmem:[#allocation5 + $0xc28] sm:$0xff] }
  0xc1   :  { %v444_v52 = vld [vmem:[#allocation5 + $0xaa0] sm:$0xff] }
  0xc2   :  { %v9307_v1 = vcombine.low %v440_v51, %v444_v52 }
  0xc3   :  { %3263 = vmatpush1.bf16.msra.mxu0 %v9243_v58  ;;  %3427 = vmatpush1.bf16.msra.mxu1 %v9245_v59  ;;  %v9308_v58 = vcombine.high %v440_v51, %v444_v52  ;;  %v9310_v59 = vcombine.high %v441_v53, %v445_v54  ;;  %v9358_v52 = vcombine.high %v489_v45, %v493_v46  ;;  %v496_v53 = vld [vmem:[#allocation5 + $0xc40] sm:$0xff] }
  0xc4   :  { %3264 = vmatprep.subr.bf16.mxu0 %v9252_v60  ;;  %3428 = vmatprep.subr.bf16.mxu1 %v9254_v61  ;;  %v448_v60 = vld [vmem:[#allocation5 + $0xac0] sm:$0xff] }
  0xc5   :  { %v452_v61 = vld [vmem:[#allocation5 + $0xae0] sm:$0xff] }
  0xc6   :  { %v9315_v9 = vcombine.low %v448_v60, %v452_v61  ;;  %v500_v54 = vld [vmem:[#allocation5 + $0xc60] sm:$0xff] }
  0xc7   :  { %3265 = vmatpush1.bf16.msra.mxu0 %v9251_v3  ;;  %3429 = vmatpush1.bf16.msra.mxu1 %v9253_v4  ;;  %v9316_v3 = vcombine.high %v448_v60, %v452_v61  ;;  %v9318_v4 = vcombine.high %v449_v62, %v453_v63  ;;  %v9357_v61 = vcombine.low %v489_v45, %v493_v46  ;;  %v544_v46 = vld [vmem:[#allocation5 + $0xdc0] sm:$0xff] }
  0xc8   :  { %3266 = vmatprep.subr.bf16.mxu0 %v9260_v5  ;;  %3430 = vmatprep.subr.bf16.mxu1 %v9262_v6  ;;  %v456_v5 = vld [vmem:[#allocation5 + $0xb00] sm:$0xff]  ;;  %v9364_v62 = vcombine.high %v496_v53, %v500_v54 }
  0xc9   :  { %v460_v6 = vld [vmem:[#allocation5 + $0xb20] sm:$0xff] }
  0xca   :  { %v9323_v17 = vcombine.low %v456_v5, %v460_v6 }
  0xcb   :  { %3267 = vmatpush1.bf16.msra.mxu0 %v9259_v11  ;;  %3431 = vmatpush1.bf16.msra.mxu1 %v9261_v12  ;;  %v9324_v11 = vcombine.high %v456_v5, %v460_v6  ;;  %v9326_v12 = vcombine.high %v457_v7, %v461_v8  ;;  %v509_v5 = vld [vmem:[#allocation5 + $0xca8] sm:$0xff]  ;;  %v9363_v6 = vcombine.low %v496_v53, %v500_v54 }
  0xcc   :  { %3268 = vmatprep.subr.bf16.mxu0 %v9268_v13  ;;  %3432 = vmatprep.subr.bf16.mxu1 %v9270_v14  ;;  %v464_v13 = vld [vmem:[#allocation5 + $0xb40] sm:$0xff] }
  0xcd   :  { %v468_v14 = vld [vmem:[#allocation5 + $0xb60] sm:$0xff] }
  0xce   :  { %v9331_v26 = vcombine.low %v464_v13, %v468_v14 }
  0xcf   :  { %3269 = vmatpush1.bf16.msra.mxu0 %v9267_v19  ;;  %3433 = vmatpush1.bf16.msra.mxu1 %v9269_v20  ;;  %v9332_v19 = vcombine.high %v464_v13, %v468_v14  ;;  %v9334_v20 = vcombine.high %v465_v15, %v469_v16  ;;  %v517_v13 = vld [vmem:[#allocation5 + $0xce8] sm:$0xff] }
  0xd0   :  { %3270 = vmatprep.subr.bf16.mxu0 %v9276_v22  ;;  %3434 = vmatprep.subr.bf16.mxu1 %v9278_v23  ;;  %v472_v22 = vld [vmem:[#allocation5 + $0xb80] sm:$0xff] }
  0xd1   :  { %v476_v23 = vld [vmem:[#allocation5 + $0xba0] sm:$0xff] }
  0xd2   :  { %v9339_v36 = vcombine.low %v472_v22, %v476_v23 }
  0xd3   :  { %3271 = vmatpush1.bf16.msra.mxu0 %v9275_v28  ;;  %3435 = vmatpush1.bf16.msra.mxu1 %v9277_v29  ;;  %v9340_v28 = vcombine.high %v472_v22, %v476_v23  ;;  %v9342_v29 = vcombine.high %v473_v24, %v477_v25  ;;  %v525_v22 = vld [vmem:[#allocation5 + $0xd28] sm:$0xff] }
  0xd4   :  { %3272 = vmatprep.subr.bf16.mxu0 %v9284_v31  ;;  %3436 = vmatprep.subr.bf16.mxu1 %v9286_v32  ;;  %v480_v31 = vld [vmem:[#allocation5 + $0xbc0] sm:$0xff] }
  0xd5   :  { %v484_v32 = vld [vmem:[#allocation5 + $0xbe0] sm:$0xff] }
  0xd7   :  { %3273 = vmatpush1.bf16.msra.mxu0 %v9283_v38  ;;  %3437 = vmatpush1.bf16.msra.mxu1 %v9285_v39  ;;  %v9341_v38 = vcombine.low %v473_v24, %v477_v25  ;;  %v9348_v39 = vcombine.high %v480_v31, %v484_v32 }
  0xd8   :  { %3274 = vmatprep.subr.bf16.mxu0 %v9292_v40  ;;  %3438 = vmatprep.subr.bf16.mxu1 %v9294_v42  ;;  %v9350_v40 = vcombine.high %v481_v33, %v485_v34  ;;  %v488_v42 = vld [vmem:[#allocation5 + $0xc00] sm:$0xff] }
  0xd9   :  { %v9356_v51 = vcombine.high %v488_v42, %v492_v43  ;;  %v9355_v60 = vcombine.low %v488_v42, %v492_v43 }
  0xdb   :  { %3275 = vmatpush1.bf16.msra.mxu0 %v9291_v48  ;;  %3439 = vmatpush1.bf16.msra.mxu1 %v9293_v56  ;;  %v10394_v48 = vld [vmem:[#allocation2] sm:$0xff] }
  0xdc   :  { %3276 = vmatprep.subr.bf16.mxu0 %v9300_v49  ;;  %3440 = vmatprep.subr.bf16.mxu1 %v9302_v50  ;;  %v75_v56 = vrot.slane %v10394_v48, %v74_v35  ;;  %v9347_v49 = vcombine.low %v480_v31, %v484_v32  ;;  %v9349_v50 = vcombine.low %v481_v33, %v485_v34  ;;  %v533_v31 = vld [vmem:[#allocation5 + $0xd68] sm:$0xff] }
  0xdf   :  { %3277 = vmatpush1.bf16.msra.mxu0 %v9299_v55  ;;  %3441 = vmatpush1.bf16.msra.mxu1 %v9301_v57  ;;  %v87_v55 = vrot.slane %v10394_v48, %v86_v44  ;;  %v10398_v57 = vpack.c.bf16 %v75_v56, %v75_v56  ;;  %v548_v56 = vld [vmem:[#allocation5 + $0xde0] sm:$0xff] }
  0xe0   :  { %3278 = vmatprep.subr.bf16.mxu0 %v9308_v58  ;;  %3442 = vmatprep.subr.bf16.mxu1 %v9310_v59  ;;  %v497_v58 = vld [vmem:[#allocation5 + $0xc48] sm:$0xff]  ;;  %v9412_v53 = vcombine.high %v544_v46, %v548_v56 }
  0xe1   :  { %v501_v59 = vld [vmem:[#allocation5 + $0xc68] sm:$0xff] }
  0xe2   :  { %v9366_v63 = vcombine.high %v497_v58, %v501_v59  ;;  %v9365_v7 = vcombine.low %v497_v58, %v501_v59  ;;  %v556_v58 = vld [vmem:[#allocation5 + $0xe20] sm:$0xff]  ;;  %v553_v59 = vld [vmem:[#allocation5 + $0xe08] sm:$0xff] }
  0xe3   :  { %3279 = vmatpush1.bf16.msra.mxu0 %v9307_v1  ;;  %3443 = vmatpush1.bf16.msra.mxu1 %v9309_v2  ;;  %v504_v1 = vld [vmem:[#allocation5 + $0xc80] sm:$0xff] }
  0xe4   :  { %3280 = vmatprep.subr.bf16.mxu0 %v9316_v3  ;;  %3444 = vmatprep.subr.bf16.mxu1 %v9318_v4  ;;  %v508_v2 = vld [vmem:[#allocation5 + $0xca0] sm:$0xff]  ;;  %v10400_v3 = vpack.c.bf16 %v87_v55, %v87_v55  ;;  %v505_v4 = vld [vmem:[#allocation5 + $0xc88] sm:$0xff] }
  0xe5   :  { %v9372_v8 = vcombine.high %v504_v1, %v508_v2  ;;  %v9371_v14 = vcombine.low %v504_v1, %v508_v2  ;;  %v9373_v15 = vcombine.low %v505_v4, %v509_v5  ;;  %v552_v55 = vld [vmem:[#allocation5 + $0xe00] sm:$0xff] }
  0xe6   :  { %v560_v2 = vld [vmem:[#allocation5 + $0xe40] sm:$0xff] }
  0xe7   :  { %3281 = vmatpush1.bf16.msra.mxu0 %v9315_v9  ;;  %3445 = vmatpush1.bf16.msra.mxu1 %v9317_v10  ;;  %v9374_v9 = vcombine.high %v505_v4, %v509_v5  ;;  %v512_v10 = vld [vmem:[#allocation5 + $0xcc0] sm:$0xff]  ;;  %v561_v5 = vld [vmem:[#allocation5 + $0xe48] sm:$0xff] }
  0xe8   :  { %3282 = vmatprep.subr.bf16.mxu0 %v9324_v11  ;;  %3446 = vmatprep.subr.bf16.mxu1 %v9326_v12  ;;  %v516_v11 = vld [vmem:[#allocation5 + $0xce0] sm:$0xff]  ;;  %v513_v12 = vld [vmem:[#allocation5 + $0xcc8] sm:$0xff] }
  0xe9   :  { %v9380_v16 = vcombine.high %v512_v10, %v516_v11  ;;  %v9379_v23 = vcombine.low %v512_v10, %v516_v11  ;;  %v9381_v24 = vcombine.low %v513_v12, %v517_v13  ;;  %v564_v4 = vld [vmem:[#allocation5 + $0xe60] sm:$0xff] }
  0xea   :  { %v568_v11 = vld [vmem:[#allocation5 + $0xe80] sm:$0xff] }
  0xeb   :  { %3283 = vmatpush1.bf16.msra.mxu0 %v9323_v17  ;;  %3447 = vmatpush1.bf16.msra.mxu1 %v9325_v18  ;;  %v9382_v17 = vcombine.high %v513_v12, %v517_v13  ;;  %v520_v18 = vld [vmem:[#allocation5 + $0xd00] sm:$0xff]  ;;  %v569_v13 = vld [vmem:[#allocation5 + $0xe88] sm:$0xff] }
  0xec   :  { %3284 = vmatprep.subr.bf16.mxu0 %v9332_v19  ;;  %3448 = vmatprep.subr.bf16.mxu1 %v9334_v20  ;;  %v524_v19 = vld [vmem:[#allocation5 + $0xd20] sm:$0xff]  ;;  %v521_v20 = vld [vmem:[#allocation5 + $0xd08] sm:$0xff] }
  0xed   :  { %v9388_v25 = vcombine.high %v520_v18, %v524_v19  ;;  %v9387_v32 = vcombine.low %v520_v18, %v524_v19  ;;  %v9389_v33 = vcombine.low %v521_v20, %v525_v22  ;;  %v572_v12 = vld [vmem:[#allocation5 + $0xea0] sm:$0xff] }
  0xee   :  { %v576_v19 = vld [vmem:[#allocation5 + $0xec0] sm:$0xff] }
  0xef   :  { %3285 = vmatpush1.bf16.msra.mxu0 %v9331_v26  ;;  %3449 = vmatpush1.bf16.msra.mxu1 %v9333_v27  ;;  %v9390_v26 = vcombine.high %v521_v20, %v525_v22  ;;  %v528_v27 = vld [vmem:[#allocation5 + $0xd40] sm:$0xff]  ;;  %v577_v22 = vld [vmem:[#allocation5 + $0xec8] sm:$0xff] }
  0xf0   :  { %3286 = vmatprep.subr.bf16.mxu0 %v9340_v28  ;;  %3450 = vmatprep.subr.bf16.mxu1 %v9342_v29  ;;  %v532_v28 = vld [vmem:[#allocation5 + $0xd60] sm:$0xff]  ;;  %v529_v29 = vld [vmem:[#allocation5 + $0xd48] sm:$0xff] }
  0xf1   :  { %v9396_v34 = vcombine.high %v528_v27, %v532_v28  ;;  %v9398_v35 = vcombine.high %v529_v29, %v533_v31  ;;  %v9395_v42 = vcombine.low %v528_v27, %v532_v28  ;;  %v9397_v43 = vcombine.low %v529_v29, %v533_v31  ;;  %v580_v20 = vld [vmem:[#allocation5 + $0xee0] sm:$0xff]  ;;  %v585_v31 = vld [vmem:[#allocation5 + $0xf08] sm:$0xff] }
  0xf2   :  { %v584_v28 = vld [vmem:[#allocation5 + $0xf00] sm:$0xff] }
  0xf3   :  { %3287 = vmatpush1.bf16.msra.mxu0 %v9339_v36  ;;  %3451 = vmatpush1.bf16.msra.mxu1 %v9341_v38  ;;  %v536_v36 = vld [vmem:[#allocation5 + $0xd80] sm:$0xff] }
  0xf4   :  { %3288 = vmatprep.subr.bf16.mxu0 %v9348_v39  ;;  %3452 = vmatprep.subr.bf16.mxu1 %v9350_v40  ;;  %v540_v38 = vld [vmem:[#allocation5 + $0xda0] sm:$0xff]  ;;  %v537_v39 = vld [vmem:[#allocation5 + $0xd88] sm:$0xff] }
  0xf5   :  { %v541_v40 = vld [vmem:[#allocation5 + $0xda8] sm:$0xff]  ;;  %v9404_v44 = vcombine.high %v536_v36, %v540_v38  ;;  %v588_v29 = vld [vmem:[#allocation5 + $0xf20] sm:$0xff] }
  0xf6   :  { %v9406_v45 = vcombine.high %v537_v39, %v541_v40 }
  0xf7   :  { %3289 = vmatpush1.bf16.msra.mxu0 %v9347_v49  ;;  %3453 = vmatpush1.bf16.msra.mxu1 %v9349_v50  ;;  %v545_v49 = vld [vmem:[#allocation5 + $0xdc8] sm:$0xff] }
  0xf8   :  { %3299 = vmatprep.subr.bf16.mxu0 %v9356_v51  ;;  %3463 = vmatprep.subr.bf16.mxu1 %v9358_v52  ;;  %v549_v50 = vld [vmem:[#allocation5 + $0xde8] sm:$0xff]  ;;  %v9403_v51 = vcombine.low %v536_v36, %v540_v38  ;;  %v9405_v52 = vcombine.low %v537_v39, %v541_v40  ;;  %v592_v38 = vld [vmem:[#allocation5 + $0xf40] sm:$0xff] }
  0xf9   :  { %v9414_v54 = vcombine.high %v545_v49, %v549_v50  ;;  %v596_v39 = vld [vmem:[#allocation5 + $0xf60] sm:$0xff]  ;;  %v593_v40 = vld [vmem:[#allocation5 + $0xf48] sm:$0xff] }
  0xfa   :  { %3291 = vmatmul.mubr.bf16.vlgmr.msra.gmra.mrb[0].mxu0 %v10398_v57  ;;  %3455 = vmatmul.mubr.bf16.vlgmr.msra.gmra.mrb[0].mxu1 %v10398_v57 }
  0xfb   :  { %3300 = vmatpush1.bf16.msra.mxu0 %v9355_v60  ;;  %3464 = vmatpush1.bf16.msra.mxu1 %v9357_v61  ;;  %v557_v60 = vld [vmem:[#allocation5 + $0xe28] sm:$0xff]  ;;  %v9411_v61 = vcombine.low %v544_v46, %v548_v56  ;;  %v600_v56 = vld [vmem:[#allocation5 + $0xf80] sm:$0xff] }
  0xfc   :  { %3301 = vmatprep.subr.bf16.mxu0 %v9364_v62  ;;  %3465 = vmatprep.subr.bf16.mxu1 %v9366_v63  ;;  %v9413_v62 = vcombine.low %v545_v49, %v549_v50  ;;  %v9420_v63 = vcombine.high %v552_v55, %v556_v58  ;;  %v9422_v1 = vcombine.high %v553_v59, %v557_v60  ;;  %v604_v49 = vld [vmem:[#allocation5 + $0xfa0] sm:$0xff]  ;;  %v601_v50 = vld [vmem:[#allocation5 + $0xf88] sm:$0xff] }
  0xfd   :  { %3331 = vmatprep.mubr.bf16.mxu0 %v10400_v3  ;;  %3495 = vmatprep.mubr.bf16.mxu1 %v10400_v3 }
  0xff   :  { %3302 = vmatpush1.bf16.msra.mxu0 %v9363_v6  ;;  %3466 = vmatpush1.bf16.msra.mxu1 %v9365_v7  ;;  %v565_v6 = vld [vmem:[#allocation5 + $0xe68] sm:$0xff]  ;;  %v9419_v7 = vcombine.low %v552_v55, %v556_v58  ;;  %v608_v58 = vld [vmem:[#allocation5 + $0xfc0] sm:$0xff] }
 0x100   :  { %3303 = vmatprep.subr.bf16.mxu0 %v9372_v8  ;;  %3467 = vmatprep.subr.bf16.mxu1 %v9374_v9  ;;  %v9421_v8 = vcombine.low %v553_v59, %v557_v60  ;;  %v9428_v9 = vcombine.high %v560_v2, %v564_v4  ;;  %v9430_v10 = vcombine.high %v561_v5, %v565_v6  ;;  %v612_v59 = vld [vmem:[#allocation5 + $0xfe0] sm:$0xff]  ;;  %v609_v60 = vld [vmem:[#allocation5 + $0xfc8] sm:$0xff] }
 0x103   :  { %3304 = vmatpush1.bf16.msra.mxu0 %v9371_v14  ;;  %3468 = vmatpush1.bf16.msra.mxu1 %v9373_v15  ;;  %v573_v14 = vld [vmem:[#allocation5 + $0xea8] sm:$0xff]  ;;  %v9427_v15 = vcombine.low %v560_v2, %v564_v4  ;;  %v9476_v2 = vcombine.high %v608_v58, %v612_v59 }
 0x104   :  { %3305 = vmatprep.subr.bf16.mxu0 %v9380_v16  ;;  %3469 = vmatprep.subr.bf16.mxu1 %v9382_v17  ;;  %v9429_v16 = vcombine.low %v561_v5, %v565_v6  ;;  %v9436_v17 = vcombine.high %v568_v11, %v572_v12  ;;  %v9438_v18 = vcombine.high %v569_v13, %v573_v14  ;;  %v106_v5 = vld [vmem:[#allocation5 + $0x10] sm:$0xff] }
 0x105   :  { %v110_v6 = vld [vmem:[#allocation5 + $0x30] sm:$0xff] }
 0x107   :  { %3306 = vmatpush1.bf16.msra.mxu0 %v9379_v23  ;;  %3470 = vmatpush1.bf16.msra.mxu1 %v9381_v24  ;;  %v581_v23 = vld [vmem:[#allocation5 + $0xee8] sm:$0xff]  ;;  %v9435_v24 = vcombine.low %v568_v11, %v572_v12  ;;  %v8976_v12 = vcombine.high %v106_v5, %v110_v6 }
 0x108   :  { %3307 = vmatprep.subr.bf16.mxu0 %v9388_v25  ;;  %3471 = vmatprep.subr.bf16.mxu1 %v9390_v26  ;;  %v9437_v25 = vcombine.low %v569_v13, %v573_v14  ;;  %v9444_v26 = vcombine.high %v576_v19, %v580_v20  ;;  %v9446_v27 = vcombine.high %v577_v22, %v581_v23  ;;  %v114_v14 = vld [vmem:[#allocation5 + $0x50] sm:$0xff] }
 0x10b   :  { %3308 = vmatpush1.bf16.msra.mxu0 %v9387_v32  ;;  %3472 = vmatpush1.bf16.msra.mxu1 %v9389_v33  ;;  %v589_v32 = vld [vmem:[#allocation5 + $0xf28] sm:$0xff]  ;;  %v9443_v33 = vcombine.low %v576_v19, %v580_v20  ;;  %v8975_v19 = vcombine.low %v106_v5, %v110_v6  ;;  %v162_v6 = vld [vmem:[#allocation5 + $0x1d0] sm:$0xff] }
 0x10c   :  { %3309 = vmatprep.subr.bf16.mxu0 %v9396_v34  ;;  %3473 = vmatprep.subr.bf16.mxu1 %v9398_v35  ;;  %v9445_v34 = vcombine.low %v577_v22, %v581_v23  ;;  %v9452_v35 = vcombine.high %v584_v28, %v588_v29  ;;  %v9454_v36 = vcombine.high %v585_v31, %v589_v32  ;;  %v122_v23 = vld [vmem:[#allocation5 + $0x90] sm:$0xff] }
 0x10f   :  { %3310 = vmatpush1.bf16.msra.mxu0 %v9395_v42  ;;  %3474 = vmatpush1.bf16.msra.mxu1 %v9397_v43  ;;  %v597_v42 = vld [vmem:[#allocation5 + $0xf68] sm:$0xff]  ;;  %v9451_v43 = vcombine.low %v584_v28, %v588_v29 }
 0x110   :  { %3311 = vmatprep.subr.bf16.mxu0 %v9404_v44  ;;  %3475 = vmatprep.subr.bf16.mxu1 %v9406_v45  ;;  %v9453_v44 = vcombine.low %v585_v31, %v589_v32  ;;  %v9460_v45 = vcombine.high %v592_v38, %v596_v39  ;;  %v9462_v46 = vcombine.high %v593_v40, %v597_v42  ;;  %v130_v32 = vld [vmem:[#allocation5 + $0xd0] sm:$0xff] }
 0x113   :  { %3312 = vmatpush1.bf16.msra.mxu0 %v9403_v51  ;;  %3476 = vmatpush1.bf16.msra.mxu1 %v9405_v52  ;;  %v605_v51 = vld [vmem:[#allocation5 + $0xfa8] sm:$0xff]  ;;  %v9459_v52 = vcombine.low %v592_v38, %v596_v39 }
 0x114   :  { %3313 = vmatprep.subr.bf16.mxu0 %v9412_v53  ;;  %3477 = vmatprep.subr.bf16.mxu1 %v9414_v54  ;;  %v9461_v53 = vcombine.low %v593_v40, %v597_v42  ;;  %v9468_v54 = vcombine.high %v600_v56, %v604_v49  ;;  %v9470_v55 = vcombine.high %v601_v50, %v605_v51  ;;  %v138_v42 = vld [vmem:[#allocation5 + $0x110] sm:$0xff] }
 0x117   :  { %3314 = vmatpush1.bf16.msra.mxu0 %v9411_v61  ;;  %3478 = vmatpush1.bf16.msra.mxu1 %v9413_v62  ;;  %v613_v61 = vld [vmem:[#allocation5 + $0xfe8] sm:$0xff]  ;;  %v82_v62 = vsub.s32 6, %v10358_v41  ;;  %v3940_v41 = vld [vmem:[#allocation7 + $0x360] sm:$0xff] }
 0x118   :  { %3315 = vmatprep.subr.bf16.mxu0 %v9420_v63  ;;  %3479 = vmatprep.subr.bf16.mxu1 %v9422_v1  ;;  %v9467_v63 = vcombine.low %v600_v56, %v604_v49  ;;  %v9469_v1 = vcombine.low %v601_v50, %v605_v51  ;;  %v9478_v4 = vcombine.high %v609_v60, %v613_v61  ;;  %v146_v50 = vld [vmem:[#allocation5 + $0x150] sm:$0xff] }
 0x119   :  { %v9477_v11 = vcombine.low %v609_v60, %v613_v61  ;;  %v150_v51 = vld [vmem:[#allocation5 + $0x170] sm:$0xff] }
 0x11a   :  { %v154_v60 = vld [vmem:[#allocation5 + $0x190] sm:$0xff] }
 0x11b   :  { %3316 = vmatpush1.bf16.msra.mxu0 %v9419_v7  ;;  %3480 = vmatpush1.bf16.msra.mxu1 %v9421_v8  ;;  %v83_v7 = vrot.slane %v10394_v48, %v82_v62  ;;  %v107_v8 = vld [vmem:[#allocation5 + $0x18] sm:$0xff]  ;;  %v158_v61 = vld [vmem:[#allocation5 + $0x1b0] sm:$0xff] }
 0x11c   :  { %3317 = vmatprep.subr.bf16.mxu0 %v9428_v9  ;;  %3481 = vmatprep.subr.bf16.mxu1 %v9430_v10  ;;  %v111_v9 = vld [vmem:[#allocation5 + $0x38] sm:$0xff]  ;;  %v9475_v10 = vcombine.low %v608_v58, %v612_v59  ;;  %v9016_v58 = vcombine.high %v146_v50, %v150_v51 }
 0x11d   :  { %v8978_v13 = vcombine.high %v107_v8, %v111_v9  ;;  %v8977_v48 = vcombine.low %v107_v8, %v111_v9  ;;  %v155_v62 = vld [vmem:[#allocation5 + $0x198] sm:$0xff] }
 0x11e   :  { %v163_v8 = vld [vmem:[#allocation5 + $0x1d8] sm:$0xff] }
 0x11f   :  { %3318 = vmatpush1.bf16.msra.mxu0 %v9427_v15  ;;  %3482 = vmatpush1.bf16.msra.mxu1 %v9429_v16  ;;  %v118_v15 = vld [vmem:[#allocation5 + $0x70] sm:$0xff]  ;;  %v10408_v16 = vpack.c.bf16 %v83_v7, %v83_v7  ;;  %v167_v9 = vld [vmem:[#allocation5 + $0x1f8] sm:$0xff] }
 0x120   :  { %3319 = vmatprep.subr.bf16.mxu0 %v9436_v17  ;;  %3483 = vmatprep.subr.bf16.mxu1 %v9438_v18  ;;  %v115_v17 = vld [vmem:[#allocation5 + $0x58] sm:$0xff]  ;;  %v8984_v20 = vcombine.high %v114_v14, %v118_v15  ;;  %v166_v7 = vld [vmem:[#allocation5 + $0x1f0] sm:$0xff] }
 0x121   :  { %v119_v18 = vld [vmem:[#allocation5 + $0x78] sm:$0xff] }
 0x122   :  { %v8986_v22 = vcombine.high %v115_v17, %v119_v18  ;;  %v8985_v28 = vcombine.low %v115_v17, %v119_v18  ;;  %v171_v17 = vld [vmem:[#allocation5 + $0x218] sm:$0xff] }
 0x123   :  { %3320 = vmatpush1.bf16.msra.mxu0 %v9435_v24  ;;  %3484 = vmatpush1.bf16.msra.mxu1 %v9437_v25  ;;  %v126_v24 = vld [vmem:[#allocation5 + $0xb0] sm:$0xff]  ;;  %v123_v25 = vld [vmem:[#allocation5 + $0x98] sm:$0xff] }
 0x124   :  { %3321 = vmatprep.subr.bf16.mxu0 %v9444_v26  ;;  %3485 = vmatprep.subr.bf16.mxu1 %v9446_v27  ;;  %v127_v26 = vld [vmem:[#allocation5 + $0xb8] sm:$0xff]  ;;  %v8983_v27 = vcombine.low %v114_v14, %v118_v15  ;;  %v8992_v29 = vcombine.high %v122_v23, %v126_v24  ;;  %v170_v14 = vld [vmem:[#allocation5 + $0x210] sm:$0xff] }
 0x125   :  { %v8994_v31 = vcombine.high %v123_v25, %v127_v26  ;;  %v8993_v38 = vcombine.low %v123_v25, %v127_v26  ;;  %v174_v15 = vld [vmem:[#allocation5 + $0x230] sm:$0xff]  ;;  %v175_v18 = vld [vmem:[#allocation5 + $0x238] sm:$0xff] }
 0x126   :  { %v179_v25 = vld [vmem:[#allocation5 + $0x258] sm:$0xff] }
 0x127   :  { %3322 = vmatpush1.bf16.msra.mxu0 %v9443_v33  ;;  %3486 = vmatpush1.bf16.msra.mxu1 %v9445_v34  ;;  %v134_v33 = vld [vmem:[#allocation5 + $0xf0] sm:$0xff]  ;;  %v131_v34 = vld [vmem:[#allocation5 + $0xd8] sm:$0xff] }
 0x128   :  { %3323 = vmatprep.subr.bf16.mxu0 %v9452_v35  ;;  %3487 = vmatprep.subr.bf16.mxu1 %v9454_v36  ;;  %v135_v35 = vld [vmem:[#allocation5 + $0xf8] sm:$0xff]  ;;  %v8991_v36 = vcombine.low %v122_v23, %v126_v24  ;;  %v9000_v39 = vcombine.high %v130_v32, %v134_v33  ;;  %v178_v23 = vld [vmem:[#allocation5 + $0x250] sm:$0xff] }
 0x129   :  { %v9002_v40 = vcombine.high %v131_v34, %v135_v35  ;;  %v9001_v56 = vcombine.low %v131_v34, %v135_v35  ;;  %v182_v24 = vld [vmem:[#allocation5 + $0x270] sm:$0xff]  ;;  %v183_v26 = vld [vmem:[#allocation5 + $0x278] sm:$0xff] }
 0x12a   :  { %v187_v34 = vld [vmem:[#allocation5 + $0x298] sm:$0xff] }
 0x12b   :  { %3324 = vmatpush1.bf16.msra.mxu0 %v9451_v43  ;;  %3488 = vmatpush1.bf16.msra.mxu1 %v9453_v44  ;;  %v142_v43 = vld [vmem:[#allocation5 + $0x130] sm:$0xff]  ;;  %v139_v44 = vld [vmem:[#allocation5 + $0x118] sm:$0xff] }
 0x12c   :  { %3325 = vmatprep.subr.bf16.mxu0 %v9460_v45  ;;  %3489 = vmatprep.subr.bf16.mxu1 %v9462_v46  ;;  %v143_v45 = vld [vmem:[#allocation5 + $0x138] sm:$0xff]  ;;  %v8999_v46 = vcombine.low %v130_v32, %v134_v33  ;;  %v9008_v49 = vcombine.high %v138_v42, %v142_v43  ;;  %v186_v32 = vld [vmem:[#allocation5 + $0x290] sm:$0xff] }
 0x12d   :  { %v190_v33 = vld [vmem:[#allocation5 + $0x2b0] sm:$0xff]  ;;  %v191_v35 = vld [vmem:[#allocation5 + $0x2b8] sm:$0xff] }
 0x12f   :  { %3326 = vmatpush1.bf16.msra.mxu0 %v9459_v52  ;;  %3490 = vmatpush1.bf16.msra.mxu1 %v9461_v53  ;;  %v147_v52 = vld [vmem:[#allocation5 + $0x158] sm:$0xff] }
 0x130   :  { %3327 = vmatprep.subr.bf16.mxu0 %v9468_v54  ;;  %3491 = vmatprep.subr.bf16.mxu1 %v9470_v55  ;;  %v151_v53 = vld [vmem:[#allocation5 + $0x178] sm:$0xff]  ;;  %v9007_v54 = vcombine.low %v138_v42, %v142_v43  ;;  %v9009_v55 = vcombine.low %v139_v44, %v143_v45  ;;  %v194_v42 = vld [vmem:[#allocation5 + $0x2d0] sm:$0xff] }
 0x131   :  { %v9018_v59 = vcombine.high %v147_v52, %v151_v53  ;;  %v198_v43 = vld [vmem:[#allocation5 + $0x2f0] sm:$0xff] }
 0x133   :  { %3328 = vmatpush1.bf16.msra.mxu0 %v9467_v63  ;;  %3492 = vmatpush1.bf16.msra.mxu1 %v9469_v1  ;;  %v159_v63 = vld [vmem:[#allocation5 + $0x1b8] sm:$0xff]  ;;  %v9015_v1 = vcombine.low %v146_v50, %v150_v51  ;;  %v202_v50 = vld [vmem:[#allocation5 + $0x310] sm:$0xff] }
 0x134   :  { %3329 = vmatprep.subr.bf16.mxu0 %v9476_v2  ;;  %3493 = vmatprep.subr.bf16.mxu1 %v9478_v4  ;;  %v9017_v2 = vcombine.low %v147_v52, %v151_v53  ;;  %v9024_v4 = vcombine.high %v154_v60, %v158_v61  ;;  %v9026_v5 = vcombine.high %v155_v62, %v159_v63  ;;  %v206_v51 = vld [vmem:[#allocation5 + $0x330] sm:$0xff]  ;;  %v203_v52 = vld [vmem:[#allocation5 + $0x318] sm:$0xff] }
 0x135   :  { %v207_v53 = vld [vmem:[#allocation5 + $0x338] sm:$0xff] }
 0x137   :  { %3330 = vmatpush1.bf16.msra.mxu0 %v9475_v10  ;;  %3494 = vmatpush1.bf16.msra.mxu1 %v9477_v11  ;;  %v9023_v10 = vcombine.low %v154_v60, %v158_v61  ;;  %v9025_v11 = vcombine.low %v155_v62, %v159_v63  ;;  %v210_v60 = vld [vmem:[#allocation5 + $0x350] sm:$0xff]  ;;  %v211_v62 = vld [vmem:[#allocation5 + $0x358] sm:$0xff] }
 0x138   :  { %3504 = vmatprep.subr.bf16.mxu0 %v8976_v12  ;;  %3668 = vmatprep.subr.bf16.mxu1 %v8978_v13  ;;  %v9032_v12 = vcombine.high %v162_v6, %v166_v7  ;;  %v9034_v13 = vcombine.high %v163_v8, %v167_v9  ;;  %v214_v61 = vld [vmem:[#allocation5 + $0x370] sm:$0xff]  ;;  %v215_v63 = vld [vmem:[#allocation5 + $0x378] sm:$0xff] }
 0x13a   :  { %3332 = vmatmul.mubr.bf16.vlgmr.msra.gmra.mrb[0].mxu0 %v10408_v16  ;;  %3496 = vmatmul.mubr.bf16.vlgmr.msra.gmra.mrb[0].mxu1 %v10408_v16 }
 0x13b   :  { %3505 = vmatpush1.bf16.msra.mxu0 %v8975_v19  ;;  %3669 = vmatpush1.bf16.msra.mxu1 %v8977_v48  ;;  %v9031_v19 = vcombine.low %v162_v6, %v166_v7  ;;  %v9033_v48 = vcombine.low %v163_v8, %v167_v9  ;;  %v218_v6 = vld [vmem:[#allocation5 + $0x390] sm:$0xff]  ;;  %v219_v8 = vld [vmem:[#allocation5 + $0x398] sm:$0xff] }
 0x13c   :  { %3506 = vmatprep.subr.bf16.mxu0 %v8984_v20  ;;  %3670 = vmatprep.subr.bf16.mxu1 %v8986_v22  ;;  %v9040_v20 = vcombine.high %v170_v14, %v174_v15  ;;  %v9042_v22 = vcombine.high %v171_v17, %v175_v18  ;;  %v222_v7 = vld [vmem:[#allocation5 + $0x3b0] sm:$0xff]  ;;  %v223_v9 = vld [vmem:[#allocation5 + $0x3b8] sm:$0xff] }
 0x13d   :  { %3536 = vmatprep.mubr.bf16.mxu0 %v10364_v0  ;;  %3700 = vmatprep.mubr.bf16.mxu1 %v10364_v0  ;;  %v9010_v0 = vcombine.high %v139_v44, %v143_v45  ;;  %v195_v44 = vld [vmem:[#allocation5 + $0x2d8] sm:$0xff] }
 0x13e   :  { %v199_v45 = vld [vmem:[#allocation5 + $0x2f8] sm:$0xff] }
 0x13f   :  { %3507 = vmatpush1.bf16.msra.mxu0 %v8983_v27  ;;  %3671 = vmatpush1.bf16.msra.mxu1 %v8985_v28  ;;  %v9039_v27 = vcombine.low %v170_v14, %v174_v15  ;;  %v9041_v28 = vcombine.low %v171_v17, %v175_v18  ;;  %v226_v14 = vld [vmem:[#allocation5 + $0x3d0] sm:$0xff]  ;;  %v227_v17 = vld [vmem:[#allocation5 + $0x3d8] sm:$0xff] }
 0x140   :  { %3508 = vmatprep.subr.bf16.mxu0 %v8992_v29  ;;  %3672 = vmatprep.subr.bf16.mxu1 %v8994_v31  ;;  %v9048_v29 = vcombine.high %v178_v23, %v182_v24  ;;  %v9050_v31 = vcombine.high %v179_v25, %v183_v26  ;;  %v230_v15 = vld [vmem:[#allocation5 + $0x3f0] sm:$0xff]  ;;  %v231_v18 = vld [vmem:[#allocation5 + $0x3f8] sm:$0xff] }
 0x143   :  { %3509 = vmatpush1.bf16.msra.mxu0 %v8991_v36  ;;  %3673 = vmatpush1.bf16.msra.mxu1 %v8993_v38  ;;  %v9047_v36 = vcombine.low %v178_v23, %v182_v24  ;;  %v9049_v38 = vcombine.low %v179_v25, %v183_v26  ;;  %v234_v23 = vld [vmem:[#allocation5 + $0x410] sm:$0xff]  ;;  %v235_v25 = vld [vmem:[#allocation5 + $0x418] sm:$0xff] }
 0x144   :  { %3510 = vmatprep.subr.bf16.mxu0 %v9000_v39  ;;  %3674 = vmatprep.subr.bf16.mxu1 %v9002_v40  ;;  %v9056_v39 = vcombine.high %v186_v32, %v190_v33  ;;  %v9058_v40 = vcombine.high %v187_v34, %v191_v35  ;;  %v238_v24 = vld [vmem:[#allocation5 + $0x430] sm:$0xff]  ;;  %v239_v26 = vld [vmem:[#allocation5 + $0x438] sm:$0xff] }
 0x147   :  { %3511 = vmatpush1.bf16.msra.mxu0 %v8999_v46  ;;  %3675 = vmatpush1.bf16.msra.mxu1 %v9001_v56  ;;  %v9055_v46 = vcombine.low %v186_v32, %v190_v33  ;;  %v9057_v56 = vcombine.low %v187_v34, %v191_v35  ;;  %v242_v32 = vld [vmem:[#allocation5 + $0x450] sm:$0xff]  ;;  %v243_v34 = vld [vmem:[#allocation5 + $0x458] sm:$0xff] }
 0x148   :  { %3512 = vmatprep.subr.bf16.mxu0 %v9008_v49  ;;  %3676 = vmatprep.subr.bf16.mxu1 %v9010_v0  ;;  %v9064_v49 = vcombine.high %v194_v42, %v198_v43  ;;  %v9066_v0 = vcombine.high %v195_v44, %v199_v45  ;;  %v246_v33 = vld [vmem:[#allocation5 + $0x470] sm:$0xff]  ;;  %v247_v35 = vld [vmem:[#allocation5 + $0x478] sm:$0xff] }
 0x14b   :  { %3513 = vmatpush1.bf16.msra.mxu0 %v9007_v54  ;;  %3677 = vmatpush1.bf16.msra.mxu1 %v9009_v55  ;;  %v9063_v54 = vcombine.low %v194_v42, %v198_v43  ;;  %v9065_v55 = vcombine.low %v195_v44, %v199_v45  ;;  %v250_v42 = vld [vmem:[#allocation5 + $0x490] sm:$0xff]  ;;  %v251_v44 = vld [vmem:[#allocation5 + $0x498] sm:$0xff] }
 0x14c   :  { %3514 = vmatprep.subr.bf16.mxu0 %v9016_v58  ;;  %3678 = vmatprep.subr.bf16.mxu1 %v9018_v59  ;;  %v9072_v58 = vcombine.high %v202_v50, %v206_v51  ;;  %v9074_v59 = vcombine.high %v203_v52, %v207_v53  ;;  %v254_v43 = vld [vmem:[#allocation5 + $0x4b0] sm:$0xff]  ;;  %v255_v45 = vld [vmem:[#allocation5 + $0x4b8] sm:$0xff] }
 0x14f   :  { %3515 = vmatpush1.bf16.msra.mxu0 %v9015_v1  ;;  %3679 = vmatpush1.bf16.msra.mxu1 %v9017_v2  ;;  %v9071_v1 = vcombine.low %v202_v50, %v206_v51  ;;  %v9073_v2 = vcombine.low %v203_v52, %v207_v53  ;;  %v258_v50 = vld [vmem:[#allocation5 + $0x4d0] sm:$0xff]  ;;  %v259_v52 = vld [vmem:[#allocation5 + $0x4d8] sm:$0xff] }
 0x150   :  { %3516 = vmatprep.subr.bf16.mxu0 %v9024_v4  ;;  %3680 = vmatprep.subr.bf16.mxu1 %v9026_v5  ;;  %v9080_v4 = vcombine.high %v210_v60, %v214_v61  ;;  %v9082_v5 = vcombine.high %v211_v62, %v215_v63  ;;  %v262_v51 = vld [vmem:[#allocation5 + $0x4f0] sm:$0xff]  ;;  %v263_v53 = vld [vmem:[#allocation5 + $0x4f8] sm:$0xff] }
 0x153   :  { %3517 = vmatpush1.bf16.msra.mxu0 %v9023_v10  ;;  %3681 = vmatpush1.bf16.msra.mxu1 %v9025_v11  ;;  %v9079_v10 = vcombine.low %v210_v60, %v214_v61  ;;  %v9081_v11 = vcombine.low %v211_v62, %v215_v63  ;;  %v270_v60 = vld [vmem:[#allocation5 + $0x530] sm:$0xff]  ;;  %v267_v61 = vld [vmem:[#allocation5 + $0x518] sm:$0xff]  ;;  %v9127_v63 = vcombine.low %v258_v50, %v262_v51 }
 0x154   :  { %3518 = vmatprep.subr.bf16.mxu0 %v9032_v12  ;;  %3682 = vmatprep.subr.bf16.mxu1 %v9034_v13  ;;  %v9088_v12 = vcombine.high %v218_v6, %v222_v7  ;;  %v9090_v13 = vcombine.high %v219_v8, %v223_v9  ;;  %v271_v62 = vld [vmem:[#allocation5 + $0x538] sm:$0xff] }
 0x157   :  { %3519 = vmatpush1.bf16.msra.mxu0 %v9031_v19  ;;  %3683 = vmatpush1.bf16.msra.mxu1 %v9033_v48  ;;  %v9087_v19 = vcombine.low %v218_v6, %v222_v7  ;;  %v9089_v48 = vcombine.low %v219_v8, %v223_v9  ;;  %v275_v6 = vld [vmem:[#allocation5 + $0x558] sm:$0xff]  ;;  %v9137_v9 = vcombine.low %v267_v61, %v271_v62 }
 0x158   :  { %3520 = vmatprep.subr.bf16.mxu0 %v9040_v20  ;;  %3684 = vmatprep.subr.bf16.mxu1 %v9042_v22  ;;  %v9096_v20 = vcombine.high %v226_v14, %v230_v15  ;;  %v9098_v22 = vcombine.high %v227_v17, %v231_v18  ;;  %v279_v7 = vld [vmem:[#allocation5 + $0x578] sm:$0xff] }
 0x15b   :  { %3521 = vmatpush1.bf16.msra.mxu0 %v9039_v27  ;;  %3685 = vmatpush1.bf16.msra.mxu1 %v9041_v28  ;;  %v9095_v27 = vcombine.low %v226_v14, %v230_v15  ;;  %v9097_v28 = vcombine.low %v227_v17, %v231_v18  ;;  %v283_v14 = vld [vmem:[#allocation5 + $0x598] sm:$0xff]  ;;  %v9145_v18 = vcombine.low %v275_v6, %v279_v7 }
 0x15c   :  { %3522 = vmatprep.subr.bf16.mxu0 %v9048_v29  ;;  %3686 = vmatprep.subr.bf16.mxu1 %v9050_v31  ;;  %v9104_v29 = vcombine.high %v234_v23, %v238_v24  ;;  %v9106_v31 = vcombine.high %v235_v25, %v239_v26  ;;  %v287_v15 = vld [vmem:[#allocation5 + $0x5b8] sm:$0xff] }
 0x15f   :  { %3523 = vmatpush1.bf16.msra.mxu0 %v9047_v36  ;;  %3687 = vmatpush1.bf16.msra.mxu1 %v9049_v38  ;;  %v9103_v36 = vcombine.low %v234_v23, %v238_v24  ;;  %v9105_v38 = vcombine.low %v235_v25, %v239_v26  ;;  %v291_v23 = vld [vmem:[#allocation5 + $0x5d8] sm:$0xff]  ;;  %v9153_v26 = vcombine.low %v283_v14, %v287_v15 }
 0x160   :  { %3524 = vmatprep.subr.bf16.mxu0 %v9056_v39  ;;  %3688 = vmatprep.subr.bf16.mxu1 %v9058_v40  ;;  %v9112_v39 = vcombine.high %v242_v32, %v246_v33  ;;  %v9114_v40 = vcombine.high %v243_v34, %v247_v35  ;;  %v295_v24 = vld [vmem:[#allocation5 + $0x5f8] sm:$0xff] }
 0x163   :  { %3525 = vmatpush1.bf16.msra.mxu0 %v9055_v46  ;;  %3689 = vmatpush1.bf16.msra.mxu1 %v9057_v56  ;;  %v9111_v46 = vcombine.low %v242_v32, %v246_v33  ;;  %v9113_v56 = vcombine.low %v243_v34, %v247_v35  ;;  %v299_v32 = vld [vmem:[#allocation5 + $0x618] sm:$0xff]  ;;  %v9161_v35 = vcombine.low %v291_v23, %v295_v24 }
 0x164   :  { %3526 = vmatprep.subr.bf16.mxu0 %v9064_v49  ;;  %3690 = vmatprep.subr.bf16.mxu1 %v9066_v0  ;;  %v9120_v49 = vcombine.high %v250_v42, %v254_v43  ;;  %v9122_v0 = vcombine.high %v251_v44, %v255_v45  ;;  %v303_v33 = vld [vmem:[#allocation5 + $0x638] sm:$0xff] }
 0x167   :  { %3527 = vmatpush1.bf16.msra.mxu0 %v9063_v54  ;;  %3691 = vmatpush1.bf16.msra.mxu1 %v9065_v55  ;;  %v9119_v54 = vcombine.low %v250_v42, %v254_v43  ;;  %v9128_v55 = vcombine.high %v258_v50, %v262_v51  ;;  %v307_v42 = vld [vmem:[#allocation5 + $0x658] sm:$0xff] }
 0x168   :  { %3528 = vmatprep.subr.bf16.mxu0 %v9072_v58  ;;  %3692 = vmatprep.subr.bf16.mxu1 %v9074_v59  ;;  %v9130_v58 = vcombine.high %v259_v52, %v263_v53  ;;  %v266_v59 = vld [vmem:[#allocation5 + $0x510] sm:$0xff]  ;;  %v311_v43 = vld [vmem:[#allocation5 + $0x678] sm:$0xff] }
 0x169   :  { %v9135_v8 = vcombine.low %v266_v59, %v270_v60  ;;  %v315_v50 = vld [vmem:[#allocation5 + $0x698] sm:$0xff] }
 0x16a   :  { %v319_v51 = vld [vmem:[#allocation5 + $0x6b8] sm:$0xff] }
 0x16b   :  { %3529 = vmatpush1.bf16.msra.mxu0 %v9071_v1  ;;  %3693 = vmatpush1.bf16.msra.mxu1 %v9073_v2  ;;  %v9129_v1 = vcombine.low %v259_v52, %v263_v53  ;;  %v9136_v2 = vcombine.high %v266_v59, %v270_v60  ;;  %v9177_v53 = vcombine.low %v307_v42, %v311_v43  ;;  %v323_v59 = vld [vmem:[#allocation5 + $0x6d8] sm:$0xff] }
 0x16c   :  { %3530 = vmatprep.subr.bf16.mxu0 %v9080_v4  ;;  %3694 = vmatprep.subr.bf16.mxu1 %v9082_v5  ;;  %v274_v4 = vld [vmem:[#allocation5 + $0x550] sm:$0xff]  ;;  %v327_v60 = vld [vmem:[#allocation5 + $0x6f8] sm:$0xff] }
 0x16d   :  { %v278_v5 = vld [vmem:[#allocation5 + $0x570] sm:$0xff] }
 0x16e   :  { %v9143_v17 = vcombine.low %v274_v4, %v278_v5 }
 0x16f   :  { %3531 = vmatpush1.bf16.msra.mxu0 %v9079_v10  ;;  %3695 = vmatpush1.bf16.msra.mxu1 %v9081_v11  ;;  %v9144_v10 = vcombine.high %v274_v4, %v278_v5  ;;  %v9146_v11 = vcombine.high %v275_v6, %v279_v7  ;;  %v331_v4 = vld [vmem:[#allocation5 + $0x718] sm:$0xff]  ;;  %v9193_v7 = vcombine.low %v323_v59, %v327_v60 }
 0x170   :  { %3532 = vmatprep.subr.bf16.mxu0 %v9088_v12  ;;  %3696 = vmatprep.subr.bf16.mxu1 %v9090_v13  ;;  %v282_v12 = vld [vmem:[#allocation5 + $0x590] sm:$0xff]  ;;  %v335_v5 = vld [vmem:[#allocation5 + $0x738] sm:$0xff] }
 0x171   :  { %v286_v13 = vld [vmem:[#allocation5 + $0x5b0] sm:$0xff] }
 0x172   :  { %v9151_v25 = vcombine.low %v282_v12, %v286_v13 }
 0x173   :  { %3533 = vmatpush1.bf16.msra.mxu0 %v9087_v19  ;;  %3697 = vmatpush1.bf16.msra.mxu1 %v9089_v48  ;;  %v9152_v19 = vcombine.high %v282_v12, %v286_v13  ;;  %v9154_v48 = vcombine.high %v283_v14, %v287_v15  ;;  %v339_v12 = vld [vmem:[#allocation5 + $0x758] sm:$0xff]  ;;  %v9201_v15 = vcombine.low %v331_v4, %v335_v5 }
 0x174   :  { %3534 = vmatprep.subr.bf16.mxu0 %v9096_v20  ;;  %3698 = vmatprep.subr.bf16.mxu1 %v9098_v22  ;;  %v290_v20 = vld [vmem:[#allocation5 + $0x5d0] sm:$0xff]  ;;  %v343_v13 = vld [vmem:[#allocation5 + $0x778] sm:$0xff] }
 0x175   :  { %v294_v22 = vld [vmem:[#allocation5 + $0x5f0] sm:$0xff] }
 0x176   :  { %v9159_v34 = vcombine.low %v290_v20, %v294_v22 }
 0x177   :  { %3535 = vmatpush1.bf16.msra.mxu0 %v9095_v27  ;;  %3699 = vmatpush1.bf16.msra.mxu1 %v9097_v28  ;;  %v9160_v27 = vcombine.high %v290_v20, %v294_v22  ;;  %v9162_v28 = vcombine.high %v291_v23, %v295_v24  ;;  %v347_v20 = vld [vmem:[#allocation5 + $0x798] sm:$0xff]  ;;  %v9209_v24 = vcombine.low %v339_v12, %v343_v13 }
 0x178   :  { %3545 = vmatprep.subr.bf16.mxu0 %v9104_v29  ;;  %3709 = vmatprep.subr.bf16.mxu1 %v9106_v31  ;;  %v298_v29 = vld [vmem:[#allocation5 + $0x610] sm:$0xff]  ;;  %v351_v22 = vld [vmem:[#allocation5 + $0x7b8] sm:$0xff] }
 0x179   :  { %v302_v31 = vld [vmem:[#allocation5 + $0x630] sm:$0xff] }
 0x17a   :  { %3537 = vmatmul.mubr.bf16.vlgmr.msra.gmra.mrb[4].mxu0 %v10372_v21  ;;  %3701 = vmatmul.mubr.bf16.vlgmr.msra.gmra.mrb[4].mxu1 %v10372_v21  ;;  %v9121_v21 = vcombine.low %v251_v44, %v255_v45  ;;  %v9167_v44 = vcombine.low %v298_v29, %v302_v31  ;;  %v9169_v45 = vcombine.low %v299_v32, %v303_v33 }
 0x17b   :  { %3546 = vmatpush1.bf16.msra.mxu0 %v9103_v36  ;;  %3710 = vmatpush1.bf16.msra.mxu1 %v9105_v38  ;;  %v9168_v36 = vcombine.high %v298_v29, %v302_v31  ;;  %v9170_v38 = vcombine.high %v299_v32, %v303_v33  ;;  %v355_v29 = vld [vmem:[#allocation5 + $0x7d8] sm:$0xff]  ;;  %v9217_v33 = vcombine.low %v347_v20, %v351_v22 }
 0x17c   :  { %3547 = vmatprep.subr.bf16.mxu0 %v9112_v39  ;;  %3711 = vmatprep.subr.bf16.mxu1 %v9114_v40  ;;  %v306_v39 = vld [vmem:[#allocation5 + $0x650] sm:$0xff]  ;;  %v359_v31 = vld [vmem:[#allocation5 + $0x7f8] sm:$0xff] }
 0x17d   :  { %3577 = vmatprep.mubr.bf16.mxu0 %v10374_v30  ;;  %3741 = vmatprep.mubr.bf16.mxu1 %v10374_v30  ;;  %v9138_v30 = vcombine.high %v267_v61, %v271_v62  ;;  %v310_v40 = vld [vmem:[#allocation5 + $0x670] sm:$0xff]  ;;  %v9185_v62 = vcombine.low %v315_v50, %v319_v51 }
 0x17e   :  { %v9175_v52 = vcombine.low %v306_v39, %v310_v40 }
 0x17f   :  { %3548 = vmatpush1.bf16.msra.mxu0 %v9111_v46  ;;  %3712 = vmatpush1.bf16.msra.mxu1 %v9113_v56  ;;  %v9176_v46 = vcombine.high %v306_v39, %v310_v40  ;;  %v9178_v56 = vcombine.high %v307_v42, %v311_v43  ;;  %v363_v39 = vld [vmem:[#allocation5 + $0x818] sm:$0xff]  ;;  %v9225_v43 = vcombine.low %v355_v29, %v359_v31 }
 0x180   :  { %3549 = vmatprep.subr.bf16.mxu0 %v9120_v49  ;;  %3713 = vmatprep.subr.bf16.mxu1 %v9122_v0  ;;  %v314_v49 = vld [vmem:[#allocation5 + $0x690] sm:$0xff]  ;;  %v367_v40 = vld [vmem:[#allocation5 + $0x838] sm:$0xff] }
 0x181   :  { %v318_v0 = vld [vmem:[#allocation5 + $0x6b0] sm:$0xff] }
 0x182   :  { %v9183_v61 = vcombine.low %v314_v49, %v318_v0 }
 0x183   :  { %3550 = vmatpush1.bf16.msra.mxu0 %v9119_v54  ;;  %3714 = vmatpush1.bf16.msra.mxu1 %v9121_v21  ;;  %v9184_v54 = vcombine.high %v314_v49, %v318_v0  ;;  %v9186_v21 = vcombine.high %v315_v50, %v319_v51  ;;  %v371_v49 = vld [vmem:[#allocation5 + $0x858] sm:$0xff]  ;;  %v9233_v51 = vcombine.low %v363_v39, %v367_v40 }
 0x184   :  { %3551 = vmatprep.subr.bf16.mxu0 %v9128_v55  ;;  %3715 = vmatprep.subr.bf16.mxu1 %v9130_v58  ;;  %v322_v55 = vld [vmem:[#allocation5 + $0x6d0] sm:$0xff]  ;;  %v375_v0 = vld [vmem:[#allocation5 + $0x878] sm:$0xff] }
 0x185   :  { %v326_v58 = vld [vmem:[#allocation5 + $0x6f0] sm:$0xff] }
 0x186   :  { %v9191_v6 = vcombine.low %v322_v55, %v326_v58 }
 0x187   :  { %3552 = vmatpush1.bf16.msra.mxu0 %v9127_v63  ;;  %3716 = vmatpush1.bf16.msra.mxu1 %v9129_v1  ;;  %v9192_v63 = vcombine.high %v322_v55, %v326_v58  ;;  %v9194_v1 = vcombine.high %v323_v59, %v327_v60  ;;  %v379_v55 = vld [vmem:[#allocation5 + $0x898] sm:$0xff]  ;;  %v9241_v60 = vcombine.low %v371_v49, %v375_v0 }
 0x188   :  { %3553 = vmatprep.subr.bf16.mxu0 %v9136_v2  ;;  %3717 = vmatprep.subr.bf16.mxu1 %v9138_v30  ;;  %v330_v2 = vld [vmem:[#allocation5 + $0x710] sm:$0xff]  ;;  %v383_v58 = vld [vmem:[#allocation5 + $0x8b8] sm:$0xff] }
 0x189   :  { %v334_v30 = vld [vmem:[#allocation5 + $0x730] sm:$0xff] }
 0x18a   :  { %v9199_v14 = vcombine.low %v330_v2, %v334_v30 }
 0x18b   :  { %3554 = vmatpush1.bf16.msra.mxu0 %v9135_v8  ;;  %3718 = vmatpush1.bf16.msra.mxu1 %v9137_v9  ;;  %v9200_v8 = vcombine.high %v330_v2, %v334_v30  ;;  %v9202_v9 = vcombine.high %v331_v4, %v335_v5  ;;  %v387_v2 = vld [vmem:[#allocation5 + $0x8d8] sm:$0xff] }
 0x18c   :  { %3555 = vmatprep.subr.bf16.mxu0 %v9144_v10  ;;  %3719 = vmatprep.subr.bf16.mxu1 %v9146_v11  ;;  %v338_v10 = vld [vmem:[#allocation5 + $0x750] sm:$0xff]  ;;  %v391_v30 = vld [vmem:[#allocation5 + $0x8f8] sm:$0xff] }
 0x18d   :  { %v342_v11 = vld [vmem:[#allocation5 + $0x770] sm:$0xff] }
 0x18e   :  { %v9207_v23 = vcombine.low %v338_v10, %v342_v11 }
 0x18f   :  { %3556 = vmatpush1.bf16.msra.mxu0 %v9143_v17  ;;  %3720 = vmatpush1.bf16.msra.mxu1 %v9145_v18  ;;  %v9208_v17 = vcombine.high %v338_v10, %v342_v11  ;;  %v9210_v18 = vcombine.high %v339_v12, %v343_v13  ;;  %v399_v10 = vld [vmem:[#allocation5 + $0x938] sm:$0xff]  ;;  %v9257_v12 = vcombine.low %v387_v2, %v391_v30 }
 0x190   :  { %3557 = vmatprep.subr.bf16.mxu0 %v9152_v19  ;;  %3721 = vmatprep.subr.bf16.mxu1 %v9154_v48  ;;  %v346_v19 = vld [vmem:[#allocation5 + $0x790] sm:$0xff] }
 0x191   :  { %v350_v48 = vld [vmem:[#allocation5 + $0x7b0] sm:$0xff] }
 0x192   :  { %v9215_v32 = vcombine.low %v346_v19, %v350_v48 }
 0x193   :  { %3558 = vmatpush1.bf16.msra.mxu0 %v9151_v25  ;;  %3722 = vmatpush1.bf16.msra.mxu1 %v9153_v26  ;;  %v9216_v25 = vcombine.high %v346_v19, %v350_v48  ;;  %v9218_v26 = vcombine.high %v347_v20, %v351_v22 }
 0x194   :  { %3559 = vmatprep.subr.bf16.mxu0 %v9160_v27  ;;  %3723 = vmatprep.subr.bf16.mxu1 %v9162_v28  ;;  %v354_v27 = vld [vmem:[#allocation5 + $0x7d0] sm:$0xff] }
 0x195   :  { %v358_v28 = vld [vmem:[#allocation5 + $0x7f0] sm:$0xff] }
 0x196   :  { %v9223_v42 = vcombine.low %v354_v27, %v358_v28 }
 0x197   :  { %3560 = vmatpush1.bf16.msra.mxu0 %v9159_v34  ;;  %3724 = vmatpush1.bf16.msra.mxu1 %v9161_v35  ;;  %v9224_v34 = vcombine.high %v354_v27, %v358_v28  ;;  %v9226_v35 = vcombine.high %v355_v29, %v359_v31 }
 0x198   :  { %3561 = vmatprep.subr.bf16.mxu0 %v9168_v36  ;;  %3725 = vmatprep.subr.bf16.mxu1 %v9170_v38  ;;  %v362_v36 = vld [vmem:[#allocation5 + $0x810] sm:$0xff] }
 0x199   :  { %v366_v38 = vld [vmem:[#allocation5 + $0x830] sm:$0xff] }
 0x19a   :  { %v9231_v50 = vcombine.low %v362_v36, %v366_v38 }
 0x19b   :  { %3562 = vmatpush1.bf16.msra.mxu0 %v9167_v44  ;;  %3726 = vmatpush1.bf16.msra.mxu1 %v9169_v45  ;;  %v9232_v44 = vcombine.high %v362_v36, %v366_v38  ;;  %v9234_v45 = vcombine.high %v363_v39, %v367_v40 }
 0x19c   :  { %3563 = vmatprep.subr.bf16.mxu0 %v9176_v46  ;;  %3727 = vmatprep.subr.bf16.mxu1 %v9178_v56  ;;  %v370_v46 = vld [vmem:[#allocation5 + $0x850] sm:$0xff] }
 0x19d   :  { %v374_v56 = vld [vmem:[#allocation5 + $0x870] sm:$0xff] }
 0x19e   :  { %v9239_v59 = vcombine.low %v370_v46, %v374_v56 }
 0x19f   :  { %3564 = vmatpush1.bf16.msra.mxu0 %v9175_v52  ;;  %3728 = vmatpush1.bf16.msra.mxu1 %v9177_v53  ;;  %v9240_v52 = vcombine.high %v370_v46, %v374_v56  ;;  %v9242_v53 = vcombine.high %v371_v49, %v375_v0 }
 0x1a0   :  { %3565 = vmatprep.subr.bf16.mxu0 %v9184_v54  ;;  %3729 = vmatprep.subr.bf16.mxu1 %v9186_v21  ;;  %v378_v54 = vld [vmem:[#allocation5 + $0x890] sm:$0xff] }
 0x1a1   :  { %v382_v21 = vld [vmem:[#allocation5 + $0x8b0] sm:$0xff] }
 0x1a2   :  { %v9247_v4 = vcombine.low %v378_v54, %v382_v21 }
 0x1a3   :  { %3566 = vmatpush1.bf16.msra.mxu0 %v9183_v61  ;;  %3730 = vmatpush1.bf16.msra.mxu1 %v9185_v62  ;;  %v9248_v61 = vcombine.high %v378_v54, %v382_v21  ;;  %v9250_v62 = vcombine.high %v379_v55, %v383_v58 }
 0x1a4   :  { %3567 = vmatprep.subr.bf16.mxu0 %v9192_v63  ;;  %3731 = vmatprep.subr.bf16.mxu1 %v9194_v1  ;;  %v386_v63 = vld [vmem:[#allocation5 + $0x8d0] sm:$0xff] }
 0x1a5   :  { %v390_v1 = vld [vmem:[#allocation5 + $0x8f0] sm:$0xff] }
 0x1a6   :  { %v9256_v5 = vcombine.high %v386_v63, %v390_v1  ;;  %v9255_v11 = vcombine.low %v386_v63, %v390_v1 }
 0x1a7   :  { %3568 = vmatpush1.bf16.msra.mxu0 %v9191_v6  ;;  %3732 = vmatpush1.bf16.msra.mxu1 %v9193_v7  ;;  %v9258_v6 = vcombine.high %v387_v2, %v391_v30  ;;  %v394_v7 = vld [vmem:[#allocation5 + $0x910] sm:$0xff] }
 0x1a8   :  { %3569 = vmatprep.subr.bf16.mxu0 %v9200_v8  ;;  %3733 = vmatprep.subr.bf16.mxu1 %v9202_v9  ;;  %v398_v8 = vld [vmem:[#allocation5 + $0x930] sm:$0xff]  ;;  %v395_v9 = vld [vmem:[#allocation5 + $0x918] sm:$0xff] }
 0x1a9   :  { %v9264_v13 = vcombine.high %v394_v7, %v398_v8  ;;  %v9263_v19 = vcombine.low %v394_v7, %v398_v8  ;;  %v9265_v48 = vcombine.low %v395_v9, %v399_v10 }
 0x1ab   :  { %3570 = vmatpush1.bf16.msra.mxu0 %v9199_v14  ;;  %3734 = vmatpush1.bf16.msra.mxu1 %v9201_v15  ;;  %v402_v14 = vld [vmem:[#allocation5 + $0x950] sm:$0xff] }
 0x1ac   :  { %3571 = vmatprep.subr.bf16.mxu0 %v9208_v17  ;;  %3735 = vmatprep.subr.bf16.mxu1 %v9210_v18  ;;  %v406_v15 = vld [vmem:[#allocation5 + $0x970] sm:$0xff]  ;;  %v403_v17 = vld [vmem:[#allocation5 + $0x958] sm:$0xff] }
 0x1ad   :  { %v407_v18 = vld [vmem:[#allocation5 + $0x978] sm:$0xff]  ;;  %v9272_v20 = vcombine.high %v402_v14, %v406_v15  ;;  %v9271_v27 = vcombine.low %v402_v14, %v406_v15 }
 0x1ae   :  { %v9274_v22 = vcombine.high %v403_v17, %v407_v18  ;;  %v9273_v28 = vcombine.low %v403_v17, %v407_v18 }
 0x1af   :  { %3572 = vmatpush1.bf16.msra.mxu0 %v9207_v23  ;;  %3736 = vmatpush1.bf16.msra.mxu1 %v9209_v24  ;;  %v410_v23 = vld [vmem:[#allocation5 + $0x990] sm:$0xff] }
 0x1b0   :  { %3573 = vmatprep.subr.bf16.mxu0 %v9216_v25  ;;  %3737 = vmatprep.subr.bf16.mxu1 %v9218_v26  ;;  %v414_v24 = vld [vmem:[#allocation5 + $0x9b0] sm:$0xff]  ;;  %v411_v25 = vld [vmem:[#allocation5 + $0x998] sm:$0xff] }
 0x1b1   :  { %v415_v26 = vld [vmem:[#allocation5 + $0x9b8] sm:$0xff]  ;;  %v9280_v29 = vcombine.high %v410_v23, %v414_v24  ;;  %v9279_v36 = vcombine.low %v410_v23, %v414_v24 }
 0x1b2   :  { %v9282_v31 = vcombine.high %v411_v25, %v415_v26  ;;  %v9281_v38 = vcombine.low %v411_v25, %v415_v26 }
 0x1b3   :  { %3574 = vmatpush1.bf16.msra.mxu0 %v9215_v32  ;;  %3738 = vmatpush1.bf16.msra.mxu1 %v9217_v33  ;;  %v418_v32 = vld [vmem:[#allocation5 + $0x9d0] sm:$0xff] }
 0x1b4   :  { %3575 = vmatprep.subr.bf16.mxu0 %v9224_v34  ;;  %3739 = vmatprep.subr.bf16.mxu1 %v9226_v35  ;;  %v422_v33 = vld [vmem:[#allocation5 + $0x9f0] sm:$0xff]  ;;  %v419_v34 = vld [vmem:[#allocation5 + $0x9d8] sm:$0xff] }
 0x1b5   :  { %v423_v35 = vld [vmem:[#allocation5 + $0x9f8] sm:$0xff]  ;;  %v9288_v39 = vcombine.high %v418_v32, %v422_v33  ;;  %v9287_v46 = vcombine.low %v418_v32, %v422_v33 }
 0x1b6   :  { %v9290_v40 = vcombine.high %v419_v34, %v423_v35  ;;  %v9289_v56 = vcombine.low %v419_v34, %v423_v35 }
 0x1b7   :  { %3576 = vmatpush1.bf16.msra.mxu0 %v9223_v42  ;;  %3740 = vmatpush1.bf16.msra.mxu1 %v9225_v43  ;;  %v426_v42 = vld [vmem:[#allocation5 + $0xa10] sm:$0xff] }
 0x1b8   :  { %3586 = vmatprep.subr.bf16.mxu0 %v9232_v44  ;;  %3750 = vmatprep.subr.bf16.mxu1 %v9234_v45  ;;  %v430_v43 = vld [vmem:[#allocation5 + $0xa30] sm:$0xff]  ;;  %v427_v44 = vld [vmem:[#allocation5 + $0xa18] sm:$0xff] }
 0x1b9   :  { %v431_v45 = vld [vmem:[#allocation5 + $0xa38] sm:$0xff]  ;;  %v9296_v49 = vcombine.high %v426_v42, %v430_v43  ;;  %v9295_v54 = vcombine.low %v426_v42, %v430_v43 }
 0x1ba   :  { %3578 = vmatmul.mubr.bf16.vlgmr.msra.gmra.mrb[4].mxu0 %v10384_v37  ;;  %3742 = vmatmul.mubr.bf16.vlgmr.msra.gmra.mrb[4].mxu1 %v10384_v37  ;;  %v9249_v37 = vcombine.low %v379_v55, %v383_v58  ;;  %v9298_v0 = vcombine.high %v427_v44, %v431_v45  ;;  %v9297_v21 = vcombine.low %v427_v44, %v431_v45 }
 0x1bb   :  { %3587 = vmatpush1.bf16.msra.mxu0 %v9231_v50  ;;  %3751 = vmatpush1.bf16.msra.mxu1 %v9233_v51  ;;  %v434_v50 = vld [vmem:[#allocation5 + $0xa50] sm:$0xff] }
 0x1bc   :  { %3588 = vmatprep.subr.bf16.mxu0 %v9240_v52  ;;  %3752 = vmatprep.subr.bf16.mxu1 %v9242_v53  ;;  %v438_v51 = vld [vmem:[#allocation5 + $0xa70] sm:$0xff]  ;;  %v435_v52 = vld [vmem:[#allocation5 + $0xa58] sm:$0xff] }
 0x1bd   :  { %3618 = vmatprep.mubr.bf16.mxu0 %v10386_v47  ;;  %3782 = vmatprep.mubr.bf16.mxu1 %v10386_v47  ;;  %v9266_v47 = vcombine.high %v395_v9, %v399_v10  ;;  %v439_v53 = vld [vmem:[#allocation5 + $0xa78] sm:$0xff]  ;;  %v9304_v55 = vcombine.high %v434_v50, %v438_v51  ;;  %v9303_v63 = vcombine.low %v434_v50, %v438_v51 }
 0x1be   :  { %v9306_v58 = vcombine.high %v435_v52, %v439_v53  ;;  %v9305_v1 = vcombine.low %v435_v52, %v439_v53 }
 0x1bf   :  { %3589 = vmatpush1.bf16.msra.mxu0 %v9239_v59  ;;  %3753 = vmatpush1.bf16.msra.mxu1 %v9241_v60  ;;  %v442_v59 = vld [vmem:[#allocation5 + $0xa90] sm:$0xff] }
 0x1c0   :  { %3590 = vmatprep.subr.bf16.mxu0 %v9248_v61  ;;  %3754 = vmatprep.subr.bf16.mxu1 %v9250_v62  ;;  %v446_v60 = vld [vmem:[#allocation5 + $0xab0] sm:$0xff]  ;;  %v443_v61 = vld [vmem:[#allocation5 + $0xa98] sm:$0xff] }
 0x1c1   :  { %v447_v62 = vld [vmem:[#allocation5 + $0xab8] sm:$0xff]  ;;  %v9312_v2 = vcombine.high %v442_v59, %v446_v60  ;;  %v9311_v7 = vcombine.low %v442_v59, %v446_v60 }
 0x1c2   :  { %v9314_v30 = vcombine.high %v443_v61, %v447_v62  ;;  %v9313_v8 = vcombine.low %v443_v61, %v447_v62 }
 0x1c3   :  { %3591 = vmatpush1.bf16.msra.mxu0 %v9247_v4  ;;  %3755 = vmatpush1.bf16.msra.mxu1 %v9249_v37  ;;  %v450_v4 = vld [vmem:[#allocation5 + $0xad0] sm:$0xff] }
 0x1c4   :  { %3592 = vmatprep.subr.bf16.mxu0 %v9256_v5  ;;  %3756 = vmatprep.subr.bf16.mxu1 %v9258_v6  ;;  %v454_v37 = vld [vmem:[#allocation5 + $0xaf0] sm:$0xff]  ;;  %v451_v5 = vld [vmem:[#allocation5 + $0xad8] sm:$0xff] }
 0x1c5   :  { %v455_v6 = vld [vmem:[#allocation5 + $0xaf8] sm:$0xff]  ;;  %v9320_v9 = vcombine.high %v450_v4, %v454_v37  ;;  %v9319_v14 = vcombine.low %v450_v4, %v454_v37 }
 0x1c6   :  { %v9322_v10 = vcombine.high %v451_v5, %v455_v6  ;;  %v9321_v15 = vcombine.low %v451_v5, %v455_v6 }
 0x1c7   :  { %3593 = vmatpush1.bf16.msra.mxu0 %v9255_v11  ;;  %3757 = vmatpush1.bf16.msra.mxu1 %v9257_v12  ;;  %v458_v11 = vld [vmem:[#allocation5 + $0xb10] sm:$0xff] }
 0x1c8   :  { %3594 = vmatprep.subr.bf16.mxu0 %v9264_v13  ;;  %3758 = vmatprep.subr.bf16.mxu1 %v9266_v47  ;;  %v462_v12 = vld [vmem:[#allocation5 + $0xb30] sm:$0xff]  ;;  %v459_v13 = vld [vmem:[#allocation5 + $0xb18] sm:$0xff] }
 0x1c9   :  { %v463_v47 = vld [vmem:[#allocation5 + $0xb38] sm:$0xff]  ;;  %v9328_v17 = vcombine.high %v458_v11, %v462_v12  ;;  %v9327_v23 = vcombine.low %v458_v11, %v462_v12 }
 0x1ca   :  { %v9330_v18 = vcombine.high %v459_v13, %v463_v47  ;;  %v9329_v24 = vcombine.low %v459_v13, %v463_v47  ;;  %v522_v47 = vld [vmem:[#allocation5 + $0xd10] sm:$0xff] }
 0x1cb   :  { %3595 = vmatpush1.bf16.msra.mxu0 %v9263_v19  ;;  %3759 = vmatpush1.bf16.msra.mxu1 %v9265_v48  ;;  %v466_v19 = vld [vmem:[#allocation5 + $0xb50] sm:$0xff] }
 0x1cc   :  { %3596 = vmatprep.subr.bf16.mxu0 %v9272_v20  ;;  %3760 = vmatprep.subr.bf16.mxu1 %v9274_v22  ;;  %v470_v48 = vld [vmem:[#allocation5 + $0xb70] sm:$0xff]  ;;  %v467_v20 = vld [vmem:[#allocation5 + $0xb58] sm:$0xff] }
 0x1cd   :  { %v471_v22 = vld [vmem:[#allocation5 + $0xb78] sm:$0xff]  ;;  %v9336_v25 = vcombine.high %v466_v19, %v470_v48  ;;  %v9335_v32 = vcombine.low %v466_v19, %v470_v48 }
 0x1ce   :  { %v9338_v26 = vcombine.high %v467_v20, %v471_v22  ;;  %v9337_v33 = vcombine.low %v467_v20, %v471_v22  ;;  %v530_v20 = vld [vmem:[#allocation5 + $0xd50] sm:$0xff] }
 0x1cf   :  { %3597 = vmatpush1.bf16.msra.mxu0 %v9271_v27  ;;  %3761 = vmatpush1.bf16.msra.mxu1 %v9273_v28  ;;  %v474_v27 = vld [vmem:[#allocation5 + $0xb90] sm:$0xff] }
 0x1d0   :  { %3598 = vmatprep.subr.bf16.mxu0 %v9280_v29  ;;  %3762 = vmatprep.subr.bf16.mxu1 %v9282_v31  ;;  %v478_v28 = vld [vmem:[#allocation5 + $0xbb0] sm:$0xff]  ;;  %v475_v29 = vld [vmem:[#allocation5 + $0xb98] sm:$0xff] }
 0x1d1   :  { %v479_v31 = vld [vmem:[#allocation5 + $0xbb8] sm:$0xff]  ;;  %v9344_v34 = vcombine.high %v474_v27, %v478_v28  ;;  %v9343_v42 = vcombine.low %v474_v27, %v478_v28  ;;  %v534_v22 = vld [vmem:[#allocation5 + $0xd70] sm:$0xff] }
 0x1d2   :  { %v9346_v35 = vcombine.high %v475_v29, %v479_v31  ;;  %v9345_v43 = vcombine.low %v475_v29, %v479_v31  ;;  %v9400_v27 = vcombine.high %v530_v20, %v534_v22  ;;  %v538_v29 = vld [vmem:[#allocation5 + $0xd90] sm:$0xff] }
 0x1d3   :  { %3599 = vmatpush1.bf16.msra.mxu0 %v9279_v36  ;;  %3763 = vmatpush1.bf16.msra.mxu1 %v9281_v38  ;;  %v482_v36 = vld [vmem:[#allocation5 + $0xbd0] sm:$0xff] }
 0x1d4   :  { %3600 = vmatprep.subr.bf16.mxu0 %v9288_v39  ;;  %3764 = vmatprep.subr.bf16.mxu1 %v9290_v40  ;;  %v486_v38 = vld [vmem:[#allocation5 + $0xbf0] sm:$0xff]  ;;  %v483_v39 = vld [vmem:[#allocation5 + $0xbd8] sm:$0xff] }
 0x1d5   :  { %v487_v40 = vld [vmem:[#allocation5 + $0xbf8] sm:$0xff]  ;;  %v9352_v44 = vcombine.high %v482_v36, %v486_v38  ;;  %v9351_v50 = vcombine.low %v482_v36, %v486_v38  ;;  %v542_v31 = vld [vmem:[#allocation5 + $0xdb0] sm:$0xff] }
 0x1d6   :  { %v9354_v45 = vcombine.high %v483_v39, %v487_v40  ;;  %v9353_v51 = vcombine.low %v483_v39, %v487_v40  ;;  %v9408_v36 = vcombine.high %v538_v29, %v542_v31  ;;  %v546_v40 = vld [vmem:[#allocation5 + $0xdd0] sm:$0xff] }
 0x1d7   :  { %3601 = vmatpush1.bf16.msra.mxu0 %v9287_v46  ;;  %3765 = vmatpush1.bf16.msra.mxu1 %v9289_v56  ;;  %v490_v46 = vld [vmem:[#allocation5 + $0xc10] sm:$0xff] }
 0x1d8   :  { %3602 = vmatprep.subr.bf16.mxu0 %v9296_v49  ;;  %3766 = vmatprep.subr.bf16.mxu1 %v9298_v0  ;;  %v494_v56 = vld [vmem:[#allocation5 + $0xc30] sm:$0xff]  ;;  %v491_v49 = vld [vmem:[#allocation5 + $0xc18] sm:$0xff] }
 0x1d9   :  { %v495_v0 = vld [vmem:[#allocation5 + $0xc38] sm:$0xff]  ;;  %v9360_v52 = vcombine.high %v490_v46, %v494_v56  ;;  %v9359_v59 = vcombine.low %v490_v46, %v494_v56 }
 0x1da   :  { %v9362_v53 = vcombine.high %v491_v49, %v495_v0  ;;  %v9361_v60 = vcombine.low %v491_v49, %v495_v0  ;;  %v551_v46 = vld [vmem:[#allocation5 + $0xdf8] sm:$0xff]  ;;  %v9407_v0 = vcombine.low %v538_v29, %v542_v31 }
 0x1db   :  { %3603 = vmatpush1.bf16.msra.mxu0 %v9295_v54  ;;  %3767 = vmatpush1.bf16.msra.mxu1 %v9297_v21  ;;  %v498_v54 = vld [vmem:[#allocation5 + $0xc50] sm:$0xff] }
 0x1dc   :  { %3604 = vmatprep.subr.bf16.mxu0 %v9304_v55  ;;  %3768 = vmatprep.subr.bf16.mxu1 %v9306_v58  ;;  %v502_v21 = vld [vmem:[#allocation5 + $0xc70] sm:$0xff]  ;;  %v499_v55 = vld [vmem:[#allocation5 + $0xc58] sm:$0xff] }
 0x1dd   :  { %v503_v58 = vld [vmem:[#allocation5 + $0xc78] sm:$0xff]  ;;  %v9368_v61 = vcombine.high %v498_v54, %v502_v21  ;;  %v9367_v4 = vcombine.low %v498_v54, %v502_v21 }
 0x1de   :  { %v9370_v62 = vcombine.high %v499_v55, %v503_v58  ;;  %v9369_v37 = vcombine.low %v499_v55, %v503_v58  ;;  %v554_v55 = vld [vmem:[#allocation5 + $0xe10] sm:$0xff] }
 0x1df   :  { %3605 = vmatpush1.bf16.msra.mxu0 %v9303_v63  ;;  %3769 = vmatpush1.bf16.msra.mxu1 %v9305_v1  ;;  %v506_v63 = vld [vmem:[#allocation5 + $0xc90] sm:$0xff] }
 0x1e0   :  { %3606 = vmatprep.subr.bf16.mxu0 %v9312_v2  ;;  %3770 = vmatprep.subr.bf16.mxu1 %v9314_v30  ;;  %v510_v1 = vld [vmem:[#allocation5 + $0xcb0] sm:$0xff]  ;;  %v507_v2 = vld [vmem:[#allocation5 + $0xc98] sm:$0xff] }
 0x1e1   :  { %v511_v30 = vld [vmem:[#allocation5 + $0xcb8] sm:$0xff]  ;;  %v9376_v5 = vcombine.high %v506_v63, %v510_v1  ;;  %v9375_v11 = vcombine.low %v506_v63, %v510_v1  ;;  %v558_v58 = vld [vmem:[#allocation5 + $0xe30] sm:$0xff] }
 0x1e2   :  { %v9378_v6 = vcombine.high %v507_v2, %v511_v30  ;;  %v9424_v63 = vcombine.high %v554_v55, %v558_v58 }
 0x1e3   :  { %3607 = vmatpush1.bf16.msra.mxu0 %v9311_v7  ;;  %3771 = vmatpush1.bf16.msra.mxu1 %v9313_v8  ;;  %v514_v7 = vld [vmem:[#allocation5 + $0xcd0] sm:$0xff] }
 0x1e4   :  { %3608 = vmatprep.subr.bf16.mxu0 %v9320_v9  ;;  %3772 = vmatprep.subr.bf16.mxu1 %v9322_v10  ;;  %v518_v8 = vld [vmem:[#allocation5 + $0xcf0] sm:$0xff]  ;;  %v515_v9 = vld [vmem:[#allocation5 + $0xcd8] sm:$0xff] }
 0x1e5   :  { %v519_v10 = vld [vmem:[#allocation5 + $0xcf8] sm:$0xff]  ;;  %v9384_v12 = vcombine.high %v514_v7, %v518_v8 }
 0x1e6   :  { %v9386_v13 = vcombine.high %v515_v9, %v519_v10  ;;  %v9385_v19 = vcombine.low %v515_v9, %v519_v10  ;;  %v570_v9 = vld [vmem:[#allocation5 + $0xe90] sm:$0xff] }
 0x1e7   :  { %3609 = vmatpush1.bf16.msra.mxu0 %v9319_v14  ;;  %3773 = vmatpush1.bf16.msra.mxu1 %v9321_v15  ;;  %v526_v14 = vld [vmem:[#allocation5 + $0xd30] sm:$0xff]  ;;  %v523_v15 = vld [vmem:[#allocation5 + $0xd18] sm:$0xff] }
 0x1e8   :  { %3610 = vmatprep.subr.bf16.mxu0 %v9328_v17  ;;  %3774 = vmatprep.subr.bf16.mxu1 %v9330_v18  ;;  %v527_v17 = vld [vmem:[#allocation5 + $0xd38] sm:$0xff]  ;;  %v9383_v18 = vcombine.low %v514_v7, %v518_v8  ;;  %v9392_v48 = vcombine.high %v522_v47, %v526_v14  ;;  %v574_v10 = vld [vmem:[#allocation5 + $0xeb0] sm:$0xff] }
 0x1eb   :  { %3611 = vmatpush1.bf16.msra.mxu0 %v9327_v23  ;;  %3775 = vmatpush1.bf16.msra.mxu1 %v9329_v24  ;;  %v531_v23 = vld [vmem:[#allocation5 + $0xd58] sm:$0xff] }
 0x1ec   :  { %3612 = vmatprep.subr.bf16.mxu0 %v9336_v25  ;;  %3776 = vmatprep.subr.bf16.mxu1 %v9338_v26  ;;  %v535_v24 = vld [vmem:[#allocation5 + $0xd78] sm:$0xff]  ;;  %v9391_v25 = vcombine.low %v522_v47, %v526_v14  ;;  %v9393_v26 = vcombine.low %v523_v15, %v527_v17  ;;  %v9440_v47 = vcombine.high %v570_v9, %v574_v10 }
 0x1ed   :  { %v9402_v28 = vcombine.high %v531_v23, %v535_v24 }
 0x1ef   :  { %3613 = vmatpush1.bf16.msra.mxu0 %v9335_v32  ;;  %3777 = vmatpush1.bf16.msra.mxu1 %v9337_v33  ;;  %v539_v32 = vld [vmem:[#allocation5 + $0xd98] sm:$0xff] }
 0x1f0   :  { %3614 = vmatprep.subr.bf16.mxu0 %v9344_v34  ;;  %3778 = vmatprep.subr.bf16.mxu1 %v9346_v35  ;;  %v543_v33 = vld [vmem:[#allocation5 + $0xdb8] sm:$0xff]  ;;  %v9399_v34 = vcombine.low %v530_v20, %v534_v22  ;;  %v9401_v35 = vcombine.low %v531_v23, %v535_v24  ;;  %v586_v23 = vld [vmem:[#allocation5 + $0xf10] sm:$0xff] }
 0x1f1   :  { %v9410_v39 = vcombine.high %v539_v32, %v543_v33  ;;  %v590_v24 = vld [vmem:[#allocation5 + $0xf30] sm:$0xff] }
 0x1f2   :  { %v9456_v29 = vcombine.high %v586_v23, %v590_v24 }
 0x1f3   :  { %3615 = vmatpush1.bf16.msra.mxu0 %v9343_v42  ;;  %3779 = vmatpush1.bf16.msra.mxu1 %v9345_v43  ;;  %v550_v42 = vld [vmem:[#allocation5 + $0xdf0] sm:$0xff] }
 0x1f4   :  { %3616 = vmatprep.subr.bf16.mxu0 %v9352_v44  ;;  %3780 = vmatprep.subr.bf16.mxu1 %v9354_v45  ;;  %v547_v45 = vld [vmem:[#allocation5 + $0xdd8] sm:$0xff] }
 0x1f5   :  { %v9418_v21 = vcombine.high %v547_v45, %v551_v46 }
 0x1f7   :  { %3617 = vmatpush1.bf16.msra.mxu0 %v9351_v50  ;;  %3781 = vmatpush1.bf16.msra.mxu1 %v9353_v51 }
 0x1f8   :  { %3627 = vmatprep.subr.bf16.mxu0 %v9360_v52  ;;  %3791 = vmatprep.subr.bf16.mxu1 %v9362_v53  ;;  %v9409_v52 = vcombine.low %v539_v32, %v543_v33  ;;  %v9416_v53 = vcombine.high %v546_v40, %v550_v42  ;;  %v594_v32 = vld [vmem:[#allocation5 + $0xf50] sm:$0xff] }
 0x1f9   :  { %v598_v33 = vld [vmem:[#allocation5 + $0xf70] sm:$0xff] }
 0x1fa   :  { %3619 = vmatmul.mubr.bf16.vlgmr.msra.gmra.mrb[4].mxu0 %v10398_v57  ;;  %3783 = vmatmul.mubr.bf16.vlgmr.msra.gmra.mrb[4].mxu1 %v10398_v57  ;;  %v9377_v57 = vcombine.low %v507_v2, %v511_v30  ;;  %v562_v2 = vld [vmem:[#allocation5 + $0xe50] sm:$0xff] }
 0x1fb   :  { %3628 = vmatpush1.bf16.msra.mxu0 %v9359_v59  ;;  %3792 = vmatpush1.bf16.msra.mxu1 %v9361_v60  ;;  %v555_v59 = vld [vmem:[#allocation5 + $0xe18] sm:$0xff]  ;;  %v566_v30 = vld [vmem:[#allocation5 + $0xe70] sm:$0xff] }
 0x1fc   :  { %3629 = vmatprep.subr.bf16.mxu0 %v9368_v61  ;;  %3793 = vmatprep.subr.bf16.mxu1 %v9370_v62  ;;  %v559_v60 = vld [vmem:[#allocation5 + $0xe38] sm:$0xff]  ;;  %v9415_v61 = vcombine.low %v546_v40, %v550_v42  ;;  %v9417_v62 = vcombine.low %v547_v45, %v551_v46  ;;  %v9432_v7 = vcombine.high %v562_v2, %v566_v30  ;;  %v602_v45 = vld [vmem:[#allocation5 + $0xf90] sm:$0xff] }
 0x1fd   :  { %3659 = vmatprep.mubr.bf16.mxu0 %v10400_v3  ;;  %3823 = vmatprep.mubr.bf16.mxu1 %v10400_v3  ;;  %v9394_v3 = vcombine.high %v523_v15, %v527_v17  ;;  %v9426_v1 = vcombine.high %v555_v59, %v559_v60  ;;  %v578_v15 = vld [vmem:[#allocation5 + $0xed0] sm:$0xff]  ;;  %v9464_v40 = vcombine.high %v594_v32, %v598_v33 }
 0x1fe   :  { %v582_v17 = vld [vmem:[#allocation5 + $0xef0] sm:$0xff] }
 0x1ff   :  { %3630 = vmatpush1.bf16.msra.mxu0 %v9367_v4  ;;  %3794 = vmatpush1.bf16.msra.mxu1 %v9369_v37  ;;  %v563_v4 = vld [vmem:[#allocation5 + $0xe58] sm:$0xff]  ;;  %v9448_v20 = vcombine.high %v578_v15, %v582_v17  ;;  %v606_v46 = vld [vmem:[#allocation5 + $0xfb0] sm:$0xff] }
 0x200   :  { %3631 = vmatprep.subr.bf16.mxu0 %v9376_v5  ;;  %3795 = vmatprep.subr.bf16.mxu1 %v9378_v6  ;;  %v567_v37 = vld [vmem:[#allocation5 + $0xe78] sm:$0xff]  ;;  %v9423_v5 = vcombine.low %v554_v55, %v558_v58  ;;  %v9425_v6 = vcombine.low %v555_v59, %v559_v60  ;;  %v9471_v59 = vcombine.low %v602_v45, %v606_v46 }
 0x201   :  { %v9434_v8 = vcombine.high %v563_v4, %v567_v37  ;;  %v611_v55 = vld [vmem:[#allocation5 + $0xfd8] sm:$0xff] }
 0x202   :  { %v615_v58 = vld [vmem:[#allocation5 + $0xff8] sm:$0xff] }
 0x203   :  { %3632 = vmatpush1.bf16.msra.mxu0 %v9375_v11  ;;  %3796 = vmatpush1.bf16.msra.mxu1 %v9377_v57  ;;  %v571_v11 = vld [vmem:[#allocation5 + $0xe98] sm:$0xff] }
 0x204   :  { %3633 = vmatprep.subr.bf16.mxu0 %v9384_v12  ;;  %3797 = vmatprep.subr.bf16.mxu1 %v9386_v13  ;;  %v575_v57 = vld [vmem:[#allocation5 + $0xeb8] sm:$0xff]  ;;  %v9431_v12 = vcombine.low %v562_v2, %v566_v30  ;;  %v9433_v13 = vcombine.low %v563_v4, %v567_v37  ;;  %v3833_v2 = vld [vmem:[#allocation7 + $0x8] sm:$0xff]  ;;  %v9481_v37 = vcombine.low %v611_v55, %v615_v58 }
 0x205   :  { %v9442_v14 = vcombine.high %v571_v11, %v575_v57  ;;  %v3837_v30 = vld [vmem:[#allocation7 + $0x28] sm:$0xff] }
 0x207   :  { %3634 = vmatpush1.bf16.msra.mxu0 %v9383_v18  ;;  %3798 = vmatpush1.bf16.msra.mxu1 %v9385_v19  ;;  %v579_v18 = vld [vmem:[#allocation5 + $0xed8] sm:$0xff] }
 0x208   :  { %3635 = vmatprep.subr.bf16.mxu0 %v9392_v48  ;;  %3799 = vmatprep.subr.bf16.mxu1 %v9394_v3  ;;  %v583_v19 = vld [vmem:[#allocation5 + $0xef8] sm:$0xff]  ;;  %v9439_v48 = vcombine.low %v570_v9, %v574_v10  ;;  %v9441_v3 = vcombine.low %v571_v11, %v575_v57  ;;  %v3841_v10 = vld [vmem:[#allocation7 + $0x48] sm:$0xff]  ;;  %v10441_v57 = vcombine.low %v3833_v2, %v3837_v30 }
 0x209   :  { %v9450_v22 = vcombine.high %v579_v18, %v583_v19  ;;  %v3845_v11 = vld [vmem:[#allocation7 + $0x68] sm:$0xff] }
 0x20b   :  { %3636 = vmatpush1.bf16.msra.mxu0 %v9391_v25  ;;  %3800 = vmatpush1.bf16.msra.mxu1 %v9393_v26  ;;  %v587_v25 = vld [vmem:[#allocation5 + $0xf18] sm:$0xff] }
 0x20c   :  { %3637 = vmatprep.subr.bf16.mxu0 %v9400_v27  ;;  %3801 = vmatprep.subr.bf16.mxu1 %v9402_v28  ;;  %v591_v26 = vld [vmem:[#allocation5 + $0xf38] sm:$0xff]  ;;  %v9447_v27 = vcombine.low %v578_v15, %v582_v17  ;;  %v9449_v28 = vcombine.low %v579_v18, %v583_v19  ;;  %v10451_v15 = vcombine.high %v3841_v10, %v3845_v11  ;;  %v3849_v17 = vld [vmem:[#allocation7 + $0x88] sm:$0xff] }
 0x20d   :  { %v10426_v38 = vpop.f32.mrb[0].mxu0  ;;  %v10428_v43 = vpop.f32.mrb[0].mxu1  ;;  %v9458_v31 = vcombine.high %v587_v25, %v591_v26  ;;  %v3853_v18 = vld [vmem:[#allocation7 + $0xa8] sm:$0xff] }
 0x20e   :  { %v10430_v44 = vpop.f32.mrb[1].mxu0  ;;  %v10432_v56 = vpop.f32.mrb[1].mxu1 }
 0x20f   :  { %v3337_v49 = vpop.f32.mrb[2].mxu0  ;;  %3638 = vmatpush1.bf16.msra.mxu0 %v9399_v34  ;;  %v3501_v50 = vpop.f32.mrb[2].mxu1  ;;  %3802 = vmatpush1.bf16.msra.mxu1 %v9401_v35  ;;  %v595_v34 = vld [vmem:[#allocation5 + $0xf58] sm:$0xff] }
 0x210   :  { %v3338_v51 = vpop.f32.mrb[3].mxu0  ;;  %3639 = vmatprep.subr.bf16.mxu0 %v9408_v36  ;;  %v3502_v54 = vpop.f32.mrb[3].mxu1  ;;  %3803 = vmatprep.subr.bf16.mxu1 %v9410_v39  ;;  %v599_v35 = vld [vmem:[#allocation5 + $0xf78] sm:$0xff]  ;;  %v9455_v36 = vcombine.low %v586_v23, %v590_v24  ;;  %v9457_v39 = vcombine.low %v587_v25, %v591_v26  ;;  %v9463_v50 = vcombine.low %v594_v32, %v598_v33  ;;  %v3861_v23 = vld [vmem:[#allocation7 + $0xe8] sm:$0xff] }
 0x211   :  { %v9466_v42 = vcombine.high %v595_v34, %v599_v35  ;;  %v603_v49 = vld [vmem:[#allocation5 + $0xf98] sm:$0xff]  ;;  %v9465_v51 = vcombine.low %v595_v34, %v599_v35  ;;  %v610_v54 = vld [vmem:[#allocation5 + $0xfd0] sm:$0xff]  ;;  %v10473_v25 = vcombine.low %v3849_v17, %v3853_v18  ;;  %v3869_v32 = vld [vmem:[#allocation7 + $0x128] sm:$0xff] }
 0x213   :  { %3640 = vmatpush1.bf16.msra.mxu0 %v9407_v0  ;;  %3804 = vmatpush1.bf16.msra.mxu1 %v9409_v52  ;;  %v607_v0 = vld [vmem:[#allocation5 + $0xfb8] sm:$0xff]  ;;  %v9472_v52 = vcombine.high %v602_v45, %v606_v46  ;;  %v3877_v45 = vld [vmem:[#allocation7 + $0x168] sm:$0xff] }
 0x214   :  { %3641 = vmatprep.subr.bf16.mxu0 %v9416_v53  ;;  %3805 = vmatprep.subr.bf16.mxu1 %v9418_v21  ;;  %v9474_v53 = vcombine.high %v603_v49, %v607_v0  ;;  %v614_v21 = vld [vmem:[#allocation5 + $0xff0] sm:$0xff]  ;;  %v9473_v60 = vcombine.low %v603_v49, %v607_v0 }
 0x215   :  { %v9479_v4 = vcombine.low %v610_v54, %v614_v21 }
 0x217   :  { %3642 = vmatpush1.bf16.msra.mxu0 %v9415_v61  ;;  %3806 = vmatpush1.bf16.msra.mxu1 %v9417_v62  ;;  %v9480_v61 = vcombine.high %v610_v54, %v614_v21  ;;  %v9482_v62 = vcombine.high %v611_v55, %v615_v58  ;;  %v3885_v54 = vld [vmem:[#allocation7 + $0x1a8] sm:$0xff] }
 0x218   :  { %3643 = vmatprep.subr.bf16.mxu0 %v9424_v63  ;;  %3807 = vmatprep.subr.bf16.mxu1 %v9426_v1  ;;  %v3832_v63 = vld [vmem:[#allocation7] sm:$0xff] }
 0x219   :  { %v3836_v1 = vld [vmem:[#allocation7 + $0x20] sm:$0xff] }
 0x21a   :  { %v10438_v9 = vcombine.low %v3832_v63, %v3836_v1 }
 0x21b   :  { %3644 = vmatpush1.bf16.msra.mxu0 %v9423_v5  ;;  %3808 = vmatpush1.bf16.msra.mxu1 %v9425_v6  ;;  %v10434_v5 = vcombine.high %v3832_v63, %v3836_v1  ;;  %v10436_v6 = vcombine.high %v3833_v2, %v3837_v30  ;;  %v3893_v63 = vld [vmem:[#allocation7 + $0x1e8] sm:$0xff] }
 0x21c   :  { %3645 = vmatprep.subr.bf16.mxu0 %v9432_v7  ;;  %3809 = vmatprep.subr.bf16.mxu1 %v9434_v8  ;;  %v3840_v7 = vld [vmem:[#allocation7 + $0x40] sm:$0xff] }
 0x21d   :  { %v3844_v8 = vld [vmem:[#allocation7 + $0x60] sm:$0xff] }
 0x21e   :  { %v10455_v19 = vcombine.low %v3840_v7, %v3844_v8 }
 0x21f   :  { %3646 = vmatpush1.bf16.msra.mxu0 %v9431_v12  ;;  %3810 = vmatpush1.bf16.msra.mxu1 %v9433_v13  ;;  %v10444_v12 = vcombine.high %v3840_v7, %v3844_v8  ;;  %v3848_v13 = vld [vmem:[#allocation7 + $0x80] sm:$0xff]  ;;  %v3897_v8 = vld [vmem:[#allocation7 + $0x208] sm:$0xff] }
 0x220   :  { %3647 = vmatprep.subr.bf16.mxu0 %v9440_v47  ;;  %3811 = vmatprep.subr.bf16.mxu1 %v9442_v14  ;;  %v3852_v47 = vld [vmem:[#allocation7 + $0xa0] sm:$0xff]  ;;  %v10448_v14 = vpack.c.bf16 %v10430_v44, %v10430_v44 }
 0x221   :  { %v10461_v44 = vcombine.high %v3848_v13, %v3852_v47  ;;  %v10469_v24 = vcombine.low %v3848_v13, %v3852_v47  ;;  %v3900_v7 = vld [vmem:[#allocation7 + $0x220] sm:$0xff] }
 0x223   :  { %3648 = vmatpush1.bf16.msra.mxu0 %v9439_v48  ;;  %3812 = vmatpush1.bf16.msra.mxu1 %v9441_v3  ;;  %v10459_v48 = vcombine.low %v3841_v10, %v3845_v11  ;;  %v10465_v3 = vcombine.high %v3849_v17, %v3853_v18  ;;  %v3901_v10 = vld [vmem:[#allocation7 + $0x228] sm:$0xff]  ;;  %v3904_v18 = vld [vmem:[#allocation7 + $0x240] sm:$0xff] }
 0x224   :  { %3649 = vmatprep.subr.bf16.mxu0 %v9448_v20  ;;  %3813 = vmatprep.subr.bf16.mxu1 %v9450_v22  ;;  %v3856_v20 = vld [vmem:[#allocation7 + $0xc0] sm:$0xff]  ;;  %v3857_v22 = vld [vmem:[#allocation7 + $0xc8] sm:$0xff]  ;;  %v10538_v17 = vcombine.high %v3897_v8, %v3901_v10 }
 0x225   :  { %v10485_v34 = vcombine.low %v3857_v22, %v3861_v23 }
 0x226   :  { %14149 = vst [vmem:[#allocation17_spill] sm:$0xff] %v10538_v17 }
 0x227   :  { %3650 = vmatpush1.bf16.msra.mxu0 %v9447_v27  ;;  %3814 = vmatpush1.bf16.msra.mxu1 %v9449_v28  ;;  %v10478_v27 = vcombine.high %v3857_v22, %v3861_v23  ;;  %v3864_v28 = vld [vmem:[#allocation7 + $0x100] sm:$0xff]  ;;  %v3909_v22 = vld [vmem:[#allocation7 + $0x268] sm:$0xff] }
 0x228   :  { %3651 = vmatprep.subr.bf16.mxu0 %v9456_v29  ;;  %3815 = vmatprep.subr.bf16.mxu1 %v9458_v31  ;;  %v3868_v29 = vld [vmem:[#allocation7 + $0x120] sm:$0xff]  ;;  %v3865_v31 = vld [vmem:[#allocation7 + $0x108] sm:$0xff] }
 0x229   :  { %v10487_v35 = vcombine.high %v3864_v28, %v3868_v29  ;;  %v10493_v46 = vcombine.low %v3864_v28, %v3868_v29  ;;  %v10497_v49 = vcombine.low %v3865_v31, %v3869_v32  ;;  %v10545_v28 = vcombine.low %v3897_v8, %v3901_v10  ;;  %v3928_v10 = vld [vmem:[#allocation7 + $0x300] sm:$0xff] }
 0x22b   :  { %3652 = vmatpush1.bf16.msra.mxu0 %v9455_v36  ;;  %3816 = vmatpush1.bf16.msra.mxu1 %v9457_v39  ;;  %v10490_v36 = vcombine.high %v3865_v31, %v3869_v32  ;;  %v3872_v39 = vld [vmem:[#allocation7 + $0x140] sm:$0xff]  ;;  %14151 = vst [vmem:[#allocation19_spill] sm:$0xff] %v10545_v28 }
 0x22c   :  { %3653 = vmatprep.subr.bf16.mxu0 %v9464_v40  ;;  %3817 = vmatprep.subr.bf16.mxu1 %v9466_v42  ;;  %v3876_v40 = vld [vmem:[#allocation7 + $0x160] sm:$0xff]  ;;  %v3873_v42 = vld [vmem:[#allocation7 + $0x148] sm:$0xff] }
 0x22d   :  { %v10499_v0 = vcombine.high %v3872_v39, %v3876_v40  ;;  %v10505_v21 = vcombine.low %v3872_v39, %v3876_v40  ;;  %v10509_v55 = vcombine.low %v3873_v42, %v3877_v45  ;;  %v3912_v32 = vld [vmem:[#allocation7 + $0x280] sm:$0xff]  ;;  %v3913_v40 = vld [vmem:[#allocation7 + $0x288] sm:$0xff] }
 0x22e   :  { %v3916_v39 = vld [vmem:[#allocation7 + $0x2a0] sm:$0xff] }
 0x22f   :  { %3654 = vmatpush1.bf16.msra.mxu0 %v9463_v50  ;;  %3818 = vmatpush1.bf16.msra.mxu1 %v9465_v51  ;;  %v10502_v50 = vcombine.high %v3873_v42, %v3877_v45  ;;  %v3880_v51 = vld [vmem:[#allocation7 + $0x180] sm:$0xff]  ;;  %v3917_v42 = vld [vmem:[#allocation7 + $0x2a8] sm:$0xff] }
 0x230   :  { %3655 = vmatprep.subr.bf16.mxu0 %v9472_v52  ;;  %3819 = vmatprep.subr.bf16.mxu1 %v9474_v53  ;;  %v3884_v52 = vld [vmem:[#allocation7 + $0x1a0] sm:$0xff]  ;;  %v3881_v53 = vld [vmem:[#allocation7 + $0x188] sm:$0xff] }
 0x231   :  { %v10511_v58 = vcombine.high %v3880_v51, %v3884_v52  ;;  %v10517_v1 = vcombine.low %v3880_v51, %v3884_v52  ;;  %v10521_v2 = vcombine.low %v3881_v53, %v3885_v54  ;;  %v10559_v52 = vcombine.high %v3912_v32, %v3916_v39 }
 0x233   :  { %3656 = vmatpush1.bf16.msra.mxu0 %v9471_v59  ;;  %3820 = vmatpush1.bf16.msra.mxu1 %v9473_v60  ;;  %v10514_v59 = vcombine.high %v3881_v53, %v3885_v54  ;;  %v3888_v60 = vld [vmem:[#allocation7 + $0x1c0] sm:$0xff]  ;;  %14156 = vst [vmem:[#allocation24_spill] sm:$0xff] %v10559_v52  ;;  %v10562_v53 = vcombine.high %v3913_v40, %v3917_v42 }
 0x234   :  { %3657 = vmatprep.subr.bf16.mxu0 %v9480_v61  ;;  %3821 = vmatprep.subr.bf16.mxu1 %v9482_v62  ;;  %v3892_v61 = vld [vmem:[#allocation7 + $0x1e0] sm:$0xff]  ;;  %v3889_v62 = vld [vmem:[#allocation7 + $0x1c8] sm:$0xff] }
 0x235   :  { %v10523_v30 = vcombine.high %v3888_v60, %v3892_v61  ;;  %v10529_v11 = vcombine.low %v3888_v60, %v3892_v61  ;;  %v10533_v13 = vcombine.low %v3889_v62, %v3893_v63  ;;  %14157 = vst [vmem:[#allocation25_spill] sm:$0xff] %v10562_v53  ;;  %v3920_v54 = vld [vmem:[#allocation7 + $0x2c0] sm:$0xff]  ;;  %v3921_v61 = vld [vmem:[#allocation7 + $0x2c8] sm:$0xff] }
 0x236   :  { %v3924_v60 = vld [vmem:[#allocation7 + $0x2e0] sm:$0xff] }
 0x237   :  { %3658 = vmatpush1.bf16.msra.mxu0 %v9479_v4  ;;  %3822 = vmatpush1.bf16.msra.mxu1 %v9481_v37  ;;  %v10526_v4 = vcombine.high %v3889_v62, %v3893_v63  ;;  %v3896_v37 = vld [vmem:[#allocation7 + $0x200] sm:$0xff]  ;;  %14146 = vst [vmem:[#allocation14_spill] sm:$0xff] %v10529_v11  ;;  %14147 = vst [vmem:[#allocation15_spill] sm:$0xff] %v10533_v13  ;;  %v3925_v62 = vld [vmem:[#allocation7 + $0x2e8] sm:$0xff]  ;;  %v10565_v63 = vcombine.low %v3912_v32, %v3916_v39 }
 0x238   :  { %6912 = vmatprep.subr.bf16.mxu0 %v10434_v5  ;;  %7076 = vmatprep.subr.bf16.mxu1 %v10436_v6  ;;  %v10535_v47 = vcombine.high %v3896_v37, %v3900_v7  ;;  %v10541_v23 = vcombine.low %v3896_v37, %v3900_v7  ;;  %v10569_v37 = vcombine.low %v3913_v40, %v3917_v42  ;;  %v3936_v42 = vld [vmem:[#allocation7 + $0x340] sm:$0xff] }
 0x239   :  { %14145 = vst [vmem:[#allocation13_spill] sm:$0xff] %v10526_v4  ;;  %14158 = vst [vmem:[#allocation26_spill] sm:$0xff] %v10565_v63  ;;  %v10571_v7 = vcombine.high %v3920_v54, %v3924_v60  ;;  %v10574_v8 = vcombine.high %v3921_v61, %v3925_v62  ;;  %v10581_v32 = vcombine.low %v3921_v61, %v3925_v62 }
 0x23a   :  { %3660 = vmatmul.mubr.bf16.vlgmr.msra.gmra.mrb[4].mxu0 %v10408_v16  ;;  %3824 = vmatmul.mubr.bf16.vlgmr.msra.gmra.mrb[4].mxu1 %v10408_v16  ;;  %v3860_v16 = vld [vmem:[#allocation7 + $0xe0] sm:$0xff]  ;;  %14148 = vst [vmem:[#allocation16_spill] sm:$0xff] %v10535_v47  ;;  %14150 = vst [vmem:[#allocation18_spill] sm:$0xff] %v10541_v23  ;;  %v10595_v61 = vcombine.high %v3936_v42, %v3940_v41 }
 0x23b   :  { %6913 = vmatpush1.bf16.msra.mxu0 %v10438_v9  ;;  %6944 = vmatprep.mubr.bf16.mxu0 %v10448_v14  ;;  %v10475_v26 = vcombine.high %v3856_v20, %v3860_v16  ;;  %v10481_v33 = vcombine.low %v3856_v20, %v3860_v16  ;;  %v3908_v20 = vld [vmem:[#allocation7 + $0x260] sm:$0xff]  ;;  %v3905_v16 = vld [vmem:[#allocation7 + $0x248] sm:$0xff]  ;;  %14159 = vst [vmem:[#allocation27_spill] sm:$0xff] %v10569_v37  ;;  %14160 = vst [vmem:[#allocation28_spill] sm:$0xff] %v10571_v7 }
 0x23c   :  { %7077 = vmatpush1.bf16.msra.mxu1 %v10441_v57  ;;  %7108 = vmatprep.mubr.bf16.mxu1 %v10448_v14  ;;  %v10547_v29 = vcombine.high %v3904_v18, %v3908_v20  ;;  %v10550_v31 = vcombine.high %v3905_v16, %v3909_v22  ;;  %v10553_v45 = vcombine.low %v3904_v18, %v3908_v20  ;;  %v3932_v18 = vld [vmem:[#allocation7 + $0x320] sm:$0xff]  ;;  %v3929_v20 = vld [vmem:[#allocation7 + $0x308] sm:$0xff] }
 0x23d   :  { %6914 = vmatprep.subr.bf16.mxu0 %v10444_v12  ;;  %7078 = vmatprep.subr.bf16.mxu1 %v10451_v15  ;;  %v10557_v51 = vcombine.low %v3905_v16, %v3909_v22  ;;  %14161 = vst [vmem:[#allocation29_spill] sm:$0xff] %v10574_v8  ;;  %v3933_v16 = vld [vmem:[#allocation7 + $0x328] sm:$0xff]  ;;  %v10577_v22 = vcombine.low %v3920_v54, %v3924_v60  ;;  %14163 = vst [vmem:[#allocation31_spill] sm:$0xff] %v10581_v32 }
 0x23e   :  { %14152 = vst [vmem:[#allocation20_spill] sm:$0xff] %v10547_v29  ;;  %14153 = vst [vmem:[#allocation21_spill] sm:$0xff] %v10550_v31  ;;  %v10583_v39 = vcombine.high %v3928_v10, %v3932_v18  ;;  %v10586_v40 = vcombine.high %v3929_v20, %v3933_v16  ;;  %v10589_v54 = vcombine.low %v3928_v10, %v3932_v18 }
 0x23f   :  { %6915 = vmatpush1.bf16.msra.mxu0 %v10455_v19  ;;  %14154 = vst [vmem:[#allocation22_spill] sm:$0xff] %v10553_v45  ;;  %14155 = vst [vmem:[#allocation23_spill] sm:$0xff] %v10557_v51  ;;  %v10593_v60 = vcombine.low %v3929_v20, %v3933_v16  ;;  %v10601_v10 = vcombine.low %v3936_v42, %v3940_v41 }
 0x240   :  { %7079 = vmatpush1.bf16.msra.mxu1 %v10459_v48  ;;  %6916 = vmatprep.subr.bf16.mxu0 %v10461_v44  ;;  %14162 = vst [vmem:[#allocation30_spill] sm:$0xff] %v10577_v22  ;;  %14164 = vst [vmem:[#allocation32_spill] sm:$0xff] %v10583_v39 }
 0x241   :  { %7080 = vmatprep.subr.bf16.mxu1 %v10465_v3  ;;  %14165 = vst [vmem:[#allocation33_spill] sm:$0xff] %v10586_v40  ;;  %14166 = vst [vmem:[#allocation34_spill] sm:$0xff] %v10589_v54 }
 0x242   :  { %14167 = vst [vmem:[#allocation35_spill] sm:$0xff] %v10593_v60  ;;  %14168 = vst [vmem:[#allocation36_spill] sm:$0xff] %v10595_v61 }
 0x243   :  { %6917 = vmatpush1.bf16.msra.mxu0 %v10469_v24  ;;  %14170 = vst [vmem:[#allocation38_spill] sm:$0xff] %v10601_v10 }
 0x244   :  { %7081 = vmatpush1.bf16.msra.mxu1 %v10473_v25  ;;  %6918 = vmatprep.subr.bf16.mxu0 %v10475_v26 }
 0x245   :  { %7082 = vmatprep.subr.bf16.mxu1 %v10478_v27 }
 0x247   :  { %6919 = vmatpush1.bf16.msra.mxu0 %v10481_v33 }
 0x248   :  { %7083 = vmatpush1.bf16.msra.mxu1 %v10485_v34  ;;  %6920 = vmatprep.subr.bf16.mxu0 %v10487_v35 }
 0x249   :  { %7084 = vmatprep.subr.bf16.mxu1 %v10490_v36 }
 0x24b   :  { %6921 = vmatpush1.bf16.msra.mxu0 %v10493_v46 }
 0x24c   :  { %7085 = vmatpush1.bf16.msra.mxu1 %v10497_v49  ;;  %6922 = vmatprep.subr.bf16.mxu0 %v10499_v0 }
 0x24d   :  { %7086 = vmatprep.subr.bf16.mxu1 %v10502_v50 }
 0x24f   :  { %6923 = vmatpush1.bf16.msra.mxu0 %v10505_v21 }
 0x250   :  { %7087 = vmatpush1.bf16.msra.mxu1 %v10509_v55  ;;  %6924 = vmatprep.subr.bf16.mxu0 %v10511_v58 }
 0x251   :  { %7088 = vmatprep.subr.bf16.mxu1 %v10514_v59 }
 0x253   :  { %6925 = vmatpush1.bf16.msra.mxu0 %v10517_v1 }
 0x254   :  { %7089 = vmatpush1.bf16.msra.mxu1 %v10521_v2  ;;  %6926 = vmatprep.subr.bf16.mxu0 %v10523_v30 }
 0x255   :  { %7090 = vmatprep.subr.bf16.mxu1 %v10526_v4 }
 0x257   :  { %6927 = vmatpush1.bf16.msra.mxu0 %v10529_v11 }
 0x258   :  { %7091 = vmatpush1.bf16.msra.mxu1 %v10533_v13  ;;  %6928 = vmatprep.subr.bf16.mxu0 %v10535_v47 }
 0x259   :  { %7092 = vmatprep.subr.bf16.mxu1 %v10538_v17 }
 0x25b   :  { %6929 = vmatpush1.bf16.msra.mxu0 %v10541_v23 }
 0x25c   :  { %7093 = vmatpush1.bf16.msra.mxu1 %v10545_v28  ;;  %6930 = vmatprep.subr.bf16.mxu0 %v10547_v29  ;;  %v4253_v29 = vld [vmem:[#allocation7 + $0xd28] sm:$0xff] }
 0x25d   :  { %7094 = vmatprep.subr.bf16.mxu1 %v10550_v31  ;;  %v4236_v31 = vld [vmem:[#allocation7 + $0xca0] sm:$0xff] }
 0x25f   :  { %6931 = vmatpush1.bf16.msra.mxu0 %v10553_v45 }
 0x260   :  { %7095 = vmatpush1.bf16.msra.mxu1 %v10557_v51  ;;  %6932 = vmatprep.subr.bf16.mxu0 %v10559_v52  ;;  %v3941_v52 = vld [vmem:[#allocation7 + $0x368] sm:$0xff] }
 0x261   :  { %7096 = vmatprep.subr.bf16.mxu1 %v10562_v53  ;;  %v3937_v53 = vld [vmem:[#allocation7 + $0x348] sm:$0xff] }
 0x262   :  { %v10598_v62 = vcombine.high %v3937_v53, %v3941_v52  ;;  %v10605_v18 = vcombine.low %v3937_v53, %v3941_v52 }
 0x263   :  { %6933 = vmatpush1.bf16.msra.mxu0 %v10565_v63  ;;  %v3949_v63 = vld [vmem:[#allocation7 + $0x3a8] sm:$0xff] }
 0x264   :  { %7097 = vmatpush1.bf16.msra.mxu1 %v10569_v37  ;;  %6934 = vmatprep.subr.bf16.mxu0 %v10571_v7  ;;  %14169 = vst [vmem:[#allocation37_spill] sm:$0xff] %v10598_v62  ;;  %v3948_v7 = vld [vmem:[#allocation7 + $0x3a0] sm:$0xff]  ;;  %v3945_v37 = vld [vmem:[#allocation7 + $0x388] sm:$0xff]  ;;  %14171 = vst [vmem:[#allocation39_spill] sm:$0xff] %v10605_v18 }
 0x265   :  { %7098 = vmatprep.subr.bf16.mxu1 %v10574_v8  ;;  %v3944_v8 = vld [vmem:[#allocation7 + $0x380] sm:$0xff]  ;;  %v10610_v16 = vcombine.high %v3945_v37, %v3949_v63  ;;  %v10617_v52 = vcombine.low %v3945_v37, %v3949_v63 }
 0x266   :  { %v10607_v20 = vcombine.high %v3944_v8, %v3948_v7  ;;  %v10613_v41 = vcombine.low %v3944_v8, %v3948_v7 }
 0x267   :  { %6935 = vmatpush1.bf16.msra.mxu0 %v10577_v22  ;;  %14173 = vst [vmem:[#allocation41_spill] sm:$0xff] %v10610_v16  ;;  %v3957_v22 = vld [vmem:[#allocation7 + $0x3e8] sm:$0xff]  ;;  %14175 = vst [vmem:[#allocation43_spill] sm:$0xff] %v10617_v52 }
 0x268   :  { %7099 = vmatpush1.bf16.msra.mxu1 %v10581_v32  ;;  %6936 = vmatprep.subr.bf16.mxu0 %v10583_v39  ;;  %14172 = vst [vmem:[#allocation40_spill] sm:$0xff] %v10607_v20  ;;  %v3956_v39 = vld [vmem:[#allocation7 + $0x3e0] sm:$0xff]  ;;  %v3953_v32 = vld [vmem:[#allocation7 + $0x3c8] sm:$0xff]  ;;  %14174 = vst [vmem:[#allocation42_spill] sm:$0xff] %v10613_v41 }
 0x269   :  { %7100 = vmatprep.subr.bf16.mxu1 %v10586_v40  ;;  %v3952_v40 = vld [vmem:[#allocation7 + $0x3c0] sm:$0xff]  ;;  %v10622_v42 = vcombine.high %v3953_v32, %v3957_v22  ;;  %v10629_v63 = vcombine.low %v3953_v32, %v3957_v22 }
 0x26a   :  { %v10619_v53 = vcombine.high %v3952_v40, %v3956_v39  ;;  %v10625_v7 = vcombine.low %v3952_v40, %v3956_v39  ;;  %v3969_v39 = vld [vmem:[#allocation7 + $0x448] sm:$0xff] }
 0x26b   :  { %6937 = vmatpush1.bf16.msra.mxu0 %v10589_v54  ;;  %14177 = vst [vmem:[#allocation45_spill] sm:$0xff] %v10622_v42  ;;  %v3965_v54 = vld [vmem:[#allocation7 + $0x428] sm:$0xff]  ;;  %14179 = vst [vmem:[#allocation47_spill] sm:$0xff] %v10629_v63 }
 0x26c   :  { %7101 = vmatpush1.bf16.msra.mxu1 %v10593_v60  ;;  %6938 = vmatprep.subr.bf16.mxu0 %v10595_v61  ;;  %14176 = vst [vmem:[#allocation44_spill] sm:$0xff] %v10619_v53  ;;  %v3964_v61 = vld [vmem:[#allocation7 + $0x420] sm:$0xff]  ;;  %v3961_v60 = vld [vmem:[#allocation7 + $0x408] sm:$0xff]  ;;  %14178 = vst [vmem:[#allocation46_spill] sm:$0xff] %v10625_v7 }
 0x26d   :  { %7102 = vmatprep.subr.bf16.mxu1 %v10598_v62  ;;  %v3960_v62 = vld [vmem:[#allocation7 + $0x400] sm:$0xff]  ;;  %v10634_v8 = vcombine.high %v3961_v60, %v3965_v54  ;;  %v3973_v40 = vld [vmem:[#allocation7 + $0x468] sm:$0xff]  ;;  %v10645_v22 = vcombine.low %v3961_v60, %v3965_v54 }
 0x26e   :  { %v10631_v37 = vcombine.high %v3960_v62, %v3964_v61  ;;  %v10663_v60 = vcombine.low %v3969_v39, %v3973_v40 }
 0x26f   :  { %6939 = vmatpush1.bf16.msra.mxu0 %v10601_v10  ;;  %14181 = vst [vmem:[#allocation49_spill] sm:$0xff] %v10634_v8  ;;  %14183 = vst [vmem:[#allocation51_spill] sm:$0xff] %v10645_v22  ;;  %v3997_v10 = vld [vmem:[#allocation7 + $0x528] sm:$0xff] }
 0x270   :  { %7103 = vmatpush1.bf16.msra.mxu1 %v10605_v18  ;;  %6940 = vmatprep.subr.bf16.mxu0 %v10607_v20  ;;  %14180 = vst [vmem:[#allocation48_spill] sm:$0xff] %v10631_v37  ;;  %v3972_v20 = vld [vmem:[#allocation7 + $0x460] sm:$0xff]  ;;  %v10637_v18 = vcombine.low %v3960_v62, %v3964_v61  ;;  %v10652_v61 = vpack.c.bf16 %v10432_v56, %v10432_v56  ;;  %v3977_v62 = vld [vmem:[#allocation7 + $0x488] sm:$0xff]  ;;  %14187 = vst [vmem:[#allocation55_spill] sm:$0xff] %v10663_v60 }
 0x271   :  { %7104 = vmatprep.subr.bf16.mxu1 %v10610_v16  ;;  %v3968_v16 = vld [vmem:[#allocation7 + $0x440] sm:$0xff] }
 0x272   :  { %14182 = vst [vmem:[#allocation50_spill] sm:$0xff] %v10637_v18  ;;  %v10648_v32 = vcombine.high %v3968_v16, %v3972_v20  ;;  %v10659_v54 = vcombine.low %v3968_v16, %v3972_v20  ;;  %v3985_v20 = vld [vmem:[#allocation7 + $0x4c8] sm:$0xff] }
 0x273   :  { %6941 = vmatpush1.bf16.msra.mxu0 %v10613_v41  ;;  %v3989_v16 = vld [vmem:[#allocation7 + $0x4e8] sm:$0xff] }
 0x274   :  { %7105 = vmatpush1.bf16.msra.mxu1 %v10617_v52  ;;  %6942 = vmatprep.subr.bf16.mxu0 %v10619_v53  ;;  %v10641_v52 = vpack.c.bf16 %v10426_v38, %v10426_v38  ;;  %14184 = vst [vmem:[#allocation52_spill] sm:$0xff] %v10648_v32  ;;  %v10655_v38 = vcombine.high %v3969_v39, %v3973_v40  ;;  %14186 = vst [vmem:[#allocation54_spill] sm:$0xff] %v10659_v54  ;;  %v3988_v53 = vld [vmem:[#allocation7 + $0x4e0] sm:$0xff]  ;;  %v3993_v41 = vld [vmem:[#allocation7 + $0x508] sm:$0xff] }
 0x275   :  { %7106 = vmatprep.subr.bf16.mxu1 %v10622_v42  ;;  %v3976_v42 = vld [vmem:[#allocation7 + $0x480] sm:$0xff] }
 0x276   :  { %14185 = vst [vmem:[#allocation53_spill] sm:$0xff] %v10655_v38 }
 0x277   :  { %6943 = vmatpush1.bf16.msra.mxu0 %v10625_v7  ;;  %v3980_v7 = vld [vmem:[#allocation7 + $0x4a0] sm:$0xff] }
 0x278   :  { %7107 = vmatpush1.bf16.msra.mxu1 %v10629_v63  ;;  %6953 = vmatprep.subr.bf16.mxu0 %v10631_v37  ;;  %v3981_v63 = vld [vmem:[#allocation7 + $0x4a8] sm:$0xff]  ;;  %v10665_v56 = vcombine.high %v3976_v42, %v3980_v7  ;;  %v3984_v37 = vld [vmem:[#allocation7 + $0x4c0] sm:$0xff] }
 0x279   :  { %7117 = vmatprep.subr.bf16.mxu1 %v10634_v8  ;;  %v10669_v8 = vcombine.high %v3977_v62, %v3981_v63  ;;  %v10677_v39 = vcombine.low %v3977_v62, %v3981_v63  ;;  %v10679_v40 = vcombine.high %v3984_v37, %v3988_v53  ;;  %v10694_v62 = vcombine.high %v3993_v41, %v3997_v10 }
 0x27a   :  { %6945 = vmatmul.mubr.bf16.vlgmr.msra.gmra.mrb[8].mxu0 %v10641_v52  ;;  %14188 = vst [vmem:[#allocation56_spill] sm:$0xff] %v10665_v56 }
 0x27b   :  { %7109 = vmatmul.mubr.bf16.vlgmr.msra.gmra.mrb[8].mxu1 %v10641_v52  ;;  %6954 = vmatpush1.bf16.msra.mxu0 %v10637_v18  ;;  %14189 = vst [vmem:[#allocation57_spill] sm:$0xff] %v10669_v8  ;;  %v10673_v18 = vcombine.low %v3976_v42, %v3980_v7  ;;  %14191 = vst [vmem:[#allocation59_spill] sm:$0xff] %v10677_v39  ;;  %v10685_v42 = vcombine.low %v3984_v37, %v3988_v53 }
 0x27c   :  { %6985 = vmatprep.mubr.bf16.mxu0 %v10652_v61  ;;  %7118 = vmatpush1.bf16.msra.mxu1 %v10645_v22  ;;  %14192 = vst [vmem:[#allocation60_spill] sm:$0xff] %v10679_v40  ;;  %v3992_v22 = vld [vmem:[#allocation7 + $0x500] sm:$0xff]  ;;  %v10689_v7 = vcombine.low %v3985_v20, %v3989_v16  ;;  %14197 = vst [vmem:[#allocation65_spill] sm:$0xff] %v10694_v62  ;;  %v10701_v37 = vcombine.low %v3993_v41, %v3997_v10 }
 0x27d   :  { %7149 = vmatprep.mubr.bf16.mxu1 %v10652_v61  ;;  %6955 = vmatprep.subr.bf16.mxu0 %v10648_v32  ;;  %14190 = vst [vmem:[#allocation58_spill] sm:$0xff] %v10673_v18  ;;  %v10682_v32 = vcombine.high %v3985_v20, %v3989_v16  ;;  %14194 = vst [vmem:[#allocation62_spill] sm:$0xff] %v10685_v42 }
 0x27e   :  { %7119 = vmatprep.subr.bf16.mxu1 %v10655_v38  ;;  %v3996_v38 = vld [vmem:[#allocation7 + $0x520] sm:$0xff]  ;;  %14195 = vst [vmem:[#allocation63_spill] sm:$0xff] %v10689_v7  ;;  %14199 = vst [vmem:[#allocation67_spill] sm:$0xff] %v10701_v37 }
 0x27f   :  { %6956 = vmatpush1.bf16.msra.mxu0 %v10659_v54  ;;  %14193 = vst [vmem:[#allocation61_spill] sm:$0xff] %v10682_v32  ;;  %v10691_v63 = vcombine.high %v3992_v22, %v3996_v38  ;;  %v4005_v54 = vld [vmem:[#allocation7 + $0x568] sm:$0xff]  ;;  %v10697_v53 = vcombine.low %v3992_v22, %v3996_v38 }
 0x280   :  { %7120 = vmatpush1.bf16.msra.mxu1 %v10663_v60  ;;  %6957 = vmatprep.subr.bf16.mxu0 %v10665_v56  ;;  %v4004_v56 = vld [vmem:[#allocation7 + $0x560] sm:$0xff]  ;;  %v4001_v60 = vld [vmem:[#allocation7 + $0x548] sm:$0xff] }
 0x281   :  { %7121 = vmatprep.subr.bf16.mxu1 %v10669_v8  ;;  %14196 = vst [vmem:[#allocation64_spill] sm:$0xff] %v10691_v63  ;;  %v4000_v8 = vld [vmem:[#allocation7 + $0x540] sm:$0xff]  ;;  %14198 = vst [vmem:[#allocation66_spill] sm:$0xff] %v10697_v53  ;;  %v10706_v16 = vcombine.high %v4001_v60, %v4005_v54  ;;  %v10713_v10 = vcombine.low %v4001_v60, %v4005_v54 }
 0x282   :  { %v10703_v20 = vcombine.high %v4000_v8, %v4004_v56  ;;  %v10709_v22 = vcombine.low %v4000_v8, %v4004_v56 }
 0x283   :  { %6958 = vmatpush1.bf16.msra.mxu0 %v10673_v18  ;;  %14201 = vst [vmem:[#allocation69_spill] sm:$0xff] %v10706_v16  ;;  %v4013_v18 = vld [vmem:[#allocation7 + $0x5a8] sm:$0xff]  ;;  %14203 = vst [vmem:[#allocation71_spill] sm:$0xff] %v10713_v10 }
 0x284   :  { %7122 = vmatpush1.bf16.msra.mxu1 %v10677_v39  ;;  %6959 = vmatprep.subr.bf16.mxu0 %v10679_v40  ;;  %14200 = vst [vmem:[#allocation68_spill] sm:$0xff] %v10703_v20  ;;  %v4012_v40 = vld [vmem:[#allocation7 + $0x5a0] sm:$0xff]  ;;  %v4009_v39 = vld [vmem:[#allocation7 + $0x588] sm:$0xff]  ;;  %14202 = vst [vmem:[#allocation70_spill] sm:$0xff] %v10709_v22 }
 0x285   :  { %7123 = vmatprep.subr.bf16.mxu1 %v10682_v32  ;;  %v4008_v32 = vld [vmem:[#allocation7 + $0x580] sm:$0xff]  ;;  %v10718_v38 = vcombine.high %v4009_v39, %v4013_v18  ;;  %v10725_v54 = vcombine.low %v4009_v39, %v4013_v18 }
 0x286   :  { %v10715_v41 = vcombine.high %v4008_v32, %v4012_v40  ;;  %v10721_v8 = vcombine.low %v4008_v32, %v4012_v40 }
 0x287   :  { %6960 = vmatpush1.bf16.msra.mxu0 %v10685_v42  ;;  %14205 = vst [vmem:[#allocation73_spill] sm:$0xff] %v10718_v38  ;;  %v4021_v42 = vld [vmem:[#allocation7 + $0x5e8] sm:$0xff]  ;;  %14207 = vst [vmem:[#allocation75_spill] sm:$0xff] %v10725_v54 }
 0x288   :  { %7124 = vmatpush1.bf16.msra.mxu1 %v10689_v7  ;;  %6961 = vmatprep.subr.bf16.mxu0 %v10691_v63  ;;  %14204 = vst [vmem:[#allocation72_spill] sm:$0xff] %v10715_v41  ;;  %v4020_v63 = vld [vmem:[#allocation7 + $0x5e0] sm:$0xff]  ;;  %v4017_v7 = vld [vmem:[#allocation7 + $0x5c8] sm:$0xff]  ;;  %14206 = vst [vmem:[#allocation74_spill] sm:$0xff] %v10721_v8 }
 0x289   :  { %7125 = vmatprep.subr.bf16.mxu1 %v10694_v62  ;;  %v4016_v62 = vld [vmem:[#allocation7 + $0x5c0] sm:$0xff]  ;;  %v10730_v56 = vcombine.high %v4017_v7, %v4021_v42  ;;  %v10737_v18 = vcombine.low %v4017_v7, %v4021_v42 }
 0x28a   :  { %v10727_v60 = vcombine.high %v4016_v62, %v4020_v63  ;;  %v10733_v32 = vcombine.low %v4016_v62, %v4020_v63 }
 0x28b   :  { %6962 = vmatpush1.bf16.msra.mxu0 %v10697_v53  ;;  %14209 = vst [vmem:[#allocation77_spill] sm:$0xff] %v10730_v56  ;;  %v4029_v53 = vld [vmem:[#allocation7 + $0x628] sm:$0xff]  ;;  %14211 = vst [vmem:[#allocation79_spill] sm:$0xff] %v10737_v18 }
 0x28c   :  { %7126 = vmatpush1.bf16.msra.mxu1 %v10701_v37  ;;  %6963 = vmatprep.subr.bf16.mxu0 %v10703_v20  ;;  %14208 = vst [vmem:[#allocation76_spill] sm:$0xff] %v10727_v60  ;;  %v4028_v20 = vld [vmem:[#allocation7 + $0x620] sm:$0xff]  ;;  %v4025_v37 = vld [vmem:[#allocation7 + $0x608] sm:$0xff]  ;;  %14210 = vst [vmem:[#allocation78_spill] sm:$0xff] %v10733_v32 }
 0x28d   :  { %7127 = vmatprep.subr.bf16.mxu1 %v10706_v16  ;;  %v4024_v16 = vld [vmem:[#allocation7 + $0x600] sm:$0xff]  ;;  %v10742_v40 = vcombine.high %v4025_v37, %v4029_v53  ;;  %v10749_v42 = vcombine.low %v4025_v37, %v4029_v53 }
 0x28e   :  { %v10739_v39 = vcombine.high %v4024_v16, %v4028_v20  ;;  %v10745_v63 = vcombine.low %v4024_v16, %v4028_v20 }
 0x28f   :  { %6964 = vmatpush1.bf16.msra.mxu0 %v10709_v22  ;;  %14213 = vst [vmem:[#allocation81_spill] sm:$0xff] %v10742_v40  ;;  %v4037_v22 = vld [vmem:[#allocation7 + $0x668] sm:$0xff]  ;;  %14215 = vst [vmem:[#allocation83_spill] sm:$0xff] %v10749_v42 }
 0x290   :  { %7128 = vmatpush1.bf16.msra.mxu1 %v10713_v10  ;;  %6965 = vmatprep.subr.bf16.mxu0 %v10715_v41  ;;  %14212 = vst [vmem:[#allocation80_spill] sm:$0xff] %v10739_v39  ;;  %v4036_v41 = vld [vmem:[#allocation7 + $0x660] sm:$0xff]  ;;  %v4033_v10 = vld [vmem:[#allocation7 + $0x648] sm:$0xff]  ;;  %14214 = vst [vmem:[#allocation82_spill] sm:$0xff] %v10745_v63 }
 0x291   :  { %7129 = vmatprep.subr.bf16.mxu1 %v10718_v38  ;;  %v4032_v38 = vld [vmem:[#allocation7 + $0x640] sm:$0xff]  ;;  %v10754_v62 = vcombine.high %v4033_v10, %v4037_v22  ;;  %v10761_v53 = vcombine.low %v4033_v10, %v4037_v22 }
 0x292   :  { %v10751_v7 = vcombine.high %v4032_v38, %v4036_v41  ;;  %v10757_v20 = vcombine.low %v4032_v38, %v4036_v41 }
 0x293   :  { %6966 = vmatpush1.bf16.msra.mxu0 %v10721_v8  ;;  %14217 = vst [vmem:[#allocation85_spill] sm:$0xff] %v10754_v62  ;;  %v4045_v8 = vld [vmem:[#allocation7 + $0x6a8] sm:$0xff]  ;;  %14219 = vst [vmem:[#allocation87_spill] sm:$0xff] %v10761_v53 }
 0x294   :  { %7130 = vmatpush1.bf16.msra.mxu1 %v10725_v54  ;;  %6967 = vmatprep.subr.bf16.mxu0 %v10727_v60  ;;  %14216 = vst [vmem:[#allocation84_spill] sm:$0xff] %v10751_v7  ;;  %v4044_v60 = vld [vmem:[#allocation7 + $0x6a0] sm:$0xff]  ;;  %v4041_v54 = vld [vmem:[#allocation7 + $0x688] sm:$0xff]  ;;  %14218 = vst [vmem:[#allocation86_spill] sm:$0xff] %v10757_v20 }
 0x295   :  { %7131 = vmatprep.subr.bf16.mxu1 %v10730_v56  ;;  %v4040_v56 = vld [vmem:[#allocation7 + $0x680] sm:$0xff]  ;;  %v10766_v16 = vcombine.high %v4041_v54, %v4045_v8  ;;  %v10773_v22 = vcombine.low %v4041_v54, %v4045_v8 }
 0x296   :  { %v10763_v37 = vcombine.high %v4040_v56, %v4044_v60  ;;  %v10769_v41 = vcombine.low %v4040_v56, %v4044_v60 }
 0x297   :  { %6968 = vmatpush1.bf16.msra.mxu0 %v10733_v32  ;;  %14221 = vst [vmem:[#allocation89_spill] sm:$0xff] %v10766_v16  ;;  %v4053_v32 = vld [vmem:[#allocation7 + $0x6e8] sm:$0xff]  ;;  %14223 = vst [vmem:[#allocation91_spill] sm:$0xff] %v10773_v22 }
 0x298   :  { %7132 = vmatpush1.bf16.msra.mxu1 %v10737_v18  ;;  %6969 = vmatprep.subr.bf16.mxu0 %v10739_v39  ;;  %14220 = vst [vmem:[#allocation88_spill] sm:$0xff] %v10763_v37  ;;  %v4052_v39 = vld [vmem:[#allocation7 + $0x6e0] sm:$0xff]  ;;  %v4049_v18 = vld [vmem:[#allocation7 + $0x6c8] sm:$0xff]  ;;  %14222 = vst [vmem:[#allocation90_spill] sm:$0xff] %v10769_v41 }
 0x299   :  { %7133 = vmatprep.subr.bf16.mxu1 %v10742_v40  ;;  %v4048_v40 = vld [vmem:[#allocation7 + $0x6c0] sm:$0xff]  ;;  %v10778_v38 = vcombine.high %v4049_v18, %v4053_v32  ;;  %v10785_v8 = vcombine.low %v4049_v18, %v4053_v32 }
 0x29a   :  { %v10775_v10 = vcombine.high %v4048_v40, %v4052_v39  ;;  %v10781_v60 = vcombine.low %v4048_v40, %v4052_v39 }
 0x29b   :  { %6970 = vmatpush1.bf16.msra.mxu0 %v10745_v63  ;;  %14225 = vst [vmem:[#allocation93_spill] sm:$0xff] %v10778_v38  ;;  %v4061_v63 = vld [vmem:[#allocation7 + $0x728] sm:$0xff]  ;;  %14227 = vst [vmem:[#allocation95_spill] sm:$0xff] %v10785_v8 }
 0x29c   :  { %7134 = vmatpush1.bf16.msra.mxu1 %v10749_v42  ;;  %6971 = vmatprep.subr.bf16.mxu0 %v10751_v7  ;;  %14224 = vst [vmem:[#allocation92_spill] sm:$0xff] %v10775_v10  ;;  %v4060_v7 = vld [vmem:[#allocation7 + $0x720] sm:$0xff]  ;;  %v4057_v42 = vld [vmem:[#allocation7 + $0x708] sm:$0xff]  ;;  %14226 = vst [vmem:[#allocation94_spill] sm:$0xff] %v10781_v60 }
 0x29d   :  { %7135 = vmatprep.subr.bf16.mxu1 %v10754_v62  ;;  %v4056_v62 = vld [vmem:[#allocation7 + $0x700] sm:$0xff]  ;;  %v10790_v56 = vcombine.high %v4057_v42, %v4061_v63  ;;  %v10797_v32 = vcombine.low %v4057_v42, %v4061_v63 }
 0x29e   :  { %v10787_v54 = vcombine.high %v4056_v62, %v4060_v7  ;;  %v10793_v39 = vcombine.low %v4056_v62, %v4060_v7 }
 0x29f   :  { %6972 = vmatpush1.bf16.msra.mxu0 %v10757_v20  ;;  %14229 = vst [vmem:[#allocation97_spill] sm:$0xff] %v10790_v56  ;;  %v4069_v20 = vld [vmem:[#allocation7 + $0x768] sm:$0xff]  ;;  %14231 = vst [vmem:[#allocation99_spill] sm:$0xff] %v10797_v32 }
 0x2a0   :  { %7136 = vmatpush1.bf16.msra.mxu1 %v10761_v53  ;;  %6973 = vmatprep.subr.bf16.mxu0 %v10763_v37  ;;  %14228 = vst [vmem:[#allocation96_spill] sm:$0xff] %v10787_v54  ;;  %v4068_v37 = vld [vmem:[#allocation7 + $0x760] sm:$0xff]  ;;  %v4065_v53 = vld [vmem:[#allocation7 + $0x748] sm:$0xff]  ;;  %14230 = vst [vmem:[#allocation98_spill] sm:$0xff] %v10793_v39 }
 0x2a1   :  { %7137 = vmatprep.subr.bf16.mxu1 %v10766_v16  ;;  %v4064_v16 = vld [vmem:[#allocation7 + $0x740] sm:$0xff]  ;;  %v10802_v40 = vcombine.high %v4065_v53, %v4069_v20  ;;  %v10809_v63 = vcombine.low %v4065_v53, %v4069_v20 }
 0x2a2   :  { %v10799_v18 = vcombine.high %v4064_v16, %v4068_v37  ;;  %v10805_v7 = vcombine.low %v4064_v16, %v4068_v37 }
 0x2a3   :  { %6974 = vmatpush1.bf16.msra.mxu0 %v10769_v41  ;;  %14233 = vst [vmem:[#allocation101_spill] sm:$0xff] %v10802_v40  ;;  %v4077_v41 = vld [vmem:[#allocation7 + $0x7a8] sm:$0xff]  ;;  %14235 = vst [vmem:[#allocation103_spill] sm:$0xff] %v10809_v63 }
 0x2a4   :  { %7138 = vmatpush1.bf16.msra.mxu1 %v10773_v22  ;;  %6975 = vmatprep.subr.bf16.mxu0 %v10775_v10  ;;  %14232 = vst [vmem:[#allocation100_spill] sm:$0xff] %v10799_v18  ;;  %v4076_v10 = vld [vmem:[#allocation7 + $0x7a0] sm:$0xff]  ;;  %v4073_v22 = vld [vmem:[#allocation7 + $0x788] sm:$0xff]  ;;  %14234 = vst [vmem:[#allocation102_spill] sm:$0xff] %v10805_v7 }
 0x2a5   :  { %7139 = vmatprep.subr.bf16.mxu1 %v10778_v38  ;;  %v4072_v38 = vld [vmem:[#allocation7 + $0x780] sm:$0xff]  ;;  %v10814_v62 = vcombine.high %v4073_v22, %v4077_v41  ;;  %v10821_v20 = vcombine.low %v4073_v22, %v4077_v41 }
 0x2a6   :  { %v10811_v42 = vcombine.high %v4072_v38, %v4076_v10  ;;  %v10817_v37 = vcombine.low %v4072_v38, %v4076_v10 }
 0x2a7   :  { %6976 = vmatpush1.bf16.msra.mxu0 %v10781_v60  ;;  %14237 = vst [vmem:[#allocation105_spill] sm:$0xff] %v10814_v62  ;;  %v4085_v60 = vld [vmem:[#allocation7 + $0x7e8] sm:$0xff]  ;;  %14239 = vst [vmem:[#allocation107_spill] sm:$0xff] %v10821_v20 }
 0x2a8   :  { %7140 = vmatpush1.bf16.msra.mxu1 %v10785_v8  ;;  %6977 = vmatprep.subr.bf16.mxu0 %v10787_v54  ;;  %14236 = vst [vmem:[#allocation104_spill] sm:$0xff] %v10811_v42  ;;  %v4084_v54 = vld [vmem:[#allocation7 + $0x7e0] sm:$0xff]  ;;  %v4081_v8 = vld [vmem:[#allocation7 + $0x7c8] sm:$0xff]  ;;  %14238 = vst [vmem:[#allocation106_spill] sm:$0xff] %v10817_v37 }
 0x2a9   :  { %7141 = vmatprep.subr.bf16.mxu1 %v10790_v56  ;;  %v4080_v56 = vld [vmem:[#allocation7 + $0x7c0] sm:$0xff]  ;;  %v10826_v16 = vcombine.high %v4081_v8, %v4085_v60  ;;  %v10833_v41 = vcombine.low %v4081_v8, %v4085_v60 }
 0x2aa   :  { %v10823_v53 = vcombine.high %v4080_v56, %v4084_v54  ;;  %v10829_v10 = vcombine.low %v4080_v56, %v4084_v54  ;;  %v10845_v56 = vpack.c.bf16 %v10428_v43, %v10428_v43 }
 0x2ab   :  { %6978 = vmatpush1.bf16.msra.mxu0 %v10793_v39  ;;  %14241 = vst [vmem:[#allocation109_spill] sm:$0xff] %v10826_v16  ;;  %v4093_v39 = vld [vmem:[#allocation7 + $0x828] sm:$0xff]  ;;  %14243 = vst [vmem:[#allocation111_spill] sm:$0xff] %v10833_v41 }
 0x2ac   :  { %7142 = vmatpush1.bf16.msra.mxu1 %v10797_v32  ;;  %6979 = vmatprep.subr.bf16.mxu0 %v10799_v18  ;;  %14240 = vst [vmem:[#allocation108_spill] sm:$0xff] %v10823_v53  ;;  %v4092_v18 = vld [vmem:[#allocation7 + $0x820] sm:$0xff]  ;;  %v4089_v32 = vld [vmem:[#allocation7 + $0x808] sm:$0xff]  ;;  %14242 = vst [vmem:[#allocation110_spill] sm:$0xff] %v10829_v10 }
 0x2ad   :  { %7143 = vmatprep.subr.bf16.mxu1 %v10802_v40  ;;  %v4088_v40 = vld [vmem:[#allocation7 + $0x800] sm:$0xff]  ;;  %v10838_v38 = vcombine.high %v4089_v32, %v4093_v39  ;;  %v10849_v60 = vcombine.low %v4089_v32, %v4093_v39 }
 0x2ae   :  { %v10835_v22 = vcombine.high %v4088_v40, %v4092_v18  ;;  %v10841_v54 = vcombine.low %v4088_v40, %v4092_v18  ;;  %v4105_v18 = vld [vmem:[#allocation7 + $0x888] sm:$0xff] }
 0x2af   :  { %6980 = vmatpush1.bf16.msra.mxu0 %v10805_v7  ;;  %14245 = vst [vmem:[#allocation113_spill] sm:$0xff] %v10838_v38  ;;  %v4101_v7 = vld [vmem:[#allocation7 + $0x868] sm:$0xff]  ;;  %14247 = vst [vmem:[#allocation115_spill] sm:$0xff] %v10849_v60 }
 0x2b0   :  { %7144 = vmatpush1.bf16.msra.mxu1 %v10809_v63  ;;  %6981 = vmatprep.subr.bf16.mxu0 %v10811_v42  ;;  %14244 = vst [vmem:[#allocation112_spill] sm:$0xff] %v10835_v22  ;;  %v4100_v42 = vld [vmem:[#allocation7 + $0x860] sm:$0xff]  ;;  %v4097_v63 = vld [vmem:[#allocation7 + $0x848] sm:$0xff]  ;;  %14246 = vst [vmem:[#allocation114_spill] sm:$0xff] %v10841_v54 }
 0x2b1   :  { %7145 = vmatprep.subr.bf16.mxu1 %v10814_v62  ;;  %v4096_v62 = vld [vmem:[#allocation7 + $0x840] sm:$0xff]  ;;  %v4109_v40 = vld [vmem:[#allocation7 + $0x8a8] sm:$0xff]  ;;  %v10863_v39 = vcombine.low %v4097_v63, %v4101_v7 }
 0x2b2   :  { %v10851_v8 = vcombine.high %v4096_v62, %v4100_v42  ;;  %v10859_v43 = vcombine.low %v4096_v62, %v4100_v42 }
 0x2b3   :  { %6982 = vmatpush1.bf16.msra.mxu0 %v10817_v37  ;;  %14251 = vst [vmem:[#allocation119_spill] sm:$0xff] %v10863_v39  ;;  %v4117_v37 = vld [vmem:[#allocation7 + $0x8e8] sm:$0xff] }
 0x2b4   :  { %7146 = vmatpush1.bf16.msra.mxu1 %v10821_v20  ;;  %6983 = vmatprep.subr.bf16.mxu0 %v10823_v53  ;;  %14248 = vst [vmem:[#allocation116_spill] sm:$0xff] %v10851_v8  ;;  %v4104_v53 = vld [vmem:[#allocation7 + $0x880] sm:$0xff]  ;;  %14250 = vst [vmem:[#allocation118_spill] sm:$0xff] %v10859_v43  ;;  %v4113_v20 = vld [vmem:[#allocation7 + $0x8c8] sm:$0xff] }
 0x2b5   :  { %7147 = vmatprep.subr.bf16.mxu1 %v10826_v16  ;;  %v10854_v16 = vcombine.high %v4097_v63, %v4101_v7  ;;  %v10875_v7 = vcombine.low %v4105_v18, %v4109_v40  ;;  %v10880_v62 = vcombine.high %v4113_v20, %v4117_v37 }
 0x2b7   :  { %6984 = vmatpush1.bf16.msra.mxu0 %v10829_v10  ;;  %14249 = vst [vmem:[#allocation117_spill] sm:$0xff] %v10854_v16  ;;  %v4108_v10 = vld [vmem:[#allocation7 + $0x8a0] sm:$0xff]  ;;  %14255 = vst [vmem:[#allocation123_spill] sm:$0xff] %v10875_v7 }
 0x2b8   :  { %7148 = vmatpush1.bf16.msra.mxu1 %v10833_v41  ;;  %6994 = vmatprep.subr.bf16.mxu0 %v10835_v22  ;;  %v10865_v32 = vcombine.high %v4104_v53, %v4108_v10  ;;  %v4112_v22 = vld [vmem:[#allocation7 + $0x8c0] sm:$0xff]  ;;  %v10871_v42 = vcombine.low %v4104_v53, %v4108_v10  ;;  %14257 = vst [vmem:[#allocation125_spill] sm:$0xff] %v10880_v62 }
 0x2b9   :  { %7158 = vmatprep.subr.bf16.mxu1 %v10838_v38  ;;  %v10868_v38 = vcombine.high %v4105_v18, %v4109_v40  ;;  %v4116_v41 = vld [vmem:[#allocation7 + $0x8e0] sm:$0xff]  ;;  %v10887_v10 = vcombine.low %v4113_v20, %v4117_v37 }
 0x2ba   :  { %6986 = vmatmul.mubr.bf16.vlgmr.msra.gmra.mrb[8].mxu0 %v10845_v56  ;;  %14252 = vst [vmem:[#allocation120_spill] sm:$0xff] %v10865_v32  ;;  %14254 = vst [vmem:[#allocation122_spill] sm:$0xff] %v10871_v42  ;;  %v10877_v63 = vcombine.high %v4112_v22, %v4116_v41  ;;  %v10883_v53 = vcombine.low %v4112_v22, %v4116_v41 }
 0x2bb   :  { %7150 = vmatmul.mubr.bf16.vlgmr.msra.gmra.mrb[8].mxu1 %v10845_v56  ;;  %6995 = vmatpush1.bf16.msra.mxu0 %v10841_v54  ;;  %14253 = vst [vmem:[#allocation121_spill] sm:$0xff] %v10868_v38  ;;  %v4125_v54 = vld [vmem:[#allocation7 + $0x928] sm:$0xff]  ;;  %14259 = vst [vmem:[#allocation127_spill] sm:$0xff] %v10887_v10 }
 0x2bc   :  { %7159 = vmatpush1.bf16.msra.mxu1 %v10849_v60  ;;  %6996 = vmatprep.subr.bf16.mxu0 %v10851_v8  ;;  %14256 = vst [vmem:[#allocation124_spill] sm:$0xff] %v10877_v63  ;;  %v4124_v8 = vld [vmem:[#allocation7 + $0x920] sm:$0xff]  ;;  %v4121_v60 = vld [vmem:[#allocation7 + $0x908] sm:$0xff]  ;;  %14258 = vst [vmem:[#allocation126_spill] sm:$0xff] %v10883_v53 }
 0x2bd   :  { %7160 = vmatprep.subr.bf16.mxu1 %v10854_v16  ;;  %v4120_v16 = vld [vmem:[#allocation7 + $0x900] sm:$0xff]  ;;  %v10892_v40 = vcombine.high %v4121_v60, %v4125_v54  ;;  %v10899_v37 = vcombine.low %v4121_v60, %v4125_v54 }
 0x2be   :  { %v10889_v18 = vcombine.high %v4120_v16, %v4124_v8  ;;  %v10895_v41 = vcombine.low %v4120_v16, %v4124_v8 }
 0x2bf   :  { %6997 = vmatpush1.bf16.msra.mxu0 %v10859_v43  ;;  %14261 = vst [vmem:[#allocation129_spill] sm:$0xff] %v10892_v40  ;;  %v4133_v43 = vld [vmem:[#allocation7 + $0x968] sm:$0xff]  ;;  %14263 = vst [vmem:[#allocation131_spill] sm:$0xff] %v10899_v37 }
 0x2c0   :  { %7161 = vmatpush1.bf16.msra.mxu1 %v10863_v39  ;;  %6998 = vmatprep.subr.bf16.mxu0 %v10865_v32  ;;  %14260 = vst [vmem:[#allocation128_spill] sm:$0xff] %v10889_v18  ;;  %v4132_v32 = vld [vmem:[#allocation7 + $0x960] sm:$0xff]  ;;  %v4129_v39 = vld [vmem:[#allocation7 + $0x948] sm:$0xff]  ;;  %14262 = vst [vmem:[#allocation130_spill] sm:$0xff] %v10895_v41 }
 0x2c1   :  { %7162 = vmatprep.subr.bf16.mxu1 %v10868_v38  ;;  %v4128_v38 = vld [vmem:[#allocation7 + $0x940] sm:$0xff]  ;;  %v10904_v22 = vcombine.high %v4129_v39, %v4133_v43  ;;  %v10911_v54 = vcombine.low %v4129_v39, %v4133_v43 }
 0x2c2   :  { %v10901_v20 = vcombine.high %v4128_v38, %v4132_v32  ;;  %v10907_v16 = vcombine.low %v4128_v38, %v4132_v32 }
 0x2c3   :  { %6999 = vmatpush1.bf16.msra.mxu0 %v10871_v42  ;;  %14265 = vst [vmem:[#allocation133_spill] sm:$0xff] %v10904_v22  ;;  %v4141_v42 = vld [vmem:[#allocation7 + $0x9a8] sm:$0xff]  ;;  %14267 = vst [vmem:[#allocation135_spill] sm:$0xff] %v10911_v54 }
 0x2c4   :  { %7163 = vmatpush1.bf16.msra.mxu1 %v10875_v7  ;;  %7000 = vmatprep.subr.bf16.mxu0 %v10877_v63  ;;  %14264 = vst [vmem:[#allocation132_spill] sm:$0xff] %v10901_v20  ;;  %v4140_v63 = vld [vmem:[#allocation7 + $0x9a0] sm:$0xff]  ;;  %v4137_v7 = vld [vmem:[#allocation7 + $0x988] sm:$0xff]  ;;  %14266 = vst [vmem:[#allocation134_spill] sm:$0xff] %v10907_v16 }
 0x2c5   :  { %7164 = vmatprep.subr.bf16.mxu1 %v10880_v62  ;;  %v4136_v62 = vld [vmem:[#allocation7 + $0x980] sm:$0xff]  ;;  %v10916_v8 = vcombine.high %v4137_v7, %v4141_v42  ;;  %v10923_v43 = vcombine.low %v4137_v7, %v4141_v42 }
 0x2c6   :  { %v10913_v60 = vcombine.high %v4136_v62, %v4140_v63  ;;  %v10919_v38 = vcombine.low %v4136_v62, %v4140_v63 }
 0x2c7   :  { %7001 = vmatpush1.bf16.msra.mxu0 %v10883_v53  ;;  %14269 = vst [vmem:[#allocation137_spill] sm:$0xff] %v10916_v8  ;;  %v4149_v53 = vld [vmem:[#allocation7 + $0x9e8] sm:$0xff]  ;;  %14271 = vst [vmem:[#allocation139_spill] sm:$0xff] %v10923_v43 }
 0x2c8   :  { %7165 = vmatpush1.bf16.msra.mxu1 %v10887_v10  ;;  %7002 = vmatprep.subr.bf16.mxu0 %v10889_v18  ;;  %14268 = vst [vmem:[#allocation136_spill] sm:$0xff] %v10913_v60  ;;  %v4148_v18 = vld [vmem:[#allocation7 + $0x9e0] sm:$0xff]  ;;  %v4145_v10 = vld [vmem:[#allocation7 + $0x9c8] sm:$0xff]  ;;  %14270 = vst [vmem:[#allocation138_spill] sm:$0xff] %v10919_v38 }
 0x2c9   :  { %7166 = vmatprep.subr.bf16.mxu1 %v10892_v40  ;;  %v4144_v40 = vld [vmem:[#allocation7 + $0x9c0] sm:$0xff]  ;;  %v10928_v32 = vcombine.high %v4145_v10, %v4149_v53  ;;  %v10935_v42 = vcombine.low %v4145_v10, %v4149_v53 }
 0x2ca   :  { %v10925_v39 = vcombine.high %v4144_v40, %v4148_v18  ;;  %v10931_v63 = vcombine.low %v4144_v40, %v4148_v18 }
 0x2cb   :  { %7003 = vmatpush1.bf16.msra.mxu0 %v10895_v41  ;;  %14273 = vst [vmem:[#allocation141_spill] sm:$0xff] %v10928_v32  ;;  %v4157_v41 = vld [vmem:[#allocation7 + $0xa28] sm:$0xff]  ;;  %14275 = vst [vmem:[#allocation143_spill] sm:$0xff] %v10935_v42 }
 0x2cc   :  { %7167 = vmatpush1.bf16.msra.mxu1 %v10899_v37  ;;  %7004 = vmatprep.subr.bf16.mxu0 %v10901_v20  ;;  %14272 = vst [vmem:[#allocation140_spill] sm:$0xff] %v10925_v39  ;;  %v4156_v20 = vld [vmem:[#allocation7 + $0xa20] sm:$0xff]  ;;  %v4153_v37 = vld [vmem:[#allocation7 + $0xa08] sm:$0xff]  ;;  %14274 = vst [vmem:[#allocation142_spill] sm:$0xff] %v10931_v63 }
 0x2cd   :  { %7168 = vmatprep.subr.bf16.mxu1 %v10904_v22  ;;  %v4152_v22 = vld [vmem:[#allocation7 + $0xa00] sm:$0xff]  ;;  %v10940_v62 = vcombine.high %v4153_v37, %v4157_v41  ;;  %v10947_v53 = vcombine.low %v4153_v37, %v4157_v41 }
 0x2ce   :  { %v10937_v7 = vcombine.high %v4152_v22, %v4156_v20  ;;  %v10943_v18 = vcombine.low %v4152_v22, %v4156_v20 }
 0x2cf   :  { %7005 = vmatpush1.bf16.msra.mxu0 %v10907_v16  ;;  %14277 = vst [vmem:[#allocation145_spill] sm:$0xff] %v10940_v62  ;;  %v4165_v16 = vld [vmem:[#allocation7 + $0xa68] sm:$0xff]  ;;  %14279 = vst [vmem:[#allocation147_spill] sm:$0xff] %v10947_v53 }
 0x2d0   :  { %7169 = vmatpush1.bf16.msra.mxu1 %v10911_v54  ;;  %7006 = vmatprep.subr.bf16.mxu0 %v10913_v60  ;;  %14276 = vst [vmem:[#allocation144_spill] sm:$0xff] %v10937_v7  ;;  %v4164_v60 = vld [vmem:[#allocation7 + $0xa60] sm:$0xff]  ;;  %v4161_v54 = vld [vmem:[#allocation7 + $0xa48] sm:$0xff]  ;;  %14278 = vst [vmem:[#allocation146_spill] sm:$0xff] %v10943_v18 }
 0x2d1   :  { %7170 = vmatprep.subr.bf16.mxu1 %v10916_v8  ;;  %v4160_v8 = vld [vmem:[#allocation7 + $0xa40] sm:$0xff]  ;;  %v10952_v40 = vcombine.high %v4161_v54, %v4165_v16  ;;  %v10959_v41 = vcombine.low %v4161_v54, %v4165_v16 }
 0x2d2   :  { %v10949_v10 = vcombine.high %v4160_v8, %v4164_v60  ;;  %v10955_v20 = vcombine.low %v4160_v8, %v4164_v60 }
 0x2d3   :  { %7007 = vmatpush1.bf16.msra.mxu0 %v10919_v38  ;;  %14281 = vst [vmem:[#allocation149_spill] sm:$0xff] %v10952_v40  ;;  %v4173_v38 = vld [vmem:[#allocation7 + $0xaa8] sm:$0xff]  ;;  %14283 = vst [vmem:[#allocation151_spill] sm:$0xff] %v10959_v41 }
 0x2d4   :  { %7171 = vmatpush1.bf16.msra.mxu1 %v10923_v43  ;;  %7008 = vmatprep.subr.bf16.mxu0 %v10925_v39  ;;  %14280 = vst [vmem:[#allocation148_spill] sm:$0xff] %v10949_v10  ;;  %v4172_v39 = vld [vmem:[#allocation7 + $0xaa0] sm:$0xff]  ;;  %v4169_v43 = vld [vmem:[#allocation7 + $0xa88] sm:$0xff]  ;;  %14282 = vst [vmem:[#allocation150_spill] sm:$0xff] %v10955_v20 }
 0x2d5   :  { %7172 = vmatprep.subr.bf16.mxu1 %v10928_v32  ;;  %v4168_v32 = vld [vmem:[#allocation7 + $0xa80] sm:$0xff]  ;;  %v10964_v22 = vcombine.high %v4169_v43, %v4173_v38  ;;  %v10971_v16 = vcombine.low %v4169_v43, %v4173_v38 }
 0x2d6   :  { %v10961_v37 = vcombine.high %v4168_v32, %v4172_v39  ;;  %v10967_v60 = vcombine.low %v4168_v32, %v4172_v39 }
 0x2d7   :  { %7009 = vmatpush1.bf16.msra.mxu0 %v10931_v63  ;;  %14285 = vst [vmem:[#allocation153_spill] sm:$0xff] %v10964_v22  ;;  %v4181_v63 = vld [vmem:[#allocation7 + $0xae8] sm:$0xff]  ;;  %14287 = vst [vmem:[#allocation155_spill] sm:$0xff] %v10971_v16 }
 0x2d8   :  { %7173 = vmatpush1.bf16.msra.mxu1 %v10935_v42  ;;  %7010 = vmatprep.subr.bf16.mxu0 %v10937_v7  ;;  %14284 = vst [vmem:[#allocation152_spill] sm:$0xff] %v10961_v37  ;;  %v4180_v7 = vld [vmem:[#allocation7 + $0xae0] sm:$0xff]  ;;  %v4177_v42 = vld [vmem:[#allocation7 + $0xac8] sm:$0xff]  ;;  %14286 = vst [vmem:[#allocation154_spill] sm:$0xff] %v10967_v60 }
 0x2d9   :  { %7174 = vmatprep.subr.bf16.mxu1 %v10940_v62  ;;  %v4176_v62 = vld [vmem:[#allocation7 + $0xac0] sm:$0xff]  ;;  %v10976_v8 = vcombine.high %v4177_v42, %v4181_v63  ;;  %v10983_v38 = vcombine.low %v4177_v42, %v4181_v63 }
 0x2da   :  { %v10973_v54 = vcombine.high %v4176_v62, %v4180_v7  ;;  %v10979_v39 = vcombine.low %v4176_v62, %v4180_v7 }
 0x2db   :  { %7011 = vmatpush1.bf16.msra.mxu0 %v10943_v18  ;;  %14289 = vst [vmem:[#allocation157_spill] sm:$0xff] %v10976_v8  ;;  %v4189_v18 = vld [vmem:[#allocation7 + $0xb28] sm:$0xff]  ;;  %14291 = vst [vmem:[#allocation159_spill] sm:$0xff] %v10983_v38 }
 0x2dc   :  { %7175 = vmatpush1.bf16.msra.mxu1 %v10947_v53  ;;  %7012 = vmatprep.subr.bf16.mxu0 %v10949_v10  ;;  %14288 = vst [vmem:[#allocation156_spill] sm:$0xff] %v10973_v54  ;;  %v4188_v10 = vld [vmem:[#allocation7 + $0xb20] sm:$0xff]  ;;  %v4185_v53 = vld [vmem:[#allocation7 + $0xb08] sm:$0xff]  ;;  %14290 = vst [vmem:[#allocation158_spill] sm:$0xff] %v10979_v39 }
 0x2dd   :  { %7176 = vmatprep.subr.bf16.mxu1 %v10952_v40  ;;  %v4184_v40 = vld [vmem:[#allocation7 + $0xb00] sm:$0xff]  ;;  %v10988_v32 = vcombine.high %v4185_v53, %v4189_v18  ;;  %v10995_v63 = vcombine.low %v4185_v53, %v4189_v18 }
 0x2de   :  { %v10985_v43 = vcombine.high %v4184_v40, %v4188_v10  ;;  %v10991_v7 = vcombine.low %v4184_v40, %v4188_v10 }
 0x2df   :  { %7013 = vmatpush1.bf16.msra.mxu0 %v10955_v20  ;;  %14293 = vst [vmem:[#allocation161_spill] sm:$0xff] %v10988_v32  ;;  %v4197_v20 = vld [vmem:[#allocation7 + $0xb68] sm:$0xff]  ;;  %14295 = vst [vmem:[#allocation163_spill] sm:$0xff] %v10995_v63 }
 0x2e0   :  { %7177 = vmatpush1.bf16.msra.mxu1 %v10959_v41  ;;  %7014 = vmatprep.subr.bf16.mxu0 %v10961_v37  ;;  %14292 = vst [vmem:[#allocation160_spill] sm:$0xff] %v10985_v43  ;;  %v4196_v37 = vld [vmem:[#allocation7 + $0xb60] sm:$0xff]  ;;  %v4193_v41 = vld [vmem:[#allocation7 + $0xb48] sm:$0xff]  ;;  %14294 = vst [vmem:[#allocation162_spill] sm:$0xff] %v10991_v7 }
 0x2e1   :  { %7178 = vmatprep.subr.bf16.mxu1 %v10964_v22  ;;  %v4192_v22 = vld [vmem:[#allocation7 + $0xb40] sm:$0xff]  ;;  %v11000_v62 = vcombine.high %v4193_v41, %v4197_v20  ;;  %v11007_v18 = vcombine.low %v4193_v41, %v4197_v20 }
 0x2e2   :  { %v10997_v42 = vcombine.high %v4192_v22, %v4196_v37  ;;  %v11003_v10 = vcombine.low %v4192_v22, %v4196_v37 }
 0x2e3   :  { %7015 = vmatpush1.bf16.msra.mxu0 %v10967_v60  ;;  %14297 = vst [vmem:[#allocation165_spill] sm:$0xff] %v11000_v62  ;;  %v4205_v60 = vld [vmem:[#allocation7 + $0xba8] sm:$0xff]  ;;  %14299 = vst [vmem:[#allocation167_spill] sm:$0xff] %v11007_v18 }
 0x2e4   :  { %7179 = vmatpush1.bf16.msra.mxu1 %v10971_v16  ;;  %7016 = vmatprep.subr.bf16.mxu0 %v10973_v54  ;;  %14296 = vst [vmem:[#allocation164_spill] sm:$0xff] %v10997_v42  ;;  %v4204_v54 = vld [vmem:[#allocation7 + $0xba0] sm:$0xff]  ;;  %v4201_v16 = vld [vmem:[#allocation7 + $0xb88] sm:$0xff]  ;;  %14298 = vst [vmem:[#allocation166_spill] sm:$0xff] %v11003_v10 }
 0x2e5   :  { %7180 = vmatprep.subr.bf16.mxu1 %v10976_v8  ;;  %v4200_v8 = vld [vmem:[#allocation7 + $0xb80] sm:$0xff]  ;;  %v11012_v40 = vcombine.high %v4201_v16, %v4205_v60  ;;  %v11019_v20 = vcombine.low %v4201_v16, %v4205_v60 }
 0x2e6   :  { %v11009_v53 = vcombine.high %v4200_v8, %v4204_v54  ;;  %v11015_v37 = vcombine.low %v4200_v8, %v4204_v54 }
 0x2e7   :  { %7017 = vmatpush1.bf16.msra.mxu0 %v10979_v39  ;;  %14301 = vst [vmem:[#allocation169_spill] sm:$0xff] %v11012_v40  ;;  %v4213_v39 = vld [vmem:[#allocation7 + $0xbe8] sm:$0xff]  ;;  %14303 = vst [vmem:[#allocation171_spill] sm:$0xff] %v11019_v20 }
 0x2e8   :  { %7181 = vmatpush1.bf16.msra.mxu1 %v10983_v38  ;;  %7018 = vmatprep.subr.bf16.mxu0 %v10985_v43  ;;  %14300 = vst [vmem:[#allocation168_spill] sm:$0xff] %v11009_v53  ;;  %v4212_v43 = vld [vmem:[#allocation7 + $0xbe0] sm:$0xff]  ;;  %v4209_v38 = vld [vmem:[#allocation7 + $0xbc8] sm:$0xff]  ;;  %14302 = vst [vmem:[#allocation170_spill] sm:$0xff] %v11015_v37 }
 0x2e9   :  { %7182 = vmatprep.subr.bf16.mxu1 %v10988_v32  ;;  %v4208_v32 = vld [vmem:[#allocation7 + $0xbc0] sm:$0xff]  ;;  %v11024_v22 = vcombine.high %v4209_v38, %v4213_v39  ;;  %v11031_v60 = vcombine.low %v4209_v38, %v4213_v39 }
 0x2ea   :  { %v11021_v41 = vcombine.high %v4208_v32, %v4212_v43  ;;  %v11027_v54 = vcombine.low %v4208_v32, %v4212_v43  ;;  %v4224_v32 = vld [vmem:[#allocation7 + $0xc40] sm:$0xff] }
 0x2eb   :  { %7019 = vmatpush1.bf16.msra.mxu0 %v10991_v7  ;;  %14305 = vst [vmem:[#allocation173_spill] sm:$0xff] %v11024_v22  ;;  %v4221_v7 = vld [vmem:[#allocation7 + $0xc28] sm:$0xff]  ;;  %14307 = vst [vmem:[#allocation175_spill] sm:$0xff] %v11031_v60  ;;  %v4228_v38 = vld [vmem:[#allocation7 + $0xc60] sm:$0xff] }
 0x2ec   :  { %7183 = vmatpush1.bf16.msra.mxu1 %v10995_v63  ;;  %7020 = vmatprep.subr.bf16.mxu0 %v10997_v42  ;;  %14304 = vst [vmem:[#allocation172_spill] sm:$0xff] %v11021_v41  ;;  %v4220_v42 = vld [vmem:[#allocation7 + $0xc20] sm:$0xff]  ;;  %v4217_v63 = vld [vmem:[#allocation7 + $0xc08] sm:$0xff]  ;;  %14306 = vst [vmem:[#allocation174_spill] sm:$0xff] %v11027_v54  ;;  %v11054_v45 = vcombine.high %v4224_v32, %v4228_v38 }
 0x2ed   :  { %7184 = vmatprep.subr.bf16.mxu1 %v11000_v62  ;;  %v4216_v62 = vld [vmem:[#allocation7 + $0xc00] sm:$0xff]  ;;  %v11036_v8 = vcombine.high %v4217_v63, %v4221_v7 }
 0x2ee   :  { %v11033_v16 = vcombine.high %v4216_v62, %v4220_v42  ;;  %14312 = vst [vmem:[#allocation180_spill] sm:$0xff] %v11054_v45 }
 0x2ef   :  { %7021 = vmatpush1.bf16.msra.mxu0 %v11003_v10  ;;  %14309 = vst [vmem:[#allocation177_spill] sm:$0xff] %v11036_v8  ;;  %v4232_v10 = vld [vmem:[#allocation7 + $0xc80] sm:$0xff] }
 0x2f0   :  { %7185 = vmatpush1.bf16.msra.mxu1 %v11007_v18  ;;  %7022 = vmatprep.subr.bf16.mxu0 %v11009_v53  ;;  %14308 = vst [vmem:[#allocation176_spill] sm:$0xff] %v11033_v16  ;;  %v11046_v18 = vcombine.low %v4216_v62, %v4220_v42  ;;  %v4237_v42 = vld [vmem:[#allocation7 + $0xca8] sm:$0xff] }
 0x2f1   :  { %7186 = vmatprep.subr.bf16.mxu1 %v11012_v40 }
 0x2f2   :  { %14310 = vst [vmem:[#allocation178_spill] sm:$0xff] %v11046_v18 }
 0x2f3   :  { %7023 = vmatpush1.bf16.msra.mxu0 %v11015_v37  ;;  %v4229_v37 = vld [vmem:[#allocation7 + $0xc68] sm:$0xff] }
 0x2f4   :  { %7187 = vmatpush1.bf16.msra.mxu1 %v11019_v20  ;;  %7024 = vmatprep.subr.bf16.mxu0 %v11021_v41  ;;  %v4225_v41 = vld [vmem:[#allocation7 + $0xc48] sm:$0xff] }
 0x2f5   :  { %7188 = vmatprep.subr.bf16.mxu1 %v11024_v22 }
 0x2f7   :  { %7025 = vmatpush1.bf16.msra.mxu0 %v11027_v54  ;;  %v11048_v54 = vcombine.low %v4217_v63, %v4221_v7  ;;  %v11066_v7 = vcombine.low %v4225_v41, %v4229_v37  ;;  %v11070_v63 = vcombine.high %v4232_v10, %v4236_v31 }
 0x2f8   :  { %7189 = vmatpush1.bf16.msra.mxu1 %v11031_v60  ;;  %7035 = vmatprep.subr.bf16.mxu0 %v11033_v16 }
 0x2f9   :  { %7199 = vmatprep.subr.bf16.mxu1 %v11036_v8  ;;  %14311 = vst [vmem:[#allocation179_spill] sm:$0xff] %v11048_v54  ;;  %14315 = vst [vmem:[#allocation183_spill] sm:$0xff] %v11066_v7 }
 0x2fa   :  { %14316 = vst [vmem:[#allocation184_spill] sm:$0xff] %v11070_v63 }
 0x30d   :  { %v3661_v43 = vpop.f32.mrb[4].mxu0  ;;  %v11042_v20 = vpop.f32.mrb[4].mxu1 }
 0x30e   :  { %v3663_v39 = vpop.f32.mrb[5].mxu0  ;;  %v3827_v22 = vpop.f32.mrb[5].mxu1  ;;  %v11050_v60 = vpack.c.bf16 %v3661_v43, %v3661_v43  ;;  %v4241_v43 = vld [vmem:[#allocation7 + $0xcc8] sm:$0xff] }
 0x30f   :  { %v11044_v40 = vpack.c.bf16 %v3663_v39, %v3663_v39  ;;  %v3665_v53 = vpop.f32.mrb[6].mxu0  ;;  %v3829_v16 = vpop.f32.mrb[6].mxu1  ;;  %v11056_v39 = vcombine.high %v4225_v41, %v4229_v37  ;;  %v11058_v62 = vpack.c.bf16 %v3827_v22, %v3827_v22  ;;  %v11078_v37 = vcombine.low %v4232_v10, %v4236_v31 }
 0x310   :  { %v3666_v8 = vpop.f32.mrb[7].mxu0  ;;  %v3830_v51 = vpop.f32.mrb[7].mxu1  ;;  %v4233_v53 = vld [vmem:[#allocation7 + $0xc88] sm:$0xff]  ;;  %v4240_v16 = vld [vmem:[#allocation7 + $0xcc0] sm:$0xff] }
 0x311   :  { %7026 = vmatprep.mubr.bf16.mxu0 %v11044_v40  ;;  %7190 = vmatprep.mubr.bf16.mxu1 %v11044_v40  ;;  %14313 = vst [vmem:[#allocation181_spill] sm:$0xff] %v11056_v39  ;;  %v11064_v51 = vcombine.low %v4224_v32, %v4228_v38  ;;  %v11072_v22 = vcombine.high %v4233_v53, %v4237_v42  ;;  %v4244_v8 = vld [vmem:[#allocation7 + $0xce0] sm:$0xff]  ;;  %14318 = vst [vmem:[#allocation186_spill] sm:$0xff] %v11078_v37 }
 0x312   :  { %7027 = vmatmul.mubr.bf16.vlgmr.msra.gmra.mrb[8].mxu0 %v11050_v60  ;;  %7191 = vmatmul.mubr.bf16.vlgmr.msra.gmra.mrb[8].mxu1 %v11050_v60  ;;  %v11080_v41 = vcombine.low %v4233_v53, %v4237_v42  ;;  %v11084_v32 = vcombine.high %v4240_v16, %v4244_v8  ;;  %v11090_v31 = vcombine.low %v4240_v16, %v4244_v8 }
 0x313   :  { %7036 = vmatpush1.bf16.msra.mxu0 %v11046_v18  ;;  %7200 = vmatpush1.bf16.msra.mxu1 %v11048_v54  ;;  %14314 = vst [vmem:[#allocation182_spill] sm:$0xff] %v11064_v51  ;;  %14317 = vst [vmem:[#allocation185_spill] sm:$0xff] %v11072_v22  ;;  %v4245_v54 = vld [vmem:[#allocation7 + $0xce8] sm:$0xff] }
 0x314   :  { %7067 = vmatprep.mubr.bf16.mxu0 %v11058_v62  ;;  %7231 = vmatprep.mubr.bf16.mxu1 %v11058_v62  ;;  %14319 = vst [vmem:[#allocation187_spill] sm:$0xff] %v11080_v41  ;;  %14320 = vst [vmem:[#allocation188_spill] sm:$0xff] %v11084_v32  ;;  %v11086_v38 = vcombine.high %v4241_v43, %v4245_v54  ;;  %v4249_v18 = vld [vmem:[#allocation7 + $0xd08] sm:$0xff]  ;;  %v11092_v10 = vcombine.low %v4241_v43, %v4245_v54 }
 0x315   :  { %7037 = vmatprep.subr.bf16.mxu0 %v11054_v45  ;;  %7201 = vmatprep.subr.bf16.mxu1 %v11056_v39  ;;  %v4248_v39 = vld [vmem:[#allocation7 + $0xd00] sm:$0xff]  ;;  %14322 = vst [vmem:[#allocation190_spill] sm:$0xff] %v11090_v31  ;;  %v11098_v42 = vcombine.high %v4249_v18, %v4253_v29  ;;  %v11104_v54 = vcombine.low %v4249_v18, %v4253_v29 }
 0x316   :  { %14321 = vst [vmem:[#allocation189_spill] sm:$0xff] %v11086_v38  ;;  %v4252_v45 = vld [vmem:[#allocation7 + $0xd20] sm:$0xff]  ;;  %14323 = vst [vmem:[#allocation191_spill] sm:$0xff] %v11092_v10 }
 0x317   :  { %7038 = vmatpush1.bf16.msra.mxu0 %v11064_v51  ;;  %7202 = vmatpush1.bf16.msra.mxu1 %v11066_v7  ;;  %v11096_v53 = vcombine.high %v4248_v39, %v4252_v45  ;;  %14325 = vst [vmem:[#allocation193_spill] sm:$0xff] %v11098_v42  ;;  %v4257_v7 = vld [vmem:[#allocation7 + $0xd48] sm:$0xff]  ;;  %v11102_v16 = vcombine.low %v4248_v39, %v4252_v45  ;;  %14327 = vst [vmem:[#allocation195_spill] sm:$0xff] %v11104_v54 }
 0x318   :  { %7039 = vmatprep.subr.bf16.mxu0 %v11070_v63  ;;  %7203 = vmatprep.subr.bf16.mxu1 %v11072_v22  ;;  %v4256_v22 = vld [vmem:[#allocation7 + $0xd40] sm:$0xff]  ;;  %v4261_v51 = vld [vmem:[#allocation7 + $0xd68] sm:$0xff] }
 0x319   :  { %14324 = vst [vmem:[#allocation192_spill] sm:$0xff] %v11096_v53  ;;  %v4260_v63 = vld [vmem:[#allocation7 + $0xd60] sm:$0xff]  ;;  %14326 = vst [vmem:[#allocation194_spill] sm:$0xff] %v11102_v16  ;;  %v11110_v43 = vcombine.high %v4257_v7, %v4261_v51  ;;  %v11116_v29 = vcombine.low %v4257_v7, %v4261_v51 }
 0x31a   :  { %v11108_v8 = vcombine.high %v4256_v22, %v4260_v63  ;;  %v11114_v45 = vcombine.low %v4256_v22, %v4260_v63 }
 0x31b   :  { %7040 = vmatpush1.bf16.msra.mxu0 %v11078_v37  ;;  %7204 = vmatpush1.bf16.msra.mxu1 %v11080_v41  ;;  %14329 = vst [vmem:[#allocation197_spill] sm:$0xff] %v11110_v43  ;;  %v4265_v41 = vld [vmem:[#allocation7 + $0xd88] sm:$0xff]  ;;  %14331 = vst [vmem:[#allocation199_spill] sm:$0xff] %v11116_v29 }
 0x31c   :  { %7041 = vmatprep.subr.bf16.mxu0 %v11084_v32  ;;  %7205 = vmatprep.subr.bf16.mxu1 %v11086_v38  ;;  %14328 = vst [vmem:[#allocation196_spill] sm:$0xff] %v11108_v8  ;;  %v4264_v38 = vld [vmem:[#allocation7 + $0xd80] sm:$0xff]  ;;  %v4269_v37 = vld [vmem:[#allocation7 + $0xda8] sm:$0xff]  ;;  %14330 = vst [vmem:[#allocation198_spill] sm:$0xff] %v11114_v45 }
 0x31d   :  { %v4268_v32 = vld [vmem:[#allocation7 + $0xda0] sm:$0xff]  ;;  %v11122_v39 = vcombine.high %v4265_v41, %v4269_v37  ;;  %v11128_v51 = vcombine.low %v4265_v41, %v4269_v37 }
 0x31e   :  { %v11120_v18 = vcombine.high %v4264_v38, %v4268_v32  ;;  %v11126_v63 = vcombine.low %v4264_v38, %v4268_v32 }
 0x31f   :  { %7042 = vmatpush1.bf16.msra.mxu0 %v11090_v31  ;;  %7206 = vmatpush1.bf16.msra.mxu1 %v11092_v10  ;;  %14333 = vst [vmem:[#allocation201_spill] sm:$0xff] %v11122_v39  ;;  %v4273_v10 = vld [vmem:[#allocation7 + $0xdc8] sm:$0xff]  ;;  %14335 = vst [vmem:[#allocation203_spill] sm:$0xff] %v11128_v51 }
 0x320   :  { %7043 = vmatprep.subr.bf16.mxu0 %v11096_v53  ;;  %7207 = vmatprep.subr.bf16.mxu1 %v11098_v42  ;;  %14332 = vst [vmem:[#allocation200_spill] sm:$0xff] %v11120_v18  ;;  %v4272_v42 = vld [vmem:[#allocation7 + $0xdc0] sm:$0xff]  ;;  %v4277_v31 = vld [vmem:[#allocation7 + $0xde8] sm:$0xff]  ;;  %14334 = vst [vmem:[#allocation202_spill] sm:$0xff] %v11126_v63 }
 0x321   :  { %v4276_v53 = vld [vmem:[#allocation7 + $0xde0] sm:$0xff]  ;;  %v11134_v22 = vcombine.high %v4273_v10, %v4277_v31  ;;  %v11140_v37 = vcombine.low %v4273_v10, %v4277_v31 }
 0x322   :  { %v11132_v7 = vcombine.high %v4272_v42, %v4276_v53  ;;  %v11138_v32 = vcombine.low %v4272_v42, %v4276_v53 }
 0x323   :  { %7044 = vmatpush1.bf16.msra.mxu0 %v11102_v16  ;;  %7208 = vmatpush1.bf16.msra.mxu1 %v11104_v54  ;;  %14337 = vst [vmem:[#allocation205_spill] sm:$0xff] %v11134_v22  ;;  %v4281_v54 = vld [vmem:[#allocation7 + $0xe08] sm:$0xff]  ;;  %14339 = vst [vmem:[#allocation207_spill] sm:$0xff] %v11140_v37 }
 0x324   :  { %7045 = vmatprep.subr.bf16.mxu0 %v11108_v8  ;;  %7209 = vmatprep.subr.bf16.mxu1 %v11110_v43  ;;  %14336 = vst [vmem:[#allocation204_spill] sm:$0xff] %v11132_v7  ;;  %v4280_v43 = vld [vmem:[#allocation7 + $0xe00] sm:$0xff]  ;;  %v4285_v16 = vld [vmem:[#allocation7 + $0xe28] sm:$0xff]  ;;  %14338 = vst [vmem:[#allocation206_spill] sm:$0xff] %v11138_v32 }
 0x325   :  { %v4284_v8 = vld [vmem:[#allocation7 + $0xe20] sm:$0xff]  ;;  %v11146_v38 = vcombine.high %v4281_v54, %v4285_v16  ;;  %v11152_v31 = vcombine.low %v4281_v54, %v4285_v16 }
 0x326   :  { %v11144_v41 = vcombine.high %v4280_v43, %v4284_v8  ;;  %v11150_v53 = vcombine.low %v4280_v43, %v4284_v8 }
 0x327   :  { %7046 = vmatpush1.bf16.msra.mxu0 %v11114_v45  ;;  %7210 = vmatpush1.bf16.msra.mxu1 %v11116_v29  ;;  %14341 = vst [vmem:[#allocation209_spill] sm:$0xff] %v11146_v38  ;;  %v4289_v29 = vld [vmem:[#allocation7 + $0xe48] sm:$0xff]  ;;  %14343 = vst [vmem:[#allocation211_spill] sm:$0xff] %v11152_v31 }
 0x328   :  { %7047 = vmatprep.subr.bf16.mxu0 %v11120_v18  ;;  %7211 = vmatprep.subr.bf16.mxu1 %v11122_v39  ;;  %14340 = vst [vmem:[#allocation208_spill] sm:$0xff] %v11144_v41  ;;  %v4288_v39 = vld [vmem:[#allocation7 + $0xe40] sm:$0xff]  ;;  %v4293_v45 = vld [vmem:[#allocation7 + $0xe68] sm:$0xff]  ;;  %14342 = vst [vmem:[#allocation210_spill] sm:$0xff] %v11150_v53 }
 0x329   :  { %v4292_v18 = vld [vmem:[#allocation7 + $0xe60] sm:$0xff]  ;;  %v11158_v42 = vcombine.high %v4289_v29, %v4293_v45  ;;  %v11164_v16 = vcombine.low %v4289_v29, %v4293_v45 }
 0x32a   :  { %v11156_v10 = vcombine.high %v4288_v39, %v4292_v18  ;;  %v11162_v8 = vcombine.low %v4288_v39, %v4292_v18 }
 0x32b   :  { %7048 = vmatpush1.bf16.msra.mxu0 %v11126_v63  ;;  %7212 = vmatpush1.bf16.msra.mxu1 %v11128_v51  ;;  %14345 = vst [vmem:[#allocation213_spill] sm:$0xff] %v11158_v42  ;;  %v4297_v51 = vld [vmem:[#allocation7 + $0xe88] sm:$0xff]  ;;  %14347 = vst [vmem:[#allocation215_spill] sm:$0xff] %v11164_v16 }
 0x32c   :  { %7049 = vmatprep.subr.bf16.mxu0 %v11132_v7  ;;  %7213 = vmatprep.subr.bf16.mxu1 %v11134_v22  ;;  %14344 = vst [vmem:[#allocation212_spill] sm:$0xff] %v11156_v10  ;;  %v4296_v22 = vld [vmem:[#allocation7 + $0xe80] sm:$0xff]  ;;  %v4301_v63 = vld [vmem:[#allocation7 + $0xea8] sm:$0xff]  ;;  %14346 = vst [vmem:[#allocation214_spill] sm:$0xff] %v11162_v8 }
 0x32d   :  { %v4300_v7 = vld [vmem:[#allocation7 + $0xea0] sm:$0xff]  ;;  %v11170_v43 = vcombine.high %v4297_v51, %v4301_v63  ;;  %v11176_v45 = vcombine.low %v4297_v51, %v4301_v63 }
 0x32e   :  { %v11168_v54 = vcombine.high %v4296_v22, %v4300_v7  ;;  %v11174_v18 = vcombine.low %v4296_v22, %v4300_v7 }
 0x32f   :  { %7050 = vmatpush1.bf16.msra.mxu0 %v11138_v32  ;;  %7214 = vmatpush1.bf16.msra.mxu1 %v11140_v37  ;;  %14349 = vst [vmem:[#allocation217_spill] sm:$0xff] %v11170_v43  ;;  %v4305_v37 = vld [vmem:[#allocation7 + $0xec8] sm:$0xff]  ;;  %14351 = vst [vmem:[#allocation219_spill] sm:$0xff] %v11176_v45 }
 0x330   :  { %7051 = vmatprep.subr.bf16.mxu0 %v11144_v41  ;;  %7215 = vmatprep.subr.bf16.mxu1 %v11146_v38  ;;  %14348 = vst [vmem:[#allocation216_spill] sm:$0xff] %v11168_v54  ;;  %v4304_v38 = vld [vmem:[#allocation7 + $0xec0] sm:$0xff]  ;;  %v4309_v32 = vld [vmem:[#allocation7 + $0xee8] sm:$0xff]  ;;  %14350 = vst [vmem:[#allocation218_spill] sm:$0xff] %v11174_v18 }
 0x331   :  { %v4308_v41 = vld [vmem:[#allocation7 + $0xee0] sm:$0xff]  ;;  %v11182_v39 = vcombine.high %v4305_v37, %v4309_v32  ;;  %v11188_v63 = vcombine.low %v4305_v37, %v4309_v32 }
 0x332   :  { %v11180_v29 = vcombine.high %v4304_v38, %v4308_v41  ;;  %v11186_v7 = vcombine.low %v4304_v38, %v4308_v41 }
 0x333   :  { %7052 = vmatpush1.bf16.msra.mxu0 %v11150_v53  ;;  %7216 = vmatpush1.bf16.msra.mxu1 %v11152_v31  ;;  %14353 = vst [vmem:[#allocation221_spill] sm:$0xff] %v11182_v39  ;;  %v4313_v31 = vld [vmem:[#allocation7 + $0xf08] sm:$0xff]  ;;  %14355 = vst [vmem:[#allocation223_spill] sm:$0xff] %v11188_v63 }
 0x334   :  { %7053 = vmatprep.subr.bf16.mxu0 %v11156_v10  ;;  %7217 = vmatprep.subr.bf16.mxu1 %v11158_v42  ;;  %14352 = vst [vmem:[#allocation220_spill] sm:$0xff] %v11180_v29  ;;  %v4312_v42 = vld [vmem:[#allocation7 + $0xf00] sm:$0xff]  ;;  %v4317_v53 = vld [vmem:[#allocation7 + $0xf28] sm:$0xff]  ;;  %14354 = vst [vmem:[#allocation222_spill] sm:$0xff] %v11186_v7 }
 0x335   :  { %v4316_v10 = vld [vmem:[#allocation7 + $0xf20] sm:$0xff]  ;;  %v11194_v22 = vcombine.high %v4313_v31, %v4317_v53  ;;  %v11200_v32 = vcombine.low %v4313_v31, %v4317_v53 }
 0x336   :  { %v11192_v51 = vcombine.high %v4312_v42, %v4316_v10  ;;  %v11198_v41 = vcombine.low %v4312_v42, %v4316_v10 }
 0x337   :  { %7054 = vmatpush1.bf16.msra.mxu0 %v11162_v8  ;;  %7218 = vmatpush1.bf16.msra.mxu1 %v11164_v16  ;;  %14357 = vst [vmem:[#allocation225_spill] sm:$0xff] %v11194_v22  ;;  %v4321_v16 = vld [vmem:[#allocation7 + $0xf48] sm:$0xff]  ;;  %14359 = vst [vmem:[#allocation227_spill] sm:$0xff] %v11200_v32 }
 0x338   :  { %7055 = vmatprep.subr.bf16.mxu0 %v11168_v54  ;;  %7219 = vmatprep.subr.bf16.mxu1 %v11170_v43  ;;  %14356 = vst [vmem:[#allocation224_spill] sm:$0xff] %v11192_v51  ;;  %v4320_v43 = vld [vmem:[#allocation7 + $0xf40] sm:$0xff]  ;;  %v4325_v8 = vld [vmem:[#allocation7 + $0xf68] sm:$0xff]  ;;  %14358 = vst [vmem:[#allocation226_spill] sm:$0xff] %v11198_v41 }
 0x339   :  { %v4324_v54 = vld [vmem:[#allocation7 + $0xf60] sm:$0xff]  ;;  %v11206_v38 = vcombine.high %v4321_v16, %v4325_v8  ;;  %v11212_v53 = vcombine.low %v4321_v16, %v4325_v8 }
 0x33a   :  { %v11204_v37 = vcombine.high %v4320_v43, %v4324_v54  ;;  %v11210_v10 = vcombine.low %v4320_v43, %v4324_v54 }
 0x33b   :  { %7056 = vmatpush1.bf16.msra.mxu0 %v11174_v18  ;;  %7220 = vmatpush1.bf16.msra.mxu1 %v11176_v45  ;;  %14361 = vst [vmem:[#allocation229_spill] sm:$0xff] %v11206_v38  ;;  %v4329_v45 = vld [vmem:[#allocation7 + $0xf88] sm:$0xff]  ;;  %14363 = vst [vmem:[#allocation231_spill] sm:$0xff] %v11212_v53 }
 0x33c   :  { %7057 = vmatprep.subr.bf16.mxu0 %v11180_v29  ;;  %7221 = vmatprep.subr.bf16.mxu1 %v11182_v39  ;;  %14360 = vst [vmem:[#allocation228_spill] sm:$0xff] %v11204_v37  ;;  %v4328_v39 = vld [vmem:[#allocation7 + $0xf80] sm:$0xff]  ;;  %v4333_v18 = vld [vmem:[#allocation7 + $0xfa8] sm:$0xff]  ;;  %14362 = vst [vmem:[#allocation230_spill] sm:$0xff] %v11210_v10 }
 0x33d   :  { %v4332_v29 = vld [vmem:[#allocation7 + $0xfa0] sm:$0xff]  ;;  %v11218_v42 = vcombine.high %v4329_v45, %v4333_v18  ;;  %v11224_v8 = vcombine.low %v4329_v45, %v4333_v18 }
 0x33e   :  { %v11216_v31 = vcombine.high %v4328_v39, %v4332_v29  ;;  %v11222_v54 = vcombine.low %v4328_v39, %v4332_v29 }
 0x33f   :  { %7058 = vmatpush1.bf16.msra.mxu0 %v11186_v7  ;;  %7222 = vmatpush1.bf16.msra.mxu1 %v11188_v63  ;;  %14365 = vst [vmem:[#allocation233_spill] sm:$0xff] %v11218_v42  ;;  %v4337_v63 = vld [vmem:[#allocation7 + $0xfc8] sm:$0xff]  ;;  %14367 = vst [vmem:[#allocation235_spill] sm:$0xff] %v11224_v8 }
 0x340   :  { %7059 = vmatprep.subr.bf16.mxu0 %v11192_v51  ;;  %7223 = vmatprep.subr.bf16.mxu1 %v11194_v22  ;;  %14364 = vst [vmem:[#allocation232_spill] sm:$0xff] %v11216_v31  ;;  %v4336_v22 = vld [vmem:[#allocation7 + $0xfc0] sm:$0xff]  ;;  %v4341_v7 = vld [vmem:[#allocation7 + $0xfe8] sm:$0xff]  ;;  %14366 = vst [vmem:[#allocation234_spill] sm:$0xff] %v11222_v54 }
 0x341   :  { %v4340_v51 = vld [vmem:[#allocation7 + $0xfe0] sm:$0xff]  ;;  %v11230_v43 = vcombine.high %v4337_v63, %v4341_v7  ;;  %v11236_v18 = vcombine.low %v4337_v63, %v4341_v7  ;;  %v11250_v7 = vpack.c.bf16 %v11042_v20, %v11042_v20 }
 0x342   :  { %v11228_v16 = vcombine.high %v4336_v22, %v4340_v51  ;;  %v11234_v29 = vcombine.low %v4336_v22, %v4340_v51 }
 0x343   :  { %7060 = vmatpush1.bf16.msra.mxu0 %v11198_v41  ;;  %7224 = vmatpush1.bf16.msra.mxu1 %v11200_v32  ;;  %14369 = vst [vmem:[#allocation237_spill] sm:$0xff] %v11230_v43  ;;  %v3835_v32 = vld [vmem:[#allocation7 + $0x18] sm:$0xff]  ;;  %14371 = vst [vmem:[#allocation239_spill] sm:$0xff] %v11236_v18 }
 0x344   :  { %7061 = vmatprep.subr.bf16.mxu0 %v11204_v37  ;;  %7225 = vmatprep.subr.bf16.mxu1 %v11206_v38  ;;  %14368 = vst [vmem:[#allocation236_spill] sm:$0xff] %v11228_v16  ;;  %v3834_v38 = vld [vmem:[#allocation7 + $0x10] sm:$0xff]  ;;  %v3839_v41 = vld [vmem:[#allocation7 + $0x38] sm:$0xff]  ;;  %14370 = vst [vmem:[#allocation238_spill] sm:$0xff] %v11234_v29 }
 0x345   :  { %v3838_v37 = vld [vmem:[#allocation7 + $0x30] sm:$0xff]  ;;  %v11242_v39 = vcombine.high %v3835_v32, %v3839_v41  ;;  %v11253_v63 = vcombine.low %v3835_v32, %v3839_v41 }
 0x346   :  { %v11240_v45 = vcombine.high %v3834_v38, %v3838_v37  ;;  %v11246_v51 = vcombine.low %v3834_v38, %v3838_v37  ;;  %v3851_v37 = vld [vmem:[#allocation7 + $0x98] sm:$0xff] }
 0x347   :  { %7062 = vmatpush1.bf16.msra.mxu0 %v11210_v10  ;;  %7226 = vmatpush1.bf16.msra.mxu1 %v11212_v53  ;;  %14373 = vst [vmem:[#allocation241_spill] sm:$0xff] %v11242_v39  ;;  %v3843_v53 = vld [vmem:[#allocation7 + $0x58] sm:$0xff]  ;;  %14375 = vst [vmem:[#allocation243_spill] sm:$0xff] %v11253_v63 }
 0x348   :  { %7063 = vmatprep.subr.bf16.mxu0 %v11216_v31  ;;  %7227 = vmatprep.subr.bf16.mxu1 %v11218_v42  ;;  %14372 = vst [vmem:[#allocation240_spill] sm:$0xff] %v11240_v45  ;;  %v3842_v42 = vld [vmem:[#allocation7 + $0x50] sm:$0xff]  ;;  %v3847_v10 = vld [vmem:[#allocation7 + $0x78] sm:$0xff]  ;;  %14374 = vst [vmem:[#allocation242_spill] sm:$0xff] %v11246_v51 }
 0x349   :  { %v3846_v31 = vld [vmem:[#allocation7 + $0x70] sm:$0xff]  ;;  %v3855_v38 = vld [vmem:[#allocation7 + $0xb8] sm:$0xff]  ;;  %v11268_v41 = vcombine.low %v3843_v53, %v3847_v10 }
 0x34a   :  { %v11256_v22 = vcombine.high %v3842_v42, %v3846_v31  ;;  %v11264_v20 = vcombine.low %v3842_v42, %v3846_v31  ;;  %v3866_v42 = vld [vmem:[#allocation7 + $0x110] sm:$0xff] }
 0x34b   :  { %7064 = vmatpush1.bf16.msra.mxu0 %v11222_v54  ;;  %7228 = vmatpush1.bf16.msra.mxu1 %v11224_v8  ;;  %14379 = vst [vmem:[#allocation247_spill] sm:$0xff] %v11268_v41  ;;  %v3863_v8 = vld [vmem:[#allocation7 + $0xf8] sm:$0xff] }
 0x34c   :  { %7065 = vmatprep.subr.bf16.mxu0 %v11228_v16  ;;  %7229 = vmatprep.subr.bf16.mxu1 %v11230_v43  ;;  %14376 = vst [vmem:[#allocation244_spill] sm:$0xff] %v11256_v22  ;;  %v11258_v43 = vcombine.high %v3843_v53, %v3847_v10  ;;  %v3850_v16 = vld [vmem:[#allocation7 + $0x90] sm:$0xff]  ;;  %14378 = vst [vmem:[#allocation246_spill] sm:$0xff] %v11264_v20 }
 0x34e   :  { %14377 = vst [vmem:[#allocation245_spill] sm:$0xff] %v11258_v43 }
 0x34f   :  { %7066 = vmatpush1.bf16.msra.mxu0 %v11234_v29  ;;  %7230 = vmatpush1.bf16.msra.mxu1 %v11236_v18  ;;  %v3854_v29 = vld [vmem:[#allocation7 + $0xb0] sm:$0xff]  ;;  %v3859_v18 = vld [vmem:[#allocation7 + $0xd8] sm:$0xff] }
 0x350   :  { %7240 = vmatprep.subr.bf16.mxu0 %v11240_v45  ;;  %7404 = vmatprep.subr.bf16.mxu1 %v11242_v39  ;;  %v11270_v32 = vcombine.high %v3850_v16, %v3854_v29  ;;  %v11274_v39 = vcombine.high %v3851_v37, %v3855_v38  ;;  %v3858_v45 = vld [vmem:[#allocation7 + $0xd0] sm:$0xff]  ;;  %v11277_v31 = vcombine.low %v3850_v16, %v3854_v29 }
 0x351   :  { %v11286_v53 = vcombine.high %v3859_v18, %v3863_v8  ;;  %v11293_v29 = vcombine.low %v3859_v18, %v3863_v8 }
 0x352   :  { %7068 = vmatmul.mubr.bf16.vlgmr.msra.gmra.mrb[8].mxu0 %v11250_v7  ;;  %7232 = vmatmul.mubr.bf16.vlgmr.msra.gmra.mrb[8].mxu1 %v11250_v7  ;;  %14380 = vst [vmem:[#allocation248_spill] sm:$0xff] %v11270_v32  ;;  %14381 = vst [vmem:[#allocation249_spill] sm:$0xff] %v11274_v39 }
 0x353   :  { %7241 = vmatpush1.bf16.msra.mxu0 %v11246_v51  ;;  %7272 = vmatprep.mubr.bf16.mxu0 %v10448_v14  ;;  %v3862_v51 = vld [vmem:[#allocation7 + $0xf0] sm:$0xff]  ;;  %14382 = vst [vmem:[#allocation250_spill] sm:$0xff] %v11277_v31  ;;  %14385 = vst [vmem:[#allocation253_spill] sm:$0xff] %v11286_v53 }
 0x354   :  { %7405 = vmatpush1.bf16.msra.mxu1 %v11253_v63  ;;  %7436 = vmatprep.mubr.bf16.mxu1 %v10448_v14  ;;  %v11281_v14 = vcombine.low %v3851_v37, %v3855_v38  ;;  %v11283_v10 = vcombine.high %v3858_v45, %v3862_v51  ;;  %v3871_v63 = vld [vmem:[#allocation7 + $0x138] sm:$0xff]  ;;  %v11289_v16 = vcombine.low %v3858_v45, %v3862_v51 }
 0x355   :  { %7242 = vmatprep.subr.bf16.mxu0 %v11256_v22  ;;  %7406 = vmatprep.subr.bf16.mxu1 %v11258_v43  ;;  %v3870_v43 = vld [vmem:[#allocation7 + $0x130] sm:$0xff]  ;;  %v3867_v22 = vld [vmem:[#allocation7 + $0x118] sm:$0xff]  ;;  %14387 = vst [vmem:[#allocation255_spill] sm:$0xff] %v11293_v29 }
 0x356   :  { %14383 = vst [vmem:[#allocation251_spill] sm:$0xff] %v11281_v14  ;;  %14384 = vst [vmem:[#allocation252_spill] sm:$0xff] %v11283_v10  ;;  %v11295_v37 = vcombine.high %v3866_v42, %v3870_v43  ;;  %v11298_v38 = vcombine.high %v3867_v22, %v3871_v63  ;;  %v11301_v45 = vcombine.low %v3866_v42, %v3870_v43 }
 0x357   :  { %7243 = vmatpush1.bf16.msra.mxu0 %v11264_v20  ;;  %14386 = vst [vmem:[#allocation254_spill] sm:$0xff] %v11289_v16  ;;  %v3879_v20 = vld [vmem:[#allocation7 + $0x178] sm:$0xff]  ;;  %v11305_v8 = vcombine.low %v3867_v22, %v3871_v63 }
 0x358   :  { %7407 = vmatpush1.bf16.msra.mxu1 %v11268_v41  ;;  %7244 = vmatprep.subr.bf16.mxu0 %v11270_v32  ;;  %14388 = vst [vmem:[#allocation256_spill] sm:$0xff] %v11295_v37  ;;  %14389 = vst [vmem:[#allocation257_spill] sm:$0xff] %v11298_v38  ;;  %v3878_v32 = vld [vmem:[#allocation7 + $0x170] sm:$0xff]  ;;  %v3875_v41 = vld [vmem:[#allocation7 + $0x158] sm:$0xff] }
 0x359   :  { %7408 = vmatprep.subr.bf16.mxu1 %v11274_v39  ;;  %v3874_v39 = vld [vmem:[#allocation7 + $0x150] sm:$0xff]  ;;  %14390 = vst [vmem:[#allocation258_spill] sm:$0xff] %v11301_v45  ;;  %14391 = vst [vmem:[#allocation259_spill] sm:$0xff] %v11305_v8  ;;  %v11310_v51 = vcombine.high %v3875_v41, %v3879_v20  ;;  %v11317_v63 = vcombine.low %v3875_v41, %v3879_v20 }
 0x35a   :  { %v11307_v18 = vcombine.high %v3874_v39, %v3878_v32  ;;  %v11313_v43 = vcombine.low %v3874_v39, %v3878_v32 }
 0x35b   :  { %7245 = vmatpush1.bf16.msra.mxu0 %v11277_v31  ;;  %14393 = vst [vmem:[#allocation261_spill] sm:$0xff] %v11310_v51  ;;  %v3887_v31 = vld [vmem:[#allocation7 + $0x1b8] sm:$0xff]  ;;  %14395 = vst [vmem:[#allocation263_spill] sm:$0xff] %v11317_v63 }
 0x35c   :  { %7409 = vmatpush1.bf16.msra.mxu1 %v11281_v14  ;;  %7246 = vmatprep.subr.bf16.mxu0 %v11283_v10  ;;  %14392 = vst [vmem:[#allocation260_spill] sm:$0xff] %v11307_v18  ;;  %v3886_v10 = vld [vmem:[#allocation7 + $0x1b0] sm:$0xff]  ;;  %v3883_v14 = vld [vmem:[#allocation7 + $0x198] sm:$0xff]  ;;  %14394 = vst [vmem:[#allocation262_spill] sm:$0xff] %v11313_v43 }
 0x35d   :  { %7410 = vmatprep.subr.bf16.mxu1 %v11286_v53  ;;  %v3882_v53 = vld [vmem:[#allocation7 + $0x190] sm:$0xff]  ;;  %v11322_v42 = vcombine.high %v3883_v14, %v3887_v31  ;;  %v11329_v20 = vcombine.low %v3883_v14, %v3887_v31 }
 0x35e   :  { %v11319_v22 = vcombine.high %v3882_v53, %v3886_v10  ;;  %v11325_v39 = vcombine.low %v3882_v53, %v3886_v10 }
 0x35f   :  { %7247 = vmatpush1.bf16.msra.mxu0 %v11289_v16  ;;  %14397 = vst [vmem:[#allocation265_spill] sm:$0xff] %v11322_v42  ;;  %v3895_v16 = vld [vmem:[#allocation7 + $0x1f8] sm:$0xff]  ;;  %14399 = vst [vmem:[#allocation267_spill] sm:$0xff] %v11329_v20 }
 0x360   :  { %7411 = vmatpush1.bf16.msra.mxu1 %v11293_v29  ;;  %7248 = vmatprep.subr.bf16.mxu0 %v11295_v37  ;;  %14396 = vst [vmem:[#allocation264_spill] sm:$0xff] %v11319_v22  ;;  %v3894_v37 = vld [vmem:[#allocation7 + $0x1f0] sm:$0xff]  ;;  %v3891_v29 = vld [vmem:[#allocation7 + $0x1d8] sm:$0xff]  ;;  %14398 = vst [vmem:[#allocation266_spill] sm:$0xff] %v11325_v39 }
 0x361   :  { %7412 = vmatprep.subr.bf16.mxu1 %v11298_v38  ;;  %v3890_v38 = vld [vmem:[#allocation7 + $0x1d0] sm:$0xff]  ;;  %v11334_v32 = vcombine.high %v3891_v29, %v3895_v16  ;;  %v11341_v31 = vcombine.low %v3891_v29, %v3895_v16 }
 0x362   :  { %v11331_v41 = vcombine.high %v3890_v38, %v3894_v37  ;;  %v11337_v10 = vcombine.low %v3890_v38, %v3894_v37 }
 0x363   :  { %7249 = vmatpush1.bf16.msra.mxu0 %v11301_v45  ;;  %14401 = vst [vmem:[#allocation269_spill] sm:$0xff] %v11334_v32  ;;  %v3903_v45 = vld [vmem:[#allocation7 + $0x238] sm:$0xff]  ;;  %14403 = vst [vmem:[#allocation271_spill] sm:$0xff] %v11341_v31 }
 0x364   :  { %7413 = vmatpush1.bf16.msra.mxu1 %v11305_v8  ;;  %7250 = vmatprep.subr.bf16.mxu0 %v11307_v18  ;;  %14400 = vst [vmem:[#allocation268_spill] sm:$0xff] %v11331_v41  ;;  %v3902_v18 = vld [vmem:[#allocation7 + $0x230] sm:$0xff]  ;;  %v3899_v8 = vld [vmem:[#allocation7 + $0x218] sm:$0xff]  ;;  %14402 = vst [vmem:[#allocation270_spill] sm:$0xff] %v11337_v10 }
 0x365   :  { %7414 = vmatprep.subr.bf16.mxu1 %v11310_v51  ;;  %v3898_v51 = vld [vmem:[#allocation7 + $0x210] sm:$0xff]  ;;  %v11346_v53 = vcombine.high %v3899_v8, %v3903_v45  ;;  %v11353_v16 = vcombine.low %v3899_v8, %v3903_v45 }
 0x366   :  { %v11343_v14 = vcombine.high %v3898_v51, %v3902_v18  ;;  %v11349_v37 = vcombine.low %v3898_v51, %v3902_v18 }
 0x367   :  { %7251 = vmatpush1.bf16.msra.mxu0 %v11313_v43  ;;  %14405 = vst [vmem:[#allocation273_spill] sm:$0xff] %v11346_v53  ;;  %v3911_v43 = vld [vmem:[#allocation7 + $0x278] sm:$0xff]  ;;  %14407 = vst [vmem:[#allocation275_spill] sm:$0xff] %v11353_v16 }
 0x368   :  { %7415 = vmatpush1.bf16.msra.mxu1 %v11317_v63  ;;  %7252 = vmatprep.subr.bf16.mxu0 %v11319_v22  ;;  %14404 = vst [vmem:[#allocation272_spill] sm:$0xff] %v11343_v14  ;;  %v3910_v22 = vld [vmem:[#allocation7 + $0x270] sm:$0xff]  ;;  %v3907_v63 = vld [vmem:[#allocation7 + $0x258] sm:$0xff]  ;;  %14406 = vst [vmem:[#allocation274_spill] sm:$0xff] %v11349_v37 }
 0x369   :  { %7416 = vmatprep.subr.bf16.mxu1 %v11322_v42  ;;  %v3906_v42 = vld [vmem:[#allocation7 + $0x250] sm:$0xff]  ;;  %v11358_v38 = vcombine.high %v3907_v63, %v3911_v43  ;;  %v11365_v45 = vcombine.low %v3907_v63, %v3911_v43 }
 0x36a   :  { %v11355_v29 = vcombine.high %v3906_v42, %v3910_v22  ;;  %v11361_v18 = vcombine.low %v3906_v42, %v3910_v22 }
 0x36b   :  { %7253 = vmatpush1.bf16.msra.mxu0 %v11325_v39  ;;  %14409 = vst [vmem:[#allocation277_spill] sm:$0xff] %v11358_v38  ;;  %v3919_v39 = vld [vmem:[#allocation7 + $0x2b8] sm:$0xff]  ;;  %14411 = vst [vmem:[#allocation279_spill] sm:$0xff] %v11365_v45 }
 0x36c   :  { %7417 = vmatpush1.bf16.msra.mxu1 %v11329_v20  ;;  %7254 = vmatprep.subr.bf16.mxu0 %v11331_v41  ;;  %14408 = vst [vmem:[#allocation276_spill] sm:$0xff] %v11355_v29  ;;  %v3918_v41 = vld [vmem:[#allocation7 + $0x2b0] sm:$0xff]  ;;  %v3915_v20 = vld [vmem:[#allocation7 + $0x298] sm:$0xff]  ;;  %14410 = vst [vmem:[#allocation278_spill] sm:$0xff] %v11361_v18 }
 0x36d   :  { %7418 = vmatprep.subr.bf16.mxu1 %v11334_v32  ;;  %v3914_v32 = vld [vmem:[#allocation7 + $0x290] sm:$0xff]  ;;  %v11370_v51 = vcombine.high %v3915_v20, %v3919_v39  ;;  %v11377_v43 = vcombine.low %v3915_v20, %v3919_v39 }
 0x36e   :  { %v11367_v8 = vcombine.high %v3914_v32, %v3918_v41  ;;  %v11373_v22 = vcombine.low %v3914_v32, %v3918_v41 }
 0x36f   :  { %7255 = vmatpush1.bf16.msra.mxu0 %v11337_v10  ;;  %14413 = vst [vmem:[#allocation281_spill] sm:$0xff] %v11370_v51  ;;  %v3927_v10 = vld [vmem:[#allocation7 + $0x2f8] sm:$0xff]  ;;  %14415 = vst [vmem:[#allocation283_spill] sm:$0xff] %v11377_v43 }
 0x370   :  { %7419 = vmatpush1.bf16.msra.mxu1 %v11341_v31  ;;  %7256 = vmatprep.subr.bf16.mxu0 %v11343_v14  ;;  %14412 = vst [vmem:[#allocation280_spill] sm:$0xff] %v11367_v8  ;;  %v3926_v14 = vld [vmem:[#allocation7 + $0x2f0] sm:$0xff]  ;;  %v3923_v31 = vld [vmem:[#allocation7 + $0x2d8] sm:$0xff]  ;;  %14414 = vst [vmem:[#allocation282_spill] sm:$0xff] %v11373_v22 }
 0x371   :  { %7420 = vmatprep.subr.bf16.mxu1 %v11346_v53  ;;  %v3922_v53 = vld [vmem:[#allocation7 + $0x2d0] sm:$0xff]  ;;  %v11382_v42 = vcombine.high %v3923_v31, %v3927_v10  ;;  %v11389_v39 = vcombine.low %v3923_v31, %v3927_v10 }
 0x372   :  { %v11379_v63 = vcombine.high %v3922_v53, %v3926_v14  ;;  %v11385_v41 = vcombine.low %v3922_v53, %v3926_v14 }
 0x373   :  { %7257 = vmatpush1.bf16.msra.mxu0 %v11349_v37  ;;  %14417 = vst [vmem:[#allocation285_spill] sm:$0xff] %v11382_v42  ;;  %v3935_v37 = vld [vmem:[#allocation7 + $0x338] sm:$0xff]  ;;  %14419 = vst [vmem:[#allocation287_spill] sm:$0xff] %v11389_v39 }
 0x374   :  { %7421 = vmatpush1.bf16.msra.mxu1 %v11353_v16  ;;  %7258 = vmatprep.subr.bf16.mxu0 %v11355_v29  ;;  %14416 = vst [vmem:[#allocation284_spill] sm:$0xff] %v11379_v63  ;;  %v3934_v29 = vld [vmem:[#allocation7 + $0x330] sm:$0xff]  ;;  %v3931_v16 = vld [vmem:[#allocation7 + $0x318] sm:$0xff]  ;;  %14418 = vst [vmem:[#allocation286_spill] sm:$0xff] %v11385_v41 }
 0x375   :  { %7422 = vmatprep.subr.bf16.mxu1 %v11358_v38  ;;  %v3930_v38 = vld [vmem:[#allocation7 + $0x310] sm:$0xff]  ;;  %v11394_v32 = vcombine.high %v3931_v16, %v3935_v37  ;;  %v11401_v10 = vcombine.low %v3931_v16, %v3935_v37 }
 0x376   :  { %v11391_v20 = vcombine.high %v3930_v38, %v3934_v29  ;;  %v11397_v14 = vcombine.low %v3930_v38, %v3934_v29 }
 0x377   :  { %7259 = vmatpush1.bf16.msra.mxu0 %v11361_v18  ;;  %14421 = vst [vmem:[#allocation289_spill] sm:$0xff] %v11394_v32  ;;  %v3943_v18 = vld [vmem:[#allocation7 + $0x378] sm:$0xff]  ;;  %14423 = vst [vmem:[#allocation291_spill] sm:$0xff] %v11401_v10 }
 0x378   :  { %7423 = vmatpush1.bf16.msra.mxu1 %v11365_v45  ;;  %7260 = vmatprep.subr.bf16.mxu0 %v11367_v8  ;;  %14420 = vst [vmem:[#allocation288_spill] sm:$0xff] %v11391_v20  ;;  %v3942_v8 = vld [vmem:[#allocation7 + $0x370] sm:$0xff]  ;;  %v3939_v45 = vld [vmem:[#allocation7 + $0x358] sm:$0xff]  ;;  %14422 = vst [vmem:[#allocation290_spill] sm:$0xff] %v11397_v14 }
 0x379   :  { %7424 = vmatprep.subr.bf16.mxu1 %v11370_v51  ;;  %v3938_v51 = vld [vmem:[#allocation7 + $0x350] sm:$0xff]  ;;  %v11406_v53 = vcombine.high %v3939_v45, %v3943_v18  ;;  %v11413_v37 = vcombine.low %v3939_v45, %v3943_v18 }
 0x37a   :  { %v11403_v31 = vcombine.high %v3938_v51, %v3942_v8  ;;  %v11409_v29 = vcombine.low %v3938_v51, %v3942_v8 }
 0x37b   :  { %7261 = vmatpush1.bf16.msra.mxu0 %v11373_v22  ;;  %14425 = vst [vmem:[#allocation293_spill] sm:$0xff] %v11406_v53  ;;  %v3951_v22 = vld [vmem:[#allocation7 + $0x3b8] sm:$0xff]  ;;  %14427 = vst [vmem:[#allocation295_spill] sm:$0xff] %v11413_v37 }
 0x37c   :  { %7425 = vmatpush1.bf16.msra.mxu1 %v11377_v43  ;;  %7262 = vmatprep.subr.bf16.mxu0 %v11379_v63  ;;  %14424 = vst [vmem:[#allocation292_spill] sm:$0xff] %v11403_v31  ;;  %v3950_v63 = vld [vmem:[#allocation7 + $0x3b0] sm:$0xff]  ;;  %v3947_v43 = vld [vmem:[#allocation7 + $0x398] sm:$0xff]  ;;  %14426 = vst [vmem:[#allocation294_spill] sm:$0xff] %v11409_v29 }
 0x37d   :  { %7426 = vmatprep.subr.bf16.mxu1 %v11382_v42  ;;  %v3946_v42 = vld [vmem:[#allocation7 + $0x390] sm:$0xff]  ;;  %v11418_v38 = vcombine.high %v3947_v43, %v3951_v22  ;;  %v11425_v18 = vcombine.low %v3947_v43, %v3951_v22 }
 0x37e   :  { %v11415_v16 = vcombine.high %v3946_v42, %v3950_v63  ;;  %v11421_v8 = vcombine.low %v3946_v42, %v3950_v63 }
 0x37f   :  { %7263 = vmatpush1.bf16.msra.mxu0 %v11385_v41  ;;  %14429 = vst [vmem:[#allocation297_spill] sm:$0xff] %v11418_v38  ;;  %v3959_v41 = vld [vmem:[#allocation7 + $0x3f8] sm:$0xff]  ;;  %14431 = vst [vmem:[#allocation299_spill] sm:$0xff] %v11425_v18 }
 0x380   :  { %7427 = vmatpush1.bf16.msra.mxu1 %v11389_v39  ;;  %7264 = vmatprep.subr.bf16.mxu0 %v11391_v20  ;;  %14428 = vst [vmem:[#allocation296_spill] sm:$0xff] %v11415_v16  ;;  %v3958_v20 = vld [vmem:[#allocation7 + $0x3f0] sm:$0xff]  ;;  %v3955_v39 = vld [vmem:[#allocation7 + $0x3d8] sm:$0xff]  ;;  %14430 = vst [vmem:[#allocation298_spill] sm:$0xff] %v11421_v8 }
 0x381   :  { %7428 = vmatprep.subr.bf16.mxu1 %v11394_v32  ;;  %v3954_v32 = vld [vmem:[#allocation7 + $0x3d0] sm:$0xff]  ;;  %v11430_v51 = vcombine.high %v3955_v39, %v3959_v41  ;;  %v11437_v22 = vcombine.low %v3955_v39, %v3959_v41 }
 0x382   :  { %v11427_v45 = vcombine.high %v3954_v32, %v3958_v20  ;;  %v11433_v63 = vcombine.low %v3954_v32, %v3958_v20  ;;  %v3971_v20 = vld [vmem:[#allocation7 + $0x458] sm:$0xff] }
 0x383   :  { %7265 = vmatpush1.bf16.msra.mxu0 %v11397_v14  ;;  %14433 = vst [vmem:[#allocation301_spill] sm:$0xff] %v11430_v51  ;;  %v3967_v14 = vld [vmem:[#allocation7 + $0x438] sm:$0xff]  ;;  %14435 = vst [vmem:[#allocation303_spill] sm:$0xff] %v11437_v22 }
 0x384   :  { %7429 = vmatpush1.bf16.msra.mxu1 %v11401_v10  ;;  %7266 = vmatprep.subr.bf16.mxu0 %v11403_v31  ;;  %14432 = vst [vmem:[#allocation300_spill] sm:$0xff] %v11427_v45  ;;  %v3966_v31 = vld [vmem:[#allocation7 + $0x430] sm:$0xff]  ;;  %v3963_v10 = vld [vmem:[#allocation7 + $0x418] sm:$0xff]  ;;  %14434 = vst [vmem:[#allocation302_spill] sm:$0xff] %v11433_v63 }
 0x385   :  { %7430 = vmatprep.subr.bf16.mxu1 %v11406_v53  ;;  %v3962_v53 = vld [vmem:[#allocation7 + $0x410] sm:$0xff]  ;;  %v11442_v42 = vcombine.high %v3963_v10, %v3967_v14  ;;  %v3975_v32 = vld [vmem:[#allocation7 + $0x478] sm:$0xff]  ;;  %v11449_v41 = vcombine.low %v3963_v10, %v3967_v14 }
 0x386   :  { %v11439_v43 = vcombine.high %v3962_v53, %v3966_v31  ;;  %v11463_v14 = vcombine.low %v3971_v20, %v3975_v32 }
 0x387   :  { %7267 = vmatpush1.bf16.msra.mxu0 %v11409_v29  ;;  %14437 = vst [vmem:[#allocation305_spill] sm:$0xff] %v11442_v42  ;;  %14439 = vst [vmem:[#allocation307_spill] sm:$0xff] %v11449_v41 }
 0x388   :  { %7431 = vmatpush1.bf16.msra.mxu1 %v11413_v37  ;;  %7268 = vmatprep.subr.bf16.mxu0 %v11415_v16  ;;  %14436 = vst [vmem:[#allocation304_spill] sm:$0xff] %v11439_v43  ;;  %v3974_v16 = vld [vmem:[#allocation7 + $0x470] sm:$0xff]  ;;  %v11445_v37 = vcombine.low %v3962_v53, %v3966_v31  ;;  %v3979_v31 = vld [vmem:[#allocation7 + $0x498] sm:$0xff]  ;;  %14443 = vst [vmem:[#allocation311_spill] sm:$0xff] %v11463_v14 }
 0x389   :  { %7432 = vmatprep.subr.bf16.mxu1 %v11418_v38  ;;  %v3970_v38 = vld [vmem:[#allocation7 + $0x450] sm:$0xff]  ;;  %v3983_v53 = vld [vmem:[#allocation7 + $0x4b8] sm:$0xff] }
 0x38a   :  { %14438 = vst [vmem:[#allocation306_spill] sm:$0xff] %v11445_v37  ;;  %v11452_v39 = vcombine.high %v3970_v38, %v3974_v16 }
 0x38b   :  { %7269 = vmatpush1.bf16.msra.mxu0 %v11421_v8  ;;  %v4283_v8 = vld [vmem:[#allocation7 + $0xe18] sm:$0xff] }
 0x38c   :  { %7433 = vmatpush1.bf16.msra.mxu1 %v11425_v18  ;;  %7270 = vmatprep.subr.bf16.mxu0 %v11427_v45  ;;  %14440 = vst [vmem:[#allocation308_spill] sm:$0xff] %v11452_v39  ;;  %v3982_v45 = vld [vmem:[#allocation7 + $0x4b0] sm:$0xff]  ;;  %v11455_v18 = vcombine.high %v3971_v20, %v3975_v32  ;;  %v11477_v20 = vcombine.low %v3979_v31, %v3983_v53 }
 0x38d   :  { %7434 = vmatprep.subr.bf16.mxu1 %v11430_v51  ;;  %v3978_v51 = vld [vmem:[#allocation7 + $0x490] sm:$0xff] }
 0x38e   :  { %14441 = vst [vmem:[#allocation309_spill] sm:$0xff] %v11455_v18  ;;  %v11465_v10 = vcombine.high %v3978_v51, %v3982_v45  ;;  %14447 = vst [vmem:[#allocation315_spill] sm:$0xff] %v11477_v20 }
 0x38f   :  { %7271 = vmatpush1.bf16.msra.mxu0 %v11433_v63  ;;  %v3999_v63 = vld [vmem:[#allocation7 + $0x538] sm:$0xff] }
 0x390   :  { %7435 = vmatpush1.bf16.msra.mxu1 %v11437_v22  ;;  %7281 = vmatprep.subr.bf16.mxu0 %v11439_v43  ;;  %v11459_v22 = vcombine.low %v3970_v38, %v3974_v16  ;;  %14444 = vst [vmem:[#allocation312_spill] sm:$0xff] %v11465_v10  ;;  %v3986_v43 = vld [vmem:[#allocation7 + $0x4d0] sm:$0xff]  ;;  %v3987_v16 = vld [vmem:[#allocation7 + $0x4d8] sm:$0xff] }
 0x391   :  { %7445 = vmatprep.subr.bf16.mxu1 %v11442_v42  ;;  %v11469_v42 = vcombine.high %v3979_v31, %v3983_v53  ;;  %v3991_v38 = vld [vmem:[#allocation7 + $0x4f8] sm:$0xff] }
 0x392   :  { %7273 = vmatmul.mubr.bf16.vlgmr.msra.gmra.mrb[12].mxu0 %v10641_v52  ;;  %14442 = vst [vmem:[#allocation310_spill] sm:$0xff] %v11459_v22  ;;  %v11482_v32 = vcombine.high %v3987_v16, %v3991_v38 }
 0x393   :  { %7437 = vmatmul.mubr.bf16.vlgmr.msra.gmra.mrb[12].mxu1 %v10641_v52  ;;  %7282 = vmatpush1.bf16.msra.mxu0 %v11445_v37  ;;  %14445 = vst [vmem:[#allocation313_spill] sm:$0xff] %v11469_v42  ;;  %v3990_v52 = vld [vmem:[#allocation7 + $0x4f0] sm:$0xff]  ;;  %v11473_v37 = vcombine.low %v3978_v51, %v3982_v45  ;;  %v11489_v51 = vcombine.low %v3987_v16, %v3991_v38 }
 0x394   :  { %7313 = vmatprep.mubr.bf16.mxu0 %v10652_v61  ;;  %7446 = vmatpush1.bf16.msra.mxu1 %v11449_v41  ;;  %14449 = vst [vmem:[#allocation317_spill] sm:$0xff] %v11482_v32  ;;  %v3995_v41 = vld [vmem:[#allocation7 + $0x518] sm:$0xff]  ;;  %v11485_v45 = vcombine.low %v3986_v43, %v3990_v52 }
 0x395   :  { %7477 = vmatprep.mubr.bf16.mxu1 %v10652_v61  ;;  %7283 = vmatprep.subr.bf16.mxu0 %v11452_v39  ;;  %14446 = vst [vmem:[#allocation314_spill] sm:$0xff] %v11473_v37  ;;  %v11479_v61 = vcombine.high %v3986_v43, %v3990_v52  ;;  %v3994_v39 = vld [vmem:[#allocation7 + $0x510] sm:$0xff]  ;;  %14451 = vst [vmem:[#allocation319_spill] sm:$0xff] %v11489_v51  ;;  %v11494_v53 = vcombine.high %v3995_v41, %v3999_v63 }
 0x396   :  { %7447 = vmatprep.subr.bf16.mxu1 %v11455_v18  ;;  %v3998_v18 = vld [vmem:[#allocation7 + $0x530] sm:$0xff]  ;;  %14450 = vst [vmem:[#allocation318_spill] sm:$0xff] %v11485_v45  ;;  %v11501_v52 = vcombine.low %v3995_v41, %v3999_v63 }
 0x397   :  { %7284 = vmatpush1.bf16.msra.mxu0 %v11459_v22  ;;  %14448 = vst [vmem:[#allocation316_spill] sm:$0xff] %v11479_v61  ;;  %v11491_v31 = vcombine.high %v3994_v39, %v3998_v18  ;;  %14453 = vst [vmem:[#allocation321_spill] sm:$0xff] %v11494_v53  ;;  %v4007_v22 = vld [vmem:[#allocation7 + $0x578] sm:$0xff]  ;;  %v11497_v43 = vcombine.low %v3994_v39, %v3998_v18 }
 0x398   :  { %7448 = vmatpush1.bf16.msra.mxu1 %v11463_v14  ;;  %7285 = vmatprep.subr.bf16.mxu0 %v11465_v10  ;;  %v4006_v10 = vld [vmem:[#allocation7 + $0x570] sm:$0xff]  ;;  %v4003_v14 = vld [vmem:[#allocation7 + $0x558] sm:$0xff]  ;;  %14455 = vst [vmem:[#allocation323_spill] sm:$0xff] %v11501_v52 }
 0x399   :  { %7449 = vmatprep.subr.bf16.mxu1 %v11469_v42  ;;  %14452 = vst [vmem:[#allocation320_spill] sm:$0xff] %v11491_v31  ;;  %v4002_v42 = vld [vmem:[#allocation7 + $0x550] sm:$0xff]  ;;  %14454 = vst [vmem:[#allocation322_spill] sm:$0xff] %v11497_v43  ;;  %v11506_v38 = vcombine.high %v4003_v14, %v4007_v22  ;;  %v11513_v63 = vcombine.low %v4003_v14, %v4007_v22 }
 0x39a   :  { %v11503_v16 = vcombine.high %v4002_v42, %v4006_v10  ;;  %v11509_v18 = vcombine.low %v4002_v42, %v4006_v10 }
 0x39b   :  { %7286 = vmatpush1.bf16.msra.mxu0 %v11473_v37  ;;  %14457 = vst [vmem:[#allocation325_spill] sm:$0xff] %v11506_v38  ;;  %v4015_v37 = vld [vmem:[#allocation7 + $0x5b8] sm:$0xff]  ;;  %14459 = vst [vmem:[#allocation327_spill] sm:$0xff] %v11513_v63 }
 0x39c   :  { %7450 = vmatpush1.bf16.msra.mxu1 %v11477_v20  ;;  %7287 = vmatprep.subr.bf16.mxu0 %v11479_v61  ;;  %14456 = vst [vmem:[#allocation324_spill] sm:$0xff] %v11503_v16  ;;  %v4014_v61 = vld [vmem:[#allocation7 + $0x5b0] sm:$0xff]  ;;  %v4011_v20 = vld [vmem:[#allocation7 + $0x598] sm:$0xff]  ;;  %14458 = vst [vmem:[#allocation326_spill] sm:$0xff] %v11509_v18 }
 0x39d   :  { %7451 = vmatprep.subr.bf16.mxu1 %v11482_v32  ;;  %v4010_v32 = vld [vmem:[#allocation7 + $0x590] sm:$0xff]  ;;  %v11518_v39 = vcombine.high %v4011_v20, %v4015_v37  ;;  %v11525_v22 = vcombine.low %v4011_v20, %v4015_v37 }
 0x39e   :  { %v11515_v41 = vcombine.high %v4010_v32, %v4014_v61  ;;  %v11521_v42 = vcombine.low %v4010_v32, %v4014_v61 }
 0x39f   :  { %7288 = vmatpush1.bf16.msra.mxu0 %v11485_v45  ;;  %14461 = vst [vmem:[#allocation329_spill] sm:$0xff] %v11518_v39  ;;  %v4023_v45 = vld [vmem:[#allocation7 + $0x5f8] sm:$0xff]  ;;  %14463 = vst [vmem:[#allocation331_spill] sm:$0xff] %v11525_v22 }
 0x3a0   :  { %7452 = vmatpush1.bf16.msra.mxu1 %v11489_v51  ;;  %7289 = vmatprep.subr.bf16.mxu0 %v11491_v31  ;;  %14460 = vst [vmem:[#allocation328_spill] sm:$0xff] %v11515_v41  ;;  %v4022_v31 = vld [vmem:[#allocation7 + $0x5f0] sm:$0xff]  ;;  %v4019_v51 = vld [vmem:[#allocation7 + $0x5d8] sm:$0xff]  ;;  %14462 = vst [vmem:[#allocation330_spill] sm:$0xff] %v11521_v42 }
 0x3a1   :  { %7453 = vmatprep.subr.bf16.mxu1 %v11494_v53  ;;  %v4018_v53 = vld [vmem:[#allocation7 + $0x5d0] sm:$0xff]  ;;  %v11530_v10 = vcombine.high %v4019_v51, %v4023_v45  ;;  %v11537_v37 = vcombine.low %v4019_v51, %v4023_v45 }
 0x3a2   :  { %v11527_v14 = vcombine.high %v4018_v53, %v4022_v31  ;;  %v11533_v61 = vcombine.low %v4018_v53, %v4022_v31 }
 0x3a3   :  { %7290 = vmatpush1.bf16.msra.mxu0 %v11497_v43  ;;  %14465 = vst [vmem:[#allocation333_spill] sm:$0xff] %v11530_v10  ;;  %v4031_v43 = vld [vmem:[#allocation7 + $0x638] sm:$0xff]  ;;  %14467 = vst [vmem:[#allocation335_spill] sm:$0xff] %v11537_v37 }
 0x3a4   :  { %7454 = vmatpush1.bf16.msra.mxu1 %v11501_v52  ;;  %7291 = vmatprep.subr.bf16.mxu0 %v11503_v16  ;;  %14464 = vst [vmem:[#allocation332_spill] sm:$0xff] %v11527_v14  ;;  %v4030_v16 = vld [vmem:[#allocation7 + $0x630] sm:$0xff]  ;;  %v4027_v52 = vld [vmem:[#allocation7 + $0x618] sm:$0xff]  ;;  %14466 = vst [vmem:[#allocation334_spill] sm:$0xff] %v11533_v61 }
 0x3a5   :  { %7455 = vmatprep.subr.bf16.mxu1 %v11506_v38  ;;  %v4026_v38 = vld [vmem:[#allocation7 + $0x610] sm:$0xff]  ;;  %v11542_v32 = vcombine.high %v4027_v52, %v4031_v43  ;;  %v11549_v45 = vcombine.low %v4027_v52, %v4031_v43 }
 0x3a6   :  { %v11539_v20 = vcombine.high %v4026_v38, %v4030_v16  ;;  %v11545_v31 = vcombine.low %v4026_v38, %v4030_v16 }
 0x3a7   :  { %7292 = vmatpush1.bf16.msra.mxu0 %v11509_v18  ;;  %14469 = vst [vmem:[#allocation337_spill] sm:$0xff] %v11542_v32  ;;  %v4039_v18 = vld [vmem:[#allocation7 + $0x678] sm:$0xff]  ;;  %14471 = vst [vmem:[#allocation339_spill] sm:$0xff] %v11549_v45 }
 0x3a8   :  { %7456 = vmatpush1.bf16.msra.mxu1 %v11513_v63  ;;  %7293 = vmatprep.subr.bf16.mxu0 %v11515_v41  ;;  %14468 = vst [vmem:[#allocation336_spill] sm:$0xff] %v11539_v20  ;;  %v4038_v41 = vld [vmem:[#allocation7 + $0x670] sm:$0xff]  ;;  %v4035_v63 = vld [vmem:[#allocation7 + $0x658] sm:$0xff]  ;;  %14470 = vst [vmem:[#allocation338_spill] sm:$0xff] %v11545_v31 }
 0x3a9   :  { %7457 = vmatprep.subr.bf16.mxu1 %v11518_v39  ;;  %v4034_v39 = vld [vmem:[#allocation7 + $0x650] sm:$0xff]  ;;  %v11554_v53 = vcombine.high %v4035_v63, %v4039_v18  ;;  %v11561_v43 = vcombine.low %v4035_v63, %v4039_v18 }
 0x3aa   :  { %v11551_v51 = vcombine.high %v4034_v39, %v4038_v41  ;;  %v11557_v16 = vcombine.low %v4034_v39, %v4038_v41 }
 0x3ab   :  { %7294 = vmatpush1.bf16.msra.mxu0 %v11521_v42  ;;  %14473 = vst [vmem:[#allocation341_spill] sm:$0xff] %v11554_v53  ;;  %v4047_v42 = vld [vmem:[#allocation7 + $0x6b8] sm:$0xff]  ;;  %14475 = vst [vmem:[#allocation343_spill] sm:$0xff] %v11561_v43 }
 0x3ac   :  { %7458 = vmatpush1.bf16.msra.mxu1 %v11525_v22  ;;  %7295 = vmatprep.subr.bf16.mxu0 %v11527_v14  ;;  %14472 = vst [vmem:[#allocation340_spill] sm:$0xff] %v11551_v51  ;;  %v4046_v14 = vld [vmem:[#allocation7 + $0x6b0] sm:$0xff]  ;;  %v4043_v22 = vld [vmem:[#allocation7 + $0x698] sm:$0xff]  ;;  %14474 = vst [vmem:[#allocation342_spill] sm:$0xff] %v11557_v16 }
 0x3ad   :  { %7459 = vmatprep.subr.bf16.mxu1 %v11530_v10  ;;  %v4042_v10 = vld [vmem:[#allocation7 + $0x690] sm:$0xff]  ;;  %v11566_v38 = vcombine.high %v4043_v22, %v4047_v42  ;;  %v11573_v18 = vcombine.low %v4043_v22, %v4047_v42 }
 0x3ae   :  { %v11563_v52 = vcombine.high %v4042_v10, %v4046_v14  ;;  %v11569_v41 = vcombine.low %v4042_v10, %v4046_v14 }
 0x3af   :  { %7296 = vmatpush1.bf16.msra.mxu0 %v11533_v61  ;;  %14477 = vst [vmem:[#allocation345_spill] sm:$0xff] %v11566_v38  ;;  %v4055_v61 = vld [vmem:[#allocation7 + $0x6f8] sm:$0xff]  ;;  %14479 = vst [vmem:[#allocation347_spill] sm:$0xff] %v11573_v18 }
 0x3b0   :  { %7460 = vmatpush1.bf16.msra.mxu1 %v11537_v37  ;;  %7297 = vmatprep.subr.bf16.mxu0 %v11539_v20  ;;  %14476 = vst [vmem:[#allocation344_spill] sm:$0xff] %v11563_v52  ;;  %v4054_v20 = vld [vmem:[#allocation7 + $0x6f0] sm:$0xff]  ;;  %v4051_v37 = vld [vmem:[#allocation7 + $0x6d8] sm:$0xff]  ;;  %14478 = vst [vmem:[#allocation346_spill] sm:$0xff] %v11569_v41 }
 0x3b1   :  { %7461 = vmatprep.subr.bf16.mxu1 %v11542_v32  ;;  %v4050_v32 = vld [vmem:[#allocation7 + $0x6d0] sm:$0xff]  ;;  %v11578_v39 = vcombine.high %v4051_v37, %v4055_v61  ;;  %v11585_v42 = vcombine.low %v4051_v37, %v4055_v61 }
 0x3b2   :  { %v11575_v63 = vcombine.high %v4050_v32, %v4054_v20  ;;  %v11581_v14 = vcombine.low %v4050_v32, %v4054_v20 }
 0x3b3   :  { %7298 = vmatpush1.bf16.msra.mxu0 %v11545_v31  ;;  %14481 = vst [vmem:[#allocation349_spill] sm:$0xff] %v11578_v39  ;;  %v4063_v31 = vld [vmem:[#allocation7 + $0x738] sm:$0xff]  ;;  %14483 = vst [vmem:[#allocation351_spill] sm:$0xff] %v11585_v42 }
 0x3b4   :  { %7462 = vmatpush1.bf16.msra.mxu1 %v11549_v45  ;;  %7299 = vmatprep.subr.bf16.mxu0 %v11551_v51  ;;  %14480 = vst [vmem:[#allocation348_spill] sm:$0xff] %v11575_v63  ;;  %v4062_v51 = vld [vmem:[#allocation7 + $0x730] sm:$0xff]  ;;  %v4059_v45 = vld [vmem:[#allocation7 + $0x718] sm:$0xff]  ;;  %14482 = vst [vmem:[#allocation350_spill] sm:$0xff] %v11581_v14 }
 0x3b5   :  { %7463 = vmatprep.subr.bf16.mxu1 %v11554_v53  ;;  %v4058_v53 = vld [vmem:[#allocation7 + $0x710] sm:$0xff]  ;;  %v11590_v10 = vcombine.high %v4059_v45, %v4063_v31  ;;  %v11597_v61 = vcombine.low %v4059_v45, %v4063_v31 }
 0x3b6   :  { %v11587_v22 = vcombine.high %v4058_v53, %v4062_v51  ;;  %v11593_v20 = vcombine.low %v4058_v53, %v4062_v51 }
 0x3b7   :  { %7300 = vmatpush1.bf16.msra.mxu0 %v11557_v16  ;;  %14485 = vst [vmem:[#allocation353_spill] sm:$0xff] %v11590_v10  ;;  %v4071_v16 = vld [vmem:[#allocation7 + $0x778] sm:$0xff]  ;;  %14487 = vst [vmem:[#allocation355_spill] sm:$0xff] %v11597_v61 }
 0x3b8   :  { %7464 = vmatpush1.bf16.msra.mxu1 %v11561_v43  ;;  %7301 = vmatprep.subr.bf16.mxu0 %v11563_v52  ;;  %14484 = vst [vmem:[#allocation352_spill] sm:$0xff] %v11587_v22  ;;  %v4070_v52 = vld [vmem:[#allocation7 + $0x770] sm:$0xff]  ;;  %v4067_v43 = vld [vmem:[#allocation7 + $0x758] sm:$0xff]  ;;  %14486 = vst [vmem:[#allocation354_spill] sm:$0xff] %v11593_v20 }
 0x3b9   :  { %7465 = vmatprep.subr.bf16.mxu1 %v11566_v38  ;;  %v4066_v38 = vld [vmem:[#allocation7 + $0x750] sm:$0xff]  ;;  %v11602_v32 = vcombine.high %v4067_v43, %v4071_v16  ;;  %v11609_v31 = vcombine.low %v4067_v43, %v4071_v16 }
 0x3ba   :  { %v11599_v37 = vcombine.high %v4066_v38, %v4070_v52  ;;  %v11605_v51 = vcombine.low %v4066_v38, %v4070_v52 }
 0x3bb   :  { %7302 = vmatpush1.bf16.msra.mxu0 %v11569_v41  ;;  %14489 = vst [vmem:[#allocation357_spill] sm:$0xff] %v11602_v32  ;;  %v4079_v41 = vld [vmem:[#allocation7 + $0x7b8] sm:$0xff]  ;;  %14491 = vst [vmem:[#allocation359_spill] sm:$0xff] %v11609_v31 }
 0x3bc   :  { %7466 = vmatpush1.bf16.msra.mxu1 %v11573_v18  ;;  %7303 = vmatprep.subr.bf16.mxu0 %v11575_v63  ;;  %14488 = vst [vmem:[#allocation356_spill] sm:$0xff] %v11599_v37  ;;  %v4078_v63 = vld [vmem:[#allocation7 + $0x7b0] sm:$0xff]  ;;  %v4075_v18 = vld [vmem:[#allocation7 + $0x798] sm:$0xff]  ;;  %14490 = vst [vmem:[#allocation358_spill] sm:$0xff] %v11605_v51 }
 0x3bd   :  { %7467 = vmatprep.subr.bf16.mxu1 %v11578_v39  ;;  %v4074_v39 = vld [vmem:[#allocation7 + $0x790] sm:$0xff]  ;;  %v11614_v53 = vcombine.high %v4075_v18, %v4079_v41  ;;  %v11621_v16 = vcombine.low %v4075_v18, %v4079_v41 }
 0x3be   :  { %v11611_v45 = vcombine.high %v4074_v39, %v4078_v63  ;;  %v11617_v52 = vcombine.low %v4074_v39, %v4078_v63 }
 0x3bf   :  { %7304 = vmatpush1.bf16.msra.mxu0 %v11581_v14  ;;  %14493 = vst [vmem:[#allocation361_spill] sm:$0xff] %v11614_v53  ;;  %v4087_v14 = vld [vmem:[#allocation7 + $0x7f8] sm:$0xff]  ;;  %14495 = vst [vmem:[#allocation363_spill] sm:$0xff] %v11621_v16 }
 0x3c0   :  { %7468 = vmatpush1.bf16.msra.mxu1 %v11585_v42  ;;  %7305 = vmatprep.subr.bf16.mxu0 %v11587_v22  ;;  %14492 = vst [vmem:[#allocation360_spill] sm:$0xff] %v11611_v45  ;;  %v4086_v22 = vld [vmem:[#allocation7 + $0x7f0] sm:$0xff]  ;;  %v4083_v42 = vld [vmem:[#allocation7 + $0x7d8] sm:$0xff]  ;;  %14494 = vst [vmem:[#allocation362_spill] sm:$0xff] %v11617_v52 }
 0x3c1   :  { %7469 = vmatprep.subr.bf16.mxu1 %v11590_v10  ;;  %v4082_v10 = vld [vmem:[#allocation7 + $0x7d0] sm:$0xff]  ;;  %v11626_v38 = vcombine.high %v4083_v42, %v4087_v14  ;;  %v11633_v41 = vcombine.low %v4083_v42, %v4087_v14 }
 0x3c2   :  { %v11623_v43 = vcombine.high %v4082_v10, %v4086_v22  ;;  %v11629_v63 = vcombine.low %v4082_v10, %v4086_v22  ;;  %v4099_v22 = vld [vmem:[#allocation7 + $0x858] sm:$0xff] }
 0x3c3   :  { %7306 = vmatpush1.bf16.msra.mxu0 %v11593_v20  ;;  %14497 = vst [vmem:[#allocation365_spill] sm:$0xff] %v11626_v38  ;;  %v4095_v20 = vld [vmem:[#allocation7 + $0x838] sm:$0xff]  ;;  %14499 = vst [vmem:[#allocation367_spill] sm:$0xff] %v11633_v41 }
 0x3c4   :  { %7470 = vmatpush1.bf16.msra.mxu1 %v11597_v61  ;;  %7307 = vmatprep.subr.bf16.mxu0 %v11599_v37  ;;  %14496 = vst [vmem:[#allocation364_spill] sm:$0xff] %v11623_v43  ;;  %v4094_v37 = vld [vmem:[#allocation7 + $0x830] sm:$0xff]  ;;  %v4091_v61 = vld [vmem:[#allocation7 + $0x818] sm:$0xff]  ;;  %14498 = vst [vmem:[#allocation366_spill] sm:$0xff] %v11629_v63 }
 0x3c5   :  { %7471 = vmatprep.subr.bf16.mxu1 %v11602_v32  ;;  %v4090_v32 = vld [vmem:[#allocation7 + $0x810] sm:$0xff]  ;;  %v11638_v39 = vcombine.high %v4091_v61, %v4095_v20  ;;  %v4103_v10 = vld [vmem:[#allocation7 + $0x878] sm:$0xff]  ;;  %v11645_v14 = vcombine.low %v4091_v61, %v4095_v20 }
 0x3c6   :  { %v11635_v18 = vcombine.high %v4090_v32, %v4094_v37  ;;  %v11659_v20 = vcombine.low %v4099_v22, %v4103_v10 }
 0x3c7   :  { %7308 = vmatpush1.bf16.msra.mxu0 %v11605_v51  ;;  %14501 = vst [vmem:[#allocation369_spill] sm:$0xff] %v11638_v39  ;;  %14503 = vst [vmem:[#allocation371_spill] sm:$0xff] %v11645_v14 }
 0x3c8   :  { %7472 = vmatpush1.bf16.msra.mxu1 %v11609_v31  ;;  %7309 = vmatprep.subr.bf16.mxu0 %v11611_v45  ;;  %14500 = vst [vmem:[#allocation368_spill] sm:$0xff] %v11635_v18  ;;  %v4102_v45 = vld [vmem:[#allocation7 + $0x870] sm:$0xff]  ;;  %v11641_v31 = vcombine.low %v4090_v32, %v4094_v37  ;;  %v4107_v37 = vld [vmem:[#allocation7 + $0x898] sm:$0xff]  ;;  %14507 = vst [vmem:[#allocation375_spill] sm:$0xff] %v11659_v20 }
 0x3c9   :  { %7473 = vmatprep.subr.bf16.mxu1 %v11614_v53  ;;  %v4098_v53 = vld [vmem:[#allocation7 + $0x850] sm:$0xff]  ;;  %v4111_v32 = vld [vmem:[#allocation7 + $0x8b8] sm:$0xff] }
 0x3ca   :  { %14502 = vst [vmem:[#allocation370_spill] sm:$0xff] %v11641_v31  ;;  %v11648_v42 = vcombine.high %v4098_v53, %v4102_v45 }
 0x3cb   :  { %7310 = vmatpush1.bf16.msra.mxu0 %v11617_v52 }
 0x3cc   :  { %7474 = vmatpush1.bf16.msra.mxu1 %v11621_v16  ;;  %7311 = vmatprep.subr.bf16.mxu0 %v11623_v43  ;;  %14504 = vst [vmem:[#allocation372_spill] sm:$0xff] %v11648_v42  ;;  %v4110_v43 = vld [vmem:[#allocation7 + $0x8b0] sm:$0xff]  ;;  %v11651_v16 = vcombine.high %v4099_v22, %v4103_v10  ;;  %v11673_v22 = vcombine.low %v4107_v37, %v4111_v32 }
 0x3cd   :  { %7475 = vmatprep.subr.bf16.mxu1 %v11626_v38  ;;  %v4106_v38 = vld [vmem:[#allocation7 + $0x890] sm:$0xff] }
 0x3ce   :  { %14505 = vst [vmem:[#allocation373_spill] sm:$0xff] %v11651_v16  ;;  %v11661_v61 = vcombine.high %v4106_v38, %v4110_v43  ;;  %14511 = vst [vmem:[#allocation379_spill] sm:$0xff] %v11673_v22 }
 0x3cf   :  { %7312 = vmatpush1.bf16.msra.mxu0 %v11629_v63  ;;  %v4127_v63 = vld [vmem:[#allocation7 + $0x938] sm:$0xff] }
 0x3d0   :  { %7476 = vmatpush1.bf16.msra.mxu1 %v11633_v41  ;;  %7322 = vmatprep.subr.bf16.mxu0 %v11635_v18  ;;  %v11655_v41 = vcombine.low %v4098_v53, %v4102_v45  ;;  %14508 = vst [vmem:[#allocation376_spill] sm:$0xff] %v11661_v61  ;;  %v4114_v18 = vld [vmem:[#allocation7 + $0x8d0] sm:$0xff]  ;;  %v4115_v45 = vld [vmem:[#allocation7 + $0x8d8] sm:$0xff] }
 0x3d1   :  { %7486 = vmatprep.subr.bf16.mxu1 %v11638_v39  ;;  %v11665_v39 = vcombine.high %v4107_v37, %v4111_v32  ;;  %v4119_v53 = vld [vmem:[#allocation7 + $0x8f8] sm:$0xff] }
 0x3d2   :  { %7314 = vmatmul.mubr.bf16.vlgmr.msra.gmra.mrb[12].mxu0 %v10845_v56  ;;  %14506 = vst [vmem:[#allocation374_spill] sm:$0xff] %v11655_v41  ;;  %v11678_v10 = vcombine.high %v4115_v45, %v4119_v53 }
 0x3d3   :  { %7478 = vmatmul.mubr.bf16.vlgmr.msra.gmra.mrb[12].mxu1 %v10845_v56  ;;  %7323 = vmatpush1.bf16.msra.mxu0 %v11641_v31  ;;  %14509 = vst [vmem:[#allocation377_spill] sm:$0xff] %v11665_v39  ;;  %v4118_v56 = vld [vmem:[#allocation7 + $0x8f0] sm:$0xff]  ;;  %v11669_v31 = vcombine.low %v4106_v38, %v4110_v43  ;;  %v11685_v38 = vcombine.low %v4115_v45, %v4119_v53 }
 0x3d4   :  { %7354 = vmatprep.mubr.bf16.mxu0 %v11044_v40  ;;  %7487 = vmatpush1.bf16.msra.mxu1 %v11645_v14  ;;  %14513 = vst [vmem:[#allocation381_spill] sm:$0xff] %v11678_v10  ;;  %v4123_v14 = vld [vmem:[#allocation7 + $0x918] sm:$0xff]  ;;  %v11681_v43 = vcombine.low %v4114_v18, %v4118_v56 }
 0x3d5   :  { %7518 = vmatprep.mubr.bf16.mxu1 %v11044_v40  ;;  %7324 = vmatprep.subr.bf16.mxu0 %v11648_v42  ;;  %14510 = vst [vmem:[#allocation378_spill] sm:$0xff] %v11669_v31  ;;  %v11675_v40 = vcombine.high %v4114_v18, %v4118_v56  ;;  %v4122_v42 = vld [vmem:[#allocation7 + $0x910] sm:$0xff]  ;;  %14515 = vst [vmem:[#allocation383_spill] sm:$0xff] %v11685_v38  ;;  %v11690_v32 = vcombine.high %v4123_v14, %v4127_v63 }
 0x3d6   :  { %7488 = vmatprep.subr.bf16.mxu1 %v11651_v16  ;;  %v4126_v16 = vld [vmem:[#allocation7 + $0x930] sm:$0xff]  ;;  %14514 = vst [vmem:[#allocation382_spill] sm:$0xff] %v11681_v43  ;;  %v11697_v56 = vcombine.low %v4123_v14, %v4127_v63 }
 0x3d7   :  { %7325 = vmatpush1.bf16.msra.mxu0 %v11655_v41  ;;  %14512 = vst [vmem:[#allocation380_spill] sm:$0xff] %v11675_v40  ;;  %v11687_v37 = vcombine.high %v4122_v42, %v4126_v16  ;;  %14517 = vst [vmem:[#allocation385_spill] sm:$0xff] %v11690_v32  ;;  %v4135_v41 = vld [vmem:[#allocation7 + $0x978] sm:$0xff]  ;;  %v11693_v18 = vcombine.low %v4122_v42, %v4126_v16 }
 0x3d8   :  { %7489 = vmatpush1.bf16.msra.mxu1 %v11659_v20  ;;  %7326 = vmatprep.subr.bf16.mxu0 %v11661_v61  ;;  %v4134_v61 = vld [vmem:[#allocation7 + $0x970] sm:$0xff]  ;;  %v4131_v20 = vld [vmem:[#allocation7 + $0x958] sm:$0xff]  ;;  %14519 = vst [vmem:[#allocation387_spill] sm:$0xff] %v11697_v56 }
 0x3d9   :  { %7490 = vmatprep.subr.bf16.mxu1 %v11665_v39  ;;  %14516 = vst [vmem:[#allocation384_spill] sm:$0xff] %v11687_v37  ;;  %v4130_v39 = vld [vmem:[#allocation7 + $0x950] sm:$0xff]  ;;  %14518 = vst [vmem:[#allocation386_spill] sm:$0xff] %v11693_v18  ;;  %v11702_v53 = vcombine.high %v4131_v20, %v4135_v41  ;;  %v11709_v63 = vcombine.low %v4131_v20, %v4135_v41 }
 0x3da   :  { %v11699_v45 = vcombine.high %v4130_v39, %v4134_v61  ;;  %v11705_v16 = vcombine.low %v4130_v39, %v4134_v61 }
 0x3db   :  { %7327 = vmatpush1.bf16.msra.mxu0 %v11669_v31  ;;  %14521 = vst [vmem:[#allocation389_spill] sm:$0xff] %v11702_v53  ;;  %v4143_v31 = vld [vmem:[#allocation7 + $0x9b8] sm:$0xff]  ;;  %14523 = vst [vmem:[#allocation391_spill] sm:$0xff] %v11709_v63 }
 0x3dc   :  { %7491 = vmatpush1.bf16.msra.mxu1 %v11673_v22  ;;  %7328 = vmatprep.subr.bf16.mxu0 %v11675_v40  ;;  %14520 = vst [vmem:[#allocation388_spill] sm:$0xff] %v11699_v45  ;;  %v4142_v40 = vld [vmem:[#allocation7 + $0x9b0] sm:$0xff]  ;;  %v4139_v22 = vld [vmem:[#allocation7 + $0x998] sm:$0xff]  ;;  %14522 = vst [vmem:[#allocation390_spill] sm:$0xff] %v11705_v16 }
 0x3dd   :  { %7492 = vmatprep.subr.bf16.mxu1 %v11678_v10  ;;  %v4138_v10 = vld [vmem:[#allocation7 + $0x990] sm:$0xff]  ;;  %v11714_v42 = vcombine.high %v4139_v22, %v4143_v31  ;;  %v11721_v41 = vcombine.low %v4139_v22, %v4143_v31 }
 0x3de   :  { %v11711_v14 = vcombine.high %v4138_v10, %v4142_v40  ;;  %v11717_v39 = vcombine.low %v4138_v10, %v4142_v40 }
 0x3df   :  { %7329 = vmatpush1.bf16.msra.mxu0 %v11681_v43  ;;  %14525 = vst [vmem:[#allocation393_spill] sm:$0xff] %v11714_v42  ;;  %v4151_v43 = vld [vmem:[#allocation7 + $0x9f8] sm:$0xff]  ;;  %14527 = vst [vmem:[#allocation395_spill] sm:$0xff] %v11721_v41 }
 0x3e0   :  { %7493 = vmatpush1.bf16.msra.mxu1 %v11685_v38  ;;  %7330 = vmatprep.subr.bf16.mxu0 %v11687_v37  ;;  %14524 = vst [vmem:[#allocation392_spill] sm:$0xff] %v11711_v14  ;;  %v4150_v37 = vld [vmem:[#allocation7 + $0x9f0] sm:$0xff]  ;;  %v4147_v38 = vld [vmem:[#allocation7 + $0x9d8] sm:$0xff]  ;;  %14526 = vst [vmem:[#allocation394_spill] sm:$0xff] %v11717_v39 }
 0x3e1   :  { %7494 = vmatprep.subr.bf16.mxu1 %v11690_v32  ;;  %v4146_v32 = vld [vmem:[#allocation7 + $0x9d0] sm:$0xff]  ;;  %v11726_v61 = vcombine.high %v4147_v38, %v4151_v43  ;;  %v11733_v31 = vcombine.low %v4147_v38, %v4151_v43 }
 0x3e2   :  { %v11723_v20 = vcombine.high %v4146_v32, %v4150_v37  ;;  %v11729_v40 = vcombine.low %v4146_v32, %v4150_v37 }
 0x3e3   :  { %7331 = vmatpush1.bf16.msra.mxu0 %v11693_v18  ;;  %14529 = vst [vmem:[#allocation397_spill] sm:$0xff] %v11726_v61  ;;  %v4159_v18 = vld [vmem:[#allocation7 + $0xa38] sm:$0xff]  ;;  %14531 = vst [vmem:[#allocation399_spill] sm:$0xff] %v11733_v31 }
 0x3e4   :  { %7495 = vmatpush1.bf16.msra.mxu1 %v11697_v56  ;;  %7332 = vmatprep.subr.bf16.mxu0 %v11699_v45  ;;  %14528 = vst [vmem:[#allocation396_spill] sm:$0xff] %v11723_v20  ;;  %v4158_v45 = vld [vmem:[#allocation7 + $0xa30] sm:$0xff]  ;;  %v4155_v56 = vld [vmem:[#allocation7 + $0xa18] sm:$0xff]  ;;  %14530 = vst [vmem:[#allocation398_spill] sm:$0xff] %v11729_v40 }
 0x3e5   :  { %7496 = vmatprep.subr.bf16.mxu1 %v11702_v53  ;;  %v4154_v53 = vld [vmem:[#allocation7 + $0xa10] sm:$0xff]  ;;  %v11738_v10 = vcombine.high %v4155_v56, %v4159_v18  ;;  %v11745_v43 = vcombine.low %v4155_v56, %v4159_v18 }
 0x3e6   :  { %v11735_v22 = vcombine.high %v4154_v53, %v4158_v45  ;;  %v11741_v37 = vcombine.low %v4154_v53, %v4158_v45 }
 0x3e7   :  { %7333 = vmatpush1.bf16.msra.mxu0 %v11705_v16  ;;  %14533 = vst [vmem:[#allocation401_spill] sm:$0xff] %v11738_v10  ;;  %v4167_v16 = vld [vmem:[#allocation7 + $0xa78] sm:$0xff]  ;;  %14535 = vst [vmem:[#allocation403_spill] sm:$0xff] %v11745_v43 }
 0x3e8   :  { %7497 = vmatpush1.bf16.msra.mxu1 %v11709_v63  ;;  %7334 = vmatprep.subr.bf16.mxu0 %v11711_v14  ;;  %14532 = vst [vmem:[#allocation400_spill] sm:$0xff] %v11735_v22  ;;  %v4166_v14 = vld [vmem:[#allocation7 + $0xa70] sm:$0xff]  ;;  %v4163_v63 = vld [vmem:[#allocation7 + $0xa58] sm:$0xff]  ;;  %14534 = vst [vmem:[#allocation402_spill] sm:$0xff] %v11741_v37 }
 0x3e9   :  { %7498 = vmatprep.subr.bf16.mxu1 %v11714_v42  ;;  %v4162_v42 = vld [vmem:[#allocation7 + $0xa50] sm:$0xff]  ;;  %v11750_v32 = vcombine.high %v4163_v63, %v4167_v16  ;;  %v11757_v18 = vcombine.low %v4163_v63, %v4167_v16 }
 0x3ea   :  { %v11747_v38 = vcombine.high %v4162_v42, %v4166_v14  ;;  %v11753_v45 = vcombine.low %v4162_v42, %v4166_v14 }
 0x3eb   :  { %7335 = vmatpush1.bf16.msra.mxu0 %v11717_v39  ;;  %14537 = vst [vmem:[#allocation405_spill] sm:$0xff] %v11750_v32  ;;  %v4175_v39 = vld [vmem:[#allocation7 + $0xab8] sm:$0xff]  ;;  %14539 = vst [vmem:[#allocation407_spill] sm:$0xff] %v11757_v18 }
 0x3ec   :  { %7499 = vmatpush1.bf16.msra.mxu1 %v11721_v41  ;;  %7336 = vmatprep.subr.bf16.mxu0 %v11723_v20  ;;  %14536 = vst [vmem:[#allocation404_spill] sm:$0xff] %v11747_v38  ;;  %v4174_v20 = vld [vmem:[#allocation7 + $0xab0] sm:$0xff]  ;;  %v4171_v41 = vld [vmem:[#allocation7 + $0xa98] sm:$0xff]  ;;  %14538 = vst [vmem:[#allocation406_spill] sm:$0xff] %v11753_v45 }
 0x3ed   :  { %7500 = vmatprep.subr.bf16.mxu1 %v11726_v61  ;;  %v4170_v61 = vld [vmem:[#allocation7 + $0xa90] sm:$0xff]  ;;  %v11762_v53 = vcombine.high %v4171_v41, %v4175_v39  ;;  %v11769_v16 = vcombine.low %v4171_v41, %v4175_v39 }
 0x3ee   :  { %v11759_v56 = vcombine.high %v4170_v61, %v4174_v20  ;;  %v11765_v14 = vcombine.low %v4170_v61, %v4174_v20 }
 0x3ef   :  { %7337 = vmatpush1.bf16.msra.mxu0 %v11729_v40  ;;  %14541 = vst [vmem:[#allocation409_spill] sm:$0xff] %v11762_v53  ;;  %v4183_v40 = vld [vmem:[#allocation7 + $0xaf8] sm:$0xff]  ;;  %14543 = vst [vmem:[#allocation411_spill] sm:$0xff] %v11769_v16 }
 0x3f0   :  { %7501 = vmatpush1.bf16.msra.mxu1 %v11733_v31  ;;  %7338 = vmatprep.subr.bf16.mxu0 %v11735_v22  ;;  %14540 = vst [vmem:[#allocation408_spill] sm:$0xff] %v11759_v56  ;;  %v4182_v22 = vld [vmem:[#allocation7 + $0xaf0] sm:$0xff]  ;;  %v4179_v31 = vld [vmem:[#allocation7 + $0xad8] sm:$0xff]  ;;  %14542 = vst [vmem:[#allocation410_spill] sm:$0xff] %v11765_v14 }
 0x3f1   :  { %7502 = vmatprep.subr.bf16.mxu1 %v11738_v10  ;;  %v4178_v10 = vld [vmem:[#allocation7 + $0xad0] sm:$0xff]  ;;  %v11774_v42 = vcombine.high %v4179_v31, %v4183_v40  ;;  %v11781_v39 = vcombine.low %v4179_v31, %v4183_v40 }
 0x3f2   :  { %v11771_v63 = vcombine.high %v4178_v10, %v4182_v22  ;;  %v11777_v20 = vcombine.low %v4178_v10, %v4182_v22 }
 0x3f3   :  { %7339 = vmatpush1.bf16.msra.mxu0 %v11741_v37  ;;  %14545 = vst [vmem:[#allocation413_spill] sm:$0xff] %v11774_v42  ;;  %v4191_v37 = vld [vmem:[#allocation7 + $0xb38] sm:$0xff]  ;;  %14547 = vst [vmem:[#allocation415_spill] sm:$0xff] %v11781_v39 }
 0x3f4   :  { %7503 = vmatpush1.bf16.msra.mxu1 %v11745_v43  ;;  %7340 = vmatprep.subr.bf16.mxu0 %v11747_v38  ;;  %14544 = vst [vmem:[#allocation412_spill] sm:$0xff] %v11771_v63  ;;  %v4190_v38 = vld [vmem:[#allocation7 + $0xb30] sm:$0xff]  ;;  %v4187_v43 = vld [vmem:[#allocation7 + $0xb18] sm:$0xff]  ;;  %14546 = vst [vmem:[#allocation414_spill] sm:$0xff] %v11777_v20 }
 0x3f5   :  { %7504 = vmatprep.subr.bf16.mxu1 %v11750_v32  ;;  %v4186_v32 = vld [vmem:[#allocation7 + $0xb10] sm:$0xff]  ;;  %v11786_v61 = vcombine.high %v4187_v43, %v4191_v37  ;;  %v11793_v40 = vcombine.low %v4187_v43, %v4191_v37 }
 0x3f6   :  { %v11783_v41 = vcombine.high %v4186_v32, %v4190_v38  ;;  %v11789_v22 = vcombine.low %v4186_v32, %v4190_v38 }
 0x3f7   :  { %7341 = vmatpush1.bf16.msra.mxu0 %v11753_v45  ;;  %14549 = vst [vmem:[#allocation417_spill] sm:$0xff] %v11786_v61  ;;  %v4199_v45 = vld [vmem:[#allocation7 + $0xb78] sm:$0xff]  ;;  %14551 = vst [vmem:[#allocation419_spill] sm:$0xff] %v11793_v40 }
 0x3f8   :  { %7505 = vmatpush1.bf16.msra.mxu1 %v11757_v18  ;;  %7342 = vmatprep.subr.bf16.mxu0 %v11759_v56  ;;  %14548 = vst [vmem:[#allocation416_spill] sm:$0xff] %v11783_v41  ;;  %v4198_v56 = vld [vmem:[#allocation7 + $0xb70] sm:$0xff]  ;;  %v4195_v18 = vld [vmem:[#allocation7 + $0xb58] sm:$0xff]  ;;  %14550 = vst [vmem:[#allocation418_spill] sm:$0xff] %v11789_v22 }
 0x3f9   :  { %7506 = vmatprep.subr.bf16.mxu1 %v11762_v53  ;;  %v4194_v53 = vld [vmem:[#allocation7 + $0xb50] sm:$0xff]  ;;  %v11798_v10 = vcombine.high %v4195_v18, %v4199_v45  ;;  %v11805_v37 = vcombine.low %v4195_v18, %v4199_v45 }
 0x3fa   :  { %v11795_v31 = vcombine.high %v4194_v53, %v4198_v56  ;;  %v11801_v38 = vcombine.low %v4194_v53, %v4198_v56 }
 0x3fb   :  { %7343 = vmatpush1.bf16.msra.mxu0 %v11765_v14  ;;  %14553 = vst [vmem:[#allocation421_spill] sm:$0xff] %v11798_v10  ;;  %v4207_v14 = vld [vmem:[#allocation7 + $0xbb8] sm:$0xff]  ;;  %14555 = vst [vmem:[#allocation423_spill] sm:$0xff] %v11805_v37 }
 0x3fc   :  { %7507 = vmatpush1.bf16.msra.mxu1 %v11769_v16  ;;  %7344 = vmatprep.subr.bf16.mxu0 %v11771_v63  ;;  %14552 = vst [vmem:[#allocation420_spill] sm:$0xff] %v11795_v31  ;;  %v4206_v63 = vld [vmem:[#allocation7 + $0xbb0] sm:$0xff]  ;;  %v4203_v16 = vld [vmem:[#allocation7 + $0xb98] sm:$0xff]  ;;  %14554 = vst [vmem:[#allocation422_spill] sm:$0xff] %v11801_v38 }
 0x3fd   :  { %7508 = vmatprep.subr.bf16.mxu1 %v11774_v42  ;;  %v4202_v42 = vld [vmem:[#allocation7 + $0xb90] sm:$0xff]  ;;  %v11810_v32 = vcombine.high %v4203_v16, %v4207_v14  ;;  %v11817_v45 = vcombine.low %v4203_v16, %v4207_v14 }
 0x3fe   :  { %v11807_v43 = vcombine.high %v4202_v42, %v4206_v63  ;;  %v11813_v56 = vcombine.low %v4202_v42, %v4206_v63 }
 0x3ff   :  { %7345 = vmatpush1.bf16.msra.mxu0 %v11777_v20  ;;  %14557 = vst [vmem:[#allocation425_spill] sm:$0xff] %v11810_v32  ;;  %v4215_v20 = vld [vmem:[#allocation7 + $0xbf8] sm:$0xff]  ;;  %14559 = vst [vmem:[#allocation427_spill] sm:$0xff] %v11817_v45 }
 0x400   :  { %7509 = vmatpush1.bf16.msra.mxu1 %v11781_v39  ;;  %7346 = vmatprep.subr.bf16.mxu0 %v11783_v41  ;;  %14556 = vst [vmem:[#allocation424_spill] sm:$0xff] %v11807_v43  ;;  %v4214_v41 = vld [vmem:[#allocation7 + $0xbf0] sm:$0xff]  ;;  %v4211_v39 = vld [vmem:[#allocation7 + $0xbd8] sm:$0xff]  ;;  %14558 = vst [vmem:[#allocation426_spill] sm:$0xff] %v11813_v56 }
 0x401   :  { %7510 = vmatprep.subr.bf16.mxu1 %v11786_v61  ;;  %v4210_v61 = vld [vmem:[#allocation7 + $0xbd0] sm:$0xff]  ;;  %v11822_v53 = vcombine.high %v4211_v39, %v4215_v20  ;;  %v11829_v14 = vcombine.low %v4211_v39, %v4215_v20 }
 0x402   :  { %v11819_v18 = vcombine.high %v4210_v61, %v4214_v41  ;;  %v11825_v63 = vcombine.low %v4210_v61, %v4214_v41  ;;  %v4227_v41 = vld [vmem:[#allocation7 + $0xc58] sm:$0xff] }
 0x403   :  { %7347 = vmatpush1.bf16.msra.mxu0 %v11789_v22  ;;  %14561 = vst [vmem:[#allocation429_spill] sm:$0xff] %v11822_v53  ;;  %v4223_v22 = vld [vmem:[#allocation7 + $0xc38] sm:$0xff]  ;;  %14563 = vst [vmem:[#allocation431_spill] sm:$0xff] %v11829_v14 }
 0x404   :  { %7511 = vmatpush1.bf16.msra.mxu1 %v11793_v40  ;;  %7348 = vmatprep.subr.bf16.mxu0 %v11795_v31  ;;  %14560 = vst [vmem:[#allocation428_spill] sm:$0xff] %v11819_v18  ;;  %v4222_v31 = vld [vmem:[#allocation7 + $0xc30] sm:$0xff]  ;;  %v4219_v40 = vld [vmem:[#allocation7 + $0xc18] sm:$0xff]  ;;  %14562 = vst [vmem:[#allocation430_spill] sm:$0xff] %v11825_v63 }
 0x405   :  { %7512 = vmatprep.subr.bf16.mxu1 %v11798_v10  ;;  %v4218_v10 = vld [vmem:[#allocation7 + $0xc10] sm:$0xff]  ;;  %v11834_v42 = vcombine.high %v4219_v40, %v4223_v22  ;;  %v4231_v61 = vld [vmem:[#allocation7 + $0xc78] sm:$0xff]  ;;  %v11841_v20 = vcombine.low %v4219_v40, %v4223_v22 }
 0x406   :  { %v11831_v16 = vcombine.high %v4218_v10, %v4222_v31  ;;  %v11855_v22 = vcombine.low %v4227_v41, %v4231_v61 }
 0x407   :  { %7349 = vmatpush1.bf16.msra.mxu0 %v11801_v38  ;;  %14565 = vst [vmem:[#allocation433_spill] sm:$0xff] %v11834_v42  ;;  %14567 = vst [vmem:[#allocation435_spill] sm:$0xff] %v11841_v20 }
 0x408   :  { %7513 = vmatpush1.bf16.msra.mxu1 %v11805_v37  ;;  %7350 = vmatprep.subr.bf16.mxu0 %v11807_v43  ;;  %14564 = vst [vmem:[#allocation432_spill] sm:$0xff] %v11831_v16  ;;  %v4230_v43 = vld [vmem:[#allocation7 + $0xc70] sm:$0xff]  ;;  %v11837_v37 = vcombine.low %v4218_v10, %v4222_v31  ;;  %v4235_v31 = vld [vmem:[#allocation7 + $0xc98] sm:$0xff]  ;;  %14571 = vst [vmem:[#allocation439_spill] sm:$0xff] %v11855_v22 }
 0x409   :  { %7514 = vmatprep.subr.bf16.mxu1 %v11810_v32  ;;  %v4226_v32 = vld [vmem:[#allocation7 + $0xc50] sm:$0xff]  ;;  %v4239_v10 = vld [vmem:[#allocation7 + $0xcb8] sm:$0xff] }
 0x40a   :  { %14566 = vst [vmem:[#allocation434_spill] sm:$0xff] %v11837_v37  ;;  %v11844_v39 = vcombine.high %v4226_v32, %v4230_v43 }
 0x40b   :  { %7351 = vmatpush1.bf16.msra.mxu0 %v11813_v56 }
 0x40c   :  { %7515 = vmatpush1.bf16.msra.mxu1 %v11817_v45  ;;  %7352 = vmatprep.subr.bf16.mxu0 %v11819_v18  ;;  %14568 = vst [vmem:[#allocation436_spill] sm:$0xff] %v11844_v39  ;;  %v4238_v18 = vld [vmem:[#allocation7 + $0xcb0] sm:$0xff]  ;;  %v11847_v45 = vcombine.high %v4227_v41, %v4231_v61  ;;  %v11869_v41 = vcombine.low %v4235_v31, %v4239_v10 }
 0x40d   :  { %7516 = vmatprep.subr.bf16.mxu1 %v11822_v53  ;;  %v4234_v53 = vld [vmem:[#allocation7 + $0xc90] sm:$0xff] }
 0x40e   :  { %14569 = vst [vmem:[#allocation437_spill] sm:$0xff] %v11847_v45  ;;  %v11857_v40 = vcombine.high %v4234_v53, %v4238_v18  ;;  %14575 = vst [vmem:[#allocation443_spill] sm:$0xff] %v11869_v41 }
 0x40f   :  { %7353 = vmatpush1.bf16.msra.mxu0 %v11825_v63  ;;  %v4255_v63 = vld [vmem:[#allocation7 + $0xd38] sm:$0xff] }
 0x410   :  { %7517 = vmatpush1.bf16.msra.mxu1 %v11829_v14  ;;  %7363 = vmatprep.subr.bf16.mxu0 %v11831_v16  ;;  %v11851_v14 = vcombine.low %v4226_v32, %v4230_v43  ;;  %14572 = vst [vmem:[#allocation440_spill] sm:$0xff] %v11857_v40  ;;  %v4242_v16 = vld [vmem:[#allocation7 + $0xcd0] sm:$0xff]  ;;  %v4243_v43 = vld [vmem:[#allocation7 + $0xcd8] sm:$0xff] }
 0x411   :  { %7527 = vmatprep.subr.bf16.mxu1 %v11834_v42  ;;  %v11861_v42 = vcombine.high %v4235_v31, %v4239_v10  ;;  %v4247_v32 = vld [vmem:[#allocation7 + $0xcf8] sm:$0xff] }
 0x412   :  { %7355 = vmatmul.mubr.bf16.vlgmr.msra.gmra.mrb[12].mxu0 %v11050_v60  ;;  %14570 = vst [vmem:[#allocation438_spill] sm:$0xff] %v11851_v14  ;;  %v11874_v61 = vcombine.high %v4243_v43, %v4247_v32 }
 0x413   :  { %7519 = vmatmul.mubr.bf16.vlgmr.msra.gmra.mrb[12].mxu1 %v11050_v60  ;;  %7364 = vmatpush1.bf16.msra.mxu0 %v11837_v37  ;;  %14573 = vst [vmem:[#allocation441_spill] sm:$0xff] %v11861_v42  ;;  %v4246_v60 = vld [vmem:[#allocation7 + $0xcf0] sm:$0xff]  ;;  %v11865_v37 = vcombine.low %v4234_v53, %v4238_v18  ;;  %v11881_v53 = vcombine.low %v4243_v43, %v4247_v32 }
 0x414   :  { %7395 = vmatprep.mubr.bf16.mxu0 %v11058_v62  ;;  %7528 = vmatpush1.bf16.msra.mxu1 %v11841_v20  ;;  %14577 = vst [vmem:[#allocation445_spill] sm:$0xff] %v11874_v61  ;;  %v4251_v20 = vld [vmem:[#allocation7 + $0xd18] sm:$0xff]  ;;  %v11877_v18 = vcombine.low %v4242_v16, %v4246_v60 }
 0x415   :  { %7559 = vmatprep.mubr.bf16.mxu1 %v11058_v62  ;;  %7365 = vmatprep.subr.bf16.mxu0 %v11844_v39  ;;  %14574 = vst [vmem:[#allocation442_spill] sm:$0xff] %v11865_v37  ;;  %v11871_v62 = vcombine.high %v4242_v16, %v4246_v60  ;;  %v4250_v39 = vld [vmem:[#allocation7 + $0xd10] sm:$0xff]  ;;  %14579 = vst [vmem:[#allocation447_spill] sm:$0xff] %v11881_v53  ;;  %v11886_v10 = vcombine.high %v4251_v20, %v4255_v63 }
 0x416   :  { %7529 = vmatprep.subr.bf16.mxu1 %v11847_v45  ;;  %v4254_v45 = vld [vmem:[#allocation7 + $0xd30] sm:$0xff]  ;;  %14578 = vst [vmem:[#allocation446_spill] sm:$0xff] %v11877_v18  ;;  %v11893_v60 = vcombine.low %v4251_v20, %v4255_v63 }
 0x417   :  { %7366 = vmatpush1.bf16.msra.mxu0 %v11851_v14  ;;  %14576 = vst [vmem:[#allocation444_spill] sm:$0xff] %v11871_v62  ;;  %v11883_v31 = vcombine.high %v4250_v39, %v4254_v45  ;;  %14581 = vst [vmem:[#allocation449_spill] sm:$0xff] %v11886_v10  ;;  %v4263_v14 = vld [vmem:[#allocation7 + $0xd78] sm:$0xff]  ;;  %v11889_v16 = vcombine.low %v4250_v39, %v4254_v45 }
 0x418   :  { %7530 = vmatpush1.bf16.msra.mxu1 %v11855_v22  ;;  %7367 = vmatprep.subr.bf16.mxu0 %v11857_v40  ;;  %v4262_v40 = vld [vmem:[#allocation7 + $0xd70] sm:$0xff]  ;;  %v4259_v22 = vld [vmem:[#allocation7 + $0xd58] sm:$0xff]  ;;  %14583 = vst [vmem:[#allocation451_spill] sm:$0xff] %v11893_v60 }
 0x419   :  { %7531 = vmatprep.subr.bf16.mxu1 %v11861_v42  ;;  %14580 = vst [vmem:[#allocation448_spill] sm:$0xff] %v11883_v31  ;;  %v4258_v42 = vld [vmem:[#allocation7 + $0xd50] sm:$0xff]  ;;  %14582 = vst [vmem:[#allocation450_spill] sm:$0xff] %v11889_v16  ;;  %v11898_v32 = vcombine.high %v4259_v22, %v4263_v14  ;;  %v11905_v63 = vcombine.low %v4259_v22, %v4263_v14 }
 0x41a   :  { %v11895_v43 = vcombine.high %v4258_v42, %v4262_v40  ;;  %v11901_v45 = vcombine.low %v4258_v42, %v4262_v40 }
 0x41b   :  { %7368 = vmatpush1.bf16.msra.mxu0 %v11865_v37  ;;  %14585 = vst [vmem:[#allocation453_spill] sm:$0xff] %v11898_v32  ;;  %v4271_v37 = vld [vmem:[#allocation7 + $0xdb8] sm:$0xff] }
 0x41c   :  { %7532 = vmatpush1.bf16.msra.mxu1 %v11869_v41  ;;  %7369 = vmatprep.subr.bf16.mxu0 %v11871_v62  ;;  %14584 = vst [vmem:[#allocation452_spill] sm:$0xff] %v11895_v43  ;;  %v4270_v62 = vld [vmem:[#allocation7 + $0xdb0] sm:$0xff]  ;;  %v4267_v41 = vld [vmem:[#allocation7 + $0xd98] sm:$0xff]  ;;  %14586 = vst [vmem:[#allocation454_spill] sm:$0xff] %v11901_v45 }
 0x41d   :  { %7533 = vmatprep.subr.bf16.mxu1 %v11874_v61  ;;  %v4266_v61 = vld [vmem:[#allocation7 + $0xd90] sm:$0xff]  ;;  %v11925_v38 = vcombine.low %v4267_v41, %v4271_v37 }
 0x41e   :  { %v11907_v20 = vcombine.high %v4266_v61, %v4270_v62 }
 0x41f   :  { %7370 = vmatpush1.bf16.msra.mxu0 %v11877_v18  ;;  %v11921_v18 = vcombine.low %v4266_v61, %v4270_v62  ;;  %14590 = vst [vmem:[#allocation458_spill] sm:$0xff] %v11925_v38  ;;  %v4290_v61 = vld [vmem:[#allocation7 + $0xe50] sm:$0xff] }
 0x420   :  { %7534 = vmatpush1.bf16.msra.mxu1 %v11881_v53  ;;  %7371 = vmatprep.subr.bf16.mxu0 %v11883_v31  ;;  %14587 = vst [vmem:[#allocation455_spill] sm:$0xff] %v11907_v20  ;;  %v11914_v31 = vcombine.high %v4267_v41, %v4271_v37  ;;  %v4274_v53 = vld [vmem:[#allocation7 + $0xdd0] sm:$0xff] }
 0x421   :  { %7535 = vmatprep.subr.bf16.mxu1 %v11886_v10  ;;  %14589 = vst [vmem:[#allocation457_spill] sm:$0xff] %v11921_v18 }
 0x422   :  { %14588 = vst [vmem:[#allocation456_spill] sm:$0xff] %v11914_v31 }
 0x423   :  { %7372 = vmatpush1.bf16.msra.mxu0 %v11889_v16  ;;  %v4278_v16 = vld [vmem:[#allocation7 + $0xdf0] sm:$0xff] }
 0x424   :  { %7536 = vmatpush1.bf16.msra.mxu1 %v11893_v60  ;;  %7373 = vmatprep.subr.bf16.mxu0 %v11895_v43  ;;  %v4275_v60 = vld [vmem:[#allocation7 + $0xdd8] sm:$0xff]  ;;  %v11927_v52 = vcombine.high %v4274_v53, %v4278_v16  ;;  %v11933_v62 = vcombine.low %v4274_v53, %v4278_v16 }
 0x425   :  { %v11909_v39 = vpop.f32.mrb[8].mxu0  ;;  %v11911_v10 = vpop.f32.mrb[8].mxu1  ;;  %7537 = vmatprep.subr.bf16.mxu1 %v11898_v32  ;;  %v4279_v43 = vld [vmem:[#allocation7 + $0xdf8] sm:$0xff] }
 0x426   :  { %v11916_v42 = vpop.f32.mrb[9].mxu0  ;;  %v11918_v40 = vpop.f32.mrb[9].mxu1  ;;  %14591 = vst [vmem:[#allocation459_spill] sm:$0xff] %v11927_v52  ;;  %v11930_v51 = vcombine.high %v4275_v60, %v4279_v43  ;;  %14593 = vst [vmem:[#allocation461_spill] sm:$0xff] %v11933_v62  ;;  %v11937_v37 = vcombine.low %v4275_v60, %v4279_v43 }
 0x427   :  { %v7073_v14 = vpop.f32.mrb[10].mxu0  ;;  %v7237_v22 = vpop.f32.mrb[10].mxu1  ;;  %7374 = vmatpush1.bf16.msra.mxu0 %v11901_v45  ;;  %v4287_v45 = vld [vmem:[#allocation7 + $0xe38] sm:$0xff] }
 0x428   :  { %7538 = vmatpush1.bf16.msra.mxu1 %v11905_v63  ;;  %v7074_v56 = vpop.f32.mrb[11].mxu0  ;;  %v7238_v32 = vpop.f32.mrb[11].mxu1  ;;  %7375 = vmatprep.subr.bf16.mxu0 %v11907_v20  ;;  %14592 = vst [vmem:[#allocation460_spill] sm:$0xff] %v11930_v51  ;;  %v4282_v14 = vld [vmem:[#allocation7 + $0xe10] sm:$0xff]  ;;  %14594 = vst [vmem:[#allocation462_spill] sm:$0xff] %v11937_v37  ;;  %v11942_v41 = vcombine.high %v4283_v8, %v4287_v45  ;;  %v4295_v20 = vld [vmem:[#allocation7 + $0xe78] sm:$0xff]  ;;  %v11949_v16 = vcombine.low %v4283_v8, %v4287_v45 }
 0x429   :  { %7539 = vmatprep.subr.bf16.mxu1 %v11914_v31  ;;  %v4286_v22 = vld [vmem:[#allocation7 + $0xe30] sm:$0xff]  ;;  %v4291_v31 = vld [vmem:[#allocation7 + $0xe58] sm:$0xff] }
 0x42a   :  { %v11939_v56 = vcombine.high %v4282_v14, %v4286_v22  ;;  %14596 = vst [vmem:[#allocation464_spill] sm:$0xff] %v11942_v41  ;;  %v4294_v32 = vld [vmem:[#allocation7 + $0xe70] sm:$0xff]  ;;  %v11945_v53 = vcombine.low %v4282_v14, %v4286_v22  ;;  %14598 = vst [vmem:[#allocation466_spill] sm:$0xff] %v11949_v16  ;;  %v11954_v43 = vcombine.high %v4291_v31, %v4295_v20 }
 0x42b   :  { %7376 = vmatpush1.bf16.msra.mxu0 %v11921_v18  ;;  %v11951_v60 = vcombine.high %v4290_v61, %v4294_v32  ;;  %v4303_v18 = vld [vmem:[#allocation7 + $0xeb8] sm:$0xff]  ;;  %v11957_v14 = vcombine.low %v4290_v61, %v4294_v32  ;;  %v11961_v8 = vcombine.low %v4291_v31, %v4295_v20 }
 0x42c   :  { %7540 = vmatpush1.bf16.msra.mxu1 %v11925_v38  ;;  %7377 = vmatprep.subr.bf16.mxu0 %v11927_v52  ;;  %14595 = vst [vmem:[#allocation463_spill] sm:$0xff] %v11939_v56  ;;  %14597 = vst [vmem:[#allocation465_spill] sm:$0xff] %v11945_v53  ;;  %v4302_v52 = vld [vmem:[#allocation7 + $0xeb0] sm:$0xff]  ;;  %v4299_v38 = vld [vmem:[#allocation7 + $0xe98] sm:$0xff] }
 0x42d   :  { %7541 = vmatprep.subr.bf16.mxu1 %v11930_v51  ;;  %14599 = vst [vmem:[#allocation467_spill] sm:$0xff] %v11951_v60  ;;  %14600 = vst [vmem:[#allocation468_spill] sm:$0xff] %v11954_v43  ;;  %v4298_v51 = vld [vmem:[#allocation7 + $0xe90] sm:$0xff]  ;;  %v11966_v22 = vcombine.high %v4299_v38, %v4303_v18  ;;  %v11973_v31 = vcombine.low %v4299_v38, %v4303_v18 }
 0x42e   :  { %14601 = vst [vmem:[#allocation469_spill] sm:$0xff] %v11957_v14  ;;  %14602 = vst [vmem:[#allocation470_spill] sm:$0xff] %v11961_v8  ;;  %v11963_v45 = vcombine.high %v4298_v51, %v4302_v52  ;;  %v11969_v61 = vcombine.low %v4298_v51, %v4302_v52 }
 0x42f   :  { %7378 = vmatpush1.bf16.msra.mxu0 %v11933_v62  ;;  %14604 = vst [vmem:[#allocation472_spill] sm:$0xff] %v11966_v22  ;;  %v4311_v62 = vld [vmem:[#allocation7 + $0xef8] sm:$0xff]  ;;  %14606 = vst [vmem:[#allocation474_spill] sm:$0xff] %v11973_v31 }
 0x430   :  { %7542 = vmatpush1.bf16.msra.mxu1 %v11937_v37  ;;  %7379 = vmatprep.subr.bf16.mxu0 %v11939_v56  ;;  %14603 = vst [vmem:[#allocation471_spill] sm:$0xff] %v11963_v45  ;;  %v4310_v56 = vld [vmem:[#allocation7 + $0xef0] sm:$0xff]  ;;  %v4307_v37 = vld [vmem:[#allocation7 + $0xed8] sm:$0xff]  ;;  %14605 = vst [vmem:[#allocation473_spill] sm:$0xff] %v11969_v61 }
 0x431   :  { %7543 = vmatprep.subr.bf16.mxu1 %v11942_v41  ;;  %v4306_v41 = vld [vmem:[#allocation7 + $0xed0] sm:$0xff]  ;;  %v11978_v32 = vcombine.high %v4307_v37, %v4311_v62  ;;  %v11985_v52 = vcombine.low %v4307_v37, %v4311_v62 }
 0x432   :  { %v11975_v20 = vcombine.high %v4306_v41, %v4310_v56  ;;  %v11981_v51 = vcombine.low %v4306_v41, %v4310_v56 }
 0x433   :  { %7380 = vmatpush1.bf16.msra.mxu0 %v11945_v53  ;;  %14608 = vst [vmem:[#allocation476_spill] sm:$0xff] %v11978_v32  ;;  %v4319_v53 = vld [vmem:[#allocation7 + $0xf38] sm:$0xff]  ;;  %14610 = vst [vmem:[#allocation478_spill] sm:$0xff] %v11985_v52 }
 0x434   :  { %7544 = vmatpush1.bf16.msra.mxu1 %v11949_v16  ;;  %7381 = vmatprep.subr.bf16.mxu0 %v11951_v60  ;;  %14607 = vst [vmem:[#allocation475_spill] sm:$0xff] %v11975_v20  ;;  %v4318_v60 = vld [vmem:[#allocation7 + $0xf30] sm:$0xff]  ;;  %v4315_v16 = vld [vmem:[#allocation7 + $0xf18] sm:$0xff]  ;;  %14609 = vst [vmem:[#allocation477_spill] sm:$0xff] %v11981_v51 }
 0x435   :  { %7545 = vmatprep.subr.bf16.mxu1 %v11954_v43  ;;  %v4314_v43 = vld [vmem:[#allocation7 + $0xf10] sm:$0xff]  ;;  %v11990_v18 = vcombine.high %v4315_v16, %v4319_v53  ;;  %v11997_v62 = vcombine.low %v4315_v16, %v4319_v53 }
 0x436   :  { %v11987_v38 = vcombine.high %v4314_v43, %v4318_v60  ;;  %v11993_v56 = vcombine.low %v4314_v43, %v4318_v60 }
 0x437   :  { %7382 = vmatpush1.bf16.msra.mxu0 %v11957_v14  ;;  %14612 = vst [vmem:[#allocation480_spill] sm:$0xff] %v11990_v18  ;;  %v4327_v14 = vld [vmem:[#allocation7 + $0xf78] sm:$0xff] }
 0x438   :  { %7546 = vmatpush1.bf16.msra.mxu1 %v11961_v8  ;;  %7383 = vmatprep.subr.bf16.mxu0 %v11963_v45  ;;  %14611 = vst [vmem:[#allocation479_spill] sm:$0xff] %v11987_v38  ;;  %v4326_v45 = vld [vmem:[#allocation7 + $0xf70] sm:$0xff]  ;;  %v4323_v8 = vld [vmem:[#allocation7 + $0xf58] sm:$0xff] }
 0x439   :  { %7547 = vmatprep.subr.bf16.mxu1 %v11966_v22  ;;  %v4322_v22 = vld [vmem:[#allocation7 + $0xf50] sm:$0xff]  ;;  %v12002_v41 = vcombine.high %v4323_v8, %v4327_v14  ;;  %v12009_v53 = vcombine.low %v4323_v8, %v4327_v14 }
 0x43a   :  { %v11999_v37 = vcombine.high %v4322_v22, %v4326_v45  ;;  %v12005_v60 = vcombine.low %v4322_v22, %v4326_v45 }
 0x43b   :  { %7384 = vmatpush1.bf16.msra.mxu0 %v11969_v61  ;;  %14613 = vst [vmem:[#allocation481_spill] sm:$0xff] %v12002_v41  ;;  %v4335_v61 = vld [vmem:[#allocation7 + $0xfb8] sm:$0xff]  ;;  %14614 = vst [vmem:[#allocation482_spill] sm:$0xff] %v12009_v53 }
 0x43c   :  { %7548 = vmatpush1.bf16.msra.mxu1 %v11973_v31  ;;  %7385 = vmatprep.subr.bf16.mxu0 %v11975_v20  ;;  %v4334_v20 = vld [vmem:[#allocation7 + $0xfb0] sm:$0xff]  ;;  %v4331_v31 = vld [vmem:[#allocation7 + $0xf98] sm:$0xff] }
 0x43d   :  { %7549 = vmatprep.subr.bf16.mxu1 %v11978_v32  ;;  %v4330_v32 = vld [vmem:[#allocation7 + $0xf90] sm:$0xff]  ;;  %v12014_v43 = vcombine.high %v4331_v31, %v4335_v61  ;;  %v12021_v14 = vcombine.low %v4331_v31, %v4335_v61  ;;  %v12042_v61 = vpack.c.bf16 %v11916_v42, %v11916_v42  ;;  %v14617_v31 = vld [vmem:[#allocation22_spill] sm:$0xff] }
 0x43e   :  { %v12011_v16 = vcombine.high %v4330_v32, %v4334_v20  ;;  %v12017_v45 = vcombine.low %v4330_v32, %v4334_v20  ;;  %v14616_v42 = vld [vmem:[#allocation21_spill] sm:$0xff]  ;;  %v14618_v32 = vld [vmem:[#allocation23_spill] sm:$0xff] }
 0x43f   :  { %7386 = vmatpush1.bf16.msra.mxu0 %v11981_v51  ;;  %v4343_v51 = vld [vmem:[#allocation7 + $0xff8] sm:$0xff] }
 0x440   :  { %7550 = vmatpush1.bf16.msra.mxu1 %v11985_v52  ;;  %7387 = vmatprep.subr.bf16.mxu0 %v11987_v38  ;;  %v4342_v38 = vld [vmem:[#allocation7 + $0xff0] sm:$0xff]  ;;  %v4339_v52 = vld [vmem:[#allocation7 + $0xfd8] sm:$0xff] }
 0x441   :  { %7551 = vmatprep.subr.bf16.mxu1 %v11990_v18  ;;  %v4338_v18 = vld [vmem:[#allocation7 + $0xfd0] sm:$0xff]  ;;  %v12026_v22 = vcombine.high %v4339_v52, %v4343_v51  ;;  %v12033_v20 = vcombine.low %v4339_v52, %v4343_v51  ;;  %v14619_v51 = vld [vmem:[#allocation24_spill] sm:$0xff] }
 0x442   :  { %v12023_v8 = vcombine.high %v4338_v18, %v4342_v38  ;;  %v14620_v52 = vld [vmem:[#allocation25_spill] sm:$0xff] }
 0x443   :  { %7388 = vmatpush1.bf16.msra.mxu0 %v11993_v56 }
 0x444   :  { %7552 = vmatpush1.bf16.msra.mxu1 %v11997_v62  ;;  %7389 = vmatprep.subr.bf16.mxu0 %v11999_v37 }
 0x445   :  { %7553 = vmatprep.subr.bf16.mxu1 %v12002_v41  ;;  %v12029_v41 = vcombine.low %v4338_v18, %v4342_v38  ;;  %v14621_v38 = vld [vmem:[#allocation26_spill] sm:$0xff]  ;;  %v14622_v18 = vld [vmem:[#allocation27_spill] sm:$0xff] }
 0x447   :  { %7390 = vmatpush1.bf16.msra.mxu0 %v12005_v60 }
 0x448   :  { %7554 = vmatpush1.bf16.msra.mxu1 %v12009_v53  ;;  %7391 = vmatprep.subr.bf16.mxu0 %v12011_v16 }
 0x449   :  { %7555 = vmatprep.subr.bf16.mxu1 %v12014_v43 }
 0x44b   :  { %7392 = vmatpush1.bf16.msra.mxu0 %v12017_v45 }
 0x44c   :  { %7556 = vmatpush1.bf16.msra.mxu1 %v12021_v14  ;;  %7393 = vmatprep.subr.bf16.mxu0 %v12023_v8 }
 0x44d   :  { %7557 = vmatprep.subr.bf16.mxu1 %v12026_v22 }
 0x44f   :  { %7394 = vmatpush1.bf16.msra.mxu0 %v12029_v41 }
 0x450   :  { %7558 = vmatpush1.bf16.msra.mxu1 %v12033_v20  ;;  %7576 = vmatprep.subr.bf16.mxu0 %v10434_v5 }
 0x451   :  { %7740 = vmatprep.subr.bf16.mxu1 %v10436_v6 }
 0x452   :  { %7396 = vmatmul.mubr.bf16.vlgmr.msra.gmra.mrb[12].mxu0 %v11250_v7 }
 0x453   :  { %7560 = vmatmul.mubr.bf16.vlgmr.msra.gmra.mrb[12].mxu1 %v11250_v7  ;;  %7577 = vmatpush1.bf16.msra.mxu0 %v10438_v9  ;;  %v14615_v7 = vld [vmem:[#allocation20_spill] sm:$0xff] }
 0x454   :  { %7608 = vmatprep.mubr.bf16.mxu0 %v12042_v61  ;;  %7741 = vmatpush1.bf16.msra.mxu1 %v10441_v57 }
 0x455   :  { %7772 = vmatprep.mubr.bf16.mxu1 %v12042_v61  ;;  %7578 = vmatprep.subr.bf16.mxu0 %v10444_v12 }
 0x456   :  { %7742 = vmatprep.subr.bf16.mxu1 %v10451_v15 }
 0x457   :  { %7579 = vmatpush1.bf16.msra.mxu0 %v10455_v19 }
 0x458   :  { %7743 = vmatpush1.bf16.msra.mxu1 %v10459_v48  ;;  %7580 = vmatprep.subr.bf16.mxu0 %v10461_v44 }
 0x459   :  { %7744 = vmatprep.subr.bf16.mxu1 %v10465_v3 }
 0x45b   :  { %7581 = vmatpush1.bf16.msra.mxu0 %v10469_v24 }
 0x45c   :  { %7745 = vmatpush1.bf16.msra.mxu1 %v10473_v25  ;;  %7582 = vmatprep.subr.bf16.mxu0 %v10475_v26 }
 0x45d   :  { %7746 = vmatprep.subr.bf16.mxu1 %v10478_v27 }
 0x45f   :  { %7583 = vmatpush1.bf16.msra.mxu0 %v10481_v33 }
 0x460   :  { %7747 = vmatpush1.bf16.msra.mxu1 %v10485_v34  ;;  %7584 = vmatprep.subr.bf16.mxu0 %v10487_v35 }
 0x461   :  { %7748 = vmatprep.subr.bf16.mxu1 %v10490_v36 }
 0x463   :  { %7585 = vmatpush1.bf16.msra.mxu0 %v10493_v46 }
 0x464   :  { %7749 = vmatpush1.bf16.msra.mxu1 %v10497_v49  ;;  %7586 = vmatprep.subr.bf16.mxu0 %v10499_v0 }
 0x465   :  { %7750 = vmatprep.subr.bf16.mxu1 %v10502_v50 }
 0x467   :  { %7587 = vmatpush1.bf16.msra.mxu0 %v10505_v21 }
 0x468   :  { %7751 = vmatpush1.bf16.msra.mxu1 %v10509_v55  ;;  %7588 = vmatprep.subr.bf16.mxu0 %v10511_v58 }
 0x469   :  { %7752 = vmatprep.subr.bf16.mxu1 %v10514_v59 }
 0x46b   :  { %7589 = vmatpush1.bf16.msra.mxu0 %v10517_v1 }
 0x46c   :  { %7753 = vmatpush1.bf16.msra.mxu1 %v10521_v2  ;;  %7590 = vmatprep.subr.bf16.mxu0 %v10523_v30 }
 0x46d   :  { %7754 = vmatprep.subr.bf16.mxu1 %v10526_v4  ;;  %v14785_v4 = vld [vmem:[#allocation190_spill] sm:$0xff] }
 0x46f   :  { %7591 = vmatpush1.bf16.msra.mxu0 %v10529_v11 }
 0x470   :  { %7755 = vmatpush1.bf16.msra.mxu1 %v10533_v13  ;;  %7592 = vmatprep.subr.bf16.mxu0 %v10535_v47 }
 0x471   :  { %7756 = vmatprep.subr.bf16.mxu1 %v10538_v17  ;;  %v14623_v17 = vld [vmem:[#allocation28_spill] sm:$0xff] }
 0x473   :  { %7593 = vmatpush1.bf16.msra.mxu0 %v10541_v23  ;;  %v14624_v23 = vld [vmem:[#allocation29_spill] sm:$0xff] }
 0x474   :  { %7757 = vmatpush1.bf16.msra.mxu1 %v10545_v28  ;;  %7594 = vmatprep.subr.bf16.mxu0 %v14615_v7  ;;  %v14625_v28 = vld [vmem:[#allocation30_spill] sm:$0xff]  ;;  %v14626_v7 = vld [vmem:[#allocation31_spill] sm:$0xff] }
 0x475   :  { %7758 = vmatprep.subr.bf16.mxu1 %v14616_v42  ;;  %v14627_v42 = vld [vmem:[#allocation32_spill] sm:$0xff] }
 0x477   :  { %7595 = vmatpush1.bf16.msra.mxu0 %v14617_v31  ;;  %v14628_v31 = vld [vmem:[#allocation33_spill] sm:$0xff] }
 0x478   :  { %7759 = vmatpush1.bf16.msra.mxu1 %v14618_v32  ;;  %7596 = vmatprep.subr.bf16.mxu0 %v14619_v51  ;;  %v14629_v32 = vld [vmem:[#allocation34_spill] sm:$0xff]  ;;  %v14630_v51 = vld [vmem:[#allocation35_spill] sm:$0xff] }
 0x479   :  { %7760 = vmatprep.subr.bf16.mxu1 %v14620_v52  ;;  %v14631_v52 = vld [vmem:[#allocation36_spill] sm:$0xff] }
 0x47b   :  { %7597 = vmatpush1.bf16.msra.mxu0 %v14621_v38  ;;  %v14632_v38 = vld [vmem:[#allocation37_spill] sm:$0xff] }
 0x47c   :  { %7761 = vmatpush1.bf16.msra.mxu1 %v14622_v18  ;;  %7598 = vmatprep.subr.bf16.mxu0 %v14623_v17  ;;  %v14633_v18 = vld [vmem:[#allocation38_spill] sm:$0xff]  ;;  %v14634_v17 = vld [vmem:[#allocation39_spill] sm:$0xff] }
 0x47d   :  { %7762 = vmatprep.subr.bf16.mxu1 %v14624_v23  ;;  %v14635_v23 = vld [vmem:[#allocation40_spill] sm:$0xff] }
 0x47f   :  { %7599 = vmatpush1.bf16.msra.mxu0 %v14625_v28  ;;  %v14636_v28 = vld [vmem:[#allocation41_spill] sm:$0xff] }
 0x480   :  { %7763 = vmatpush1.bf16.msra.mxu1 %v14626_v7  ;;  %7600 = vmatprep.subr.bf16.mxu0 %v14627_v42  ;;  %v14637_v7 = vld [vmem:[#allocation42_spill] sm:$0xff]  ;;  %v14638_v42 = vld [vmem:[#allocation43_spill] sm:$0xff] }
 0x481   :  { %7764 = vmatprep.subr.bf16.mxu1 %v14628_v31  ;;  %v14639_v31 = vld [vmem:[#allocation44_spill] sm:$0xff] }
 0x483   :  { %7601 = vmatpush1.bf16.msra.mxu0 %v14629_v32  ;;  %v14640_v32 = vld [vmem:[#allocation45_spill] sm:$0xff] }
 0x484   :  { %7765 = vmatpush1.bf16.msra.mxu1 %v14630_v51  ;;  %7602 = vmatprep.subr.bf16.mxu0 %v14631_v52  ;;  %v14641_v51 = vld [vmem:[#allocation46_spill] sm:$0xff] }
 0x485   :  { %7766 = vmatprep.subr.bf16.mxu1 %v14632_v38  ;;  %v12111_v38 = vpack.c.bf16 %v11909_v39, %v11909_v39  ;;  %v14646_v39 = vld [vmem:[#allocation51_spill] sm:$0xff]  ;;  %v14657_v52 = vld [vmem:[#allocation62_spill] sm:$0xff] }
 0x487   :  { %7603 = vmatpush1.bf16.msra.mxu0 %v14633_v18  ;;  %v14642_v18 = vld [vmem:[#allocation47_spill] sm:$0xff] }
 0x488   :  { %7767 = vmatpush1.bf16.msra.mxu1 %v14634_v17  ;;  %7604 = vmatprep.subr.bf16.mxu0 %v14635_v23  ;;  %v14643_v17 = vld [vmem:[#allocation48_spill] sm:$0xff]  ;;  %v14644_v23 = vld [vmem:[#allocation49_spill] sm:$0xff] }
 0x489   :  { %7768 = vmatprep.subr.bf16.mxu1 %v14636_v28  ;;  %v14655_v28 = vld [vmem:[#allocation60_spill] sm:$0xff] }
 0x48b   :  { %7605 = vmatpush1.bf16.msra.mxu0 %v14637_v7  ;;  %v12118_v7 = vpack.c.bf16 %v11918_v40, %v11918_v40  ;;  %v14650_v40 = vld [vmem:[#allocation55_spill] sm:$0xff] }
 0x48c   :  { %7769 = vmatpush1.bf16.msra.mxu1 %v14638_v42  ;;  %7606 = vmatprep.subr.bf16.mxu0 %v14639_v31  ;;  %v14652_v31 = vld [vmem:[#allocation57_spill] sm:$0xff]  ;;  %v14653_v42 = vld [vmem:[#allocation58_spill] sm:$0xff] }
 0x48d   :  { %7770 = vmatprep.subr.bf16.mxu1 %v14640_v32  ;;  %v14645_v32 = vld [vmem:[#allocation50_spill] sm:$0xff] }
 0x48f   :  { %7607 = vmatpush1.bf16.msra.mxu0 %v14641_v51  ;;  %v14651_v51 = vld [vmem:[#allocation56_spill] sm:$0xff] }
 0x490   :  { %7771 = vmatpush1.bf16.msra.mxu1 %v14642_v18  ;;  %7617 = vmatprep.subr.bf16.mxu0 %v14643_v17  ;;  %v14647_v18 = vld [vmem:[#allocation52_spill] sm:$0xff]  ;;  %v14648_v17 = vld [vmem:[#allocation53_spill] sm:$0xff] }
 0x491   :  { %7781 = vmatprep.subr.bf16.mxu1 %v14644_v23  ;;  %v14649_v23 = vld [vmem:[#allocation54_spill] sm:$0xff] }
 0x492   :  { %7609 = vmatmul.mubr.bf16.vlgmr.msra.gmra.mrb[16].mxu0 %v12111_v38 }
 0x493   :  { %7773 = vmatmul.mubr.bf16.vlgmr.msra.gmra.mrb[16].mxu1 %v12111_v38  ;;  %7618 = vmatpush1.bf16.msra.mxu0 %v14645_v32  ;;  %v14654_v32 = vld [vmem:[#allocation59_spill] sm:$0xff] }
 0x494   :  { %7649 = vmatprep.mubr.bf16.mxu0 %v12118_v7  ;;  %7782 = vmatpush1.bf16.msra.mxu1 %v14646_v39  ;;  %v14656_v39 = vld [vmem:[#allocation61_spill] sm:$0xff] }
 0x495   :  { %7813 = vmatprep.mubr.bf16.mxu1 %v12118_v7  ;;  %7619 = vmatprep.subr.bf16.mxu0 %v14647_v18  ;;  %v14658_v18 = vld [vmem:[#allocation63_spill] sm:$0xff] }
 0x496   :  { %7783 = vmatprep.subr.bf16.mxu1 %v14648_v17  ;;  %v14659_v17 = vld [vmem:[#allocation64_spill] sm:$0xff] }
 0x497   :  { %7620 = vmatpush1.bf16.msra.mxu0 %v14649_v23  ;;  %v14660_v23 = vld [vmem:[#allocation65_spill] sm:$0xff] }
 0x498   :  { %7784 = vmatpush1.bf16.msra.mxu1 %v14650_v40  ;;  %7621 = vmatprep.subr.bf16.mxu0 %v14651_v51  ;;  %v14661_v40 = vld [vmem:[#allocation66_spill] sm:$0xff]  ;;  %v14662_v51 = vld [vmem:[#allocation67_spill] sm:$0xff] }
 0x499   :  { %7785 = vmatprep.subr.bf16.mxu1 %v14652_v31  ;;  %v14663_v31 = vld [vmem:[#allocation68_spill] sm:$0xff] }
 0x49b   :  { %7622 = vmatpush1.bf16.msra.mxu0 %v14653_v42  ;;  %v14664_v42 = vld [vmem:[#allocation69_spill] sm:$0xff] }
 0x49c   :  { %7786 = vmatpush1.bf16.msra.mxu1 %v14654_v32  ;;  %7623 = vmatprep.subr.bf16.mxu0 %v14655_v28  ;;  %v14665_v32 = vld [vmem:[#allocation70_spill] sm:$0xff]  ;;  %v14666_v28 = vld [vmem:[#allocation71_spill] sm:$0xff] }
 0x49d   :  { %7787 = vmatprep.subr.bf16.mxu1 %v14656_v39  ;;  %v14667_v39 = vld [vmem:[#allocation72_spill] sm:$0xff] }
 0x49f   :  { %7624 = vmatpush1.bf16.msra.mxu0 %v14657_v52  ;;  %v14668_v52 = vld [vmem:[#allocation73_spill] sm:$0xff] }
 0x4a0   :  { %7788 = vmatpush1.bf16.msra.mxu1 %v14658_v18  ;;  %7625 = vmatprep.subr.bf16.mxu0 %v14659_v17  ;;  %v14669_v18 = vld [vmem:[#allocation74_spill] sm:$0xff]  ;;  %v14670_v17 = vld [vmem:[#allocation75_spill] sm:$0xff] }
 0x4a1   :  { %7789 = vmatprep.subr.bf16.mxu1 %v14660_v23  ;;  %v14671_v23 = vld [vmem:[#allocation76_spill] sm:$0xff] }
 0x4a3   :  { %7626 = vmatpush1.bf16.msra.mxu0 %v14661_v40  ;;  %v14672_v40 = vld [vmem:[#allocation77_spill] sm:$0xff] }
 0x4a4   :  { %7790 = vmatpush1.bf16.msra.mxu1 %v14662_v51  ;;  %7627 = vmatprep.subr.bf16.mxu0 %v14663_v31  ;;  %v14673_v51 = vld [vmem:[#allocation78_spill] sm:$0xff]  ;;  %v14674_v31 = vld [vmem:[#allocation79_spill] sm:$0xff] }
 0x4a5   :  { %7791 = vmatprep.subr.bf16.mxu1 %v14664_v42  ;;  %v14675_v42 = vld [vmem:[#allocation80_spill] sm:$0xff] }
 0x4a7   :  { %7628 = vmatpush1.bf16.msra.mxu0 %v14665_v32  ;;  %v14676_v32 = vld [vmem:[#allocation81_spill] sm:$0xff] }
 0x4a8   :  { %7792 = vmatpush1.bf16.msra.mxu1 %v14666_v28  ;;  %7629 = vmatprep.subr.bf16.mxu0 %v14667_v39  ;;  %v14677_v28 = vld [vmem:[#allocation82_spill] sm:$0xff]  ;;  %v14678_v39 = vld [vmem:[#allocation83_spill] sm:$0xff] }
 0x4a9   :  { %7793 = vmatprep.subr.bf16.mxu1 %v14668_v52  ;;  %v14679_v52 = vld [vmem:[#allocation84_spill] sm:$0xff] }
 0x4ab   :  { %7630 = vmatpush1.bf16.msra.mxu0 %v14669_v18  ;;  %v14680_v18 = vld [vmem:[#allocation85_spill] sm:$0xff] }
 0x4ac   :  { %7794 = vmatpush1.bf16.msra.mxu1 %v14670_v17  ;;  %7631 = vmatprep.subr.bf16.mxu0 %v14671_v23  ;;  %v14681_v17 = vld [vmem:[#allocation86_spill] sm:$0xff]  ;;  %v14682_v23 = vld [vmem:[#allocation87_spill] sm:$0xff] }
 0x4ad   :  { %7795 = vmatprep.subr.bf16.mxu1 %v14672_v40  ;;  %v14683_v40 = vld [vmem:[#allocation88_spill] sm:$0xff] }
 0x4af   :  { %7632 = vmatpush1.bf16.msra.mxu0 %v14673_v51  ;;  %v14684_v51 = vld [vmem:[#allocation89_spill] sm:$0xff] }
 0x4b0   :  { %7796 = vmatpush1.bf16.msra.mxu1 %v14674_v31  ;;  %7633 = vmatprep.subr.bf16.mxu0 %v14675_v42  ;;  %v14685_v31 = vld [vmem:[#allocation90_spill] sm:$0xff]  ;;  %v14686_v42 = vld [vmem:[#allocation91_spill] sm:$0xff] }
 0x4b1   :  { %7797 = vmatprep.subr.bf16.mxu1 %v14676_v32  ;;  %v14687_v32 = vld [vmem:[#allocation92_spill] sm:$0xff] }
 0x4b3   :  { %7634 = vmatpush1.bf16.msra.mxu0 %v14677_v28  ;;  %v14688_v28 = vld [vmem:[#allocation93_spill] sm:$0xff] }
 0x4b4   :  { %7798 = vmatpush1.bf16.msra.mxu1 %v14678_v39  ;;  %7635 = vmatprep.subr.bf16.mxu0 %v14679_v52  ;;  %v14689_v39 = vld [vmem:[#allocation94_spill] sm:$0xff]  ;;  %v14690_v52 = vld [vmem:[#allocation95_spill] sm:$0xff] }
 0x4b5   :  { %7799 = vmatprep.subr.bf16.mxu1 %v14680_v18  ;;  %v14691_v18 = vld [vmem:[#allocation96_spill] sm:$0xff] }
 0x4b7   :  { %7636 = vmatpush1.bf16.msra.mxu0 %v14681_v17  ;;  %v14692_v17 = vld [vmem:[#allocation97_spill] sm:$0xff] }
 0x4b8   :  { %7800 = vmatpush1.bf16.msra.mxu1 %v14682_v23  ;;  %7637 = vmatprep.subr.bf16.mxu0 %v14683_v40  ;;  %v14693_v23 = vld [vmem:[#allocation98_spill] sm:$0xff]  ;;  %v14694_v40 = vld [vmem:[#allocation99_spill] sm:$0xff] }
 0x4b9   :  { %7801 = vmatprep.subr.bf16.mxu1 %v14684_v51  ;;  %v14695_v51 = vld [vmem:[#allocation100_spill] sm:$0xff] }
 0x4bb   :  { %7638 = vmatpush1.bf16.msra.mxu0 %v14685_v31  ;;  %v14696_v31 = vld [vmem:[#allocation101_spill] sm:$0xff] }
 0x4bc   :  { %7802 = vmatpush1.bf16.msra.mxu1 %v14686_v42  ;;  %7639 = vmatprep.subr.bf16.mxu0 %v14687_v32  ;;  %v14697_v42 = vld [vmem:[#allocation102_spill] sm:$0xff]  ;;  %v14698_v32 = vld [vmem:[#allocation103_spill] sm:$0xff] }
 0x4bd   :  { %7803 = vmatprep.subr.bf16.mxu1 %v14688_v28  ;;  %v14699_v28 = vld [vmem:[#allocation104_spill] sm:$0xff] }
 0x4bf   :  { %7640 = vmatpush1.bf16.msra.mxu0 %v14689_v39  ;;  %v14700_v39 = vld [vmem:[#allocation105_spill] sm:$0xff] }
 0x4c0   :  { %7804 = vmatpush1.bf16.msra.mxu1 %v14690_v52  ;;  %7641 = vmatprep.subr.bf16.mxu0 %v14691_v18  ;;  %v14701_v52 = vld [vmem:[#allocation106_spill] sm:$0xff]  ;;  %v14702_v18 = vld [vmem:[#allocation107_spill] sm:$0xff] }
 0x4c1   :  { %7805 = vmatprep.subr.bf16.mxu1 %v14692_v17  ;;  %v14703_v17 = vld [vmem:[#allocation108_spill] sm:$0xff] }
 0x4c3   :  { %7642 = vmatpush1.bf16.msra.mxu0 %v14693_v23  ;;  %v14704_v23 = vld [vmem:[#allocation109_spill] sm:$0xff] }
 0x4c4   :  { %7806 = vmatpush1.bf16.msra.mxu1 %v14694_v40  ;;  %7643 = vmatprep.subr.bf16.mxu0 %v14695_v51  ;;  %v14705_v40 = vld [vmem:[#allocation110_spill] sm:$0xff]  ;;  %v14719_v51 = vld [vmem:[#allocation124_spill] sm:$0xff] }
 0x4c5   :  { %7807 = vmatprep.subr.bf16.mxu1 %v14696_v31  ;;  %v12187_v31 = vpack.c.bf16 %v11911_v10, %v11911_v10  ;;  %v14713_v10 = vld [vmem:[#allocation118_spill] sm:$0xff] }
 0x4c7   :  { %7644 = vmatpush1.bf16.msra.mxu0 %v14697_v42  ;;  %v14706_v42 = vld [vmem:[#allocation111_spill] sm:$0xff] }
 0x4c8   :  { %7808 = vmatpush1.bf16.msra.mxu1 %v14698_v32  ;;  %7645 = vmatprep.subr.bf16.mxu0 %v14699_v28  ;;  %v14707_v32 = vld [vmem:[#allocation112_spill] sm:$0xff]  ;;  %v14708_v28 = vld [vmem:[#allocation113_spill] sm:$0xff] }
 0x4c9   :  { %7809 = vmatprep.subr.bf16.mxu1 %v14700_v39  ;;  %v14718_v39 = vld [vmem:[#allocation123_spill] sm:$0xff] }
 0x4cb   :  { %7646 = vmatpush1.bf16.msra.mxu0 %v14701_v52  ;;  %v14714_v52 = vld [vmem:[#allocation119_spill] sm:$0xff] }
 0x4cc   :  { %7810 = vmatpush1.bf16.msra.mxu1 %v14702_v18  ;;  %7647 = vmatprep.subr.bf16.mxu0 %v14703_v17  ;;  %v14709_v18 = vld [vmem:[#allocation114_spill] sm:$0xff]  ;;  %v14710_v17 = vld [vmem:[#allocation115_spill] sm:$0xff] }
 0x4cd   :  { %7811 = vmatprep.subr.bf16.mxu1 %v14704_v23  ;;  %v14711_v23 = vld [vmem:[#allocation116_spill] sm:$0xff] }
 0x4cf   :  { %7648 = vmatpush1.bf16.msra.mxu0 %v14705_v40  ;;  %v14712_v40 = vld [vmem:[#allocation117_spill] sm:$0xff] }
 0x4d0   :  { %7812 = vmatpush1.bf16.msra.mxu1 %v14706_v42  ;;  %7658 = vmatprep.subr.bf16.mxu0 %v14707_v32  ;;  %v14715_v42 = vld [vmem:[#allocation120_spill] sm:$0xff]  ;;  %v14716_v32 = vld [vmem:[#allocation121_spill] sm:$0xff] }
 0x4d1   :  { %7822 = vmatprep.subr.bf16.mxu1 %v14708_v28  ;;  %v14717_v28 = vld [vmem:[#allocation122_spill] sm:$0xff] }
 0x4d2   :  { %7650 = vmatmul.mubr.bf16.vlgmr.msra.gmra.mrb[16].mxu0 %v12187_v31 }
 0x4d3   :  { %7814 = vmatmul.mubr.bf16.vlgmr.msra.gmra.mrb[16].mxu1 %v12187_v31  ;;  %7659 = vmatpush1.bf16.msra.mxu0 %v14709_v18  ;;  %v14720_v18 = vld [vmem:[#allocation125_spill] sm:$0xff] }
 0x4d4   :  { %7823 = vmatpush1.bf16.msra.mxu1 %v14710_v17  ;;  %7660 = vmatprep.subr.bf16.mxu0 %v14711_v23  ;;  %v14721_v17 = vld [vmem:[#allocation126_spill] sm:$0xff]  ;;  %v14722_v23 = vld [vmem:[#allocation127_spill] sm:$0xff] }
 0x4d5   :  { %7824 = vmatprep.subr.bf16.mxu1 %v14712_v40  ;;  %v14723_v40 = vld [vmem:[#allocation128_spill] sm:$0xff] }
 0x4d7   :  { %7661 = vmatpush1.bf16.msra.mxu0 %v14713_v10  ;;  %v14724_v10 = vld [vmem:[#allocation129_spill] sm:$0xff] }
 0x4d8   :  { %7825 = vmatpush1.bf16.msra.mxu1 %v14714_v52  ;;  %7662 = vmatprep.subr.bf16.mxu0 %v14715_v42  ;;  %v14725_v52 = vld [vmem:[#allocation130_spill] sm:$0xff]  ;;  %v14726_v42 = vld [vmem:[#allocation131_spill] sm:$0xff] }
 0x4d9   :  { %7826 = vmatprep.subr.bf16.mxu1 %v14716_v32  ;;  %v14727_v32 = vld [vmem:[#allocation132_spill] sm:$0xff] }
 0x4db   :  { %7663 = vmatpush1.bf16.msra.mxu0 %v14717_v28  ;;  %v14728_v28 = vld [vmem:[#allocation133_spill] sm:$0xff] }
 0x4dc   :  { %7827 = vmatpush1.bf16.msra.mxu1 %v14718_v39  ;;  %7664 = vmatprep.subr.bf16.mxu0 %v14719_v51  ;;  %v14729_v39 = vld [vmem:[#allocation134_spill] sm:$0xff]  ;;  %v14730_v51 = vld [vmem:[#allocation135_spill] sm:$0xff] }
 0x4dd   :  { %7828 = vmatprep.subr.bf16.mxu1 %v14720_v18  ;;  %v14731_v18 = vld [vmem:[#allocation136_spill] sm:$0xff] }
 0x4df   :  { %7665 = vmatpush1.bf16.msra.mxu0 %v14721_v17  ;;  %v14732_v17 = vld [vmem:[#allocation137_spill] sm:$0xff] }
 0x4e0   :  { %7829 = vmatpush1.bf16.msra.mxu1 %v14722_v23  ;;  %7666 = vmatprep.subr.bf16.mxu0 %v14723_v40  ;;  %v14733_v23 = vld [vmem:[#allocation138_spill] sm:$0xff]  ;;  %v14734_v40 = vld [vmem:[#allocation139_spill] sm:$0xff] }
 0x4e1   :  { %7830 = vmatprep.subr.bf16.mxu1 %v14724_v10  ;;  %v14735_v10 = vld [vmem:[#allocation140_spill] sm:$0xff] }
 0x4e3   :  { %7667 = vmatpush1.bf16.msra.mxu0 %v14725_v52  ;;  %v14736_v52 = vld [vmem:[#allocation141_spill] sm:$0xff] }
 0x4e4   :  { %7831 = vmatpush1.bf16.msra.mxu1 %v14726_v42  ;;  %7668 = vmatprep.subr.bf16.mxu0 %v14727_v32  ;;  %v14737_v42 = vld [vmem:[#allocation142_spill] sm:$0xff]  ;;  %v14738_v32 = vld [vmem:[#allocation143_spill] sm:$0xff] }
 0x4e5   :  { %7832 = vmatprep.subr.bf16.mxu1 %v14728_v28  ;;  %v14739_v28 = vld [vmem:[#allocation144_spill] sm:$0xff] }
 0x4e7   :  { %7669 = vmatpush1.bf16.msra.mxu0 %v14729_v39  ;;  %v14740_v39 = vld [vmem:[#allocation145_spill] sm:$0xff] }
 0x4e8   :  { %7833 = vmatpush1.bf16.msra.mxu1 %v14730_v51  ;;  %7670 = vmatprep.subr.bf16.mxu0 %v14731_v18  ;;  %v14741_v51 = vld [vmem:[#allocation146_spill] sm:$0xff]  ;;  %v14742_v18 = vld [vmem:[#allocation147_spill] sm:$0xff] }
 0x4e9   :  { %7834 = vmatprep.subr.bf16.mxu1 %v14732_v17  ;;  %v14743_v17 = vld [vmem:[#allocation148_spill] sm:$0xff] }
 0x4eb   :  { %7671 = vmatpush1.bf16.msra.mxu0 %v14733_v23  ;;  %v14744_v23 = vld [vmem:[#allocation149_spill] sm:$0xff] }
 0x4ec   :  { %7835 = vmatpush1.bf16.msra.mxu1 %v14734_v40  ;;  %7672 = vmatprep.subr.bf16.mxu0 %v14735_v10  ;;  %v14745_v40 = vld [vmem:[#allocation150_spill] sm:$0xff]  ;;  %v14746_v10 = vld [vmem:[#allocation151_spill] sm:$0xff] }
 0x4ed   :  { %7836 = vmatprep.subr.bf16.mxu1 %v14736_v52  ;;  %v14747_v52 = vld [vmem:[#allocation152_spill] sm:$0xff] }
 0x4ef   :  { %7673 = vmatpush1.bf16.msra.mxu0 %v14737_v42  ;;  %v14748_v42 = vld [vmem:[#allocation153_spill] sm:$0xff] }
 0x4f0   :  { %7837 = vmatpush1.bf16.msra.mxu1 %v14738_v32  ;;  %7674 = vmatprep.subr.bf16.mxu0 %v14739_v28  ;;  %v14749_v32 = vld [vmem:[#allocation154_spill] sm:$0xff]  ;;  %v14750_v28 = vld [vmem:[#allocation155_spill] sm:$0xff] }
 0x4f1   :  { %7838 = vmatprep.subr.bf16.mxu1 %v14740_v39  ;;  %v14751_v39 = vld [vmem:[#allocation156_spill] sm:$0xff] }
 0x4f3   :  { %7675 = vmatpush1.bf16.msra.mxu0 %v14741_v51  ;;  %v14752_v51 = vld [vmem:[#allocation157_spill] sm:$0xff] }
 0x4f4   :  { %7839 = vmatpush1.bf16.msra.mxu1 %v14742_v18  ;;  %7676 = vmatprep.subr.bf16.mxu0 %v14743_v17  ;;  %v14753_v18 = vld [vmem:[#allocation158_spill] sm:$0xff]  ;;  %v14754_v17 = vld [vmem:[#allocation159_spill] sm:$0xff] }
 0x4f5   :  { %7840 = vmatprep.subr.bf16.mxu1 %v14744_v23  ;;  %v14755_v23 = vld [vmem:[#allocation160_spill] sm:$0xff] }
 0x4f7   :  { %7677 = vmatpush1.bf16.msra.mxu0 %v14745_v40  ;;  %v14756_v40 = vld [vmem:[#allocation161_spill] sm:$0xff] }
 0x4f8   :  { %7841 = vmatpush1.bf16.msra.mxu1 %v14746_v10  ;;  %7678 = vmatprep.subr.bf16.mxu0 %v14747_v52  ;;  %v14757_v10 = vld [vmem:[#allocation162_spill] sm:$0xff]  ;;  %v14758_v52 = vld [vmem:[#allocation163_spill] sm:$0xff] }
 0x4f9   :  { %7842 = vmatprep.subr.bf16.mxu1 %v14748_v42  ;;  %v14759_v42 = vld [vmem:[#allocation164_spill] sm:$0xff] }
 0x4fb   :  { %7679 = vmatpush1.bf16.msra.mxu0 %v14749_v32  ;;  %v14760_v32 = vld [vmem:[#allocation165_spill] sm:$0xff] }
 0x4fc   :  { %7843 = vmatpush1.bf16.msra.mxu1 %v14750_v28  ;;  %7680 = vmatprep.subr.bf16.mxu0 %v14751_v39  ;;  %v14761_v28 = vld [vmem:[#allocation166_spill] sm:$0xff]  ;;  %v14762_v39 = vld [vmem:[#allocation167_spill] sm:$0xff] }
 0x4fd   :  { %7844 = vmatprep.subr.bf16.mxu1 %v14752_v51  ;;  %v14763_v51 = vld [vmem:[#allocation168_spill] sm:$0xff] }
 0x4ff   :  { %7681 = vmatpush1.bf16.msra.mxu0 %v14753_v18  ;;  %v14764_v18 = vld [vmem:[#allocation169_spill] sm:$0xff] }
 0x500   :  { %7845 = vmatpush1.bf16.msra.mxu1 %v14754_v17  ;;  %7682 = vmatprep.subr.bf16.mxu0 %v14755_v23  ;;  %v14765_v17 = vld [vmem:[#allocation170_spill] sm:$0xff]  ;;  %v14766_v23 = vld [vmem:[#allocation171_spill] sm:$0xff] }
 0x501   :  { %7846 = vmatprep.subr.bf16.mxu1 %v14756_v40  ;;  %v14767_v40 = vld [vmem:[#allocation172_spill] sm:$0xff] }
 0x503   :  { %7683 = vmatpush1.bf16.msra.mxu0 %v14757_v10  ;;  %v14768_v10 = vld [vmem:[#allocation173_spill] sm:$0xff] }
 0x504   :  { %7847 = vmatpush1.bf16.msra.mxu1 %v14758_v52  ;;  %7684 = vmatprep.subr.bf16.mxu0 %v14759_v42  ;;  %v14769_v52 = vld [vmem:[#allocation174_spill] sm:$0xff]  ;;  %v14770_v42 = vld [vmem:[#allocation175_spill] sm:$0xff] }
 0x505   :  { %7848 = vmatprep.subr.bf16.mxu1 %v14760_v32  ;;  %v14771_v32 = vld [vmem:[#allocation176_spill] sm:$0xff] }
 0x507   :  { %7685 = vmatpush1.bf16.msra.mxu0 %v14761_v28  ;;  %v14772_v28 = vld [vmem:[#allocation177_spill] sm:$0xff] }
 0x508   :  { %7849 = vmatpush1.bf16.msra.mxu1 %v14762_v39  ;;  %7686 = vmatprep.subr.bf16.mxu0 %v14763_v51 }
 0x509   :  { %7850 = vmatprep.subr.bf16.mxu1 %v14764_v18 }
 0x50b   :  { %7687 = vmatpush1.bf16.msra.mxu0 %v14765_v17 }
 0x50c   :  { %7851 = vmatpush1.bf16.msra.mxu1 %v14766_v23  ;;  %7688 = vmatprep.subr.bf16.mxu0 %v14767_v40 }
 0x50d   :  { %7852 = vmatprep.subr.bf16.mxu1 %v14768_v10 }
 0x50f   :  { %7689 = vmatpush1.bf16.msra.mxu0 %v14769_v52  ;;  %v14784_v52 = vld [vmem:[#allocation189_spill] sm:$0xff] }
 0x510   :  { %7853 = vmatpush1.bf16.msra.mxu1 %v14770_v42  ;;  %7699 = vmatprep.subr.bf16.mxu0 %v14771_v32  ;;  %v14781_v42 = vld [vmem:[#allocation186_spill] sm:$0xff] }
 0x511   :  { %7863 = vmatprep.subr.bf16.mxu1 %v14772_v28  ;;  %v14773_v28 = vld [vmem:[#allocation178_spill] sm:$0xff] }
 0x525   :  { %v7397_v39 = vpop.f32.mrb[12].mxu0 }
 0x526   :  { %v12258_v51 = vpop.f32.mrb[12].mxu1  ;;  %v7399_v18 = vpop.f32.mrb[13].mxu0  ;;  %v12262_v13 = vpack.c.bf16 %v7397_v39, %v7397_v39  ;;  %v14777_v39 = vld [vmem:[#allocation182_spill] sm:$0xff] }
 0x527   :  { %v12260_v47 = vpack.c.bf16 %v7399_v18, %v7399_v18  ;;  %v7563_v17 = vpop.f32.mrb[13].mxu1  ;;  %v7401_v23 = vpop.f32.mrb[14].mxu0  ;;  %v14774_v18 = vld [vmem:[#allocation179_spill] sm:$0xff] }
 0x528   :  { %v7565_v40 = vpop.f32.mrb[14].mxu1  ;;  %v7402_v10 = vpop.f32.mrb[15].mxu0  ;;  %v12266_v32 = vpack.c.bf16 %v7563_v17, %v7563_v17  ;;  %v14775_v23 = vld [vmem:[#allocation180_spill] sm:$0xff]  ;;  %v14778_v17 = vld [vmem:[#allocation183_spill] sm:$0xff] }
 0x529   :  { %v7566_v11 = vpop.f32.mrb[15].mxu1  ;;  %7690 = vmatprep.mubr.bf16.mxu0 %v12260_v47  ;;  %7854 = vmatprep.mubr.bf16.mxu1 %v12260_v47  ;;  %v14779_v40 = vld [vmem:[#allocation184_spill] sm:$0xff]  ;;  %v14780_v10 = vld [vmem:[#allocation185_spill] sm:$0xff] }
 0x52a   :  { %7691 = vmatmul.mubr.bf16.vlgmr.msra.gmra.mrb[16].mxu0 %v12262_v13  ;;  %7855 = vmatmul.mubr.bf16.vlgmr.msra.gmra.mrb[16].mxu1 %v12262_v13  ;;  %v14776_v11 = vld [vmem:[#allocation181_spill] sm:$0xff] }
 0x52b   :  { %7700 = vmatpush1.bf16.msra.mxu0 %v14773_v28  ;;  %7864 = vmatpush1.bf16.msra.mxu1 %v14774_v18  ;;  %v14782_v28 = vld [vmem:[#allocation187_spill] sm:$0xff]  ;;  %v14783_v18 = vld [vmem:[#allocation188_spill] sm:$0xff] }
 0x52c   :  { %7731 = vmatprep.mubr.bf16.mxu0 %v12266_v32  ;;  %7895 = vmatprep.mubr.bf16.mxu1 %v12266_v32 }
 0x52d   :  { %7701 = vmatprep.subr.bf16.mxu0 %v14775_v23  ;;  %7865 = vmatprep.subr.bf16.mxu1 %v14776_v11  ;;  %v14786_v23 = vld [vmem:[#allocation191_spill] sm:$0xff]  ;;  %v14787_v11 = vld [vmem:[#allocation192_spill] sm:$0xff] }
 0x52f   :  { %7702 = vmatpush1.bf16.msra.mxu0 %v14777_v39  ;;  %7866 = vmatpush1.bf16.msra.mxu1 %v14778_v17  ;;  %v14788_v39 = vld [vmem:[#allocation193_spill] sm:$0xff]  ;;  %v14789_v17 = vld [vmem:[#allocation194_spill] sm:$0xff] }
 0x530   :  { %7703 = vmatprep.subr.bf16.mxu0 %v14779_v40  ;;  %7867 = vmatprep.subr.bf16.mxu1 %v14780_v10  ;;  %v14790_v40 = vld [vmem:[#allocation195_spill] sm:$0xff]  ;;  %v14791_v10 = vld [vmem:[#allocation196_spill] sm:$0xff] }
 0x533   :  { %7704 = vmatpush1.bf16.msra.mxu0 %v14781_v42  ;;  %7868 = vmatpush1.bf16.msra.mxu1 %v14782_v28  ;;  %v14792_v42 = vld [vmem:[#allocation197_spill] sm:$0xff]  ;;  %v14793_v28 = vld [vmem:[#allocation198_spill] sm:$0xff] }
 0x534   :  { %7705 = vmatprep.subr.bf16.mxu0 %v14783_v18  ;;  %7869 = vmatprep.subr.bf16.mxu1 %v14784_v52  ;;  %v14794_v18 = vld [vmem:[#allocation199_spill] sm:$0xff]  ;;  %v14795_v52 = vld [vmem:[#allocation200_spill] sm:$0xff] }
 0x537   :  { %7706 = vmatpush1.bf16.msra.mxu0 %v14785_v4  ;;  %7870 = vmatpush1.bf16.msra.mxu1 %v14786_v23  ;;  %v14796_v4 = vld [vmem:[#allocation201_spill] sm:$0xff]  ;;  %v14797_v23 = vld [vmem:[#allocation202_spill] sm:$0xff] }
 0x538   :  { %7707 = vmatprep.subr.bf16.mxu0 %v14787_v11  ;;  %7871 = vmatprep.subr.bf16.mxu1 %v14788_v39  ;;  %v14798_v11 = vld [vmem:[#allocation203_spill] sm:$0xff]  ;;  %v14799_v39 = vld [vmem:[#allocation204_spill] sm:$0xff] }
 0x53b   :  { %7708 = vmatpush1.bf16.msra.mxu0 %v14789_v17  ;;  %7872 = vmatpush1.bf16.msra.mxu1 %v14790_v40  ;;  %v14800_v17 = vld [vmem:[#allocation205_spill] sm:$0xff]  ;;  %v14801_v40 = vld [vmem:[#allocation206_spill] sm:$0xff] }
 0x53c   :  { %7709 = vmatprep.subr.bf16.mxu0 %v14791_v10  ;;  %7873 = vmatprep.subr.bf16.mxu1 %v14792_v42  ;;  %v14802_v10 = vld [vmem:[#allocation207_spill] sm:$0xff]  ;;  %v14803_v42 = vld [vmem:[#allocation208_spill] sm:$0xff] }
 0x53f   :  { %7710 = vmatpush1.bf16.msra.mxu0 %v14793_v28  ;;  %7874 = vmatpush1.bf16.msra.mxu1 %v14794_v18  ;;  %v14804_v28 = vld [vmem:[#allocation209_spill] sm:$0xff]  ;;  %v14805_v18 = vld [vmem:[#allocation210_spill] sm:$0xff] }
 0x540   :  { %7711 = vmatprep.subr.bf16.mxu0 %v14795_v52  ;;  %7875 = vmatprep.subr.bf16.mxu1 %v14796_v4  ;;  %v14806_v52 = vld [vmem:[#allocation211_spill] sm:$0xff]  ;;  %v14807_v4 = vld [vmem:[#allocation212_spill] sm:$0xff] }
 0x543   :  { %7712 = vmatpush1.bf16.msra.mxu0 %v14797_v23  ;;  %7876 = vmatpush1.bf16.msra.mxu1 %v14798_v11  ;;  %v14808_v23 = vld [vmem:[#allocation213_spill] sm:$0xff]  ;;  %v14809_v11 = vld [vmem:[#allocation214_spill] sm:$0xff] }
 0x544   :  { %7713 = vmatprep.subr.bf16.mxu0 %v14799_v39  ;;  %7877 = vmatprep.subr.bf16.mxu1 %v14800_v17  ;;  %v14810_v39 = vld [vmem:[#allocation215_spill] sm:$0xff]  ;;  %v14811_v17 = vld [vmem:[#allocation216_spill] sm:$0xff] }
 0x547   :  { %7714 = vmatpush1.bf16.msra.mxu0 %v14801_v40  ;;  %7878 = vmatpush1.bf16.msra.mxu1 %v14802_v10  ;;  %v14812_v40 = vld [vmem:[#allocation217_spill] sm:$0xff]  ;;  %v14813_v10 = vld [vmem:[#allocation218_spill] sm:$0xff] }
 0x548   :  { %7715 = vmatprep.subr.bf16.mxu0 %v14803_v42  ;;  %7879 = vmatprep.subr.bf16.mxu1 %v14804_v28  ;;  %v14814_v42 = vld [vmem:[#allocation219_spill] sm:$0xff]  ;;  %v14815_v28 = vld [vmem:[#allocation220_spill] sm:$0xff] }
 0x54b   :  { %7716 = vmatpush1.bf16.msra.mxu0 %v14805_v18  ;;  %7880 = vmatpush1.bf16.msra.mxu1 %v14806_v52  ;;  %v14816_v18 = vld [vmem:[#allocation221_spill] sm:$0xff]  ;;  %v14817_v52 = vld [vmem:[#allocation222_spill] sm:$0xff] }
 0x54c   :  { %7717 = vmatprep.subr.bf16.mxu0 %v14807_v4  ;;  %7881 = vmatprep.subr.bf16.mxu1 %v14808_v23  ;;  %v14818_v4 = vld [vmem:[#allocation223_spill] sm:$0xff]  ;;  %v14819_v23 = vld [vmem:[#allocation224_spill] sm:$0xff] }
 0x54f   :  { %7718 = vmatpush1.bf16.msra.mxu0 %v14809_v11  ;;  %7882 = vmatpush1.bf16.msra.mxu1 %v14810_v39  ;;  %v14820_v11 = vld [vmem:[#allocation225_spill] sm:$0xff]  ;;  %v14821_v39 = vld [vmem:[#allocation226_spill] sm:$0xff] }
 0x550   :  { %7719 = vmatprep.subr.bf16.mxu0 %v14811_v17  ;;  %7883 = vmatprep.subr.bf16.mxu1 %v14812_v40  ;;  %v14822_v17 = vld [vmem:[#allocation227_spill] sm:$0xff]  ;;  %v14823_v40 = vld [vmem:[#allocation228_spill] sm:$0xff] }
 0x553   :  { %7720 = vmatpush1.bf16.msra.mxu0 %v14813_v10  ;;  %7884 = vmatpush1.bf16.msra.mxu1 %v14814_v42  ;;  %v14824_v10 = vld [vmem:[#allocation229_spill] sm:$0xff]  ;;  %v14825_v42 = vld [vmem:[#allocation230_spill] sm:$0xff] }
 0x554   :  { %7721 = vmatprep.subr.bf16.mxu0 %v14815_v28  ;;  %7885 = vmatprep.subr.bf16.mxu1 %v14816_v18  ;;  %v14826_v28 = vld [vmem:[#allocation231_spill] sm:$0xff]  ;;  %v14827_v18 = vld [vmem:[#allocation232_spill] sm:$0xff] }
 0x557   :  { %7722 = vmatpush1.bf16.msra.mxu0 %v14817_v52  ;;  %7886 = vmatpush1.bf16.msra.mxu1 %v14818_v4  ;;  %v14828_v52 = vld [vmem:[#allocation233_spill] sm:$0xff] }
 0x558   :  { %7723 = vmatprep.subr.bf16.mxu0 %v14819_v23  ;;  %7887 = vmatprep.subr.bf16.mxu1 %v14820_v11  ;;  %v14829_v23 = vld [vmem:[#allocation235_spill] sm:$0xff]  ;;  %v14830_v11 = vld [vmem:[#allocation236_spill] sm:$0xff] }
 0x55b   :  { %7724 = vmatpush1.bf16.msra.mxu0 %v14821_v39  ;;  %7888 = vmatpush1.bf16.msra.mxu1 %v14822_v17  ;;  %v14831_v39 = vld [vmem:[#allocation237_spill] sm:$0xff]  ;;  %v14832_v17 = vld [vmem:[#allocation238_spill] sm:$0xff] }
 0x55c   :  { %7725 = vmatprep.subr.bf16.mxu0 %v14823_v40  ;;  %7889 = vmatprep.subr.bf16.mxu1 %v14824_v10  ;;  %v14833_v40 = vld [vmem:[#allocation239_spill] sm:$0xff] }
 0x55f   :  { %7726 = vmatpush1.bf16.msra.mxu0 %v14825_v42  ;;  %7890 = vmatpush1.bf16.msra.mxu1 %v14826_v28  ;;  %v12336_v42 = vpack.c.bf16 %v12258_v51, %v12258_v51  ;;  %v14834_v28 = vld [vmem:[#allocation240_spill] sm:$0xff]  ;;  %v14839_v51 = vld [vmem:[#allocation245_spill] sm:$0xff] }
 0x560   :  { %7727 = vmatprep.subr.bf16.mxu0 %v14827_v18  ;;  %7891 = vmatprep.subr.bf16.mxu1 %v14828_v52  ;;  %v14835_v18 = vld [vmem:[#allocation241_spill] sm:$0xff]  ;;  %v14846_v52 = vld [vmem:[#allocation252_spill] sm:$0xff] }
 0x563   :  { %7728 = vmatpush1.bf16.msra.mxu0 %v11222_v54  ;;  %7892 = vmatpush1.bf16.msra.mxu1 %v14829_v23  ;;  %v14836_v23 = vld [vmem:[#allocation242_spill] sm:$0xff] }
 0x564   :  { %7729 = vmatprep.subr.bf16.mxu0 %v14830_v11  ;;  %7893 = vmatprep.subr.bf16.mxu1 %v14831_v39  ;;  %v14837_v39 = vld [vmem:[#allocation243_spill] sm:$0xff]  ;;  %v14843_v11 = vld [vmem:[#allocation249_spill] sm:$0xff]  ;;  %v14844_v54 = vld [vmem:[#allocation250_spill] sm:$0xff] }
 0x567   :  { %7730 = vmatpush1.bf16.msra.mxu0 %v14832_v17  ;;  %7894 = vmatpush1.bf16.msra.mxu1 %v14833_v40  ;;  %v14838_v40 = vld [vmem:[#allocation244_spill] sm:$0xff]  ;;  %v14840_v17 = vld [vmem:[#allocation246_spill] sm:$0xff] }
 0x568   :  { %7904 = vmatprep.subr.bf16.mxu0 %v14834_v28  ;;  %8068 = vmatprep.subr.bf16.mxu1 %v14835_v18  ;;  %v14841_v28 = vld [vmem:[#allocation247_spill] sm:$0xff]  ;;  %v14842_v18 = vld [vmem:[#allocation248_spill] sm:$0xff] }
 0x56a   :  { %7732 = vmatmul.mubr.bf16.vlgmr.msra.gmra.mrb[16].mxu0 %v12336_v42  ;;  %7896 = vmatmul.mubr.bf16.vlgmr.msra.gmra.mrb[16].mxu1 %v12336_v42 }
 0x56b   :  { %7905 = vmatpush1.bf16.msra.mxu0 %v14836_v23  ;;  %7936 = vmatprep.mubr.bf16.mxu0 %v12042_v61  ;;  %v14845_v23 = vld [vmem:[#allocation251_spill] sm:$0xff] }
 0x56c   :  { %8069 = vmatpush1.bf16.msra.mxu1 %v14837_v39  ;;  %8100 = vmatprep.mubr.bf16.mxu1 %v12042_v61  ;;  %v14847_v39 = vld [vmem:[#allocation253_spill] sm:$0xff]  ;;  %v14848_v61 = vld [vmem:[#allocation254_spill] sm:$0xff] }
 0x56d   :  { %7906 = vmatprep.subr.bf16.mxu0 %v14838_v40  ;;  %8070 = vmatprep.subr.bf16.mxu1 %v14839_v51  ;;  %v14849_v40 = vld [vmem:[#allocation255_spill] sm:$0xff]  ;;  %v14850_v51 = vld [vmem:[#allocation256_spill] sm:$0xff] }
 0x56f   :  { %7907 = vmatpush1.bf16.msra.mxu0 %v14840_v17  ;;  %v14851_v17 = vld [vmem:[#allocation257_spill] sm:$0xff] }
 0x570   :  { %8071 = vmatpush1.bf16.msra.mxu1 %v14841_v28  ;;  %7908 = vmatprep.subr.bf16.mxu0 %v14842_v18  ;;  %v14852_v28 = vld [vmem:[#allocation258_spill] sm:$0xff]  ;;  %v14853_v18 = vld [vmem:[#allocation259_spill] sm:$0xff] }
 0x571   :  { %8072 = vmatprep.subr.bf16.mxu1 %v14843_v11  ;;  %v14854_v11 = vld [vmem:[#allocation260_spill] sm:$0xff] }
 0x573   :  { %7909 = vmatpush1.bf16.msra.mxu0 %v14844_v54  ;;  %v14855_v54 = vld [vmem:[#allocation261_spill] sm:$0xff] }
 0x574   :  { %8073 = vmatpush1.bf16.msra.mxu1 %v14845_v23  ;;  %7910 = vmatprep.subr.bf16.mxu0 %v14846_v52  ;;  %v14856_v23 = vld [vmem:[#allocation262_spill] sm:$0xff]  ;;  %v14857_v52 = vld [vmem:[#allocation263_spill] sm:$0xff] }
 0x575   :  { %8074 = vmatprep.subr.bf16.mxu1 %v14847_v39  ;;  %v14858_v39 = vld [vmem:[#allocation264_spill] sm:$0xff] }
 0x577   :  { %7911 = vmatpush1.bf16.msra.mxu0 %v14848_v61  ;;  %v14859_v61 = vld [vmem:[#allocation265_spill] sm:$0xff] }
 0x578   :  { %8075 = vmatpush1.bf16.msra.mxu1 %v14849_v40  ;;  %7912 = vmatprep.subr.bf16.mxu0 %v14850_v51  ;;  %v14860_v40 = vld [vmem:[#allocation266_spill] sm:$0xff]  ;;  %v14861_v51 = vld [vmem:[#allocation267_spill] sm:$0xff] }
 0x579   :  { %8076 = vmatprep.subr.bf16.mxu1 %v14851_v17  ;;  %v14862_v17 = vld [vmem:[#allocation268_spill] sm:$0xff] }
 0x57b   :  { %7913 = vmatpush1.bf16.msra.mxu0 %v14852_v28  ;;  %v14863_v28 = vld [vmem:[#allocation269_spill] sm:$0xff] }
 0x57c   :  { %8077 = vmatpush1.bf16.msra.mxu1 %v14853_v18  ;;  %7914 = vmatprep.subr.bf16.mxu0 %v14854_v11  ;;  %v14864_v18 = vld [vmem:[#allocation270_spill] sm:$0xff]  ;;  %v14865_v11 = vld [vmem:[#allocation271_spill] sm:$0xff] }
 0x57d   :  { %8078 = vmatprep.subr.bf16.mxu1 %v14855_v54  ;;  %v14866_v54 = vld [vmem:[#allocation272_spill] sm:$0xff] }
 0x57f   :  { %7915 = vmatpush1.bf16.msra.mxu0 %v14856_v23  ;;  %v14867_v23 = vld [vmem:[#allocation273_spill] sm:$0xff] }
 0x580   :  { %8079 = vmatpush1.bf16.msra.mxu1 %v14857_v52  ;;  %7916 = vmatprep.subr.bf16.mxu0 %v14858_v39  ;;  %v14868_v52 = vld [vmem:[#allocation274_spill] sm:$0xff]  ;;  %v14869_v39 = vld [vmem:[#allocation275_spill] sm:$0xff] }
 0x581   :  { %8080 = vmatprep.subr.bf16.mxu1 %v14859_v61  ;;  %v14870_v61 = vld [vmem:[#allocation276_spill] sm:$0xff] }
 0x583   :  { %7917 = vmatpush1.bf16.msra.mxu0 %v14860_v40  ;;  %v14871_v40 = vld [vmem:[#allocation277_spill] sm:$0xff] }
 0x584   :  { %8081 = vmatpush1.bf16.msra.mxu1 %v14861_v51  ;;  %7918 = vmatprep.subr.bf16.mxu0 %v14862_v17  ;;  %v14872_v51 = vld [vmem:[#allocation278_spill] sm:$0xff]  ;;  %v14873_v17 = vld [vmem:[#allocation279_spill] sm:$0xff] }
 0x585   :  { %8082 = vmatprep.subr.bf16.mxu1 %v14863_v28  ;;  %v14874_v28 = vld [vmem:[#allocation280_spill] sm:$0xff] }
 0x587   :  { %7919 = vmatpush1.bf16.msra.mxu0 %v14864_v18  ;;  %v14875_v18 = vld [vmem:[#allocation281_spill] sm:$0xff] }
 0x588   :  { %8083 = vmatpush1.bf16.msra.mxu1 %v14865_v11  ;;  %7920 = vmatprep.subr.bf16.mxu0 %v14866_v54  ;;  %v14876_v11 = vld [vmem:[#allocation282_spill] sm:$0xff]  ;;  %v14877_v54 = vld [vmem:[#allocation283_spill] sm:$0xff] }
 0x589   :  { %8084 = vmatprep.subr.bf16.mxu1 %v14867_v23  ;;  %v14878_v23 = vld [vmem:[#allocation284_spill] sm:$0xff] }
 0x58b   :  { %7921 = vmatpush1.bf16.msra.mxu0 %v14868_v52  ;;  %v14879_v52 = vld [vmem:[#allocation285_spill] sm:$0xff] }
 0x58c   :  { %8085 = vmatpush1.bf16.msra.mxu1 %v14869_v39  ;;  %7922 = vmatprep.subr.bf16.mxu0 %v14870_v61  ;;  %v14880_v39 = vld [vmem:[#allocation286_spill] sm:$0xff]  ;;  %v14881_v61 = vld [vmem:[#allocation287_spill] sm:$0xff] }
 0x58d   :  { %8086 = vmatprep.subr.bf16.mxu1 %v14871_v40  ;;  %v14882_v40 = vld [vmem:[#allocation288_spill] sm:$0xff] }
 0x58f   :  { %7923 = vmatpush1.bf16.msra.mxu0 %v14872_v51  ;;  %v14883_v51 = vld [vmem:[#allocation289_spill] sm:$0xff] }
 0x590   :  { %8087 = vmatpush1.bf16.msra.mxu1 %v14873_v17  ;;  %7924 = vmatprep.subr.bf16.mxu0 %v14874_v28  ;;  %v14884_v17 = vld [vmem:[#allocation290_spill] sm:$0xff]  ;;  %v14885_v28 = vld [vmem:[#allocation291_spill] sm:$0xff] }
 0x591   :  { %8088 = vmatprep.subr.bf16.mxu1 %v14875_v18  ;;  %v14886_v18 = vld [vmem:[#allocation292_spill] sm:$0xff] }
 0x593   :  { %7925 = vmatpush1.bf16.msra.mxu0 %v14876_v11  ;;  %v14887_v11 = vld [vmem:[#allocation293_spill] sm:$0xff] }
 0x594   :  { %8089 = vmatpush1.bf16.msra.mxu1 %v14877_v54  ;;  %7926 = vmatprep.subr.bf16.mxu0 %v14878_v23  ;;  %v14888_v23 = vld [vmem:[#allocation295_spill] sm:$0xff] }
 0x595   :  { %8090 = vmatprep.subr.bf16.mxu1 %v14879_v52  ;;  %v14889_v52 = vld [vmem:[#allocation296_spill] sm:$0xff] }
 0x597   :  { %7927 = vmatpush1.bf16.msra.mxu0 %v14880_v39  ;;  %v14890_v39 = vld [vmem:[#allocation297_spill] sm:$0xff] }
 0x598   :  { %8091 = vmatpush1.bf16.msra.mxu1 %v14881_v61  ;;  %7928 = vmatprep.subr.bf16.mxu0 %v14882_v40  ;;  %v14891_v61 = vld [vmem:[#allocation298_spill] sm:$0xff]  ;;  %v14892_v40 = vld [vmem:[#allocation299_spill] sm:$0xff] }
 0x599   :  { %8092 = vmatprep.subr.bf16.mxu1 %v14883_v51  ;;  %v14893_v51 = vld [vmem:[#allocation300_spill] sm:$0xff] }
 0x59b   :  { %7929 = vmatpush1.bf16.msra.mxu0 %v14884_v17  ;;  %v14894_v17 = vld [vmem:[#allocation301_spill] sm:$0xff] }
 0x59c   :  { %8093 = vmatpush1.bf16.msra.mxu1 %v14885_v28  ;;  %7930 = vmatprep.subr.bf16.mxu0 %v14886_v18  ;;  %v14895_v28 = vld [vmem:[#allocation302_spill] sm:$0xff]  ;;  %v14896_v18 = vld [vmem:[#allocation303_spill] sm:$0xff] }
 0x59d   :  { %8094 = vmatprep.subr.bf16.mxu1 %v14887_v11  ;;  %v14897_v11 = vld [vmem:[#allocation304_spill] sm:$0xff] }
 0x59f   :  { %7931 = vmatpush1.bf16.msra.mxu0 %v11409_v29  ;;  %v14898_v29 = vld [vmem:[#allocation305_spill] sm:$0xff] }
 0x5a0   :  { %8095 = vmatpush1.bf16.msra.mxu1 %v14888_v23  ;;  %7932 = vmatprep.subr.bf16.mxu0 %v14889_v52 }
 0x5a1   :  { %8096 = vmatprep.subr.bf16.mxu1 %v14890_v39  ;;  %v14899_v39 = vld [vmem:[#allocation306_spill] sm:$0xff] }
 0x5a3   :  { %7933 = vmatpush1.bf16.msra.mxu0 %v14891_v61  ;;  %v14909_v61 = vld [vmem:[#allocation316_spill] sm:$0xff] }
 0x5a4   :  { %8097 = vmatpush1.bf16.msra.mxu1 %v14892_v40  ;;  %7934 = vmatprep.subr.bf16.mxu0 %v14893_v51  ;;  %v14900_v40 = vld [vmem:[#allocation307_spill] sm:$0xff]  ;;  %v14906_v51 = vld [vmem:[#allocation313_spill] sm:$0xff] }
 0x5a5   :  { %8098 = vmatprep.subr.bf16.mxu1 %v14894_v17  ;;  %v14901_v17 = vld [vmem:[#allocation308_spill] sm:$0xff] }
 0x5a7   :  { %7935 = vmatpush1.bf16.msra.mxu0 %v14895_v28  ;;  %v14902_v28 = vld [vmem:[#allocation309_spill] sm:$0xff] }
 0x5a8   :  { %8099 = vmatpush1.bf16.msra.mxu1 %v14896_v18  ;;  %7945 = vmatprep.subr.bf16.mxu0 %v14897_v11  ;;  %v14903_v18 = vld [vmem:[#allocation310_spill] sm:$0xff]  ;;  %v14904_v11 = vld [vmem:[#allocation311_spill] sm:$0xff] }
 0x5a9   :  { %8109 = vmatprep.subr.bf16.mxu1 %v14898_v29  ;;  %v14905_v29 = vld [vmem:[#allocation312_spill] sm:$0xff] }
 0x5aa   :  { %7937 = vmatmul.mubr.bf16.vlgmr.msra.gmra.mrb[20].mxu0 %v12111_v38 }
 0x5ab   :  { %8101 = vmatmul.mubr.bf16.vlgmr.msra.gmra.mrb[20].mxu1 %v12111_v38  ;;  %7946 = vmatpush1.bf16.msra.mxu0 %v14899_v39  ;;  %v14907_v38 = vld [vmem:[#allocation314_spill] sm:$0xff]  ;;  %v14908_v39 = vld [vmem:[#allocation315_spill] sm:$0xff] }
 0x5ac   :  { %7977 = vmatprep.mubr.bf16.mxu0 %v12118_v7  ;;  %8110 = vmatpush1.bf16.msra.mxu1 %v14900_v40  ;;  %v14910_v40 = vld [vmem:[#allocation317_spill] sm:$0xff] }
 0x5ad   :  { %8141 = vmatprep.mubr.bf16.mxu1 %v12118_v7  ;;  %7947 = vmatprep.subr.bf16.mxu0 %v14901_v17  ;;  %v14911_v7 = vld [vmem:[#allocation318_spill] sm:$0xff]  ;;  %v14912_v17 = vld [vmem:[#allocation319_spill] sm:$0xff] }
 0x5ae   :  { %8111 = vmatprep.subr.bf16.mxu1 %v14902_v28  ;;  %v14913_v28 = vld [vmem:[#allocation320_spill] sm:$0xff] }
 0x5af   :  { %7948 = vmatpush1.bf16.msra.mxu0 %v14903_v18  ;;  %v14914_v18 = vld [vmem:[#allocation321_spill] sm:$0xff] }
 0x5b0   :  { %8112 = vmatpush1.bf16.msra.mxu1 %v14904_v11  ;;  %7949 = vmatprep.subr.bf16.mxu0 %v14905_v29  ;;  %v14915_v11 = vld [vmem:[#allocation322_spill] sm:$0xff]  ;;  %v14916_v29 = vld [vmem:[#allocation323_spill] sm:$0xff] }
 0x5b1   :  { %8113 = vmatprep.subr.bf16.mxu1 %v14906_v51  ;;  %v14917_v51 = vld [vmem:[#allocation324_spill] sm:$0xff] }
 0x5b3   :  { %7950 = vmatpush1.bf16.msra.mxu0 %v14907_v38  ;;  %v14918_v38 = vld [vmem:[#allocation325_spill] sm:$0xff] }
 0x5b4   :  { %8114 = vmatpush1.bf16.msra.mxu1 %v14908_v39  ;;  %7951 = vmatprep.subr.bf16.mxu0 %v14909_v61  ;;  %v14919_v39 = vld [vmem:[#allocation326_spill] sm:$0xff]  ;;  %v14920_v61 = vld [vmem:[#allocation327_spill] sm:$0xff] }
 0x5b5   :  { %8115 = vmatprep.subr.bf16.mxu1 %v14910_v40  ;;  %v14921_v40 = vld [vmem:[#allocation328_spill] sm:$0xff] }
 0x5b7   :  { %7952 = vmatpush1.bf16.msra.mxu0 %v14911_v7  ;;  %v14922_v7 = vld [vmem:[#allocation329_spill] sm:$0xff] }
 0x5b8   :  { %8116 = vmatpush1.bf16.msra.mxu1 %v14912_v17  ;;  %7953 = vmatprep.subr.bf16.mxu0 %v14913_v28  ;;  %v14923_v17 = vld [vmem:[#allocation330_spill] sm:$0xff]  ;;  %v14924_v28 = vld [vmem:[#allocation331_spill] sm:$0xff] }
 0x5b9   :  { %8117 = vmatprep.subr.bf16.mxu1 %v14914_v18  ;;  %v14925_v18 = vld [vmem:[#allocation332_spill] sm:$0xff] }
 0x5bb   :  { %7954 = vmatpush1.bf16.msra.mxu0 %v14915_v11  ;;  %v14926_v11 = vld [vmem:[#allocation333_spill] sm:$0xff] }
 0x5bc   :  { %8118 = vmatpush1.bf16.msra.mxu1 %v14916_v29  ;;  %7955 = vmatprep.subr.bf16.mxu0 %v14917_v51  ;;  %v14927_v29 = vld [vmem:[#allocation334_spill] sm:$0xff]  ;;  %v14928_v51 = vld [vmem:[#allocation335_spill] sm:$0xff] }
 0x5bd   :  { %8119 = vmatprep.subr.bf16.mxu1 %v14918_v38  ;;  %v14929_v38 = vld [vmem:[#allocation336_spill] sm:$0xff] }
 0x5bf   :  { %7956 = vmatpush1.bf16.msra.mxu0 %v14919_v39  ;;  %v14930_v39 = vld [vmem:[#allocation337_spill] sm:$0xff] }
 0x5c0   :  { %8120 = vmatpush1.bf16.msra.mxu1 %v14920_v61  ;;  %7957 = vmatprep.subr.bf16.mxu0 %v14921_v40  ;;  %v14931_v61 = vld [vmem:[#allocation338_spill] sm:$0xff]  ;;  %v14932_v40 = vld [vmem:[#allocation339_spill] sm:$0xff] }
 0x5c1   :  { %8121 = vmatprep.subr.bf16.mxu1 %v14922_v7  ;;  %v14933_v7 = vld [vmem:[#allocation340_spill] sm:$0xff] }
 0x5c3   :  { %7958 = vmatpush1.bf16.msra.mxu0 %v14923_v17  ;;  %v14934_v17 = vld [vmem:[#allocation341_spill] sm:$0xff] }
 0x5c4   :  { %8122 = vmatpush1.bf16.msra.mxu1 %v14924_v28  ;;  %7959 = vmatprep.subr.bf16.mxu0 %v14925_v18  ;;  %v14935_v28 = vld [vmem:[#allocation342_spill] sm:$0xff]  ;;  %v14936_v18 = vld [vmem:[#allocation343_spill] sm:$0xff] }
 0x5c5   :  { %8123 = vmatprep.subr.bf16.mxu1 %v14926_v11  ;;  %v14937_v11 = vld [vmem:[#allocation344_spill] sm:$0xff] }
 0x5c7   :  { %7960 = vmatpush1.bf16.msra.mxu0 %v14927_v29  ;;  %v14938_v29 = vld [vmem:[#allocation345_spill] sm:$0xff] }
 0x5c8   :  { %8124 = vmatpush1.bf16.msra.mxu1 %v14928_v51  ;;  %7961 = vmatprep.subr.bf16.mxu0 %v14929_v38  ;;  %v14939_v51 = vld [vmem:[#allocation346_spill] sm:$0xff]  ;;  %v14940_v38 = vld [vmem:[#allocation347_spill] sm:$0xff] }
 0x5c9   :  { %8125 = vmatprep.subr.bf16.mxu1 %v14930_v39  ;;  %v14941_v39 = vld [vmem:[#allocation348_spill] sm:$0xff] }
 0x5cb   :  { %7962 = vmatpush1.bf16.msra.mxu0 %v14931_v61  ;;  %v14942_v61 = vld [vmem:[#allocation349_spill] sm:$0xff] }
 0x5cc   :  { %8126 = vmatpush1.bf16.msra.mxu1 %v14932_v40  ;;  %7963 = vmatprep.subr.bf16.mxu0 %v14933_v7  ;;  %v14943_v40 = vld [vmem:[#allocation350_spill] sm:$0xff]  ;;  %v14944_v7 = vld [vmem:[#allocation351_spill] sm:$0xff] }
 0x5cd   :  { %8127 = vmatprep.subr.bf16.mxu1 %v14934_v17  ;;  %v14945_v17 = vld [vmem:[#allocation352_spill] sm:$0xff] }
 0x5cf   :  { %7964 = vmatpush1.bf16.msra.mxu0 %v14935_v28  ;;  %v14946_v28 = vld [vmem:[#allocation353_spill] sm:$0xff] }
 0x5d0   :  { %8128 = vmatpush1.bf16.msra.mxu1 %v14936_v18  ;;  %7965 = vmatprep.subr.bf16.mxu0 %v14937_v11  ;;  %v14947_v18 = vld [vmem:[#allocation354_spill] sm:$0xff]  ;;  %v14948_v11 = vld [vmem:[#allocation355_spill] sm:$0xff] }
 0x5d1   :  { %8129 = vmatprep.subr.bf16.mxu1 %v14938_v29  ;;  %v14949_v29 = vld [vmem:[#allocation356_spill] sm:$0xff] }
 0x5d3   :  { %7966 = vmatpush1.bf16.msra.mxu0 %v14939_v51  ;;  %v14950_v51 = vld [vmem:[#allocation357_spill] sm:$0xff] }
 0x5d4   :  { %8130 = vmatpush1.bf16.msra.mxu1 %v14940_v38  ;;  %7967 = vmatprep.subr.bf16.mxu0 %v14941_v39  ;;  %v14951_v38 = vld [vmem:[#allocation358_spill] sm:$0xff]  ;;  %v14952_v39 = vld [vmem:[#allocation359_spill] sm:$0xff] }
 0x5d5   :  { %8131 = vmatprep.subr.bf16.mxu1 %v14942_v61  ;;  %v14953_v61 = vld [vmem:[#allocation360_spill] sm:$0xff] }
 0x5d7   :  { %7968 = vmatpush1.bf16.msra.mxu0 %v14943_v40  ;;  %v14954_v40 = vld [vmem:[#allocation361_spill] sm:$0xff] }
 0x5d8   :  { %8132 = vmatpush1.bf16.msra.mxu1 %v14944_v7  ;;  %7969 = vmatprep.subr.bf16.mxu0 %v14945_v17  ;;  %v14955_v7 = vld [vmem:[#allocation362_spill] sm:$0xff]  ;;  %v14956_v17 = vld [vmem:[#allocation363_spill] sm:$0xff] }
 0x5d9   :  { %8133 = vmatprep.subr.bf16.mxu1 %v14946_v28  ;;  %v14957_v28 = vld [vmem:[#allocation364_spill] sm:$0xff] }
 0x5db   :  { %7970 = vmatpush1.bf16.msra.mxu0 %v14947_v18  ;;  %v14958_v18 = vld [vmem:[#allocation365_spill] sm:$0xff] }
 0x5dc   :  { %8134 = vmatpush1.bf16.msra.mxu1 %v14948_v11  ;;  %7971 = vmatprep.subr.bf16.mxu0 %v14949_v29  ;;  %v14959_v11 = vld [vmem:[#allocation366_spill] sm:$0xff]  ;;  %v14960_v29 = vld [vmem:[#allocation367_spill] sm:$0xff] }
 0x5dd   :  { %8135 = vmatprep.subr.bf16.mxu1 %v14950_v51  ;;  %v14961_v51 = vld [vmem:[#allocation368_spill] sm:$0xff] }
 0x5df   :  { %7972 = vmatpush1.bf16.msra.mxu0 %v14951_v38  ;;  %v14962_v38 = vld [vmem:[#allocation369_spill] sm:$0xff] }
 0x5e0   :  { %8136 = vmatpush1.bf16.msra.mxu1 %v14952_v39  ;;  %7973 = vmatprep.subr.bf16.mxu0 %v14953_v61  ;;  %v15051_v61 = vld [vmem:[#allocation458_spill] sm:$0xff]  ;;  %v15053_v39 = vld [vmem:[#allocation460_spill] sm:$0xff] }
 0x5e1   :  { %8137 = vmatprep.subr.bf16.mxu1 %v14954_v40  ;;  %v14963_v40 = vld [vmem:[#allocation370_spill] sm:$0xff] }
 0x5e3   :  { %7974 = vmatpush1.bf16.msra.mxu0 %v14955_v7  ;;  %v14973_v7 = vld [vmem:[#allocation380_spill] sm:$0xff] }
 0x5e4   :  { %8138 = vmatpush1.bf16.msra.mxu1 %v14956_v17  ;;  %7975 = vmatprep.subr.bf16.mxu0 %v14957_v28  ;;  %v14964_v17 = vld [vmem:[#allocation371_spill] sm:$0xff]  ;;  %v14970_v28 = vld [vmem:[#allocation377_spill] sm:$0xff] }
 0x5e5   :  { %8139 = vmatprep.subr.bf16.mxu1 %v14958_v18  ;;  %v14965_v18 = vld [vmem:[#allocation372_spill] sm:$0xff] }
 0x5e7   :  { %7976 = vmatpush1.bf16.msra.mxu0 %v14959_v11  ;;  %v14966_v11 = vld [vmem:[#allocation373_spill] sm:$0xff] }
 0x5e8   :  { %8140 = vmatpush1.bf16.msra.mxu1 %v14960_v29  ;;  %7986 = vmatprep.subr.bf16.mxu0 %v14961_v51  ;;  %v14967_v29 = vld [vmem:[#allocation374_spill] sm:$0xff]  ;;  %v14968_v51 = vld [vmem:[#allocation375_spill] sm:$0xff] }
 0x5e9   :  { %8150 = vmatprep.subr.bf16.mxu1 %v14962_v38  ;;  %v14969_v38 = vld [vmem:[#allocation376_spill] sm:$0xff] }
 0x5ea   :  { %7978 = vmatmul.mubr.bf16.vlgmr.msra.gmra.mrb[20].mxu0 %v12187_v31 }
 0x5eb   :  { %8142 = vmatmul.mubr.bf16.vlgmr.msra.gmra.mrb[20].mxu1 %v12187_v31  ;;  %7987 = vmatpush1.bf16.msra.mxu0 %v14963_v40  ;;  %v14971_v31 = vld [vmem:[#allocation378_spill] sm:$0xff]  ;;  %v14972_v40 = vld [vmem:[#allocation379_spill] sm:$0xff] }
 0x5ec   :  { %8018 = vmatprep.mubr.bf16.mxu0 %v12260_v47  ;;  %8151 = vmatpush1.bf16.msra.mxu1 %v14964_v17  ;;  %v14974_v17 = vld [vmem:[#allocation381_spill] sm:$0xff] }
 0x5ed   :  { %8182 = vmatprep.mubr.bf16.mxu1 %v12260_v47  ;;  %7988 = vmatprep.subr.bf16.mxu0 %v14965_v18  ;;  %v14975_v47 = vld [vmem:[#allocation382_spill] sm:$0xff]  ;;  %v14976_v18 = vld [vmem:[#allocation383_spill] sm:$0xff] }
 0x5ee   :  { %8152 = vmatprep.subr.bf16.mxu1 %v14966_v11  ;;  %v14977_v11 = vld [vmem:[#allocation384_spill] sm:$0xff] }
 0x5ef   :  { %7989 = vmatpush1.bf16.msra.mxu0 %v14967_v29  ;;  %v14978_v29 = vld [vmem:[#allocation385_spill] sm:$0xff] }
 0x5f0   :  { %8153 = vmatpush1.bf16.msra.mxu1 %v14968_v51  ;;  %7990 = vmatprep.subr.bf16.mxu0 %v14969_v38  ;;  %v14979_v51 = vld [vmem:[#allocation386_spill] sm:$0xff]  ;;  %v14980_v38 = vld [vmem:[#allocation387_spill] sm:$0xff] }
 0x5f1   :  { %8154 = vmatprep.subr.bf16.mxu1 %v14970_v28  ;;  %v14981_v28 = vld [vmem:[#allocation388_spill] sm:$0xff] }
 0x5f3   :  { %7991 = vmatpush1.bf16.msra.mxu0 %v14971_v31  ;;  %v14982_v31 = vld [vmem:[#allocation389_spill] sm:$0xff] }
 0x5f4   :  { %8155 = vmatpush1.bf16.msra.mxu1 %v14972_v40  ;;  %7992 = vmatprep.subr.bf16.mxu0 %v14973_v7  ;;  %v14983_v40 = vld [vmem:[#allocation390_spill] sm:$0xff]  ;;  %v14984_v7 = vld [vmem:[#allocation391_spill] sm:$0xff] }
 0x5f5   :  { %8156 = vmatprep.subr.bf16.mxu1 %v14974_v17  ;;  %v14985_v17 = vld [vmem:[#allocation392_spill] sm:$0xff] }
 0x5f7   :  { %7993 = vmatpush1.bf16.msra.mxu0 %v14975_v47  ;;  %v14986_v47 = vld [vmem:[#allocation393_spill] sm:$0xff] }
 0x5f8   :  { %8157 = vmatpush1.bf16.msra.mxu1 %v14976_v18  ;;  %7994 = vmatprep.subr.bf16.mxu0 %v14977_v11  ;;  %v14987_v18 = vld [vmem:[#allocation394_spill] sm:$0xff]  ;;  %v14988_v11 = vld [vmem:[#allocation395_spill] sm:$0xff] }
 0x5f9   :  { %8158 = vmatprep.subr.bf16.mxu1 %v14978_v29  ;;  %v14989_v29 = vld [vmem:[#allocation396_spill] sm:$0xff] }
 0x5fb   :  { %7995 = vmatpush1.bf16.msra.mxu0 %v14979_v51  ;;  %v14990_v51 = vld [vmem:[#allocation397_spill] sm:$0xff] }
 0x5fc   :  { %8159 = vmatpush1.bf16.msra.mxu1 %v14980_v38  ;;  %7996 = vmatprep.subr.bf16.mxu0 %v14981_v28  ;;  %v14991_v38 = vld [vmem:[#allocation398_spill] sm:$0xff]  ;;  %v14992_v28 = vld [vmem:[#allocation399_spill] sm:$0xff] }
 0x5fd   :  { %8160 = vmatprep.subr.bf16.mxu1 %v14982_v31  ;;  %v14993_v31 = vld [vmem:[#allocation400_spill] sm:$0xff] }
 0x5ff   :  { %7997 = vmatpush1.bf16.msra.mxu0 %v14983_v40  ;;  %v14994_v40 = vld [vmem:[#allocation401_spill] sm:$0xff] }
 0x600   :  { %8161 = vmatpush1.bf16.msra.mxu1 %v14984_v7  ;;  %7998 = vmatprep.subr.bf16.mxu0 %v14985_v17  ;;  %v14995_v7 = vld [vmem:[#allocation402_spill] sm:$0xff]  ;;  %v14996_v17 = vld [vmem:[#allocation403_spill] sm:$0xff] }
 0x601   :  { %8162 = vmatprep.subr.bf16.mxu1 %v14986_v47  ;;  %v14997_v47 = vld [vmem:[#allocation404_spill] sm:$0xff] }
 0x603   :  { %7999 = vmatpush1.bf16.msra.mxu0 %v14987_v18  ;;  %v14998_v18 = vld [vmem:[#allocation405_spill] sm:$0xff] }
 0x604   :  { %8163 = vmatpush1.bf16.msra.mxu1 %v14988_v11  ;;  %8000 = vmatprep.subr.bf16.mxu0 %v14989_v29  ;;  %v14999_v11 = vld [vmem:[#allocation406_spill] sm:$0xff]  ;;  %v15000_v29 = vld [vmem:[#allocation407_spill] sm:$0xff] }
 0x605   :  { %8164 = vmatprep.subr.bf16.mxu1 %v14990_v51  ;;  %v15001_v51 = vld [vmem:[#allocation408_spill] sm:$0xff] }
 0x607   :  { %8001 = vmatpush1.bf16.msra.mxu0 %v14991_v38  ;;  %v15002_v38 = vld [vmem:[#allocation409_spill] sm:$0xff] }
 0x608   :  { %8165 = vmatpush1.bf16.msra.mxu1 %v14992_v28  ;;  %8002 = vmatprep.subr.bf16.mxu0 %v14993_v31  ;;  %v15003_v28 = vld [vmem:[#allocation410_spill] sm:$0xff]  ;;  %v15004_v31 = vld [vmem:[#allocation411_spill] sm:$0xff] }
 0x609   :  { %8166 = vmatprep.subr.bf16.mxu1 %v14994_v40  ;;  %v15005_v40 = vld [vmem:[#allocation412_spill] sm:$0xff] }
 0x60b   :  { %8003 = vmatpush1.bf16.msra.mxu0 %v14995_v7  ;;  %v15006_v7 = vld [vmem:[#allocation413_spill] sm:$0xff] }
 0x60c   :  { %8167 = vmatpush1.bf16.msra.mxu1 %v14996_v17  ;;  %8004 = vmatprep.subr.bf16.mxu0 %v14997_v47  ;;  %v15007_v17 = vld [vmem:[#allocation414_spill] sm:$0xff]  ;;  %v15008_v47 = vld [vmem:[#allocation415_spill] sm:$0xff] }
 0x60d   :  { %8168 = vmatprep.subr.bf16.mxu1 %v14998_v18  ;;  %v15009_v18 = vld [vmem:[#allocation416_spill] sm:$0xff] }
 0x60f   :  { %8005 = vmatpush1.bf16.msra.mxu0 %v14999_v11  ;;  %v15010_v11 = vld [vmem:[#allocation417_spill] sm:$0xff] }
 0x610   :  { %8169 = vmatpush1.bf16.msra.mxu1 %v15000_v29  ;;  %8006 = vmatprep.subr.bf16.mxu0 %v15001_v51  ;;  %v15011_v29 = vld [vmem:[#allocation418_spill] sm:$0xff]  ;;  %v15012_v51 = vld [vmem:[#allocation419_spill] sm:$0xff] }
 0x611   :  { %8170 = vmatprep.subr.bf16.mxu1 %v15002_v38  ;;  %v15013_v38 = vld [vmem:[#allocation420_spill] sm:$0xff] }
 0x613   :  { %8007 = vmatpush1.bf16.msra.mxu0 %v15003_v28  ;;  %v15014_v28 = vld [vmem:[#allocation421_spill] sm:$0xff] }
 0x614   :  { %8171 = vmatpush1.bf16.msra.mxu1 %v15004_v31  ;;  %8008 = vmatprep.subr.bf16.mxu0 %v15005_v40  ;;  %v15015_v31 = vld [vmem:[#allocation422_spill] sm:$0xff]  ;;  %v15016_v40 = vld [vmem:[#allocation423_spill] sm:$0xff] }
 0x615   :  { %8172 = vmatprep.subr.bf16.mxu1 %v15006_v7  ;;  %v15017_v7 = vld [vmem:[#allocation424_spill] sm:$0xff] }
 0x617   :  { %8009 = vmatpush1.bf16.msra.mxu0 %v15007_v17  ;;  %v15018_v17 = vld [vmem:[#allocation425_spill] sm:$0xff] }
 0x618   :  { %8173 = vmatpush1.bf16.msra.mxu1 %v15008_v47  ;;  %8010 = vmatprep.subr.bf16.mxu0 %v15009_v18  ;;  %v15019_v47 = vld [vmem:[#allocation426_spill] sm:$0xff]  ;;  %v15020_v18 = vld [vmem:[#allocation427_spill] sm:$0xff] }
 0x619   :  { %8174 = vmatprep.subr.bf16.mxu1 %v15010_v11  ;;  %v15021_v11 = vld [vmem:[#allocation428_spill] sm:$0xff] }
 0x61b   :  { %8011 = vmatpush1.bf16.msra.mxu0 %v15011_v29  ;;  %v15022_v29 = vld [vmem:[#allocation429_spill] sm:$0xff] }
 0x61c   :  { %8175 = vmatpush1.bf16.msra.mxu1 %v15012_v51  ;;  %8012 = vmatprep.subr.bf16.mxu0 %v15013_v38  ;;  %v15023_v51 = vld [vmem:[#allocation430_spill] sm:$0xff]  ;;  %v15024_v38 = vld [vmem:[#allocation431_spill] sm:$0xff] }
 0x61d   :  { %8176 = vmatprep.subr.bf16.mxu1 %v15014_v28  ;;  %v15025_v28 = vld [vmem:[#allocation432_spill] sm:$0xff] }
 0x61f   :  { %8013 = vmatpush1.bf16.msra.mxu0 %v15015_v31  ;;  %v15026_v31 = vld [vmem:[#allocation433_spill] sm:$0xff] }
 0x620   :  { %8177 = vmatpush1.bf16.msra.mxu1 %v15016_v40  ;;  %8014 = vmatprep.subr.bf16.mxu0 %v15017_v7  ;;  %v15050_v40 = vld [vmem:[#allocation457_spill] sm:$0xff] }
 0x621   :  { %8178 = vmatprep.subr.bf16.mxu1 %v15018_v17  ;;  %v15027_v17 = vld [vmem:[#allocation434_spill] sm:$0xff] }
 0x623   :  { %8015 = vmatpush1.bf16.msra.mxu0 %v15019_v47  ;;  %v15037_v47 = vld [vmem:[#allocation444_spill] sm:$0xff] }
 0x624   :  { %8179 = vmatpush1.bf16.msra.mxu1 %v15020_v18  ;;  %8016 = vmatprep.subr.bf16.mxu0 %v15021_v11  ;;  %v15028_v18 = vld [vmem:[#allocation435_spill] sm:$0xff]  ;;  %v15034_v11 = vld [vmem:[#allocation441_spill] sm:$0xff] }
 0x625   :  { %8180 = vmatprep.subr.bf16.mxu1 %v15022_v29  ;;  %v15029_v29 = vld [vmem:[#allocation436_spill] sm:$0xff] }
 0x627   :  { %8017 = vmatpush1.bf16.msra.mxu0 %v15023_v51  ;;  %v15030_v51 = vld [vmem:[#allocation437_spill] sm:$0xff] }
 0x628   :  { %8181 = vmatpush1.bf16.msra.mxu1 %v15024_v38  ;;  %8027 = vmatprep.subr.bf16.mxu0 %v15025_v28  ;;  %v15031_v38 = vld [vmem:[#allocation438_spill] sm:$0xff]  ;;  %v15032_v28 = vld [vmem:[#allocation439_spill] sm:$0xff] }
 0x629   :  { %8191 = vmatprep.subr.bf16.mxu1 %v15026_v31  ;;  %v15033_v31 = vld [vmem:[#allocation440_spill] sm:$0xff] }
 0x62a   :  { %8019 = vmatmul.mubr.bf16.vlgmr.msra.gmra.mrb[20].mxu0 %v12262_v13 }
 0x62b   :  { %8183 = vmatmul.mubr.bf16.vlgmr.msra.gmra.mrb[20].mxu1 %v12262_v13  ;;  %8028 = vmatpush1.bf16.msra.mxu0 %v15027_v17  ;;  %v15035_v13 = vld [vmem:[#allocation442_spill] sm:$0xff]  ;;  %v15036_v17 = vld [vmem:[#allocation443_spill] sm:$0xff] }
 0x62c   :  { %8059 = vmatprep.mubr.bf16.mxu0 %v12266_v32  ;;  %8192 = vmatpush1.bf16.msra.mxu1 %v15028_v18  ;;  %v15038_v18 = vld [vmem:[#allocation445_spill] sm:$0xff] }
 0x62d   :  { %8223 = vmatprep.mubr.bf16.mxu1 %v12266_v32  ;;  %8029 = vmatprep.subr.bf16.mxu0 %v15029_v29  ;;  %v15039_v32 = vld [vmem:[#allocation446_spill] sm:$0xff]  ;;  %v15040_v29 = vld [vmem:[#allocation447_spill] sm:$0xff] }
 0x62e   :  { %8193 = vmatprep.subr.bf16.mxu1 %v15030_v51  ;;  %v15041_v51 = vld [vmem:[#allocation448_spill] sm:$0xff] }
 0x62f   :  { %8030 = vmatpush1.bf16.msra.mxu0 %v15031_v38  ;;  %v15042_v38 = vld [vmem:[#allocation449_spill] sm:$0xff] }
 0x630   :  { %8194 = vmatpush1.bf16.msra.mxu1 %v15032_v28  ;;  %8031 = vmatprep.subr.bf16.mxu0 %v15033_v31  ;;  %v15043_v28 = vld [vmem:[#allocation450_spill] sm:$0xff]  ;;  %v15044_v31 = vld [vmem:[#allocation451_spill] sm:$0xff] }
 0x631   :  { %8195 = vmatprep.subr.bf16.mxu1 %v15034_v11  ;;  %v15045_v11 = vld [vmem:[#allocation452_spill] sm:$0xff] }
 0x633   :  { %8032 = vmatpush1.bf16.msra.mxu0 %v15035_v13 }
 0x634   :  { %8196 = vmatpush1.bf16.msra.mxu1 %v15036_v17  ;;  %8033 = vmatprep.subr.bf16.mxu0 %v15037_v47  ;;  %v15046_v47 = vld [vmem:[#allocation453_spill] sm:$0xff] }
 0x635   :  { %8197 = vmatprep.subr.bf16.mxu1 %v15038_v18 }
 0x637   :  { %8034 = vmatpush1.bf16.msra.mxu0 %v15039_v32 }
 0x638   :  { %8198 = vmatpush1.bf16.msra.mxu1 %v15040_v29  ;;  %8035 = vmatprep.subr.bf16.mxu0 %v15041_v51  ;;  %v15047_v51 = vld [vmem:[#allocation454_spill] sm:$0xff] }
 0x639   :  { %8199 = vmatprep.subr.bf16.mxu1 %v15042_v38 }
 0x63b   :  { %8036 = vmatpush1.bf16.msra.mxu0 %v15043_v28 }
 0x63c   :  { %8200 = vmatpush1.bf16.msra.mxu1 %v15044_v31  ;;  %8037 = vmatprep.subr.bf16.mxu0 %v15045_v11  ;;  %v15048_v31 = vld [vmem:[#allocation455_spill] sm:$0xff]  ;;  %v15049_v11 = vld [vmem:[#allocation456_spill] sm:$0xff] }
 0x63d   :  { %v12567_v13 = vpop.f32.mrb[16].mxu0  ;;  %v12569_v17 = vpop.f32.mrb[16].mxu1  ;;  %8201 = vmatprep.subr.bf16.mxu1 %v15046_v47  ;;  %v15052_v47 = vld [vmem:[#allocation459_spill] sm:$0xff] }
 0x63e   :  { %v7735_v18 = vpop.f32.mrb[17].mxu0  ;;  %v12572_v32 = vpop.f32.mrb[17].mxu1 }
 0x63f   :  { %v7737_v29 = vpop.f32.mrb[18].mxu0  ;;  %v7901_v7 = vpop.f32.mrb[18].mxu1  ;;  %8038 = vmatpush1.bf16.msra.mxu0 %v15047_v51  ;;  %v15056_v51 = vld [vmem:[#allocation463_spill] sm:$0xff] }
 0x640   :  { %8202 = vmatpush1.bf16.msra.mxu1 %v11905_v63  ;;  %v7738_v28 = vpop.f32.mrb[19].mxu0  ;;  %v7902_v38 = vpop.f32.mrb[19].mxu1  ;;  %8039 = vmatprep.subr.bf16.mxu0 %v15048_v31  ;;  %v15054_v29 = vld [vmem:[#allocation461_spill] sm:$0xff]  ;;  %v15055_v7 = vld [vmem:[#allocation462_spill] sm:$0xff] }
 0x641   :  { %8203 = vmatprep.subr.bf16.mxu1 %v15049_v11  ;;  %v15057_v28 = vld [vmem:[#allocation464_spill] sm:$0xff]  ;;  %v15058_v38 = vld [vmem:[#allocation465_spill] sm:$0xff]  ;;  %v15059_v31 = vld [vmem:[#allocation466_spill] sm:$0xff] }
 0x642   :  { %v15060_v11 = vld [vmem:[#allocation467_spill] sm:$0xff] }
 0x643   :  { %8040 = vmatpush1.bf16.msra.mxu0 %v15050_v40  ;;  %v15061_v40 = vld [vmem:[#allocation468_spill] sm:$0xff] }
 0x644   :  { %8204 = vmatpush1.bf16.msra.mxu1 %v15051_v61  ;;  %8041 = vmatprep.subr.bf16.mxu0 %v15052_v47  ;;  %v15062_v61 = vld [vmem:[#allocation469_spill] sm:$0xff]  ;;  %v15063_v47 = vld [vmem:[#allocation470_spill] sm:$0xff] }
 0x645   :  { %8205 = vmatprep.subr.bf16.mxu1 %v15053_v39  ;;  %v15064_v39 = vld [vmem:[#allocation471_spill] sm:$0xff] }
 0x647   :  { %8042 = vmatpush1.bf16.msra.mxu0 %v15054_v29  ;;  %v15065_v29 = vld [vmem:[#allocation472_spill] sm:$0xff] }
 0x648   :  { %8206 = vmatpush1.bf16.msra.mxu1 %v15055_v7  ;;  %8043 = vmatprep.subr.bf16.mxu0 %v15056_v51  ;;  %v15066_v7 = vld [vmem:[#allocation473_spill] sm:$0xff]  ;;  %v15067_v51 = vld [vmem:[#allocation474_spill] sm:$0xff] }
 0x649   :  { %8207 = vmatprep.subr.bf16.mxu1 %v15057_v28  ;;  %v15068_v28 = vld [vmem:[#allocation475_spill] sm:$0xff] }
 0x64b   :  { %8044 = vmatpush1.bf16.msra.mxu0 %v15058_v38  ;;  %v15069_v38 = vld [vmem:[#allocation476_spill] sm:$0xff] }
 0x64c   :  { %8208 = vmatpush1.bf16.msra.mxu1 %v15059_v31  ;;  %8045 = vmatprep.subr.bf16.mxu0 %v15060_v11  ;;  %v15070_v31 = vld [vmem:[#allocation477_spill] sm:$0xff]  ;;  %v15071_v11 = vld [vmem:[#allocation478_spill] sm:$0xff] }
 0x64d   :  { %8209 = vmatprep.subr.bf16.mxu1 %v15061_v40  ;;  %v15072_v40 = vld [vmem:[#allocation479_spill] sm:$0xff] }
 0x64f   :  { %8046 = vmatpush1.bf16.msra.mxu0 %v15062_v61  ;;  %v15073_v61 = vld [vmem:[#allocation480_spill] sm:$0xff] }
 0x650   :  { %8210 = vmatpush1.bf16.msra.mxu1 %v15063_v47  ;;  %8047 = vmatprep.subr.bf16.mxu0 %v15064_v39 }
 0x651   :  { %8211 = vmatprep.subr.bf16.mxu1 %v15065_v29 }
 0x653   :  { %8048 = vmatpush1.bf16.msra.mxu0 %v15066_v7  ;;  %v15074_v7 = vld [vmem:[#allocation481_spill] sm:$0xff] }
 0x654   :  { %8212 = vmatpush1.bf16.msra.mxu1 %v15067_v51  ;;  %8049 = vmatprep.subr.bf16.mxu0 %v15068_v28 }
 0x655   :  { %8213 = vmatprep.subr.bf16.mxu1 %v15069_v38 }
 0x657   :  { %8050 = vmatpush1.bf16.msra.mxu0 %v15070_v31 }
 0x658   :  { %8214 = vmatpush1.bf16.msra.mxu1 %v15071_v11  ;;  %8051 = vmatprep.subr.bf16.mxu0 %v15072_v40 }
 0x659   :  { %8215 = vmatprep.subr.bf16.mxu1 %v15073_v61 }
 0x65b   :  { %8052 = vmatpush1.bf16.msra.mxu0 %v11993_v56 }
 0x65c   :  { %8216 = vmatpush1.bf16.msra.mxu1 %v11997_v62  ;;  %8053 = vmatprep.subr.bf16.mxu0 %v11999_v37 }
 0x65d   :  { %8217 = vmatprep.subr.bf16.mxu1 %v15074_v7 }
 0x65f   :  { %8054 = vmatpush1.bf16.msra.mxu0 %v12005_v60 }
 0x660   :  { %8218 = vmatpush1.bf16.msra.mxu1 %v12009_v53  ;;  %8055 = vmatprep.subr.bf16.mxu0 %v12011_v16  ;;  %v12618_v53 = vpack.c.bf16 %v7735_v18, %v7735_v18  ;;  %v15105_v18 = vld [vmem:[#allocation43_spill] sm:$0xff] }
 0x661   :  { %8219 = vmatprep.subr.bf16.mxu1 %v12014_v43 }
 0x663   :  { %8056 = vmatpush1.bf16.msra.mxu0 %v12017_v45 }
 0x664   :  { %8220 = vmatpush1.bf16.msra.mxu1 %v12021_v14  ;;  %8057 = vmatprep.subr.bf16.mxu0 %v12023_v8 }
 0x665   :  { %8221 = vmatprep.subr.bf16.mxu1 %v12026_v22 }
 0x667   :  { %8058 = vmatpush1.bf16.msra.mxu0 %v12029_v41 }
 0x668   :  { %8222 = vmatpush1.bf16.msra.mxu1 %v12033_v20  ;;  %8240 = vmatprep.subr.bf16.mxu0 %v10434_v5  ;;  %v15075_v5 = vld [vmem:[#allocation13_spill] sm:$0xff] }
 0x669   :  { %8404 = vmatprep.subr.bf16.mxu1 %v10436_v6  ;;  %v15076_v6 = vld [vmem:[#allocation14_spill] sm:$0xff] }
 0x66a   :  { %8060 = vmatmul.mubr.bf16.vlgmr.msra.gmra.mrb[20].mxu0 %v12336_v42 }
 0x66b   :  { %8224 = vmatmul.mubr.bf16.vlgmr.msra.gmra.mrb[20].mxu1 %v12336_v42  ;;  %8241 = vmatpush1.bf16.msra.mxu0 %v10438_v9  ;;  %v15077_v9 = vld [vmem:[#allocation15_spill] sm:$0xff]  ;;  %v15104_v42 = vld [vmem:[#allocation42_spill] sm:$0xff] }
 0x66c   :  { %8272 = vmatprep.mubr.bf16.mxu0 %v12618_v53  ;;  %8405 = vmatpush1.bf16.msra.mxu1 %v10441_v57  ;;  %v15078_v57 = vld [vmem:[#allocation16_spill] sm:$0xff] }
 0x66d   :  { %8436 = vmatprep.mubr.bf16.mxu1 %v12618_v53  ;;  %8242 = vmatprep.subr.bf16.mxu0 %v10444_v12  ;;  %v15079_v12 = vld [vmem:[#allocation17_spill] sm:$0xff] }
 0x66e   :  { %8406 = vmatprep.subr.bf16.mxu1 %v10451_v15  ;;  %v15080_v15 = vld [vmem:[#allocation18_spill] sm:$0xff] }
 0x66f   :  { %8243 = vmatpush1.bf16.msra.mxu0 %v10455_v19  ;;  %v15081_v19 = vld [vmem:[#allocation19_spill] sm:$0xff] }
 0x670   :  { %8407 = vmatpush1.bf16.msra.mxu1 %v10459_v48  ;;  %8244 = vmatprep.subr.bf16.mxu0 %v10461_v44  ;;  %v15082_v48 = vld [vmem:[#allocation20_spill] sm:$0xff]  ;;  %v15083_v44 = vld [vmem:[#allocation21_spill] sm:$0xff] }
 0x671   :  { %8408 = vmatprep.subr.bf16.mxu1 %v10465_v3  ;;  %v15084_v3 = vld [vmem:[#allocation22_spill] sm:$0xff] }
 0x673   :  { %8245 = vmatpush1.bf16.msra.mxu0 %v10469_v24  ;;  %v15085_v24 = vld [vmem:[#allocation23_spill] sm:$0xff] }
 0x674   :  { %8409 = vmatpush1.bf16.msra.mxu1 %v10473_v25  ;;  %8246 = vmatprep.subr.bf16.mxu0 %v10475_v26  ;;  %v15086_v25 = vld [vmem:[#allocation24_spill] sm:$0xff]  ;;  %v15087_v26 = vld [vmem:[#allocation25_spill] sm:$0xff] }
 0x675   :  { %8410 = vmatprep.subr.bf16.mxu1 %v10478_v27  ;;  %v15088_v27 = vld [vmem:[#allocation26_spill] sm:$0xff] }
 0x677   :  { %8247 = vmatpush1.bf16.msra.mxu0 %v10481_v33  ;;  %v15089_v33 = vld [vmem:[#allocation27_spill] sm:$0xff] }
 0x678   :  { %8411 = vmatpush1.bf16.msra.mxu1 %v10485_v34  ;;  %8248 = vmatprep.subr.bf16.mxu0 %v10487_v35  ;;  %v15090_v34 = vld [vmem:[#allocation28_spill] sm:$0xff]  ;;  %v15091_v35 = vld [vmem:[#allocation29_spill] sm:$0xff] }
 0x679   :  { %8412 = vmatprep.subr.bf16.mxu1 %v10490_v36  ;;  %v15092_v36 = vld [vmem:[#allocation30_spill] sm:$0xff] }
 0x67b   :  { %8249 = vmatpush1.bf16.msra.mxu0 %v10493_v46  ;;  %v15093_v46 = vld [vmem:[#allocation31_spill] sm:$0xff] }
 0x67c   :  { %8413 = vmatpush1.bf16.msra.mxu1 %v10497_v49  ;;  %8250 = vmatprep.subr.bf16.mxu0 %v10499_v0  ;;  %v15094_v49 = vld [vmem:[#allocation32_spill] sm:$0xff]  ;;  %v15095_v0 = vld [vmem:[#allocation33_spill] sm:$0xff] }
 0x67d   :  { %8414 = vmatprep.subr.bf16.mxu1 %v10502_v50  ;;  %v15096_v50 = vld [vmem:[#allocation34_spill] sm:$0xff] }
 0x67f   :  { %8251 = vmatpush1.bf16.msra.mxu0 %v10505_v21  ;;  %v15097_v21 = vld [vmem:[#allocation35_spill] sm:$0xff] }
 0x680   :  { %8415 = vmatpush1.bf16.msra.mxu1 %v10509_v55  ;;  %8252 = vmatprep.subr.bf16.mxu0 %v10511_v58  ;;  %v15098_v55 = vld [vmem:[#allocation36_spill] sm:$0xff]  ;;  %v15099_v58 = vld [vmem:[#allocation37_spill] sm:$0xff] }
 0x681   :  { %8416 = vmatprep.subr.bf16.mxu1 %v10514_v59  ;;  %v15100_v59 = vld [vmem:[#allocation38_spill] sm:$0xff] }
 0x683   :  { %8253 = vmatpush1.bf16.msra.mxu0 %v10517_v1  ;;  %v15101_v1 = vld [vmem:[#allocation39_spill] sm:$0xff] }
 0x684   :  { %8417 = vmatpush1.bf16.msra.mxu1 %v10521_v2  ;;  %8254 = vmatprep.subr.bf16.mxu0 %v10523_v30  ;;  %v15102_v2 = vld [vmem:[#allocation40_spill] sm:$0xff]  ;;  %v15103_v30 = vld [vmem:[#allocation41_spill] sm:$0xff] }
 0x685   :  { %8418 = vmatprep.subr.bf16.mxu1 %v15075_v5  ;;  %v15106_v5 = vld [vmem:[#allocation44_spill] sm:$0xff] }
 0x687   :  { %8255 = vmatpush1.bf16.msra.mxu0 %v15076_v6  ;;  %v15107_v6 = vld [vmem:[#allocation45_spill] sm:$0xff] }
 0x688   :  { %8419 = vmatpush1.bf16.msra.mxu1 %v15077_v9  ;;  %8256 = vmatprep.subr.bf16.mxu0 %v15078_v57  ;;  %v15108_v9 = vld [vmem:[#allocation46_spill] sm:$0xff]  ;;  %v12687_v57 = vpack.c.bf16 %v12567_v13, %v12567_v13  ;;  %v15113_v13 = vld [vmem:[#allocation51_spill] sm:$0xff] }
 0x689   :  { %8420 = vmatprep.subr.bf16.mxu1 %v15079_v12  ;;  %v15109_v12 = vld [vmem:[#allocation47_spill] sm:$0xff] }
 0x68b   :  { %8257 = vmatpush1.bf16.msra.mxu0 %v15080_v15  ;;  %v15110_v15 = vld [vmem:[#allocation48_spill] sm:$0xff] }
 0x68c   :  { %8421 = vmatpush1.bf16.msra.mxu1 %v15081_v19  ;;  %8258 = vmatprep.subr.bf16.mxu0 %v15082_v48  ;;  %v15111_v19 = vld [vmem:[#allocation49_spill] sm:$0xff]  ;;  %v12694_v48 = vpack.c.bf16 %v12572_v32, %v12572_v32  ;;  %v15117_v32 = vld [vmem:[#allocation55_spill] sm:$0xff] }
 0x68d   :  { %8422 = vmatprep.subr.bf16.mxu1 %v15083_v44  ;;  %v15112_v44 = vld [vmem:[#allocation50_spill] sm:$0xff] }
 0x68f   :  { %8259 = vmatpush1.bf16.msra.mxu0 %v15084_v3  ;;  %v15114_v3 = vld [vmem:[#allocation52_spill] sm:$0xff] }
 0x690   :  { %8423 = vmatpush1.bf16.msra.mxu1 %v15085_v24  ;;  %8260 = vmatprep.subr.bf16.mxu0 %v15086_v25  ;;  %v15115_v24 = vld [vmem:[#allocation53_spill] sm:$0xff]  ;;  %v15116_v25 = vld [vmem:[#allocation54_spill] sm:$0xff] }
 0x691   :  { %8424 = vmatprep.subr.bf16.mxu1 %v15087_v26  ;;  %v15118_v26 = vld [vmem:[#allocation56_spill] sm:$0xff] }
 0x693   :  { %8261 = vmatpush1.bf16.msra.mxu0 %v15088_v27  ;;  %v15119_v27 = vld [vmem:[#allocation57_spill] sm:$0xff] }
 0x694   :  { %8425 = vmatpush1.bf16.msra.mxu1 %v15089_v33  ;;  %8262 = vmatprep.subr.bf16.mxu0 %v15090_v34  ;;  %v15120_v33 = vld [vmem:[#allocation58_spill] sm:$0xff]  ;;  %v15121_v34 = vld [vmem:[#allocation59_spill] sm:$0xff] }
 0x695   :  { %8426 = vmatprep.subr.bf16.mxu1 %v15091_v35  ;;  %v15122_v35 = vld [vmem:[#allocation60_spill] sm:$0xff] }
 0x697   :  { %8263 = vmatpush1.bf16.msra.mxu0 %v15092_v36  ;;  %v15123_v36 = vld [vmem:[#allocation61_spill] sm:$0xff] }
 0x698   :  { %8427 = vmatpush1.bf16.msra.mxu1 %v15093_v46  ;;  %8264 = vmatprep.subr.bf16.mxu0 %v15094_v49  ;;  %v15124_v46 = vld [vmem:[#allocation62_spill] sm:$0xff]  ;;  %v15125_v49 = vld [vmem:[#allocation63_spill] sm:$0xff] }
 0x699   :  { %8428 = vmatprep.subr.bf16.mxu1 %v15095_v0  ;;  %v15126_v0 = vld [vmem:[#allocation64_spill] sm:$0xff] }
 0x69b   :  { %8265 = vmatpush1.bf16.msra.mxu0 %v15096_v50  ;;  %v15127_v50 = vld [vmem:[#allocation65_spill] sm:$0xff] }
 0x69c   :  { %8429 = vmatpush1.bf16.msra.mxu1 %v15097_v21  ;;  %8266 = vmatprep.subr.bf16.mxu0 %v15098_v55  ;;  %v15128_v21 = vld [vmem:[#allocation66_spill] sm:$0xff]  ;;  %v15129_v55 = vld [vmem:[#allocation67_spill] sm:$0xff] }
 0x69d   :  { %8430 = vmatprep.subr.bf16.mxu1 %v15099_v58  ;;  %v15130_v58 = vld [vmem:[#allocation68_spill] sm:$0xff] }
 0x69f   :  { %8267 = vmatpush1.bf16.msra.mxu0 %v15100_v59  ;;  %v15131_v59 = vld [vmem:[#allocation69_spill] sm:$0xff] }
 0x6a0   :  { %8431 = vmatpush1.bf16.msra.mxu1 %v15101_v1  ;;  %8268 = vmatprep.subr.bf16.mxu0 %v15102_v2  ;;  %v15132_v1 = vld [vmem:[#allocation70_spill] sm:$0xff]  ;;  %v15133_v2 = vld [vmem:[#allocation71_spill] sm:$0xff] }
 0x6a1   :  { %8432 = vmatprep.subr.bf16.mxu1 %v15103_v30  ;;  %v15134_v30 = vld [vmem:[#allocation72_spill] sm:$0xff] }
 0x6a3   :  { %8269 = vmatpush1.bf16.msra.mxu0 %v15104_v42  ;;  %v15135_v42 = vld [vmem:[#allocation73_spill] sm:$0xff] }
 0x6a4   :  { %8433 = vmatpush1.bf16.msra.mxu1 %v15105_v18  ;;  %8270 = vmatprep.subr.bf16.mxu0 %v15106_v5  ;;  %v15136_v18 = vld [vmem:[#allocation74_spill] sm:$0xff]  ;;  %v15137_v5 = vld [vmem:[#allocation75_spill] sm:$0xff] }
 0x6a5   :  { %8434 = vmatprep.subr.bf16.mxu1 %v15107_v6  ;;  %v15138_v6 = vld [vmem:[#allocation76_spill] sm:$0xff] }
 0x6a7   :  { %8271 = vmatpush1.bf16.msra.mxu0 %v15108_v9  ;;  %v15139_v9 = vld [vmem:[#allocation77_spill] sm:$0xff] }
 0x6a8   :  { %8435 = vmatpush1.bf16.msra.mxu1 %v15109_v12  ;;  %8281 = vmatprep.subr.bf16.mxu0 %v15110_v15  ;;  %v15140_v12 = vld [vmem:[#allocation78_spill] sm:$0xff]  ;;  %v15141_v15 = vld [vmem:[#allocation79_spill] sm:$0xff] }
 0x6a9   :  { %8445 = vmatprep.subr.bf16.mxu1 %v15111_v19  ;;  %v15142_v19 = vld [vmem:[#allocation80_spill] sm:$0xff] }
 0x6aa   :  { %8273 = vmatmul.mubr.bf16.vlgmr.msra.gmra.mrb[24].mxu0 %v12687_v57 }
 0x6ab   :  { %8437 = vmatmul.mubr.bf16.vlgmr.msra.gmra.mrb[24].mxu1 %v12687_v57  ;;  %8282 = vmatpush1.bf16.msra.mxu0 %v15112_v44  ;;  %v15143_v44 = vld [vmem:[#allocation81_spill] sm:$0xff] }
 0x6ac   :  { %8313 = vmatprep.mubr.bf16.mxu0 %v12694_v48  ;;  %8446 = vmatpush1.bf16.msra.mxu1 %v15113_v13  ;;  %v15144_v13 = vld [vmem:[#allocation82_spill] sm:$0xff] }
 0x6ad   :  { %8477 = vmatprep.mubr.bf16.mxu1 %v12694_v48  ;;  %8283 = vmatprep.subr.bf16.mxu0 %v15114_v3  ;;  %v15145_v3 = vld [vmem:[#allocation83_spill] sm:$0xff] }
 0x6ae   :  { %8447 = vmatprep.subr.bf16.mxu1 %v15115_v24  ;;  %v15146_v24 = vld [vmem:[#allocation84_spill] sm:$0xff] }
 0x6af   :  { %8284 = vmatpush1.bf16.msra.mxu0 %v15116_v25  ;;  %v15147_v25 = vld [vmem:[#allocation85_spill] sm:$0xff] }
 0x6b0   :  { %8448 = vmatpush1.bf16.msra.mxu1 %v15117_v32  ;;  %8285 = vmatprep.subr.bf16.mxu0 %v15118_v26  ;;  %v15148_v32 = vld [vmem:[#allocation86_spill] sm:$0xff]  ;;  %v15149_v26 = vld [vmem:[#allocation87_spill] sm:$0xff] }
 0x6b1   :  { %8449 = vmatprep.subr.bf16.mxu1 %v15119_v27  ;;  %v15150_v27 = vld [vmem:[#allocation88_spill] sm:$0xff] }
 0x6b3   :  { %8286 = vmatpush1.bf16.msra.mxu0 %v15120_v33  ;;  %v15151_v33 = vld [vmem:[#allocation89_spill] sm:$0xff] }
 0x6b4   :  { %8450 = vmatpush1.bf16.msra.mxu1 %v15121_v34  ;;  %8287 = vmatprep.subr.bf16.mxu0 %v15122_v35  ;;  %v15152_v34 = vld [vmem:[#allocation90_spill] sm:$0xff]  ;;  %v15153_v35 = vld [vmem:[#allocation91_spill] sm:$0xff] }
 0x6b5   :  { %8451 = vmatprep.subr.bf16.mxu1 %v15123_v36  ;;  %v15154_v36 = vld [vmem:[#allocation92_spill] sm:$0xff] }
 0x6b7   :  { %8288 = vmatpush1.bf16.msra.mxu0 %v15124_v46  ;;  %v15155_v46 = vld [vmem:[#allocation93_spill] sm:$0xff] }
 0x6b8   :  { %8452 = vmatpush1.bf16.msra.mxu1 %v15125_v49  ;;  %8289 = vmatprep.subr.bf16.mxu0 %v15126_v0  ;;  %v15156_v49 = vld [vmem:[#allocation94_spill] sm:$0xff]  ;;  %v15157_v0 = vld [vmem:[#allocation95_spill] sm:$0xff] }
 0x6b9   :  { %8453 = vmatprep.subr.bf16.mxu1 %v15127_v50  ;;  %v15158_v50 = vld [vmem:[#allocation96_spill] sm:$0xff] }
 0x6bb   :  { %8290 = vmatpush1.bf16.msra.mxu0 %v15128_v21  ;;  %v15159_v21 = vld [vmem:[#allocation97_spill] sm:$0xff] }
 0x6bc   :  { %8454 = vmatpush1.bf16.msra.mxu1 %v15129_v55  ;;  %8291 = vmatprep.subr.bf16.mxu0 %v15130_v58  ;;  %v15160_v55 = vld [vmem:[#allocation98_spill] sm:$0xff]  ;;  %v15161_v58 = vld [vmem:[#allocation99_spill] sm:$0xff] }
 0x6bd   :  { %8455 = vmatprep.subr.bf16.mxu1 %v15131_v59  ;;  %v15162_v59 = vld [vmem:[#allocation100_spill] sm:$0xff] }
 0x6bf   :  { %8292 = vmatpush1.bf16.msra.mxu0 %v15132_v1  ;;  %v15163_v1 = vld [vmem:[#allocation101_spill] sm:$0xff] }
 0x6c0   :  { %8456 = vmatpush1.bf16.msra.mxu1 %v15133_v2  ;;  %8293 = vmatprep.subr.bf16.mxu0 %v15134_v30  ;;  %v15164_v2 = vld [vmem:[#allocation102_spill] sm:$0xff]  ;;  %v15165_v30 = vld [vmem:[#allocation103_spill] sm:$0xff] }
 0x6c1   :  { %8457 = vmatprep.subr.bf16.mxu1 %v15135_v42  ;;  %v15166_v42 = vld [vmem:[#allocation104_spill] sm:$0xff] }
 0x6c3   :  { %8294 = vmatpush1.bf16.msra.mxu0 %v15136_v18  ;;  %v15167_v18 = vld [vmem:[#allocation105_spill] sm:$0xff] }
 0x6c4   :  { %8458 = vmatpush1.bf16.msra.mxu1 %v15137_v5  ;;  %8295 = vmatprep.subr.bf16.mxu0 %v15138_v6  ;;  %v15168_v5 = vld [vmem:[#allocation106_spill] sm:$0xff]  ;;  %v15169_v6 = vld [vmem:[#allocation107_spill] sm:$0xff] }
 0x6c5   :  { %8459 = vmatprep.subr.bf16.mxu1 %v15139_v9  ;;  %v15170_v9 = vld [vmem:[#allocation108_spill] sm:$0xff] }
 0x6c7   :  { %8296 = vmatpush1.bf16.msra.mxu0 %v15140_v12  ;;  %v15171_v12 = vld [vmem:[#allocation109_spill] sm:$0xff] }
 0x6c8   :  { %8460 = vmatpush1.bf16.msra.mxu1 %v15141_v15  ;;  %8297 = vmatprep.subr.bf16.mxu0 %v15142_v19  ;;  %v15172_v15 = vld [vmem:[#allocation110_spill] sm:$0xff]  ;;  %v12763_v19 = vpack.c.bf16 %v12569_v17, %v12569_v17 }
 0x6c9   :  { %8461 = vmatprep.subr.bf16.mxu1 %v15143_v44  ;;  %v15173_v44 = vld [vmem:[#allocation111_spill] sm:$0xff]  ;;  %v15180_v17 = vld [vmem:[#allocation118_spill] sm:$0xff] }
 0x6cb   :  { %8298 = vmatpush1.bf16.msra.mxu0 %v15144_v13  ;;  %v15174_v13 = vld [vmem:[#allocation112_spill] sm:$0xff] }
 0x6cc   :  { %8462 = vmatpush1.bf16.msra.mxu1 %v15145_v3  ;;  %8299 = vmatprep.subr.bf16.mxu0 %v15146_v24  ;;  %v15175_v3 = vld [vmem:[#allocation113_spill] sm:$0xff]  ;;  %v15176_v24 = vld [vmem:[#allocation114_spill] sm:$0xff] }
 0x6cd   :  { %8463 = vmatprep.subr.bf16.mxu1 %v15147_v25  ;;  %v15177_v25 = vld [vmem:[#allocation115_spill] sm:$0xff] }
 0x6cf   :  { %8300 = vmatpush1.bf16.msra.mxu0 %v15148_v32  ;;  %v15178_v32 = vld [vmem:[#allocation116_spill] sm:$0xff] }
 0x6d0   :  { %8464 = vmatpush1.bf16.msra.mxu1 %v15149_v26  ;;  %8301 = vmatprep.subr.bf16.mxu0 %v15150_v27  ;;  %v15179_v26 = vld [vmem:[#allocation117_spill] sm:$0xff]  ;;  %v15181_v27 = vld [vmem:[#allocation119_spill] sm:$0xff] }
 0x6d1   :  { %8465 = vmatprep.subr.bf16.mxu1 %v15151_v33  ;;  %v15182_v33 = vld [vmem:[#allocation120_spill] sm:$0xff] }
 0x6d3   :  { %8302 = vmatpush1.bf16.msra.mxu0 %v15152_v34  ;;  %v15183_v34 = vld [vmem:[#allocation121_spill] sm:$0xff] }
 0x6d4   :  { %8466 = vmatpush1.bf16.msra.mxu1 %v15153_v35  ;;  %8303 = vmatprep.subr.bf16.mxu0 %v15154_v36  ;;  %v15184_v35 = vld [vmem:[#allocation122_spill] sm:$0xff]  ;;  %v15185_v36 = vld [vmem:[#allocation123_spill] sm:$0xff] }
 0x6d5   :  { %8467 = vmatprep.subr.bf16.mxu1 %v15155_v46  ;;  %v15186_v46 = vld [vmem:[#allocation124_spill] sm:$0xff] }
 0x6d7   :  { %8304 = vmatpush1.bf16.msra.mxu0 %v15156_v49  ;;  %v15187_v49 = vld [vmem:[#allocation125_spill] sm:$0xff] }
 0x6d8   :  { %8468 = vmatpush1.bf16.msra.mxu1 %v15157_v0  ;;  %8305 = vmatprep.subr.bf16.mxu0 %v15158_v50  ;;  %v15188_v0 = vld [vmem:[#allocation126_spill] sm:$0xff]  ;;  %v15189_v50 = vld [vmem:[#allocation127_spill] sm:$0xff] }
 0x6d9   :  { %8469 = vmatprep.subr.bf16.mxu1 %v15159_v21  ;;  %v15190_v21 = vld [vmem:[#allocation128_spill] sm:$0xff] }
 0x6db   :  { %8306 = vmatpush1.bf16.msra.mxu0 %v15160_v55  ;;  %v15191_v55 = vld [vmem:[#allocation129_spill] sm:$0xff] }
 0x6dc   :  { %8470 = vmatpush1.bf16.msra.mxu1 %v15161_v58  ;;  %8307 = vmatprep.subr.bf16.mxu0 %v15162_v59  ;;  %v15192_v58 = vld [vmem:[#allocation130_spill] sm:$0xff]  ;;  %v15193_v59 = vld [vmem:[#allocation131_spill] sm:$0xff] }
 0x6dd   :  { %8471 = vmatprep.subr.bf16.mxu1 %v15163_v1  ;;  %v15194_v1 = vld [vmem:[#allocation132_spill] sm:$0xff] }
 0x6df   :  { %8308 = vmatpush1.bf16.msra.mxu0 %v15164_v2  ;;  %v15195_v2 = vld [vmem:[#allocation133_spill] sm:$0xff] }
 0x6e0   :  { %8472 = vmatpush1.bf16.msra.mxu1 %v15165_v30  ;;  %8309 = vmatprep.subr.bf16.mxu0 %v15166_v42  ;;  %v15196_v30 = vld [vmem:[#allocation134_spill] sm:$0xff]  ;;  %v15197_v42 = vld [vmem:[#allocation135_spill] sm:$0xff] }
 0x6e1   :  { %8473 = vmatprep.subr.bf16.mxu1 %v15167_v18  ;;  %v15198_v18 = vld [vmem:[#allocation136_spill] sm:$0xff] }
 0x6e3   :  { %8310 = vmatpush1.bf16.msra.mxu0 %v15168_v5  ;;  %v15199_v5 = vld [vmem:[#allocation137_spill] sm:$0xff] }
 0x6e4   :  { %8474 = vmatpush1.bf16.msra.mxu1 %v15169_v6  ;;  %8311 = vmatprep.subr.bf16.mxu0 %v15170_v9  ;;  %v15200_v6 = vld [vmem:[#allocation138_spill] sm:$0xff]  ;;  %v15201_v9 = vld [vmem:[#allocation139_spill] sm:$0xff] }
 0x6e5   :  { %8475 = vmatprep.subr.bf16.mxu1 %v15171_v12  ;;  %v15202_v12 = vld [vmem:[#allocation140_spill] sm:$0xff] }
 0x6e7   :  { %8312 = vmatpush1.bf16.msra.mxu0 %v15172_v15  ;;  %v15203_v15 = vld [vmem:[#allocation141_spill] sm:$0xff] }
 0x6e8   :  { %8476 = vmatpush1.bf16.msra.mxu1 %v15173_v44  ;;  %8322 = vmatprep.subr.bf16.mxu0 %v15174_v13  ;;  %v15204_v44 = vld [vmem:[#allocation142_spill] sm:$0xff]  ;;  %v15205_v13 = vld [vmem:[#allocation143_spill] sm:$0xff] }
 0x6e9   :  { %8486 = vmatprep.subr.bf16.mxu1 %v15175_v3  ;;  %v15206_v3 = vld [vmem:[#allocation144_spill] sm:$0xff] }
 0x6ea   :  { %8314 = vmatmul.mubr.bf16.vlgmr.msra.gmra.mrb[24].mxu0 %v12763_v19 }
 0x6eb   :  { %8478 = vmatmul.mubr.bf16.vlgmr.msra.gmra.mrb[24].mxu1 %v12763_v19  ;;  %8323 = vmatpush1.bf16.msra.mxu0 %v15176_v24  ;;  %v15207_v24 = vld [vmem:[#allocation145_spill] sm:$0xff] }
 0x6ec   :  { %8487 = vmatpush1.bf16.msra.mxu1 %v15177_v25  ;;  %8324 = vmatprep.subr.bf16.mxu0 %v15178_v32  ;;  %v15208_v25 = vld [vmem:[#allocation146_spill] sm:$0xff]  ;;  %v15209_v32 = vld [vmem:[#allocation147_spill] sm:$0xff] }
 0x6ed   :  { %8488 = vmatprep.subr.bf16.mxu1 %v15179_v26  ;;  %v15210_v26 = vld [vmem:[#allocation148_spill] sm:$0xff] }
 0x6ef   :  { %8325 = vmatpush1.bf16.msra.mxu0 %v15180_v17  ;;  %v15211_v17 = vld [vmem:[#allocation149_spill] sm:$0xff] }
 0x6f0   :  { %8489 = vmatpush1.bf16.msra.mxu1 %v15181_v27  ;;  %8326 = vmatprep.subr.bf16.mxu0 %v15182_v33  ;;  %v15212_v27 = vld [vmem:[#allocation150_spill] sm:$0xff]  ;;  %v15213_v33 = vld [vmem:[#allocation151_spill] sm:$0xff] }
 0x6f1   :  { %8490 = vmatprep.subr.bf16.mxu1 %v15183_v34  ;;  %v15214_v34 = vld [vmem:[#allocation152_spill] sm:$0xff] }
 0x6f3   :  { %8327 = vmatpush1.bf16.msra.mxu0 %v15184_v35  ;;  %v15215_v35 = vld [vmem:[#allocation153_spill] sm:$0xff] }
 0x6f4   :  { %8491 = vmatpush1.bf16.msra.mxu1 %v15185_v36  ;;  %8328 = vmatprep.subr.bf16.mxu0 %v15186_v46  ;;  %v15216_v36 = vld [vmem:[#allocation154_spill] sm:$0xff]  ;;  %v15217_v46 = vld [vmem:[#allocation155_spill] sm:$0xff] }
 0x6f5   :  { %8492 = vmatprep.subr.bf16.mxu1 %v15187_v49  ;;  %v15218_v49 = vld [vmem:[#allocation156_spill] sm:$0xff] }
 0x6f7   :  { %8329 = vmatpush1.bf16.msra.mxu0 %v15188_v0  ;;  %v15219_v0 = vld [vmem:[#allocation157_spill] sm:$0xff] }
 0x6f8   :  { %8493 = vmatpush1.bf16.msra.mxu1 %v15189_v50  ;;  %8330 = vmatprep.subr.bf16.mxu0 %v15190_v21  ;;  %v15220_v50 = vld [vmem:[#allocation158_spill] sm:$0xff]  ;;  %v15221_v21 = vld [vmem:[#allocation159_spill] sm:$0xff] }
 0x6f9   :  { %8494 = vmatprep.subr.bf16.mxu1 %v15191_v55  ;;  %v15222_v55 = vld [vmem:[#allocation160_spill] sm:$0xff] }
 0x6fb   :  { %8331 = vmatpush1.bf16.msra.mxu0 %v15192_v58  ;;  %v15223_v58 = vld [vmem:[#allocation161_spill] sm:$0xff] }
 0x6fc   :  { %8495 = vmatpush1.bf16.msra.mxu1 %v15193_v59  ;;  %8332 = vmatprep.subr.bf16.mxu0 %v15194_v1  ;;  %v15224_v59 = vld [vmem:[#allocation162_spill] sm:$0xff]  ;;  %v15225_v1 = vld [vmem:[#allocation163_spill] sm:$0xff] }
 0x6fd   :  { %8496 = vmatprep.subr.bf16.mxu1 %v15195_v2  ;;  %v15226_v2 = vld [vmem:[#allocation164_spill] sm:$0xff] }
 0x6ff   :  { %8333 = vmatpush1.bf16.msra.mxu0 %v15196_v30  ;;  %v15227_v30 = vld [vmem:[#allocation165_spill] sm:$0xff] }
 0x700   :  { %8497 = vmatpush1.bf16.msra.mxu1 %v15197_v42  ;;  %8334 = vmatprep.subr.bf16.mxu0 %v15198_v18  ;;  %v15228_v42 = vld [vmem:[#allocation166_spill] sm:$0xff]  ;;  %v15229_v18 = vld [vmem:[#allocation167_spill] sm:$0xff] }
 0x701   :  { %8498 = vmatprep.subr.bf16.mxu1 %v15199_v5  ;;  %v15230_v5 = vld [vmem:[#allocation168_spill] sm:$0xff] }
 0x703   :  { %8335 = vmatpush1.bf16.msra.mxu0 %v15200_v6  ;;  %v15231_v6 = vld [vmem:[#allocation169_spill] sm:$0xff] }
 0x704   :  { %8499 = vmatpush1.bf16.msra.mxu1 %v15201_v9  ;;  %8336 = vmatprep.subr.bf16.mxu0 %v15202_v12  ;;  %v15232_v9 = vld [vmem:[#allocation170_spill] sm:$0xff]  ;;  %v15233_v12 = vld [vmem:[#allocation171_spill] sm:$0xff] }
 0x705   :  { %8500 = vmatprep.subr.bf16.mxu1 %v15203_v15  ;;  %v15234_v15 = vld [vmem:[#allocation172_spill] sm:$0xff] }
 0x707   :  { %8337 = vmatpush1.bf16.msra.mxu0 %v15204_v44  ;;  %v15235_v44 = vld [vmem:[#allocation173_spill] sm:$0xff] }
 0x708   :  { %8501 = vmatpush1.bf16.msra.mxu1 %v15205_v13  ;;  %8338 = vmatprep.subr.bf16.mxu0 %v15206_v3  ;;  %v15236_v13 = vld [vmem:[#allocation174_spill] sm:$0xff]  ;;  %v15237_v3 = vld [vmem:[#allocation175_spill] sm:$0xff] }
 0x709   :  { %8502 = vmatprep.subr.bf16.mxu1 %v15207_v24  ;;  %v15238_v24 = vld [vmem:[#allocation176_spill] sm:$0xff] }
 0x70b   :  { %8339 = vmatpush1.bf16.msra.mxu0 %v15208_v25  ;;  %v15239_v25 = vld [vmem:[#allocation177_spill] sm:$0xff] }
 0x70c   :  { %8503 = vmatpush1.bf16.msra.mxu1 %v15209_v32  ;;  %8340 = vmatprep.subr.bf16.mxu0 %v15210_v26 }
 0x70d   :  { %8504 = vmatprep.subr.bf16.mxu1 %v15211_v17 }
 0x70f   :  { %8341 = vmatpush1.bf16.msra.mxu0 %v15212_v27 }
 0x710   :  { %8505 = vmatpush1.bf16.msra.mxu1 %v15213_v33  ;;  %8342 = vmatprep.subr.bf16.mxu0 %v15214_v34 }
 0x711   :  { %8506 = vmatprep.subr.bf16.mxu1 %v15215_v35 }
 0x713   :  { %8343 = vmatpush1.bf16.msra.mxu0 %v15216_v36 }
 0x714   :  { %8507 = vmatpush1.bf16.msra.mxu1 %v15217_v46  ;;  %8344 = vmatprep.subr.bf16.mxu0 %v15218_v49 }
 0x715   :  { %8508 = vmatprep.subr.bf16.mxu1 %v15219_v0 }
 0x717   :  { %8345 = vmatpush1.bf16.msra.mxu0 %v15220_v50  ;;  %v15240_v50 = vld [vmem:[#allocation178_spill] sm:$0xff] }
 0x718   :  { %8509 = vmatpush1.bf16.msra.mxu1 %v15221_v21  ;;  %8346 = vmatprep.subr.bf16.mxu0 %v15222_v55  ;;  %v15241_v21 = vld [vmem:[#allocation179_spill] sm:$0xff]  ;;  %v15242_v55 = vld [vmem:[#allocation180_spill] sm:$0xff] }
 0x719   :  { %8510 = vmatprep.subr.bf16.mxu1 %v15223_v58  ;;  %v15243_v58 = vld [vmem:[#allocation181_spill] sm:$0xff] }
 0x71b   :  { %8347 = vmatpush1.bf16.msra.mxu0 %v15224_v59  ;;  %v15244_v59 = vld [vmem:[#allocation182_spill] sm:$0xff] }
 0x71c   :  { %8511 = vmatpush1.bf16.msra.mxu1 %v15225_v1  ;;  %8348 = vmatprep.subr.bf16.mxu0 %v15226_v2  ;;  %v15245_v1 = vld [vmem:[#allocation183_spill] sm:$0xff]  ;;  %v15246_v2 = vld [vmem:[#allocation184_spill] sm:$0xff] }
 0x71d   :  { %8512 = vmatprep.subr.bf16.mxu1 %v15227_v30  ;;  %v15247_v30 = vld [vmem:[#allocation185_spill] sm:$0xff] }
 0x71f   :  { %8349 = vmatpush1.bf16.msra.mxu0 %v15228_v42  ;;  %v15248_v42 = vld [vmem:[#allocation186_spill] sm:$0xff] }
 0x720   :  { %8513 = vmatpush1.bf16.msra.mxu1 %v15229_v18  ;;  %8350 = vmatprep.subr.bf16.mxu0 %v15230_v5  ;;  %v15249_v18 = vld [vmem:[#allocation187_spill] sm:$0xff]  ;;  %v15250_v5 = vld [vmem:[#allocation188_spill] sm:$0xff] }
 0x721   :  { %8514 = vmatprep.subr.bf16.mxu1 %v15231_v6  ;;  %v15251_v6 = vld [vmem:[#allocation189_spill] sm:$0xff] }
 0x723   :  { %8351 = vmatpush1.bf16.msra.mxu0 %v15232_v9  ;;  %v15252_v9 = vld [vmem:[#allocation190_spill] sm:$0xff] }
 0x724   :  { %8515 = vmatpush1.bf16.msra.mxu1 %v15233_v12  ;;  %8352 = vmatprep.subr.bf16.mxu0 %v15234_v15  ;;  %v15253_v12 = vld [vmem:[#allocation191_spill] sm:$0xff]  ;;  %v15254_v15 = vld [vmem:[#allocation192_spill] sm:$0xff] }
 0x725   :  { %8516 = vmatprep.subr.bf16.mxu1 %v15235_v44  ;;  %v15255_v44 = vld [vmem:[#allocation193_spill] sm:$0xff] }
 0x727   :  { %8353 = vmatpush1.bf16.msra.mxu0 %v15236_v13  ;;  %v15256_v13 = vld [vmem:[#allocation194_spill] sm:$0xff] }
 0x728   :  { %8517 = vmatpush1.bf16.msra.mxu1 %v15237_v3  ;;  %8363 = vmatprep.subr.bf16.mxu0 %v15238_v24  ;;  %v15257_v3 = vld [vmem:[#allocation195_spill] sm:$0xff]  ;;  %v15258_v24 = vld [vmem:[#allocation196_spill] sm:$0xff] }
 0x729   :  { %8527 = vmatprep.subr.bf16.mxu1 %v15239_v25  ;;  %v15259_v25 = vld [vmem:[#allocation197_spill] sm:$0xff] }
 0x73d   :  { %v8061_v32 = vpop.f32.mrb[20].mxu0 }
 0x73e   :  { %v12834_v26 = vpop.f32.mrb[20].mxu1  ;;  %v8063_v17 = vpop.f32.mrb[21].mxu0  ;;  %v12838_v35 = vpack.c.bf16 %v8061_v32, %v8061_v32  ;;  %v15260_v32 = vld [vmem:[#allocation198_spill] sm:$0xff] }
 0x73f   :  { %v12836_v27 = vpack.c.bf16 %v8063_v17, %v8063_v17  ;;  %v8227_v33 = vpop.f32.mrb[21].mxu1  ;;  %v8065_v34 = vpop.f32.mrb[22].mxu0  ;;  %v15261_v17 = vld [vmem:[#allocation199_spill] sm:$0xff] }
 0x740   :  { %v8229_v36 = vpop.f32.mrb[22].mxu1  ;;  %v8066_v46 = vpop.f32.mrb[23].mxu0  ;;  %v12842_v0 = vpack.c.bf16 %v8227_v33, %v8227_v33  ;;  %v15262_v33 = vld [vmem:[#allocation200_spill] sm:$0xff]  ;;  %v15263_v34 = vld [vmem:[#allocation201_spill] sm:$0xff] }
 0x741   :  { %v8230_v49 = vpop.f32.mrb[23].mxu1  ;;  %8354 = vmatprep.mubr.bf16.mxu0 %v12836_v27  ;;  %8518 = vmatprep.mubr.bf16.mxu1 %v12836_v27  ;;  %v15264_v36 = vld [vmem:[#allocation202_spill] sm:$0xff]  ;;  %v15265_v46 = vld [vmem:[#allocation203_spill] sm:$0xff] }
 0x742   :  { %8355 = vmatmul.mubr.bf16.vlgmr.msra.gmra.mrb[24].mxu0 %v12838_v35  ;;  %8519 = vmatmul.mubr.bf16.vlgmr.msra.gmra.mrb[24].mxu1 %v12838_v35  ;;  %v15266_v49 = vld [vmem:[#allocation204_spill] sm:$0xff] }
 0x743   :  { %8364 = vmatpush1.bf16.msra.mxu0 %v15240_v50  ;;  %8528 = vmatpush1.bf16.msra.mxu1 %v15241_v21  ;;  %v15267_v50 = vld [vmem:[#allocation205_spill] sm:$0xff]  ;;  %v15268_v21 = vld [vmem:[#allocation206_spill] sm:$0xff] }
 0x744   :  { %8395 = vmatprep.mubr.bf16.mxu0 %v12842_v0  ;;  %8559 = vmatprep.mubr.bf16.mxu1 %v12842_v0 }
 0x745   :  { %8365 = vmatprep.subr.bf16.mxu0 %v15242_v55  ;;  %8529 = vmatprep.subr.bf16.mxu1 %v15243_v58  ;;  %v15269_v55 = vld [vmem:[#allocation207_spill] sm:$0xff]  ;;  %v15270_v58 = vld [vmem:[#allocation208_spill] sm:$0xff] }
 0x747   :  { %8366 = vmatpush1.bf16.msra.mxu0 %v15244_v59  ;;  %8530 = vmatpush1.bf16.msra.mxu1 %v15245_v1  ;;  %v15271_v59 = vld [vmem:[#allocation209_spill] sm:$0xff]  ;;  %v15272_v1 = vld [vmem:[#allocation210_spill] sm:$0xff] }
 0x748   :  { %8367 = vmatprep.subr.bf16.mxu0 %v15246_v2  ;;  %8531 = vmatprep.subr.bf16.mxu1 %v15247_v30  ;;  %v15273_v2 = vld [vmem:[#allocation211_spill] sm:$0xff]  ;;  %v15274_v30 = vld [vmem:[#allocation212_spill] sm:$0xff] }
 0x74b   :  { %8368 = vmatpush1.bf16.msra.mxu0 %v15248_v42  ;;  %8532 = vmatpush1.bf16.msra.mxu1 %v15249_v18  ;;  %v15275_v42 = vld [vmem:[#allocation213_spill] sm:$0xff]  ;;  %v15276_v18 = vld [vmem:[#allocation214_spill] sm:$0xff] }
 0x74c   :  { %8369 = vmatprep.subr.bf16.mxu0 %v15250_v5  ;;  %8533 = vmatprep.subr.bf16.mxu1 %v15251_v6  ;;  %v15277_v5 = vld [vmem:[#allocation215_spill] sm:$0xff]  ;;  %v15278_v6 = vld [vmem:[#allocation216_spill] sm:$0xff] }
 0x74f   :  { %8370 = vmatpush1.bf16.msra.mxu0 %v15252_v9  ;;  %8534 = vmatpush1.bf16.msra.mxu1 %v15253_v12  ;;  %v15279_v9 = vld [vmem:[#allocation217_spill] sm:$0xff]  ;;  %v15280_v12 = vld [vmem:[#allocation218_spill] sm:$0xff] }
 0x750   :  { %8371 = vmatprep.subr.bf16.mxu0 %v15254_v15  ;;  %8535 = vmatprep.subr.bf16.mxu1 %v15255_v44  ;;  %v15281_v15 = vld [vmem:[#allocation219_spill] sm:$0xff]  ;;  %v15282_v44 = vld [vmem:[#allocation220_spill] sm:$0xff] }
 0x753   :  { %8372 = vmatpush1.bf16.msra.mxu0 %v15256_v13  ;;  %8536 = vmatpush1.bf16.msra.mxu1 %v15257_v3  ;;  %v15283_v13 = vld [vmem:[#allocation221_spill] sm:$0xff]  ;;  %v15284_v3 = vld [vmem:[#allocation222_spill] sm:$0xff] }
 0x754   :  { %8373 = vmatprep.subr.bf16.mxu0 %v15258_v24  ;;  %8537 = vmatprep.subr.bf16.mxu1 %v15259_v25  ;;  %v15285_v24 = vld [vmem:[#allocation224_spill] sm:$0xff]  ;;  %v15286_v25 = vld [vmem:[#allocation225_spill] sm:$0xff] }
 0x757   :  { %8374 = vmatpush1.bf16.msra.mxu0 %v15260_v32  ;;  %8538 = vmatpush1.bf16.msra.mxu1 %v15261_v17  ;;  %v15287_v32 = vld [vmem:[#allocation226_spill] sm:$0xff]  ;;  %v15288_v17 = vld [vmem:[#allocation227_spill] sm:$0xff] }
 0x758   :  { %8375 = vmatprep.subr.bf16.mxu0 %v15262_v33  ;;  %8539 = vmatprep.subr.bf16.mxu1 %v15263_v34  ;;  %v15289_v33 = vld [vmem:[#allocation228_spill] sm:$0xff]  ;;  %v15290_v34 = vld [vmem:[#allocation230_spill] sm:$0xff] }
 0x75b   :  { %8376 = vmatpush1.bf16.msra.mxu0 %v15264_v36  ;;  %8540 = vmatpush1.bf16.msra.mxu1 %v15265_v46  ;;  %v15291_v36 = vld [vmem:[#allocation231_spill] sm:$0xff]  ;;  %v15292_v46 = vld [vmem:[#allocation232_spill] sm:$0xff] }
 0x75c   :  { %8377 = vmatprep.subr.bf16.mxu0 %v15266_v49  ;;  %8541 = vmatprep.subr.bf16.mxu1 %v15267_v50  ;;  %v15293_v49 = vld [vmem:[#allocation233_spill] sm:$0xff]  ;;  %v15295_v50 = vld [vmem:[#allocation235_spill] sm:$0xff] }
 0x75f   :  { %8378 = vmatpush1.bf16.msra.mxu0 %v15268_v21  ;;  %8542 = vmatpush1.bf16.msra.mxu1 %v15269_v55  ;;  %v15296_v21 = vld [vmem:[#allocation236_spill] sm:$0xff]  ;;  %v15297_v55 = vld [vmem:[#allocation237_spill] sm:$0xff] }
 0x760   :  { %8379 = vmatprep.subr.bf16.mxu0 %v15270_v58  ;;  %8543 = vmatprep.subr.bf16.mxu1 %v15271_v59  ;;  %v15298_v58 = vld [vmem:[#allocation238_spill] sm:$0xff]  ;;  %v15299_v59 = vld [vmem:[#allocation239_spill] sm:$0xff] }
 0x763   :  { %8380 = vmatpush1.bf16.msra.mxu0 %v15272_v1  ;;  %8544 = vmatpush1.bf16.msra.mxu1 %v15273_v2  ;;  %v15300_v1 = vld [vmem:[#allocation240_spill] sm:$0xff]  ;;  %v15301_v2 = vld [vmem:[#allocation241_spill] sm:$0xff] }
 0x764   :  { %8381 = vmatprep.subr.bf16.mxu0 %v15274_v30  ;;  %8545 = vmatprep.subr.bf16.mxu1 %v15275_v42  ;;  %v15302_v30 = vld [vmem:[#allocation242_spill] sm:$0xff]  ;;  %v15303_v42 = vld [vmem:[#allocation243_spill] sm:$0xff] }
 0x767   :  { %8382 = vmatpush1.bf16.msra.mxu0 %v15276_v18  ;;  %8546 = vmatpush1.bf16.msra.mxu1 %v15277_v5  ;;  %v15304_v18 = vld [vmem:[#allocation244_spill] sm:$0xff]  ;;  %v15306_v5 = vld [vmem:[#allocation246_spill] sm:$0xff] }
 0x768   :  { %8383 = vmatprep.subr.bf16.mxu0 %v15278_v6  ;;  %8547 = vmatprep.subr.bf16.mxu1 %v15279_v9  ;;  %v15307_v6 = vld [vmem:[#allocation247_spill] sm:$0xff]  ;;  %v15308_v9 = vld [vmem:[#allocation248_spill] sm:$0xff] }
 0x76b   :  { %8384 = vmatpush1.bf16.msra.mxu0 %v15280_v12  ;;  %8548 = vmatpush1.bf16.msra.mxu1 %v15281_v15  ;;  %v15309_v12 = vld [vmem:[#allocation249_spill] sm:$0xff]  ;;  %v15310_v15 = vld [vmem:[#allocation250_spill] sm:$0xff] }
 0x76c   :  { %8385 = vmatprep.subr.bf16.mxu0 %v15282_v44  ;;  %8549 = vmatprep.subr.bf16.mxu1 %v15283_v13  ;;  %v15311_v44 = vld [vmem:[#allocation251_spill] sm:$0xff]  ;;  %v15312_v13 = vld [vmem:[#allocation252_spill] sm:$0xff] }
 0x76f   :  { %8386 = vmatpush1.bf16.msra.mxu0 %v15284_v3  ;;  %8550 = vmatpush1.bf16.msra.mxu1 %v14818_v4  ;;  %v15294_v4 = vld [vmem:[#allocation234_spill] sm:$0xff]  ;;  %v15313_v3 = vld [vmem:[#allocation253_spill] sm:$0xff] }
 0x770   :  { %8387 = vmatprep.subr.bf16.mxu0 %v15285_v24  ;;  %8551 = vmatprep.subr.bf16.mxu1 %v15286_v25  ;;  %v15315_v24 = vld [vmem:[#allocation255_spill] sm:$0xff]  ;;  %v15316_v25 = vld [vmem:[#allocation256_spill] sm:$0xff] }
 0x773   :  { %8388 = vmatpush1.bf16.msra.mxu0 %v15287_v32  ;;  %8552 = vmatpush1.bf16.msra.mxu1 %v15288_v17  ;;  %v15317_v32 = vld [vmem:[#allocation257_spill] sm:$0xff]  ;;  %v15318_v17 = vld [vmem:[#allocation258_spill] sm:$0xff] }
 0x774   :  { %8389 = vmatprep.subr.bf16.mxu0 %v15289_v33  ;;  %8553 = vmatprep.subr.bf16.mxu1 %v14824_v10  ;;  %v12912_v10 = vpack.c.bf16 %v12834_v26, %v12834_v26  ;;  %v15305_v26 = vld [vmem:[#allocation245_spill] sm:$0xff]  ;;  %v15319_v33 = vld [vmem:[#allocation259_spill] sm:$0xff] }
 0x777   :  { %8390 = vmatpush1.bf16.msra.mxu0 %v15290_v34  ;;  %8554 = vmatpush1.bf16.msra.mxu1 %v15291_v36  ;;  %v15320_v34 = vld [vmem:[#allocation260_spill] sm:$0xff]  ;;  %v15321_v36 = vld [vmem:[#allocation261_spill] sm:$0xff] }
 0x778   :  { %8391 = vmatprep.subr.bf16.mxu0 %v15292_v46  ;;  %8555 = vmatprep.subr.bf16.mxu1 %v15293_v49  ;;  %v15322_v46 = vld [vmem:[#allocation262_spill] sm:$0xff]  ;;  %v15323_v49 = vld [vmem:[#allocation263_spill] sm:$0xff] }
 0x77b   :  { %8392 = vmatpush1.bf16.msra.mxu0 %v15294_v4  ;;  %8556 = vmatpush1.bf16.msra.mxu1 %v15295_v50  ;;  %v15324_v4 = vld [vmem:[#allocation264_spill] sm:$0xff]  ;;  %v15325_v50 = vld [vmem:[#allocation265_spill] sm:$0xff] }
 0x77c   :  { %8393 = vmatprep.subr.bf16.mxu0 %v15296_v21  ;;  %8557 = vmatprep.subr.bf16.mxu1 %v15297_v55  ;;  %v15326_v21 = vld [vmem:[#allocation266_spill] sm:$0xff]  ;;  %v15327_v55 = vld [vmem:[#allocation267_spill] sm:$0xff] }
 0x77f   :  { %8394 = vmatpush1.bf16.msra.mxu0 %v15298_v58  ;;  %8558 = vmatpush1.bf16.msra.mxu1 %v15299_v59  ;;  %v15328_v58 = vld [vmem:[#allocation268_spill] sm:$0xff]  ;;  %v15329_v59 = vld [vmem:[#allocation269_spill] sm:$0xff] }
 0x780   :  { %8568 = vmatprep.subr.bf16.mxu0 %v15300_v1  ;;  %8732 = vmatprep.subr.bf16.mxu1 %v15301_v2  ;;  %v15330_v1 = vld [vmem:[#allocation270_spill] sm:$0xff]  ;;  %v15331_v2 = vld [vmem:[#allocation271_spill] sm:$0xff] }
 0x782   :  { %8396 = vmatmul.mubr.bf16.vlgmr.msra.gmra.mrb[24].mxu0 %v12912_v10  ;;  %8560 = vmatmul.mubr.bf16.vlgmr.msra.gmra.mrb[24].mxu1 %v12912_v10 }
 0x783   :  { %8569 = vmatpush1.bf16.msra.mxu0 %v15302_v30  ;;  %8600 = vmatprep.mubr.bf16.mxu0 %v12618_v53  ;;  %v15332_v30 = vld [vmem:[#allocation272_spill] sm:$0xff] }
 0x784   :  { %8733 = vmatpush1.bf16.msra.mxu1 %v15303_v42  ;;  %8764 = vmatprep.mubr.bf16.mxu1 %v12618_v53  ;;  %v15314_v53 = vld [vmem:[#allocation254_spill] sm:$0xff]  ;;  %v15333_v42 = vld [vmem:[#allocation273_spill] sm:$0xff] }
 0x785   :  { %8570 = vmatprep.subr.bf16.mxu0 %v15304_v18  ;;  %8734 = vmatprep.subr.bf16.mxu1 %v15305_v26  ;;  %v15334_v18 = vld [vmem:[#allocation274_spill] sm:$0xff]  ;;  %v15335_v26 = vld [vmem:[#allocation275_spill] sm:$0xff] }
 0x787   :  { %8571 = vmatpush1.bf16.msra.mxu0 %v15306_v5  ;;  %v15336_v5 = vld [vmem:[#allocation276_spill] sm:$0xff] }
 0x788   :  { %8735 = vmatpush1.bf16.msra.mxu1 %v15307_v6  ;;  %8572 = vmatprep.subr.bf16.mxu0 %v15308_v9  ;;  %v15337_v6 = vld [vmem:[#allocation277_spill] sm:$0xff]  ;;  %v15338_v9 = vld [vmem:[#allocation278_spill] sm:$0xff] }
 0x789   :  { %8736 = vmatprep.subr.bf16.mxu1 %v15309_v12  ;;  %v15339_v12 = vld [vmem:[#allocation279_spill] sm:$0xff] }
 0x78b   :  { %8573 = vmatpush1.bf16.msra.mxu0 %v15310_v15  ;;  %v15340_v15 = vld [vmem:[#allocation280_spill] sm:$0xff] }
 0x78c   :  { %8737 = vmatpush1.bf16.msra.mxu1 %v15311_v44  ;;  %8574 = vmatprep.subr.bf16.mxu0 %v15312_v13  ;;  %v15341_v44 = vld [vmem:[#allocation281_spill] sm:$0xff]  ;;  %v15342_v13 = vld [vmem:[#allocation282_spill] sm:$0xff] }
 0x78d   :  { %8738 = vmatprep.subr.bf16.mxu1 %v15313_v3  ;;  %v15343_v3 = vld [vmem:[#allocation284_spill] sm:$0xff] }
 0x78f   :  { %8575 = vmatpush1.bf16.msra.mxu0 %v15314_v53  ;;  %v15344_v53 = vld [vmem:[#allocation285_spill] sm:$0xff] }
 0x790   :  { %8739 = vmatpush1.bf16.msra.mxu1 %v15315_v24  ;;  %8576 = vmatprep.subr.bf16.mxu0 %v15316_v25  ;;  %v15345_v24 = vld [vmem:[#allocation286_spill] sm:$0xff]  ;;  %v15346_v25 = vld [vmem:[#allocation287_spill] sm:$0xff] }
 0x791   :  { %8740 = vmatprep.subr.bf16.mxu1 %v15317_v32  ;;  %v15347_v32 = vld [vmem:[#allocation288_spill] sm:$0xff] }
 0x793   :  { %8577 = vmatpush1.bf16.msra.mxu0 %v15318_v17  ;;  %v15348_v17 = vld [vmem:[#allocation289_spill] sm:$0xff] }
 0x794   :  { %8741 = vmatpush1.bf16.msra.mxu1 %v15319_v33  ;;  %8578 = vmatprep.subr.bf16.mxu0 %v15320_v34  ;;  %v15349_v33 = vld [vmem:[#allocation290_spill] sm:$0xff]  ;;  %v15350_v34 = vld [vmem:[#allocation291_spill] sm:$0xff] }
 0x795   :  { %8742 = vmatprep.subr.bf16.mxu1 %v15321_v36  ;;  %v15351_v36 = vld [vmem:[#allocation292_spill] sm:$0xff] }
 0x797   :  { %8579 = vmatpush1.bf16.msra.mxu0 %v15322_v46  ;;  %v15352_v46 = vld [vmem:[#allocation293_spill] sm:$0xff] }
 0x798   :  { %8743 = vmatpush1.bf16.msra.mxu1 %v15323_v49  ;;  %8580 = vmatprep.subr.bf16.mxu0 %v15324_v4  ;;  %v15354_v49 = vld [vmem:[#allocation297_spill] sm:$0xff]  ;;  %v15355_v4 = vld [vmem:[#allocation298_spill] sm:$0xff] }
 0x799   :  { %8744 = vmatprep.subr.bf16.mxu1 %v15325_v50  ;;  %v15356_v50 = vld [vmem:[#allocation299_spill] sm:$0xff] }
 0x79b   :  { %8581 = vmatpush1.bf16.msra.mxu0 %v15326_v21  ;;  %v15357_v21 = vld [vmem:[#allocation300_spill] sm:$0xff] }
 0x79c   :  { %8745 = vmatpush1.bf16.msra.mxu1 %v15327_v55  ;;  %8582 = vmatprep.subr.bf16.mxu0 %v15328_v58  ;;  %v15358_v55 = vld [vmem:[#allocation301_spill] sm:$0xff]  ;;  %v15359_v58 = vld [vmem:[#allocation302_spill] sm:$0xff] }
 0x79d   :  { %8746 = vmatprep.subr.bf16.mxu1 %v15329_v59  ;;  %v15360_v59 = vld [vmem:[#allocation303_spill] sm:$0xff] }
 0x79f   :  { %8583 = vmatpush1.bf16.msra.mxu0 %v15330_v1  ;;  %v15361_v1 = vld [vmem:[#allocation304_spill] sm:$0xff] }
 0x7a0   :  { %8747 = vmatpush1.bf16.msra.mxu1 %v15331_v2  ;;  %8584 = vmatprep.subr.bf16.mxu0 %v15332_v30  ;;  %v15362_v2 = vld [vmem:[#allocation305_spill] sm:$0xff]  ;;  %v15365_v30 = vld [vmem:[#allocation308_spill] sm:$0xff] }
 0x7a1   :  { %8748 = vmatprep.subr.bf16.mxu1 %v15333_v42  ;;  %v15366_v42 = vld [vmem:[#allocation309_spill] sm:$0xff] }
 0x7a3   :  { %8585 = vmatpush1.bf16.msra.mxu0 %v15334_v18  ;;  %v15367_v18 = vld [vmem:[#allocation310_spill] sm:$0xff] }
 0x7a4   :  { %8749 = vmatpush1.bf16.msra.mxu1 %v15335_v26  ;;  %8586 = vmatprep.subr.bf16.mxu0 %v15336_v5  ;;  %v15368_v26 = vld [vmem:[#allocation311_spill] sm:$0xff]  ;;  %v15369_v5 = vld [vmem:[#allocation312_spill] sm:$0xff] }
 0x7a5   :  { %8750 = vmatprep.subr.bf16.mxu1 %v15337_v6  ;;  %v15370_v6 = vld [vmem:[#allocation313_spill] sm:$0xff] }
 0x7a7   :  { %8587 = vmatpush1.bf16.msra.mxu0 %v15338_v9  ;;  %v15372_v9 = vld [vmem:[#allocation315_spill] sm:$0xff] }
 0x7a8   :  { %8751 = vmatpush1.bf16.msra.mxu1 %v15339_v12  ;;  %8588 = vmatprep.subr.bf16.mxu0 %v15340_v15  ;;  %v15373_v12 = vld [vmem:[#allocation316_spill] sm:$0xff]  ;;  %v15374_v15 = vld [vmem:[#allocation317_spill] sm:$0xff] }
 0x7a9   :  { %8752 = vmatprep.subr.bf16.mxu1 %v15341_v44  ;;  %v15376_v44 = vld [vmem:[#allocation319_spill] sm:$0xff] }
 0x7ab   :  { %8589 = vmatpush1.bf16.msra.mxu0 %v15342_v13  ;;  %v15377_v13 = vld [vmem:[#allocation320_spill] sm:$0xff] }
 0x7ac   :  { %8753 = vmatpush1.bf16.msra.mxu1 %v14877_v54  ;;  %8590 = vmatprep.subr.bf16.mxu0 %v15343_v3  ;;  %v15353_v54 = vld [vmem:[#allocation294_spill] sm:$0xff]  ;;  %v15378_v3 = vld [vmem:[#allocation321_spill] sm:$0xff] }
 0x7ad   :  { %8754 = vmatprep.subr.bf16.mxu1 %v15344_v53  ;;  %v15379_v53 = vld [vmem:[#allocation322_spill] sm:$0xff] }
 0x7af   :  { %8591 = vmatpush1.bf16.msra.mxu0 %v15345_v24  ;;  %v15380_v24 = vld [vmem:[#allocation323_spill] sm:$0xff] }
 0x7b0   :  { %8755 = vmatpush1.bf16.msra.mxu1 %v15346_v25  ;;  %8592 = vmatprep.subr.bf16.mxu0 %v15347_v32  ;;  %v15381_v25 = vld [vmem:[#allocation324_spill] sm:$0xff]  ;;  %v15382_v32 = vld [vmem:[#allocation325_spill] sm:$0xff] }
 0x7b1   :  { %8756 = vmatprep.subr.bf16.mxu1 %v15348_v17  ;;  %v15383_v17 = vld [vmem:[#allocation326_spill] sm:$0xff] }
 0x7b3   :  { %8593 = vmatpush1.bf16.msra.mxu0 %v15349_v33  ;;  %v15384_v33 = vld [vmem:[#allocation327_spill] sm:$0xff] }
 0x7b4   :  { %8757 = vmatpush1.bf16.msra.mxu1 %v15350_v34  ;;  %8594 = vmatprep.subr.bf16.mxu0 %v15351_v36  ;;  %v15385_v34 = vld [vmem:[#allocation328_spill] sm:$0xff]  ;;  %v15386_v36 = vld [vmem:[#allocation329_spill] sm:$0xff] }
 0x7b5   :  { %8758 = vmatprep.subr.bf16.mxu1 %v15352_v46  ;;  %v15387_v46 = vld [vmem:[#allocation330_spill] sm:$0xff] }
 0x7b7   :  { %8595 = vmatpush1.bf16.msra.mxu0 %v15353_v54  ;;  %v15388_v54 = vld [vmem:[#allocation331_spill] sm:$0xff] }
 0x7b8   :  { %8759 = vmatpush1.bf16.msra.mxu1 %v14888_v23  ;;  %8596 = vmatprep.subr.bf16.mxu0 %v14889_v52  ;;  %v15363_v52 = vld [vmem:[#allocation306_spill] sm:$0xff]  ;;  %v15364_v23 = vld [vmem:[#allocation307_spill] sm:$0xff] }
 0x7b9   :  { %8760 = vmatprep.subr.bf16.mxu1 %v15354_v49  ;;  %v15389_v49 = vld [vmem:[#allocation332_spill] sm:$0xff] }
 0x7bb   :  { %8597 = vmatpush1.bf16.msra.mxu0 %v15355_v4  ;;  %v15390_v4 = vld [vmem:[#allocation333_spill] sm:$0xff] }
 0x7bc   :  { %8761 = vmatpush1.bf16.msra.mxu1 %v15356_v50  ;;  %8598 = vmatprep.subr.bf16.mxu0 %v15357_v21  ;;  %v15391_v50 = vld [vmem:[#allocation334_spill] sm:$0xff]  ;;  %v15392_v21 = vld [vmem:[#allocation335_spill] sm:$0xff] }
 0x7bd   :  { %8762 = vmatprep.subr.bf16.mxu1 %v15358_v55  ;;  %v15393_v55 = vld [vmem:[#allocation336_spill] sm:$0xff] }
 0x7bf   :  { %8599 = vmatpush1.bf16.msra.mxu0 %v15359_v58  ;;  %v15394_v58 = vld [vmem:[#allocation337_spill] sm:$0xff] }
 0x7c0   :  { %8763 = vmatpush1.bf16.msra.mxu1 %v15360_v59  ;;  %8609 = vmatprep.subr.bf16.mxu0 %v15361_v1  ;;  %v15395_v59 = vld [vmem:[#allocation338_spill] sm:$0xff]  ;;  %v15396_v1 = vld [vmem:[#allocation339_spill] sm:$0xff] }
 0x7c1   :  { %8773 = vmatprep.subr.bf16.mxu1 %v15362_v2  ;;  %v15397_v2 = vld [vmem:[#allocation340_spill] sm:$0xff] }
 0x7c2   :  { %8601 = vmatmul.mubr.bf16.vlgmr.msra.gmra.mrb[28].mxu0 %v12687_v57 }
 0x7c3   :  { %8765 = vmatmul.mubr.bf16.vlgmr.msra.gmra.mrb[28].mxu1 %v12687_v57  ;;  %8610 = vmatpush1.bf16.msra.mxu0 %v15363_v52  ;;  %v15371_v57 = vld [vmem:[#allocation314_spill] sm:$0xff]  ;;  %v15398_v52 = vld [vmem:[#allocation341_spill] sm:$0xff] }
 0x7c4   :  { %8641 = vmatprep.mubr.bf16.mxu0 %v12694_v48  ;;  %8774 = vmatpush1.bf16.msra.mxu1 %v15364_v23  ;;  %v15399_v23 = vld [vmem:[#allocation342_spill] sm:$0xff] }
 0x7c5   :  { %8805 = vmatprep.mubr.bf16.mxu1 %v12694_v48  ;;  %8611 = vmatprep.subr.bf16.mxu0 %v15365_v30  ;;  %v15375_v48 = vld [vmem:[#allocation318_spill] sm:$0xff]  ;;  %v15400_v30 = vld [vmem:[#allocation343_spill] sm:$0xff] }
 0x7c6   :  { %8775 = vmatprep.subr.bf16.mxu1 %v15366_v42  ;;  %v15401_v42 = vld [vmem:[#allocation344_spill] sm:$0xff] }
 0x7c7   :  { %8612 = vmatpush1.bf16.msra.mxu0 %v15367_v18  ;;  %v15402_v18 = vld [vmem:[#allocation345_spill] sm:$0xff] }
 0x7c8   :  { %8776 = vmatpush1.bf16.msra.mxu1 %v15368_v26  ;;  %8613 = vmatprep.subr.bf16.mxu0 %v15369_v5  ;;  %v15403_v26 = vld [vmem:[#allocation346_spill] sm:$0xff]  ;;  %v15404_v5 = vld [vmem:[#allocation347_spill] sm:$0xff] }
 0x7c9   :  { %8777 = vmatprep.subr.bf16.mxu1 %v15370_v6  ;;  %v15405_v6 = vld [vmem:[#allocation348_spill] sm:$0xff] }
 0x7cb   :  { %8614 = vmatpush1.bf16.msra.mxu0 %v15371_v57  ;;  %v15406_v57 = vld [vmem:[#allocation349_spill] sm:$0xff] }
 0x7cc   :  { %8778 = vmatpush1.bf16.msra.mxu1 %v15372_v9  ;;  %8615 = vmatprep.subr.bf16.mxu0 %v15373_v12  ;;  %v15407_v9 = vld [vmem:[#allocation350_spill] sm:$0xff]  ;;  %v15408_v12 = vld [vmem:[#allocation351_spill] sm:$0xff] }
 0x7cd   :  { %8779 = vmatprep.subr.bf16.mxu1 %v15374_v15  ;;  %v15409_v15 = vld [vmem:[#allocation352_spill] sm:$0xff] }
 0x7cf   :  { %8616 = vmatpush1.bf16.msra.mxu0 %v15375_v48  ;;  %v15410_v48 = vld [vmem:[#allocation353_spill] sm:$0xff] }
 0x7d0   :  { %8780 = vmatpush1.bf16.msra.mxu1 %v15376_v44  ;;  %8617 = vmatprep.subr.bf16.mxu0 %v15377_v13  ;;  %v15411_v44 = vld [vmem:[#allocation354_spill] sm:$0xff]  ;;  %v15412_v13 = vld [vmem:[#allocation355_spill] sm:$0xff] }
 0x7d1   :  { %8781 = vmatprep.subr.bf16.mxu1 %v15378_v3  ;;  %v15413_v3 = vld [vmem:[#allocation356_spill] sm:$0xff] }
 0x7d3   :  { %8618 = vmatpush1.bf16.msra.mxu0 %v15379_v53  ;;  %v15414_v53 = vld [vmem:[#allocation357_spill] sm:$0xff] }
 0x7d4   :  { %8782 = vmatpush1.bf16.msra.mxu1 %v15380_v24  ;;  %8619 = vmatprep.subr.bf16.mxu0 %v15381_v25  ;;  %v15415_v24 = vld [vmem:[#allocation358_spill] sm:$0xff]  ;;  %v15416_v25 = vld [vmem:[#allocation359_spill] sm:$0xff] }
 0x7d5   :  { %8783 = vmatprep.subr.bf16.mxu1 %v15382_v32  ;;  %v15417_v32 = vld [vmem:[#allocation360_spill] sm:$0xff] }
 0x7d7   :  { %8620 = vmatpush1.bf16.msra.mxu0 %v15383_v17  ;;  %v15418_v17 = vld [vmem:[#allocation361_spill] sm:$0xff] }
 0x7d8   :  { %8784 = vmatpush1.bf16.msra.mxu1 %v15384_v33  ;;  %8621 = vmatprep.subr.bf16.mxu0 %v15385_v34  ;;  %v15419_v33 = vld [vmem:[#allocation362_spill] sm:$0xff]  ;;  %v15420_v34 = vld [vmem:[#allocation363_spill] sm:$0xff] }
 0x7d9   :  { %8785 = vmatprep.subr.bf16.mxu1 %v15386_v36  ;;  %v15421_v36 = vld [vmem:[#allocation364_spill] sm:$0xff] }
 0x7db   :  { %8622 = vmatpush1.bf16.msra.mxu0 %v15387_v46  ;;  %v15422_v46 = vld [vmem:[#allocation365_spill] sm:$0xff] }
 0x7dc   :  { %8786 = vmatpush1.bf16.msra.mxu1 %v15388_v54  ;;  %8623 = vmatprep.subr.bf16.mxu0 %v15389_v49  ;;  %v15423_v54 = vld [vmem:[#allocation366_spill] sm:$0xff]  ;;  %v15424_v49 = vld [vmem:[#allocation367_spill] sm:$0xff] }
 0x7dd   :  { %8787 = vmatprep.subr.bf16.mxu1 %v15390_v4  ;;  %v15425_v4 = vld [vmem:[#allocation368_spill] sm:$0xff] }
 0x7df   :  { %8624 = vmatpush1.bf16.msra.mxu0 %v15391_v50  ;;  %v15426_v50 = vld [vmem:[#allocation369_spill] sm:$0xff] }
 0x7e0   :  { %8788 = vmatpush1.bf16.msra.mxu1 %v15392_v21  ;;  %8625 = vmatprep.subr.bf16.mxu0 %v15393_v55  ;;  %v15427_v21 = vld [vmem:[#allocation370_spill] sm:$0xff]  ;;  %v15428_v55 = vld [vmem:[#allocation371_spill] sm:$0xff] }
 0x7e1   :  { %8789 = vmatprep.subr.bf16.mxu1 %v15394_v58  ;;  %v15429_v58 = vld [vmem:[#allocation372_spill] sm:$0xff] }
 0x7e3   :  { %8626 = vmatpush1.bf16.msra.mxu0 %v15395_v59  ;;  %v15430_v59 = vld [vmem:[#allocation373_spill] sm:$0xff] }
 0x7e4   :  { %8790 = vmatpush1.bf16.msra.mxu1 %v15396_v1  ;;  %8627 = vmatprep.subr.bf16.mxu0 %v15397_v2  ;;  %v15431_v1 = vld [vmem:[#allocation374_spill] sm:$0xff]  ;;  %v15432_v2 = vld [vmem:[#allocation375_spill] sm:$0xff] }
 0x7e5   :  { %8791 = vmatprep.subr.bf16.mxu1 %v15398_v52  ;;  %v15433_v52 = vld [vmem:[#allocation376_spill] sm:$0xff] }
 0x7e7   :  { %8628 = vmatpush1.bf16.msra.mxu0 %v15399_v23  ;;  %v15434_v23 = vld [vmem:[#allocation377_spill] sm:$0xff] }
 0x7e8   :  { %8792 = vmatpush1.bf16.msra.mxu1 %v15400_v30  ;;  %8629 = vmatprep.subr.bf16.mxu0 %v15401_v42  ;;  %v15436_v30 = vld [vmem:[#allocation379_spill] sm:$0xff]  ;;  %v15437_v42 = vld [vmem:[#allocation380_spill] sm:$0xff] }
 0x7e9   :  { %8793 = vmatprep.subr.bf16.mxu1 %v15402_v18  ;;  %v15438_v18 = vld [vmem:[#allocation381_spill] sm:$0xff] }
 0x7eb   :  { %8630 = vmatpush1.bf16.msra.mxu0 %v15403_v26  ;;  %v15440_v26 = vld [vmem:[#allocation383_spill] sm:$0xff] }
 0x7ec   :  { %8794 = vmatpush1.bf16.msra.mxu1 %v15404_v5  ;;  %8631 = vmatprep.subr.bf16.mxu0 %v15405_v6  ;;  %v15441_v5 = vld [vmem:[#allocation384_spill] sm:$0xff]  ;;  %v15442_v6 = vld [vmem:[#allocation385_spill] sm:$0xff] }
 0x7ed   :  { %8795 = vmatprep.subr.bf16.mxu1 %v15406_v57  ;;  %v15443_v57 = vld [vmem:[#allocation386_spill] sm:$0xff] }
 0x7ef   :  { %8632 = vmatpush1.bf16.msra.mxu0 %v15407_v9  ;;  %v15444_v9 = vld [vmem:[#allocation387_spill] sm:$0xff] }
 0x7f0   :  { %8796 = vmatpush1.bf16.msra.mxu1 %v15408_v12  ;;  %8633 = vmatprep.subr.bf16.mxu0 %v15409_v15  ;;  %v15445_v12 = vld [vmem:[#allocation388_spill] sm:$0xff]  ;;  %v15446_v15 = vld [vmem:[#allocation389_spill] sm:$0xff] }
 0x7f1   :  { %8797 = vmatprep.subr.bf16.mxu1 %v15410_v48  ;;  %v15447_v48 = vld [vmem:[#allocation390_spill] sm:$0xff] }
 0x7f3   :  { %8634 = vmatpush1.bf16.msra.mxu0 %v15411_v44  ;;  %v15448_v44 = vld [vmem:[#allocation391_spill] sm:$0xff] }
 0x7f4   :  { %8798 = vmatpush1.bf16.msra.mxu1 %v15412_v13  ;;  %8635 = vmatprep.subr.bf16.mxu0 %v15413_v3  ;;  %v15449_v13 = vld [vmem:[#allocation392_spill] sm:$0xff]  ;;  %v15450_v3 = vld [vmem:[#allocation393_spill] sm:$0xff] }
 0x7f5   :  { %8799 = vmatprep.subr.bf16.mxu1 %v15414_v53  ;;  %v15451_v53 = vld [vmem:[#allocation394_spill] sm:$0xff] }
 0x7f7   :  { %8636 = vmatpush1.bf16.msra.mxu0 %v15415_v24  ;;  %v15452_v24 = vld [vmem:[#allocation395_spill] sm:$0xff] }
 0x7f8   :  { %8800 = vmatpush1.bf16.msra.mxu1 %v15416_v25  ;;  %8637 = vmatprep.subr.bf16.mxu0 %v15417_v32  ;;  %v15453_v25 = vld [vmem:[#allocation396_spill] sm:$0xff]  ;;  %v15454_v32 = vld [vmem:[#allocation397_spill] sm:$0xff] }
 0x7f9   :  { %8801 = vmatprep.subr.bf16.mxu1 %v15418_v17  ;;  %v15455_v17 = vld [vmem:[#allocation398_spill] sm:$0xff] }
 0x7fb   :  { %8638 = vmatpush1.bf16.msra.mxu0 %v15419_v33  ;;  %v15456_v33 = vld [vmem:[#allocation399_spill] sm:$0xff] }
 0x7fc   :  { %8802 = vmatpush1.bf16.msra.mxu1 %v15420_v34  ;;  %8639 = vmatprep.subr.bf16.mxu0 %v15421_v36  ;;  %v15457_v34 = vld [vmem:[#allocation400_spill] sm:$0xff]  ;;  %v15458_v36 = vld [vmem:[#allocation401_spill] sm:$0xff] }
 0x7fd   :  { %8803 = vmatprep.subr.bf16.mxu1 %v15422_v46  ;;  %v15459_v46 = vld [vmem:[#allocation402_spill] sm:$0xff] }
 0x7ff   :  { %8640 = vmatpush1.bf16.msra.mxu0 %v15423_v54  ;;  %v15460_v54 = vld [vmem:[#allocation403_spill] sm:$0xff] }
 0x800   :  { %8804 = vmatpush1.bf16.msra.mxu1 %v15424_v49  ;;  %8650 = vmatprep.subr.bf16.mxu0 %v15425_v4  ;;  %v15461_v49 = vld [vmem:[#allocation404_spill] sm:$0xff]  ;;  %v15462_v4 = vld [vmem:[#allocation405_spill] sm:$0xff] }
 0x801   :  { %8814 = vmatprep.subr.bf16.mxu1 %v15426_v50  ;;  %v15463_v50 = vld [vmem:[#allocation406_spill] sm:$0xff] }
 0x802   :  { %8642 = vmatmul.mubr.bf16.vlgmr.msra.gmra.mrb[28].mxu0 %v12763_v19 }
 0x803   :  { %8806 = vmatmul.mubr.bf16.vlgmr.msra.gmra.mrb[28].mxu1 %v12763_v19  ;;  %8651 = vmatpush1.bf16.msra.mxu0 %v15427_v21  ;;  %v15435_v19 = vld [vmem:[#allocation378_spill] sm:$0xff]  ;;  %v15464_v21 = vld [vmem:[#allocation407_spill] sm:$0xff] }
 0x804   :  { %8682 = vmatprep.mubr.bf16.mxu0 %v12836_v27  ;;  %8815 = vmatpush1.bf16.msra.mxu1 %v15428_v55  ;;  %v15465_v55 = vld [vmem:[#allocation408_spill] sm:$0xff] }
 0x805   :  { %8846 = vmatprep.mubr.bf16.mxu1 %v12836_v27  ;;  %8652 = vmatprep.subr.bf16.mxu0 %v15429_v58  ;;  %v15439_v27 = vld [vmem:[#allocation382_spill] sm:$0xff]  ;;  %v15466_v58 = vld [vmem:[#allocation409_spill] sm:$0xff] }
 0x806   :  { %8816 = vmatprep.subr.bf16.mxu1 %v15430_v59  ;;  %v15467_v59 = vld [vmem:[#allocation410_spill] sm:$0xff] }
 0x807   :  { %8653 = vmatpush1.bf16.msra.mxu0 %v15431_v1  ;;  %v15468_v1 = vld [vmem:[#allocation411_spill] sm:$0xff] }
 0x808   :  { %8817 = vmatpush1.bf16.msra.mxu1 %v15432_v2  ;;  %8654 = vmatprep.subr.bf16.mxu0 %v15433_v52  ;;  %v15469_v2 = vld [vmem:[#allocation412_spill] sm:$0xff]  ;;  %v15470_v52 = vld [vmem:[#allocation413_spill] sm:$0xff] }
 0x809   :  { %8818 = vmatprep.subr.bf16.mxu1 %v15434_v23  ;;  %v15471_v23 = vld [vmem:[#allocation414_spill] sm:$0xff] }
 0x80b   :  { %8655 = vmatpush1.bf16.msra.mxu0 %v15435_v19  ;;  %v15472_v19 = vld [vmem:[#allocation415_spill] sm:$0xff] }
 0x80c   :  { %8819 = vmatpush1.bf16.msra.mxu1 %v15436_v30  ;;  %8656 = vmatprep.subr.bf16.mxu0 %v15437_v42  ;;  %v15473_v30 = vld [vmem:[#allocation416_spill] sm:$0xff]  ;;  %v15474_v42 = vld [vmem:[#allocation417_spill] sm:$0xff] }
 0x80d   :  { %8820 = vmatprep.subr.bf16.mxu1 %v15438_v18  ;;  %v15475_v18 = vld [vmem:[#allocation418_spill] sm:$0xff] }
 0x80f   :  { %8657 = vmatpush1.bf16.msra.mxu0 %v15439_v27  ;;  %v15476_v27 = vld [vmem:[#allocation419_spill] sm:$0xff] }
 0x810   :  { %8821 = vmatpush1.bf16.msra.mxu1 %v15440_v26  ;;  %8658 = vmatprep.subr.bf16.mxu0 %v15441_v5  ;;  %v15477_v26 = vld [vmem:[#allocation420_spill] sm:$0xff]  ;;  %v15478_v5 = vld [vmem:[#allocation421_spill] sm:$0xff] }
 0x811   :  { %8822 = vmatprep.subr.bf16.mxu1 %v15442_v6  ;;  %v15479_v6 = vld [vmem:[#allocation422_spill] sm:$0xff] }
 0x813   :  { %8659 = vmatpush1.bf16.msra.mxu0 %v15443_v57  ;;  %v15480_v57 = vld [vmem:[#allocation423_spill] sm:$0xff] }
 0x814   :  { %8823 = vmatpush1.bf16.msra.mxu1 %v15444_v9  ;;  %8660 = vmatprep.subr.bf16.mxu0 %v15445_v12  ;;  %v15481_v9 = vld [vmem:[#allocation424_spill] sm:$0xff]  ;;  %v15482_v12 = vld [vmem:[#allocation425_spill] sm:$0xff] }
 0x815   :  { %8824 = vmatprep.subr.bf16.mxu1 %v15446_v15  ;;  %v15483_v15 = vld [vmem:[#allocation426_spill] sm:$0xff] }
 0x817   :  { %8661 = vmatpush1.bf16.msra.mxu0 %v15447_v48  ;;  %v15484_v48 = vld [vmem:[#allocation427_spill] sm:$0xff] }
 0x818   :  { %8825 = vmatpush1.bf16.msra.mxu1 %v15448_v44  ;;  %8662 = vmatprep.subr.bf16.mxu0 %v15449_v13  ;;  %v15485_v44 = vld [vmem:[#allocation428_spill] sm:$0xff]  ;;  %v15486_v13 = vld [vmem:[#allocation429_spill] sm:$0xff] }
 0x819   :  { %8826 = vmatprep.subr.bf16.mxu1 %v15450_v3  ;;  %v15487_v3 = vld [vmem:[#allocation430_spill] sm:$0xff] }
 0x81b   :  { %8663 = vmatpush1.bf16.msra.mxu0 %v15451_v53  ;;  %v15488_v53 = vld [vmem:[#allocation431_spill] sm:$0xff] }
 0x81c   :  { %8827 = vmatpush1.bf16.msra.mxu1 %v15452_v24  ;;  %8664 = vmatprep.subr.bf16.mxu0 %v15453_v25  ;;  %v15489_v24 = vld [vmem:[#allocation432_spill] sm:$0xff]  ;;  %v15490_v25 = vld [vmem:[#allocation433_spill] sm:$0xff] }
 0x81d   :  { %8828 = vmatprep.subr.bf16.mxu1 %v15454_v32  ;;  %v15491_v32 = vld [vmem:[#allocation434_spill] sm:$0xff] }
 0x81f   :  { %8665 = vmatpush1.bf16.msra.mxu0 %v15455_v17  ;;  %v15492_v17 = vld [vmem:[#allocation435_spill] sm:$0xff] }
 0x820   :  { %8829 = vmatpush1.bf16.msra.mxu1 %v15456_v33  ;;  %8666 = vmatprep.subr.bf16.mxu0 %v15457_v34  ;;  %v15493_v33 = vld [vmem:[#allocation436_spill] sm:$0xff]  ;;  %v15494_v34 = vld [vmem:[#allocation437_spill] sm:$0xff] }
 0x821   :  { %8830 = vmatprep.subr.bf16.mxu1 %v15458_v36  ;;  %v15495_v36 = vld [vmem:[#allocation438_spill] sm:$0xff] }
 0x823   :  { %8667 = vmatpush1.bf16.msra.mxu0 %v15459_v46  ;;  %v15496_v46 = vld [vmem:[#allocation439_spill] sm:$0xff] }
 0x824   :  { %8831 = vmatpush1.bf16.msra.mxu1 %v15460_v54  ;;  %8668 = vmatprep.subr.bf16.mxu0 %v15461_v49  ;;  %v15497_v54 = vld [vmem:[#allocation440_spill] sm:$0xff]  ;;  %v15498_v49 = vld [vmem:[#allocation441_spill] sm:$0xff] }
 0x825   :  { %8832 = vmatprep.subr.bf16.mxu1 %v15462_v4  ;;  %v15500_v4 = vld [vmem:[#allocation443_spill] sm:$0xff] }
 0x827   :  { %8669 = vmatpush1.bf16.msra.mxu0 %v15463_v50  ;;  %v15501_v50 = vld [vmem:[#allocation444_spill] sm:$0xff] }
 0x828   :  { %8833 = vmatpush1.bf16.msra.mxu1 %v15464_v21  ;;  %8670 = vmatprep.subr.bf16.mxu0 %v15465_v55  ;;  %v15502_v21 = vld [vmem:[#allocation445_spill] sm:$0xff] }
 0x829   :  { %8834 = vmatprep.subr.bf16.mxu1 %v15466_v58  ;;  %v15503_v58 = vld [vmem:[#allocation446_spill] sm:$0xff] }
 0x82b   :  { %8671 = vmatpush1.bf16.msra.mxu0 %v15467_v59  ;;  %v15504_v59 = vld [vmem:[#allocation447_spill] sm:$0xff] }
 0x82c   :  { %8835 = vmatpush1.bf16.msra.mxu1 %v15468_v1  ;;  %8672 = vmatprep.subr.bf16.mxu0 %v15469_v2  ;;  %v15505_v1 = vld [vmem:[#allocation448_spill] sm:$0xff]  ;;  %v15506_v2 = vld [vmem:[#allocation449_spill] sm:$0xff] }
 0x82d   :  { %8836 = vmatprep.subr.bf16.mxu1 %v15470_v52 }
 0x82f   :  { %8673 = vmatpush1.bf16.msra.mxu0 %v15471_v23  ;;  %v15507_v23 = vld [vmem:[#allocation450_spill] sm:$0xff] }
 0x830   :  { %8837 = vmatpush1.bf16.msra.mxu1 %v15472_v19  ;;  %8674 = vmatprep.subr.bf16.mxu0 %v15473_v30  ;;  %v15508_v19 = vld [vmem:[#allocation451_spill] sm:$0xff]  ;;  %v15509_v30 = vld [vmem:[#allocation452_spill] sm:$0xff] }
 0x831   :  { %8838 = vmatprep.subr.bf16.mxu1 %v15474_v42 }
 0x833   :  { %8675 = vmatpush1.bf16.msra.mxu0 %v15475_v18 }
 0x834   :  { %8839 = vmatpush1.bf16.msra.mxu1 %v15476_v27  ;;  %8676 = vmatprep.subr.bf16.mxu0 %v15477_v26  ;;  %v15510_v27 = vld [vmem:[#allocation12_spill] sm:$0xff] }
 0x835   :  { %8840 = vmatprep.subr.bf16.mxu1 %v15478_v5  ;;  %v15511_v5 = vld [vmem:[#allocation453_spill] sm:$0xff] }
 0x837   :  { %8677 = vmatpush1.bf16.msra.mxu0 %v15479_v6 }
 0x838   :  { %8841 = vmatpush1.bf16.msra.mxu1 %v15480_v57  ;;  %8678 = vmatprep.subr.bf16.mxu0 %v15481_v9 }
 0x839   :  { %8842 = vmatprep.subr.bf16.mxu1 %v15482_v12 }
 0x83b   :  { %8679 = vmatpush1.bf16.msra.mxu0 %v15483_v15 }
 0x83c   :  { %8843 = vmatpush1.bf16.msra.mxu1 %v15484_v48  ;;  %8680 = vmatprep.subr.bf16.mxu0 %v15485_v44  ;;  %v15512_v44 = vld [vmem:[#allocation454_spill] sm:$0xff] }
 0x83d   :  { %8844 = vmatprep.subr.bf16.mxu1 %v15486_v13 }
 0x83f   :  { %8681 = vmatpush1.bf16.msra.mxu0 %v15487_v3 }
 0x840   :  { %8845 = vmatpush1.bf16.msra.mxu1 %v15488_v53  ;;  %8691 = vmatprep.subr.bf16.mxu0 %v15489_v24  ;;  %v15513_v53 = vld [vmem:[#allocation455_spill] sm:$0xff] }
 0x841   :  { %8855 = vmatprep.subr.bf16.mxu1 %v15490_v25 }
 0x842   :  { %8683 = vmatmul.mubr.bf16.vlgmr.msra.gmra.mrb[28].mxu0 %v12838_v35 }
 0x843   :  { %8847 = vmatmul.mubr.bf16.vlgmr.msra.gmra.mrb[28].mxu1 %v12838_v35  ;;  %8692 = vmatpush1.bf16.msra.mxu0 %v15491_v32  ;;  %v15499_v35 = vld [vmem:[#allocation442_spill] sm:$0xff]  ;;  %v15514_v32 = vld [vmem:[#allocation456_spill] sm:$0xff] }
 0x844   :  { %8723 = vmatprep.mubr.bf16.mxu0 %v12842_v0  ;;  %8856 = vmatpush1.bf16.msra.mxu1 %v15492_v17 }
 0x845   :  { %8887 = vmatprep.mubr.bf16.mxu1 %v12842_v0  ;;  %8693 = vmatprep.subr.bf16.mxu0 %v15493_v33  ;;  %v10294_v0 = vmov 1966171168   ;;  %v15515_v33 = vld [vmem:[#allocation457_spill] sm:$0xff] }
 0x846   :  { %8857 = vmatprep.subr.bf16.mxu1 %v15494_v34  ;;  %v8909_v55 = vunpack.c.l.s4 %v10294_v0  ;;  %v15516_v34 = vld [vmem:[#allocation458_spill] sm:$0xff]  ;;  %v15526_v0 = vld [vmem:[#allocation468_spill] sm:$0xff] }
 0x847   :  { %8694 = vmatpush1.bf16.msra.mxu0 %v15495_v36  ;;  %v15517_v36 = vld [vmem:[#allocation459_spill] sm:$0xff] }
 0x848   :  { %8858 = vmatpush1.bf16.msra.mxu1 %v15496_v46  ;;  %8695 = vmatprep.subr.bf16.mxu0 %v15497_v54  ;;  %v8910_v52 = vunpack.c.0.s8 %v8909_v55  ;;  %v15518_v46 = vld [vmem:[#allocation460_spill] sm:$0xff]  ;;  %v15520_v54 = vld [vmem:[#allocation462_spill] sm:$0xff]  ;;  %v15527_v55 = vld [vmem:[#allocation469_spill] sm:$0xff] }
 0x849   :  { %8859 = vmatprep.subr.bf16.mxu1 %v15498_v49  ;;  %v15521_v49 = vld [vmem:[#allocation463_spill] sm:$0xff] }
 0x84a   :  { %v13144_v26 = vsub.s32 %v8910_v52, %v15510_v27 }
 0x84b   :  { %8696 = vmatpush1.bf16.msra.mxu0 %v15499_v35  ;;  %v15522_v35 = vld [vmem:[#allocation464_spill] sm:$0xff] }
 0x84c   :  { %8860 = vmatpush1.bf16.msra.mxu1 %v15500_v4  ;;  %8697 = vmatprep.subr.bf16.mxu0 %v15501_v50  ;;  %v15523_v4 = vld [vmem:[#allocation465_spill] sm:$0xff]  ;;  %v15524_v50 = vld [vmem:[#allocation466_spill] sm:$0xff] }
 0x84d   :  { %8861 = vmatprep.subr.bf16.mxu1 %v15502_v21  ;;  %v15525_v21 = vld [vmem:[#allocation467_spill] sm:$0xff] }
 0x84f   :  { %8698 = vmatpush1.bf16.msra.mxu0 %v15503_v58  ;;  %v15528_v58 = vld [vmem:[#allocation473_spill] sm:$0xff] }
 0x850   :  { %8862 = vmatpush1.bf16.msra.mxu1 %v15504_v59  ;;  %8699 = vmatprep.subr.bf16.mxu0 %v15505_v1 }
 0x851   :  { %8863 = vmatprep.subr.bf16.mxu1 %v15506_v2 }
 0x853   :  { %8700 = vmatpush1.bf16.msra.mxu0 %v15507_v23 }
 0x854   :  { %8864 = vmatpush1.bf16.msra.mxu1 %v15508_v19  ;;  %8701 = vmatprep.subr.bf16.mxu0 %v15509_v30 }
 0x855   :  { %v8397_v42 = vpop.f32.mrb[24].mxu0  ;;  %v8561_v18 = vpop.f32.mrb[24].mxu1  ;;  %8865 = vmatprep.subr.bf16.mxu1 %v15511_v5 }
 0x856   :  { %v8399_v6 = vpop.f32.mrb[25].mxu0  ;;  %v8563_v57 = vpop.f32.mrb[25].mxu1 }
 0x857   :  { %v8904_v9 = vcombine.low %v8397_v42, %v8399_v6  ;;  %v8905_v12 = vcombine.low %v8561_v18, %v8563_v57  ;;  %v8401_v15 = vpop.f32.mrb[26].mxu0  ;;  %v8565_v48 = vpop.f32.mrb[26].mxu1  ;;  %8702 = vmatpush1.bf16.msra.mxu0 %v15512_v44 }
 0x858   :  { %8866 = vmatpush1.bf16.msra.mxu1 %v11905_v63  ;;  %v8402_v13 = vpop.f32.mrb[27].mxu0  ;;  %v8566_v3 = vpop.f32.mrb[27].mxu1  ;;  %8703 = vmatprep.subr.bf16.mxu0 %v15513_v53  ;;  %v15519_v63 = vld [vmem:[#allocation461_spill] sm:$0xff] }
 0x859   :  { %v8914_v24 = vrot.slane %v8904_v9, %v13144_v26  ;;  %v8921_v25 = vrot.slane %v8905_v12, %v13144_v26  ;;  %8867 = vmatprep.subr.bf16.mxu1 %v15514_v32 }
 0x85b   :  { %v8936_v17 = vcombine.low %v8914_v24, %v8921_v25  ;;  %8704 = vmatpush1.bf16.msra.mxu0 %v15515_v33 }
 0x85c   :  { %8868 = vmatpush1.bf16.msra.mxu1 %v15516_v34  ;;  %8705 = vmatprep.subr.bf16.mxu0 %v15517_v36 }
 0x85d   :  { %8869 = vmatprep.subr.bf16.mxu1 %v15518_v46 }
 0x85f   :  { %8706 = vmatpush1.bf16.msra.mxu0 %v15519_v63 }
 0x860   :  { %8870 = vmatpush1.bf16.msra.mxu1 %v15520_v54  ;;  %8707 = vmatprep.subr.bf16.mxu0 %v15521_v49 }
 0x861   :  { %8871 = vmatprep.subr.bf16.mxu1 %v15522_v35 }
 0x863   :  { %8708 = vmatpush1.bf16.msra.mxu0 %v15523_v4 }
 0x864   :  { %8872 = vmatpush1.bf16.msra.mxu1 %v15524_v50  ;;  %8709 = vmatprep.subr.bf16.mxu0 %v15525_v21 }
 0x865   :  { %8873 = vmatprep.subr.bf16.mxu1 %v15526_v0 }
 0x867   :  { %8710 = vmatpush1.bf16.msra.mxu0 %v15527_v55 }
 0x868   :  { %8874 = vmatpush1.bf16.msra.mxu1 %v15063_v47  ;;  %8711 = vmatprep.subr.bf16.mxu0 %v15064_v39  ;;  %v15529_v39 = vld [vmem:[#allocation482_spill] sm:$0xff] }
 0x869   :  { %8875 = vmatprep.subr.bf16.mxu1 %v15065_v29 }
 0x86b   :  { %8712 = vmatpush1.bf16.msra.mxu0 %v15528_v58 }
 0x86c   :  { %8876 = vmatpush1.bf16.msra.mxu1 %v15067_v51  ;;  %8713 = vmatprep.subr.bf16.mxu0 %v15068_v28 }
 0x86d   :  { %8877 = vmatprep.subr.bf16.mxu1 %v15069_v38 }
 0x86f   :  { %8714 = vmatpush1.bf16.msra.mxu0 %v15070_v31 }
 0x870   :  { %8878 = vmatpush1.bf16.msra.mxu1 %v15071_v11  ;;  %8715 = vmatprep.subr.bf16.mxu0 %v15072_v40 }
 0x871   :  { %8879 = vmatprep.subr.bf16.mxu1 %v15073_v61 }
 0x873   :  { %8716 = vmatpush1.bf16.msra.mxu0 %v11993_v56 }
 0x874   :  { %8880 = vmatpush1.bf16.msra.mxu1 %v11997_v62  ;;  %8717 = vmatprep.subr.bf16.mxu0 %v11999_v37 }
 0x875   :  { %8881 = vmatprep.subr.bf16.mxu1 %v15074_v7 }
 0x877   :  { %8718 = vmatpush1.bf16.msra.mxu0 %v12005_v60 }
 0x878   :  { %8882 = vmatpush1.bf16.msra.mxu1 %v15529_v39  ;;  %8719 = vmatprep.subr.bf16.mxu0 %v12011_v16 }
 0x879   :  { %8883 = vmatprep.subr.bf16.mxu1 %v12014_v43 }
 0x87b   :  { %8720 = vmatpush1.bf16.msra.mxu0 %v12017_v45 }
 0x87c   :  { %8884 = vmatpush1.bf16.msra.mxu1 %v12021_v14  ;;  %8721 = vmatprep.subr.bf16.mxu0 %v12023_v8 }
 0x87d   :  { %8885 = vmatprep.subr.bf16.mxu1 %v12026_v22 }
 0x87f   :  { %8722 = vmatpush1.bf16.msra.mxu0 %v12029_v41 }
 0x880   :  { %8886 = vmatpush1.bf16.msra.mxu1 %v12033_v20  ;;  %v8944_v20 = vrot.slane %v8936_v17, %v13144_v26 }
 0x882   :  { %8724 = vmatmul.mubr.bf16.vlgmr.msra.gmra.mrb[28].mxu0 %v12912_v10 }
 0x883   :  { %8888 = vmatmul.mubr.bf16.vlgmr.msra.gmra.mrb[28].mxu1 %v12912_v10 }
 0x955   :  { %v8725_v56 = vpop.f32.mrb[28].mxu0 }
 0x956   :  { %v8889_v62 = vpop.f32.mrb[28].mxu1  ;;  %v8727_v37 = vpop.f32.mrb[29].mxu0 }
 0x957   :  { %v8906_v60 = vcombine.low %v8725_v56, %v8727_v37  ;;  %v8891_v16 = vpop.f32.mrb[29].mxu1  ;;  %v8729_v43 = vpop.f32.mrb[30].mxu0 }
 0x958   :  { %v8907_v45 = vcombine.low %v8889_v62, %v8891_v16  ;;  %v8893_v14 = vpop.f32.mrb[30].mxu1  ;;  %v8730_v11 = vpop.f32.mrb[31].mxu0 }
 0x959   :  { %v8928_v8 = vrot.slane %v8906_v60, %v13144_v26  ;;  %v8894_v22 = vpop.f32.mrb[31].mxu1 }
 0x95a   :  { %v8935_v41 = vrot.slane %v8907_v45, %v13144_v26 }
 0x95c   :  { %v8937_v40 = vcombine.low %v8928_v8, %v8935_v41 }
 0x95e   :  { %v8951_v51 = vrot.slane %v8937_v40, %v13144_v26 }
 0x960   :  { %v8952_v61 = vcombine.low %v8944_v20, %v8951_v51 }
 0x962   :  { %8954 = vst [vmem:[#allocation8] sm:$0xff] %v8952_v61 }
 0x963   :  { %10272 = shalt.err (!%p10269_p0)
}
 0x964   :  { %s10273_s25 = scalar_lea.hbm %s13212_s3, 128 }
 0x965   :  { %p10274_p1 = scmp.ne.s32.totalorder %s13212_s3, %s10273_s25  ;;  %p10277_p2 = scmp.lt.u32.totalorder %s10273_s25, %s13212_s3 }
 0x967   :  { %p10279_p3 = pnand %p10277_p2, %p10274_p1 }
 0x969   :  { %10282 = shalt.err (!%p10279_p3)
}
 0x96a   :  { %8964 = dma.vmem_to_hbm [thread:$0]  %s8962_s21, 128, %s13212_s3, [#allocation4]  }
 0x96b   :  { %10287 = dma.done.wait [#allocation4], 128  }
 0x96c   :  { %10288 = vsyncadd [#allocation4], 4294967168 }
 0x96d   :  { %8968 = vsyncpa [#allocation3], 1 }
 0x96e   :  { %8969 = vsyncpa [#allocation6], 1 }
 0x96f   :  { %8970 = vsyncpa [#allocation4], 1 }

</bundles_post_ra>
